<compile_context>
chip_gen: v6e
topology: v6e:2x2x1
jax: 0.10.0
libtpu: 0.0.40
codegen_flags: <defaults>
</compile_context>

<pallas_src>
import functools

import numpy as np
import jax
import jax.numpy as jnp
from jax import lax
from jax.experimental import pallas as pl
from jax.experimental.pallas import tpu as pltpu

WINDOW_SIZE = 11
SIGMA = 1.5            # kornia default gaussian sigma for SSIM
MAX_VAL = 1.0
C1 = (0.01 * MAX_VAL) ** 2
C2 = (0.03 * MAX_VAL) ** 2
_HIGHEST = jax.lax.Precision.HIGHEST


def _gaussian_1d(window_size: int, sigma: float) -> np.ndarray:
    # matches kornia.filters.gaussian()
    x = np.arange(window_size, dtype=np.float64) - window_size // 2
    if window_size % 2 == 0:
        x = x + 0.5
    g = np.exp(-(x ** 2) / (2.0 * sigma ** 2))
    return (g / g.sum()).astype(np.float32)


def _reflect_index(t: int, n: int) -> int:
    # numpy / torch 'reflect' (no edge repeat)
    if t < 0:
        return -t
    if t >= n:
        return 2 * (n - 1) - t
    return t


def _reflect_band_matrix(n: int, n_pad: int, gauss: np.ndarray) -> np.ndarray:
    """(n_pad, n_pad) matrix A with A[src, out] such that (row @ A)[out] equals
    the reflect-padded 1-D Gaussian filter of row[:n] at position out (< n).
    Rows/cols >= n are zero, so zero-padded lanes stay exactly zero."""
    ws = len(gauss)
    pad = (ws - 1) // 2
    A = np.zeros((n_pad, n_pad), dtype=np.float32)
    for out in range(n):
        for j in range(ws):
            src = _reflect_index(out + j - pad, n)
            A[src, out] += float(gauss[j])
    return A


def _round_up(a: int, m: int) -> int:
    return ((a + m - 1) // m) * m


def _ssim_block_kernel(x_ref, y_ref, ah_ref, av_ref, out_ref, *, B):
    """One grid step = B lane/sublane-aligned channel image pairs (B, Hp, Wp).

    filt(z) = A_v @ (z @ A_h) runs the separable Gaussian window (with the
    reflect border folded into the band matrices) entirely on the MXU; the VPU
    only does the cheap per-pixel SSIM-map math on dense 128-wide rows.
    """
    ah = ah_ref[...]          # (Wp, Wp) band matrix, right-multiply (columns)
    av = av_ref[...]          # (Hp, Hp) band matrix, left-multiply (rows)

    loss_acc = None
    for b in range(B):        # unrolled; B is a small compile-time constant
        xb = x_ref[b].astype(jnp.float32)   # (Hp, Wp)
        yb = y_ref[b].astype(jnp.float32)

        def filt(z):
            h = jnp.dot(z, ah, precision=_HIGHEST,
                        preferred_element_type=jnp.float32)      # horizontal taps
            return jnp.dot(av, h, precision=_HIGHEST,
                           preferred_element_type=jnp.float32)   # vertical taps

        mu1 = filt(xb)
        mu2 = filt(yb)
        mxx = filt(xb * xb)
        myy = filt(yb * yb)
        mxy = filt(xb * yb)

        mu1_sq = mu1 * mu1
        mu2_sq = mu2 * mu2
        mu1_mu2 = mu1 * mu2
        sigma1_sq = mxx - mu1_sq
        sigma2_sq = myy - mu2_sq
        sigma12 = mxy - mu1_mu2

        num = (2.0 * mu1_mu2 + C1) * (2.0 * sigma12 + C2)
        den = (mu1_sq + mu2_sq + C1) * (sigma1_sq + sigma2_sq + C2)
        # padded rows/cols: all moments are 0 -> num == den == C1*C2 -> loss 0
        loss_map = jnp.clip((1.0 - num / den) * 0.5, 0.0, 1.0)

        loss_acc = loss_map if loss_acc is None else loss_acc + loss_map

    out_ref[...] = jnp.sum(loss_acc).reshape(1, 1, 1)


def ssim_loss_pallas(x, y, window_size: int = WINDOW_SIZE):
    """Pallas implementation of kornia.losses.ssim_loss(x, y, window_size)."""
    N, C, H, W = x.shape
    pad = (window_size - 1) // 2
    if H <= pad or W <= pad:
        raise ValueError("reflect border requires H, W > (window_size-1)//2")
    gauss = _gaussian_1d(window_size, SIGMA)

    Hp = _round_up(H, 8)       # sublane-aligned
    Wp = _round_up(W, 128)     # lane-aligned
    NC = N * C

    # Band matrices: reflect padding + 1-D Gaussian folded into small constant
    # matmul operands (loaded once, resident across the whole grid).
    ah = jnp.asarray(_reflect_band_matrix(W, Wp, gauss))       # (Wp, Wp)
    av = jnp.asarray(_reflect_band_matrix(H, Hp, gauss).T)     # (Hp, Hp)

    # Channels per grid step: amortize per-step overhead / output DMAs, keep the
    # per-step working set ~<= 12 MiB, and keep >= 2 grid steps for v7x's 2 TCs.
    bytes_per_chan = 64 * Hp * Wp          # ~2 dbl-buffered inputs + f32 temps
    b_vmem = max(1, (12 * 1024 * 1024) // bytes_per_chan)
    B = max(1, min(NC, b_vmem, -(-NC // 2)))
    steps = -(-NC // B)
    NCp = steps * B

    xf = x.reshape(NC, H, W)
    yf = y.reshape(NC, H, W)
    # Zero-pad to aligned shapes (padded pixels/channels contribute exactly 0
    # loss, so no masking is needed). Input dtype is preserved; cast is in-kernel.
    xf = jnp.pad(xf, ((0, NCp - NC), (0, Hp - H), (0, Wp - W)))
    yf = jnp.pad(yf, ((0, NCp - NC), (0, Hp - H), (0, Wp - W)))
    # TODO(synk): fuse this alignment pad into the kernel (ragged loads) and add
    # halo-based spatial tiling for images whose per-channel working set exceeds
    # v7x's 64 MiB VMEM.

    kern = functools.partial(_ssim_block_kernel, B=B)

    partial_sums = pl.pallas_call(
        kern,
        out_shape=jax.ShapeDtypeStruct((steps, 1, 1), jnp.float32),
        grid_spec=pltpu.PrefetchScalarGridSpec(
            num_scalar_prefetch=0,
            grid=(steps,),
            in_specs=[
                pl.BlockSpec((B, Hp, Wp), lambda i: (i, 0, 0)),
                pl.BlockSpec((B, Hp, Wp), lambda i: (i, 0, 0)),
                pl.BlockSpec((Wp, Wp), lambda i: (0, 0)),   # resident constant
                pl.BlockSpec((Hp, Hp), lambda i: (0, 0)),   # resident constant
            ],
            out_specs=pl.BlockSpec((1, 1, 1), lambda i: (i, 0, 0)),
        ),
        compiler_params=pltpu.CompilerParams(
            dimension_semantics=("parallel",),
            vmem_limit_bytes=64 * 1024 * 1024,
        ),
    )(xf, yf, ah, av)

    # reduction 'mean' over the original N*C*H*W loss-map elements
    return jnp.sum(partial_sums) / jnp.float32(N * C * H * W)


def ssim_loss_ref(x, y, window_size: int = WINDOW_SIZE):
    """Pure-JAX reference (depthwise 2D conv) mirroring kornia's math."""
    N, C, H, W = x.shape
    pad = (window_size - 1) // 2
    g = _gaussian_1d(window_size, SIGMA)
    k2d = jnp.asarray(np.outer(g, g), jnp.float32)
    kernel = jnp.tile(k2d[None, None], (C, 1, 1, 1))  # (C,1,ws,ws) depthwise

    def filt(img):
        imgp = jnp.pad(img, ((0, 0), (0, 0), (pad, pad), (pad, pad)), mode="reflect")
        return lax.conv_general_dilated(
            imgp, kernel, window_strides=(1, 1), padding="VALID",
            feature_group_count=C,
            dimension_numbers=("NCHW", "OIHW", "NCHW"),
            precision=lax.Precision.HIGHEST,
        )

    x = x.astype(jnp.float32)
    y = y.astype(jnp.float32)
    mu1, mu2 = filt(x), filt(y)
    mu1_sq, mu2_sq, mu1_mu2 = mu1 * mu1, mu2 * mu2, mu1 * mu2
    sigma1_sq = filt(x * x) - mu1_sq
    sigma2_sq = filt(y * y) - mu2_sq
    sigma12 = filt(x * y) - mu1_mu2
    num = (2.0 * mu1_mu2 + C1) * (2.0 * sigma12 + C2)
    den = (mu1_sq + mu2_sq + C1) * (sigma1_sq + sigma2_sq + C2)
    ssim_map = num / den
    return jnp.mean(jnp.clip((1.0 - ssim_map) * 0.5, 0.0, 1.0))


if __name__ == "__main__":
    key = jax.random.PRNGKey(0)
    k1, k2 = jax.random.split(key)
    x = jax.random.uniform(k1, (2, 4, 16, 16), dtype=jnp.float32)
    y = jax.random.uniform(k2, (2, 4, 16, 16), dtype=jnp.float32)

    loss = ssim_loss_pallas(x, y, WINDOW_SIZE)
    jax.block_until_ready(loss)

    ref = ssim_loss_ref(x, y, WINDOW_SIZE)
    # With HIGHEST-precision MXU matmuls the observed error is ~1e-6; tolerance
    # keeps margin while still catching any real semantic bug (>= ~1e-2).
    assert jnp.allclose(loss, ref, atol=5e-4, rtol=5e-4), (float(loss), float(ref))

    print("KERNEL_OK")
</pallas_src>

<mosaic_0001>
module attributes {stable_mosaic.version = 11 : i64} {
  func.func @_ssim_block_kernel(%arg0: i32, %arg1: memref<4x16x128xf32, #tpu.memory_space<vmem>>, %arg2: memref<4x16x128xf32, #tpu.memory_space<vmem>>, %arg3: memref<128x128xf32, #tpu.memory_space<vmem>>, %arg4: memref<16x16xf32, #tpu.memory_space<vmem>>, %arg5: memref<1x1x1xf32, #tpu.memory_space<vmem>>) attributes {dimension_semantics = [#tpu.dimension_semantics<parallel>], iteration_bounds = array<i64: 2>, scalar_prefetch = 0 : i64, scratch_operands = 0 : i64, tpu.core_type = #tpu.core_type<tc>, window_params = [{transform_indices = @transform_0, window_bounds = array<i64: 4, 16, 128>}, {transform_indices = @transform_1, window_bounds = array<i64: 4, 16, 128>}, {pipeline_mode = #tpu.pipeline_mode<synchronous>, transform_indices = @transform_2, window_bounds = array<i64: 128, 128>}, {pipeline_mode = #tpu.pipeline_mode<synchronous>, transform_indices = @transform_3, window_bounds = array<i64: 16, 16>}, {transform_indices = @transform_4, window_bounds = array<i64: 1, 1, 1>}]} {
    %c0 = arith.constant 0 : index
    %c0_0 = arith.constant 0 : index
    %0 = vector.load %arg3[%c0, %c0_0] : memref<128x128xf32, #tpu.memory_space<vmem>>, vector<128x128xf32>
    %c0_1 = arith.constant 0 : index
    %c0_2 = arith.constant 0 : index
    %1 = vector.load %arg4[%c0_1, %c0_2] : memref<16x16xf32, #tpu.memory_space<vmem>>, vector<16x16xf32>
    %c0_3 = arith.constant 0 : index
    %c0_4 = arith.constant 0 : index
    %c0_5 = arith.constant 0 : index
    %2 = vector.load %arg1[%c0_3, %c0_4, %c0_5] : memref<4x16x128xf32, #tpu.memory_space<vmem>>, vector<1x16x128xf32>
    %3 = vector.shape_cast %2 : vector<1x16x128xf32> to vector<16x128xf32>
    %c0_6 = arith.constant 0 : index
    %c0_7 = arith.constant 0 : index
    %c0_8 = arith.constant 0 : index
    %4 = vector.load %arg2[%c0_6, %c0_7, %c0_8] : memref<4x16x128xf32, #tpu.memory_space<vmem>>, vector<1x16x128xf32>
    %5 = vector.shape_cast %4 : vector<1x16x128xf32> to vector<16x128xf32>
    %cst = arith.constant dense<0.000000e+00> : vector<16x128xf32>
    %6 = tpu.matmul %3, %0, %cst {dimension_numbers = #tpu.dot_dimension_numbers<[1], [0], [0], [1], [0, 0, 1, 1], [], []>, precision = #tpu.contract_precision<fp32>} : vector<16x128xf32>, vector<128x128xf32>, vector<16x128xf32> -> vector<16x128xf32>
    %cst_9 = arith.constant dense<0.000000e+00> : vector<16x128xf32>
    %7 = tpu.matmul %1, %6, %cst_9 {dimension_numbers = #tpu.dot_dimension_numbers<[1], [0], [0], [1], [0, 0, 1, 1], [], []>, precision = #tpu.contract_precision<fp32>} : vector<16x16xf32>, vector<16x128xf32>, vector<16x128xf32> -> vector<16x128xf32>
    %cst_10 = arith.constant dense<0.000000e+00> : vector<16x128xf32>
    %8 = tpu.matmul %5, %0, %cst_10 {dimension_numbers = #tpu.dot_dimension_numbers<[1], [0], [0], [1], [0, 0, 1, 1], [], []>, precision = #tpu.contract_precision<fp32>} : vector<16x128xf32>, vector<128x128xf32>, vector<16x128xf32> -> vector<16x128xf32>
    %cst_11 = arith.constant dense<0.000000e+00> : vector<16x128xf32>
    %9 = tpu.matmul %1, %8, %cst_11 {dimension_numbers = #tpu.dot_dimension_numbers<[1], [0], [0], [1], [0, 0, 1, 1], [], []>, precision = #tpu.contract_precision<fp32>} : vector<16x16xf32>, vector<16x128xf32>, vector<16x128xf32> -> vector<16x128xf32>
    %10 = arith.mulf %3, %3 : vector<16x128xf32>
    %cst_12 = arith.constant dense<0.000000e+00> : vector<16x128xf32>
    %11 = tpu.matmul %10, %0, %cst_12 {dimension_numbers = #tpu.dot_dimension_numbers<[1], [0], [0], [1], [0, 0, 1, 1], [], []>, precision = #tpu.contract_precision<fp32>} : vector<16x128xf32>, vector<128x128xf32>, vector<16x128xf32> -> vector<16x128xf32>
    %cst_13 = arith.constant dense<0.000000e+00> : vector<16x128xf32>
    %12 = tpu.matmul %1, %11, %cst_13 {dimension_numbers = #tpu.dot_dimension_numbers<[1], [0], [0], [1], [0, 0, 1, 1], [], []>, precision = #tpu.contract_precision<fp32>} : vector<16x16xf32>, vector<16x128xf32>, vector<16x128xf32> -> vector<16x128xf32>
    %13 = arith.mulf %5, %5 : vector<16x128xf32>
    %cst_14 = arith.constant dense<0.000000e+00> : vector<16x128xf32>
    %14 = tpu.matmul %13, %0, %cst_14 {dimension_numbers = #tpu.dot_dimension_numbers<[1], [0], [0], [1], [0, 0, 1, 1], [], []>, precision = #tpu.contract_precision<fp32>} : vector<16x128xf32>, vector<128x128xf32>, vector<16x128xf32> -> vector<16x128xf32>
    %cst_15 = arith.constant dense<0.000000e+00> : vector<16x128xf32>
    %15 = tpu.matmul %1, %14, %cst_15 {dimension_numbers = #tpu.dot_dimension_numbers<[1], [0], [0], [1], [0, 0, 1, 1], [], []>, precision = #tpu.contract_precision<fp32>} : vector<16x16xf32>, vector<16x128xf32>, vector<16x128xf32> -> vector<16x128xf32>
    %16 = arith.mulf %3, %5 : vector<16x128xf32>
    %cst_16 = arith.constant dense<0.000000e+00> : vector<16x128xf32>
    %17 = tpu.matmul %16, %0, %cst_16 {dimension_numbers = #tpu.dot_dimension_numbers<[1], [0], [0], [1], [0, 0, 1, 1], [], []>, precision = #tpu.contract_precision<fp32>} : vector<16x128xf32>, vector<128x128xf32>, vector<16x128xf32> -> vector<16x128xf32>
    %cst_17 = arith.constant dense<0.000000e+00> : vector<16x128xf32>
    %18 = tpu.matmul %1, %17, %cst_17 {dimension_numbers = #tpu.dot_dimension_numbers<[1], [0], [0], [1], [0, 0, 1, 1], [], []>, precision = #tpu.contract_precision<fp32>} : vector<16x16xf32>, vector<16x128xf32>, vector<16x128xf32> -> vector<16x128xf32>
    %19 = arith.mulf %7, %7 : vector<16x128xf32>
    %20 = arith.mulf %9, %9 : vector<16x128xf32>
    %21 = arith.mulf %7, %9 : vector<16x128xf32>
    %22 = arith.subf %12, %19 : vector<16x128xf32>
    %23 = arith.subf %15, %20 : vector<16x128xf32>
    %24 = arith.subf %18, %21 : vector<16x128xf32>
    %cst_18 = arith.constant 2.000000e+00 : f32
    %25 = vector.broadcast %cst_18 : f32 to vector<16x128xf32>
    %26 = arith.mulf %25, %21 : vector<16x128xf32>
    %cst_19 = arith.constant 9.99999974E-5 : f32
    %27 = vector.broadcast %cst_19 : f32 to vector<16x128xf32>
    %28 = arith.addf %26, %27 : vector<16x128xf32>
    %cst_20 = arith.constant 2.000000e+00 : f32
    %29 = vector.broadcast %cst_20 : f32 to vector<16x128xf32>
    %30 = arith.mulf %29, %24 : vector<16x128xf32>
    %cst_21 = arith.constant 8.99999984E-4 : f32
    %31 = vector.broadcast %cst_21 : f32 to vector<16x128xf32>
    %32 = arith.addf %30, %31 : vector<16x128xf32>
    %33 = arith.mulf %28, %32 : vector<16x128xf32>
    %34 = arith.addf %19, %20 : vector<16x128xf32>
    %cst_22 = arith.constant 9.99999974E-5 : f32
    %35 = vector.broadcast %cst_22 : f32 to vector<16x128xf32>
    %36 = arith.addf %34, %35 : vector<16x128xf32>
    %37 = arith.addf %22, %23 : vector<16x128xf32>
    %cst_23 = arith.constant 8.99999984E-4 : f32
    %38 = vector.broadcast %cst_23 : f32 to vector<16x128xf32>
    %39 = arith.addf %37, %38 : vector<16x128xf32>
    %40 = arith.mulf %36, %39 : vector<16x128xf32>
    %41 = arith.divf %33, %40 : vector<16x128xf32>
    %cst_24 = arith.constant 1.000000e+00 : f32
    %42 = vector.broadcast %cst_24 : f32 to vector<16x128xf32>
    %43 = arith.subf %42, %41 : vector<16x128xf32>
    %cst_25 = arith.constant 5.000000e-01 : f32
    %44 = vector.broadcast %cst_25 : f32 to vector<16x128xf32>
    %45 = arith.mulf %43, %44 : vector<16x128xf32>
    %cst_26 = arith.constant 0.000000e+00 : f32
    %cst_27 = arith.constant 1.000000e+00 : f32
    %46 = vector.broadcast %cst_26 : f32 to vector<16x128xf32>
    %47 = arith.maximumf %46, %45 : vector<16x128xf32>
    %48 = vector.broadcast %cst_27 : f32 to vector<16x128xf32>
    %49 = arith.minimumf %48, %47 : vector<16x128xf32>
    %c1 = arith.constant 1 : index
    %c0_28 = arith.constant 0 : index
    %c0_29 = arith.constant 0 : index
    %50 = vector.load %arg1[%c1, %c0_28, %c0_29] : memref<4x16x128xf32, #tpu.memory_space<vmem>>, vector<1x16x128xf32>
    %51 = vector.shape_cast %50 : vector<1x16x128xf32> to vector<16x128xf32>
    %c1_30 = arith.constant 1 : index
    %c0_31 = arith.constant 0 : index
    %c0_32 = arith.constant 0 : index
    %52 = vector.load %arg2[%c1_30, %c0_31, %c0_32] : memref<4x16x128xf32, #tpu.memory_space<vmem>>, vector<1x16x128xf32>
    %53 = vector.shape_cast %52 : vector<1x16x128xf32> to vector<16x128xf32>
    %cst_33 = arith.constant dense<0.000000e+00> : vector<16x128xf32>
    %54 = tpu.matmul %51, %0, %cst_33 {dimension_numbers = #tpu.dot_dimension_numbers<[1], [0], [0], [1], [0, 0, 1, 1], [], []>, precision = #tpu.contract_precision<fp32>} : vector<16x128xf32>, vector<128x128xf32>, vector<16x128xf32> -> vector<16x128xf32>
    %cst_34 = arith.constant dense<0.000000e+00> : vector<16x128xf32>
    %55 = tpu.matmul %1, %54, %cst_34 {dimension_numbers = #tpu.dot_dimension_numbers<[1], [0], [0], [1], [0, 0, 1, 1], [], []>, precision = #tpu.contract_precision<fp32>} : vector<16x16xf32>, vector<16x128xf32>, vector<16x128xf32> -> vector<16x128xf32>
    %cst_35 = arith.constant dense<0.000000e+00> : vector<16x128xf32>
    %56 = tpu.matmul %53, %0, %cst_35 {dimension_numbers = #tpu.dot_dimension_numbers<[1], [0], [0], [1], [0, 0, 1, 1], [], []>, precision = #tpu.contract_precision<fp32>} : vector<16x128xf32>, vector<128x128xf32>, vector<16x128xf32> -> vector<16x128xf32>
    %cst_36 = arith.constant dense<0.000000e+00> : vector<16x128xf32>
    %57 = tpu.matmul %1, %56, %cst_36 {dimension_numbers = #tpu.dot_dimension_numbers<[1], [0], [0], [1], [0, 0, 1, 1], [], []>, precision = #tpu.contract_precision<fp32>} : vector<16x16xf32>, vector<16x128xf32>, vector<16x128xf32> -> vector<16x128xf32>
    %58 = arith.mulf %51, %51 : vector<16x128xf32>
    %cst_37 = arith.constant dense<0.000000e+00> : vector<16x128xf32>
    %59 = tpu.matmul %58, %0, %cst_37 {dimension_numbers = #tpu.dot_dimension_numbers<[1], [0], [0], [1], [0, 0, 1, 1], [], []>, precision = #tpu.contract_precision<fp32>} : vector<16x128xf32>, vector<128x128xf32>, vector<16x128xf32> -> vector<16x128xf32>
    %cst_38 = arith.constant dense<0.000000e+00> : vector<16x128xf32>
    %60 = tpu.matmul %1, %59, %cst_38 {dimension_numbers = #tpu.dot_dimension_numbers<[1], [0], [0], [1], [0, 0, 1, 1], [], []>, precision = #tpu.contract_precision<fp32>} : vector<16x16xf32>, vector<16x128xf32>, vector<16x128xf32> -> vector<16x128xf32>
    %61 = arith.mulf %53, %53 : vector<16x128xf32>
    %cst_39 = arith.constant dense<0.000000e+00> : vector<16x128xf32>
    %62 = tpu.matmul %61, %0, %cst_39 {dimension_numbers = #tpu.dot_dimension_numbers<[1], [0], [0], [1], [0, 0, 1, 1], [], []>, precision = #tpu.contract_precision<fp32>} : vector<16x128xf32>, vector<128x128xf32>, vector<16x128xf32> -> vector<16x128xf32>
    %cst_40 = arith.constant dense<0.000000e+00> : vector<16x128xf32>
    %63 = tpu.matmul %1, %62, %cst_40 {dimension_numbers = #tpu.dot_dimension_numbers<[1], [0], [0], [1], [0, 0, 1, 1], [], []>, precision = #tpu.contract_precision<fp32>} : vector<16x16xf32>, vector<16x128xf32>, vector<16x128xf32> -> vector<16x128xf32>
    %64 = arith.mulf %51, %53 : vector<16x128xf32>
    %cst_41 = arith.constant dense<0.000000e+00> : vector<16x128xf32>
    %65 = tpu.matmul %64, %0, %cst_41 {dimension_numbers = #tpu.dot_dimension_numbers<[1], [0], [0], [1], [0, 0, 1, 1], [], []>, precision = #tpu.contract_precision<fp32>} : vector<16x128xf32>, vector<128x128xf32>, vector<16x128xf32> -> vector<16x128xf32>
    %cst_42 = arith.constant dense<0.000000e+00> : vector<16x128xf32>
    %66 = tpu.matmul %1, %65, %cst_42 {dimension_numbers = #tpu.dot_dimension_numbers<[1], [0], [0], [1], [0, 0, 1, 1], [], []>, precision = #tpu.contract_precision<fp32>} : vector<16x16xf32>, vector<16x128xf32>, vector<16x128xf32> -> vector<16x128xf32>
    %67 = arith.mulf %55, %55 : vector<16x128xf32>
    %68 = arith.mulf %57, %57 : vector<16x128xf32>
    %69 = arith.mulf %55, %57 : vector<16x128xf32>
    %70 = arith.subf %60, %67 : vector<16x128xf32>
    %71 = arith.subf %63, %68 : vector<16x128xf32>
    %72 = arith.subf %66, %69 : vector<16x128xf32>
    %cst_43 = arith.constant 2.000000e+00 : f32
    %73 = vector.broadcast %cst_43 : f32 to vector<16x128xf32>
    %74 = arith.mulf %73, %69 : vector<16x128xf32>
    %cst_44 = arith.constant 9.99999974E-5 : f32
    %75 = vector.broadcast %cst_44 : f32 to vector<16x128xf32>
    %76 = arith.addf %74, %75 : vector<16x128xf32>
    %cst_45 = arith.constant 2.000000e+00 : f32
    %77 = vector.broadcast %cst_45 : f32 to vector<16x128xf32>
    %78 = arith.mulf %77, %72 : vector<16x128xf32>
    %cst_46 = arith.constant 8.99999984E-4 : f32
    %79 = vector.broadcast %cst_46 : f32 to vector<16x128xf32>
    %80 = arith.addf %78, %79 : vector<16x128xf32>
    %81 = arith.mulf %76, %80 : vector<16x128xf32>
    %82 = arith.addf %67, %68 : vector<16x128xf32>
    %cst_47 = arith.constant 9.99999974E-5 : f32
    %83 = vector.broadcast %cst_47 : f32 to vector<16x128xf32>
    %84 = arith.addf %82, %83 : vector<16x128xf32>
    %85 = arith.addf %70, %71 : vector<16x128xf32>
    %cst_48 = arith.constant 8.99999984E-4 : f32
    %86 = vector.broadcast %cst_48 : f32 to vector<16x128xf32>
    %87 = arith.addf %85, %86 : vector<16x128xf32>
    %88 = arith.mulf %84, %87 : vector<16x128xf32>
    %89 = arith.divf %81, %88 : vector<16x128xf32>
    %cst_49 = arith.constant 1.000000e+00 : f32
    %90 = vector.broadcast %cst_49 : f32 to vector<16x128xf32>
    %91 = arith.subf %90, %89 : vector<16x128xf32>
    %cst_50 = arith.constant 5.000000e-01 : f32
    %92 = vector.broadcast %cst_50 : f32 to vector<16x128xf32>
    %93 = arith.mulf %91, %92 : vector<16x128xf32>
    %cst_51 = arith.constant 0.000000e+00 : f32
    %cst_52 = arith.constant 1.000000e+00 : f32
    %94 = vector.broadcast %cst_51 : f32 to vector<16x128xf32>
    %95 = arith.maximumf %94, %93 : vector<16x128xf32>
    %96 = vector.broadcast %cst_52 : f32 to vector<16x128xf32>
    %97 = arith.minimumf %96, %95 : vector<16x128xf32>
    %98 = arith.addf %49, %97 : vector<16x128xf32>
    %c2 = arith.constant 2 : index
    %c0_53 = arith.constant 0 : index
    %c0_54 = arith.constant 0 : index
    %99 = vector.load %arg1[%c2, %c0_53, %c0_54] : memref<4x16x128xf32, #tpu.memory_space<vmem>>, vector<1x16x128xf32>
    %100 = vector.shape_cast %99 : vector<1x16x128xf32> to vector<16x128xf32>
    %c2_55 = arith.constant 2 : index
    %c0_56 = arith.constant 0 : index
    %c0_57 = arith.constant 0 : index
    %101 = vector.load %arg2[%c2_55, %c0_56, %c0_57] : memref<4x16x128xf32, #tpu.memory_space<vmem>>, vector<1x16x128xf32>
    %102 = vector.shape_cast %101 : vector<1x16x128xf32> to vector<16x128xf32>
    %cst_58 = arith.constant dense<0.000000e+00> : vector<16x128xf32>
    %103 = tpu.matmul %100, %0, %cst_58 {dimension_numbers = #tpu.dot_dimension_numbers<[1], [0], [0], [1], [0, 0, 1, 1], [], []>, precision = #tpu.contract_precision<fp32>} : vector<16x128xf32>, vector<128x128xf32>, vector<16x128xf32> -> vector<16x128xf32>
    %cst_59 = arith.constant dense<0.000000e+00> : vector<16x128xf32>
    %104 = tpu.matmul %1, %103, %cst_59 {dimension_numbers = #tpu.dot_dimension_numbers<[1], [0], [0], [1], [0, 0, 1, 1], [], []>, precision = #tpu.contract_precision<fp32>} : vector<16x16xf32>, vector<16x128xf32>, vector<16x128xf32> -> vector<16x128xf32>
    %cst_60 = arith.constant dense<0.000000e+00> : vector<16x128xf32>
    %105 = tpu.matmul %102, %0, %cst_60 {dimension_numbers = #tpu.dot_dimension_numbers<[1], [0], [0], [1], [0, 0, 1, 1], [], []>, precision = #tpu.contract_precision<fp32>} : vector<16x128xf32>, vector<128x128xf32>, vector<16x128xf32> -> vector<16x128xf32>
    %cst_61 = arith.constant dense<0.000000e+00> : vector<16x128xf32>
    %106 = tpu.matmul %1, %105, %cst_61 {dimension_numbers = #tpu.dot_dimension_numbers<[1], [0], [0], [1], [0, 0, 1, 1], [], []>, precision = #tpu.contract_precision<fp32>} : vector<16x16xf32>, vector<16x128xf32>, vector<16x128xf32> -> vector<16x128xf32>
    %107 = arith.mulf %100, %100 : vector<16x128xf32>
    %cst_62 = arith.constant dense<0.000000e+00> : vector<16x128xf32>
    %108 = tpu.matmul %107, %0, %cst_62 {dimension_numbers = #tpu.dot_dimension_numbers<[1], [0], [0], [1], [0, 0, 1, 1], [], []>, precision = #tpu.contract_precision<fp32>} : vector<16x128xf32>, vector<128x128xf32>, vector<16x128xf32> -> vector<16x128xf32>
    %cst_63 = arith.constant dense<0.000000e+00> : vector<16x128xf32>
    %109 = tpu.matmul %1, %108, %cst_63 {dimension_numbers = #tpu.dot_dimension_numbers<[1], [0], [0], [1], [0, 0, 1, 1], [], []>, precision = #tpu.contract_precision<fp32>} : vector<16x16xf32>, vector<16x128xf32>, vector<16x128xf32> -> vector<16x128xf32>
    %110 = arith.mulf %102, %102 : vector<16x128xf32>
    %cst_64 = arith.constant dense<0.000000e+00> : vector<16x128xf32>
    %111 = tpu.matmul %110, %0, %cst_64 {dimension_numbers = #tpu.dot_dimension_numbers<[1], [0], [0], [1], [0, 0, 1, 1], [], []>, precision = #tpu.contract_precision<fp32>} : vector<16x128xf32>, vector<128x128xf32>, vector<16x128xf32> -> vector<16x128xf32>
    %cst_65 = arith.constant dense<0.000000e+00> : vector<16x128xf32>
    %112 = tpu.matmul %1, %111, %cst_65 {dimension_numbers = #tpu.dot_dimension_numbers<[1], [0], [0], [1], [0, 0, 1, 1], [], []>, precision = #tpu.contract_precision<fp32>} : vector<16x16xf32>, vector<16x128xf32>, vector<16x128xf32> -> vector<16x128xf32>
    %113 = arith.mulf %100, %102 : vector<16x128xf32>
    %cst_66 = arith.constant dense<0.000000e+00> : vector<16x128xf32>
    %114 = tpu.matmul %113, %0, %cst_66 {dimension_numbers = #tpu.dot_dimension_numbers<[1], [0], [0], [1], [0, 0, 1, 1], [], []>, precision = #tpu.contract_precision<fp32>} : vector<16x128xf32>, vector<128x128xf32>, vector<16x128xf32> -> vector<16x128xf32>
    %cst_67 = arith.constant dense<0.000000e+00> : vector<16x128xf32>
    %115 = tpu.matmul %1, %114, %cst_67 {dimension_numbers = #tpu.dot_dimension_numbers<[1], [0], [0], [1], [0, 0, 1, 1], [], []>, precision = #tpu.contract_precision<fp32>} : vector<16x16xf32>, vector<16x128xf32>, vector<16x128xf32> -> vector<16x128xf32>
    %116 = arith.mulf %104, %104 : vector<16x128xf32>
    %117 = arith.mulf %106, %106 : vector<16x128xf32>
    %118 = arith.mulf %104, %106 : vector<16x128xf32>
    %119 = arith.subf %109, %116 : vector<16x128xf32>
    %120 = arith.subf %112, %117 : vector<16x128xf32>
    %121 = arith.subf %115, %118 : vector<16x128xf32>
    %cst_68 = arith.constant 2.000000e+00 : f32
    %122 = vector.broadcast %cst_68 : f32 to vector<16x128xf32>
    %123 = arith.mulf %122, %118 : vector<16x128xf32>
    %cst_69 = arith.constant 9.99999974E-5 : f32
    %124 = vector.broadcast %cst_69 : f32 to vector<16x128xf32>
    %125 = arith.addf %123, %124 : vector<16x128xf32>
    %cst_70 = arith.constant 2.000000e+00 : f32
    %126 = vector.broadcast %cst_70 : f32 to vector<16x128xf32>
    %127 = arith.mulf %126, %121 : vector<16x128xf32>
    %cst_71 = arith.constant 8.99999984E-4 : f32
    %128 = vector.broadcast %cst_71 : f32 to vector<16x128xf32>
    %129 = arith.addf %127, %128 : vector<16x128xf32>
    %130 = arith.mulf %125, %129 : vector<16x128xf32>
    %131 = arith.addf %116, %117 : vector<16x128xf32>
    %cst_72 = arith.constant 9.99999974E-5 : f32
    %132 = vector.broadcast %cst_72 : f32 to vector<16x128xf32>
    %133 = arith.addf %131, %132 : vector<16x128xf32>
    %134 = arith.addf %119, %120 : vector<16x128xf32>
    %cst_73 = arith.constant 8.99999984E-4 : f32
    %135 = vector.broadcast %cst_73 : f32 to vector<16x128xf32>
    %136 = arith.addf %134, %135 : vector<16x128xf32>
    %137 = arith.mulf %133, %136 : vector<16x128xf32>
    %138 = arith.divf %130, %137 : vector<16x128xf32>
    %cst_74 = arith.constant 1.000000e+00 : f32
    %139 = vector.broadcast %cst_74 : f32 to vector<16x128xf32>
    %140 = arith.subf %139, %138 : vector<16x128xf32>
    %cst_75 = arith.constant 5.000000e-01 : f32
    %141 = vector.broadcast %cst_75 : f32 to vector<16x128xf32>
    %142 = arith.mulf %140, %141 : vector<16x128xf32>
    %cst_76 = arith.constant 0.000000e+00 : f32
    %cst_77 = arith.constant 1.000000e+00 : f32
    %143 = vector.broadcast %cst_76 : f32 to vector<16x128xf32>
    %144 = arith.maximumf %143, %142 : vector<16x128xf32>
    %145 = vector.broadcast %cst_77 : f32 to vector<16x128xf32>
    %146 = arith.minimumf %145, %144 : vector<16x128xf32>
    %147 = arith.addf %98, %146 : vector<16x128xf32>
    %c3 = arith.constant 3 : index
    %c0_78 = arith.constant 0 : index
    %c0_79 = arith.constant 0 : index
    %148 = vector.load %arg1[%c3, %c0_78, %c0_79] : memref<4x16x128xf32, #tpu.memory_space<vmem>>, vector<1x16x128xf32>
    %149 = vector.shape_cast %148 : vector<1x16x128xf32> to vector<16x128xf32>
    %c3_80 = arith.constant 3 : index
    %c0_81 = arith.constant 0 : index
    %c0_82 = arith.constant 0 : index
    %150 = vector.load %arg2[%c3_80, %c0_81, %c0_82] : memref<4x16x128xf32, #tpu.memory_space<vmem>>, vector<1x16x128xf32>
    %151 = vector.shape_cast %150 : vector<1x16x128xf32> to vector<16x128xf32>
    %cst_83 = arith.constant dense<0.000000e+00> : vector<16x128xf32>
    %152 = tpu.matmul %149, %0, %cst_83 {dimension_numbers = #tpu.dot_dimension_numbers<[1], [0], [0], [1], [0, 0, 1, 1], [], []>, precision = #tpu.contract_precision<fp32>} : vector<16x128xf32>, vector<128x128xf32>, vector<16x128xf32> -> vector<16x128xf32>
    %cst_84 = arith.constant dense<0.000000e+00> : vector<16x128xf32>
    %153 = tpu.matmul %1, %152, %cst_84 {dimension_numbers = #tpu.dot_dimension_numbers<[1], [0], [0], [1], [0, 0, 1, 1], [], []>, precision = #tpu.contract_precision<fp32>} : vector<16x16xf32>, vector<16x128xf32>, vector<16x128xf32> -> vector<16x128xf32>
    %cst_85 = arith.constant dense<0.000000e+00> : vector<16x128xf32>
    %154 = tpu.matmul %151, %0, %cst_85 {dimension_numbers = #tpu.dot_dimension_numbers<[1], [0], [0], [1], [0, 0, 1, 1], [], []>, precision = #tpu.contract_precision<fp32>} : vector<16x128xf32>, vector<128x128xf32>, vector<16x128xf32> -> vector<16x128xf32>
    %cst_86 = arith.constant dense<0.000000e+00> : vector<16x128xf32>
    %155 = tpu.matmul %1, %154, %cst_86 {dimension_numbers = #tpu.dot_dimension_numbers<[1], [0], [0], [1], [0, 0, 1, 1], [], []>, precision = #tpu.contract_precision<fp32>} : vector<16x16xf32>, vector<16x128xf32>, vector<16x128xf32> -> vector<16x128xf32>
    %156 = arith.mulf %149, %149 : vector<16x128xf32>
    %cst_87 = arith.constant dense<0.000000e+00> : vector<16x128xf32>
    %157 = tpu.matmul %156, %0, %cst_87 {dimension_numbers = #tpu.dot_dimension_numbers<[1], [0], [0], [1], [0, 0, 1, 1], [], []>, precision = #tpu.contract_precision<fp32>} : vector<16x128xf32>, vector<128x128xf32>, vector<16x128xf32> -> vector<16x128xf32>
    %cst_88 = arith.constant dense<0.000000e+00> : vector<16x128xf32>
    %158 = tpu.matmul %1, %157, %cst_88 {dimension_numbers = #tpu.dot_dimension_numbers<[1], [0], [0], [1], [0, 0, 1, 1], [], []>, precision = #tpu.contract_precision<fp32>} : vector<16x16xf32>, vector<16x128xf32>, vector<16x128xf32> -> vector<16x128xf32>
    %159 = arith.mulf %151, %151 : vector<16x128xf32>
    %cst_89 = arith.constant dense<0.000000e+00> : vector<16x128xf32>
    %160 = tpu.matmul %159, %0, %cst_89 {dimension_numbers = #tpu.dot_dimension_numbers<[1], [0], [0], [1], [0, 0, 1, 1], [], []>, precision = #tpu.contract_precision<fp32>} : vector<16x128xf32>, vector<128x128xf32>, vector<16x128xf32> -> vector<16x128xf32>
    %cst_90 = arith.constant dense<0.000000e+00> : vector<16x128xf32>
    %161 = tpu.matmul %1, %160, %cst_90 {dimension_numbers = #tpu.dot_dimension_numbers<[1], [0], [0], [1], [0, 0, 1, 1], [], []>, precision = #tpu.contract_precision<fp32>} : vector<16x16xf32>, vector<16x128xf32>, vector<16x128xf32> -> vector<16x128xf32>
    %162 = arith.mulf %149, %151 : vector<16x128xf32>
    %cst_91 = arith.constant dense<0.000000e+00> : vector<16x128xf32>
    %163 = tpu.matmul %162, %0, %cst_91 {dimension_numbers = #tpu.dot_dimension_numbers<[1], [0], [0], [1], [0, 0, 1, 1], [], []>, precision = #tpu.contract_precision<fp32>} : vector<16x128xf32>, vector<128x128xf32>, vector<16x128xf32> -> vector<16x128xf32>
    %cst_92 = arith.constant dense<0.000000e+00> : vector<16x128xf32>
    %164 = tpu.matmul %1, %163, %cst_92 {dimension_numbers = #tpu.dot_dimension_numbers<[1], [0], [0], [1], [0, 0, 1, 1], [], []>, precision = #tpu.contract_precision<fp32>} : vector<16x16xf32>, vector<16x128xf32>, vector<16x128xf32> -> vector<16x128xf32>
    %165 = arith.mulf %153, %153 : vector<16x128xf32>
    %166 = arith.mulf %155, %155 : vector<16x128xf32>
    %167 = arith.mulf %153, %155 : vector<16x128xf32>
    %168 = arith.subf %158, %165 : vector<16x128xf32>
    %169 = arith.subf %161, %166 : vector<16x128xf32>
    %170 = arith.subf %164, %167 : vector<16x128xf32>
    %cst_93 = arith.constant 2.000000e+00 : f32
    %171 = vector.broadcast %cst_93 : f32 to vector<16x128xf32>
    %172 = arith.mulf %171, %167 : vector<16x128xf32>
    %cst_94 = arith.constant 9.99999974E-5 : f32
    %173 = vector.broadcast %cst_94 : f32 to vector<16x128xf32>
    %174 = arith.addf %172, %173 : vector<16x128xf32>
    %cst_95 = arith.constant 2.000000e+00 : f32
    %175 = vector.broadcast %cst_95 : f32 to vector<16x128xf32>
    %176 = arith.mulf %175, %170 : vector<16x128xf32>
    %cst_96 = arith.constant 8.99999984E-4 : f32
    %177 = vector.broadcast %cst_96 : f32 to vector<16x128xf32>
    %178 = arith.addf %176, %177 : vector<16x128xf32>
    %179 = arith.mulf %174, %178 : vector<16x128xf32>
    %180 = arith.addf %165, %166 : vector<16x128xf32>
    %cst_97 = arith.constant 9.99999974E-5 : f32
    %181 = vector.broadcast %cst_97 : f32 to vector<16x128xf32>
    %182 = arith.addf %180, %181 : vector<16x128xf32>
    %183 = arith.addf %168, %169 : vector<16x128xf32>
    %cst_98 = arith.constant 8.99999984E-4 : f32
    %184 = vector.broadcast %cst_98 : f32 to vector<16x128xf32>
    %185 = arith.addf %183, %184 : vector<16x128xf32>
    %186 = arith.mulf %182, %185 : vector<16x128xf32>
    %187 = arith.divf %179, %186 : vector<16x128xf32>
    %cst_99 = arith.constant 1.000000e+00 : f32
    %188 = vector.broadcast %cst_99 : f32 to vector<16x128xf32>
    %189 = arith.subf %188, %187 : vector<16x128xf32>
    %cst_100 = arith.constant 5.000000e-01 : f32
    %190 = vector.broadcast %cst_100 : f32 to vector<16x128xf32>
    %191 = arith.mulf %189, %190 : vector<16x128xf32>
    %cst_101 = arith.constant 0.000000e+00 : f32
    %cst_102 = arith.constant 1.000000e+00 : f32
    %192 = vector.broadcast %cst_101 : f32 to vector<16x128xf32>
    %193 = arith.maximumf %192, %191 : vector<16x128xf32>
    %194 = vector.broadcast %cst_102 : f32 to vector<16x128xf32>
    %195 = arith.minimumf %194, %193 : vector<16x128xf32>
    %196 = arith.addf %147, %195 : vector<16x128xf32>
    %197 = vector.shape_cast %196 : vector<16x128xf32> to vector<1x16x128xf32>
    %cst_103 = arith.constant dense<0.000000e+00> : vector<1xf32>
    %198 = vector.multi_reduction <add>, %197, %cst_103 [1, 2] : vector<1x16x128xf32> to vector<1xf32>
    %199 = vector.shape_cast %198 : vector<1xf32> to vector<1x1x1xf32>
    %200 = vector.extract %199[0, 0, 0] : f32 from vector<1x1x1xf32>
    %201 = vector.broadcast %200 : f32 to vector<1x1x1xf32>
    %c0_104 = arith.constant 0 : index
    %c0_105 = arith.constant 0 : index
    %c0_106 = arith.constant 0 : index
    %202 = vector.load %arg5[%c0_104, %c0_105, %c0_106] : memref<1x1x1xf32, #tpu.memory_space<vmem>>, vector<1x1x1xf32>
    tpu.vector_store %arg5[%c0_104, %c0_105, %c0_106], %201 {strides = array<i32>} : memref<1x1x1xf32, #tpu.memory_space<vmem>>, vector<1x1x1xf32>,
    return
  }
  func.func @transform_0(%arg0: i32) -> (i32, i32, i32) {
    %c0_i32 = arith.constant 0 : i32
    %c0_i32_0 = arith.constant 0 : i32
    %c0_i32_1 = arith.constant 0 : i32
    return %arg0, %c0_i32, %c0_i32_0 : i32, i32, i32
  }
  func.func @transform_1(%arg0: i32) -> (i32, i32, i32) {
    %c0_i32 = arith.constant 0 : i32
    %c0_i32_0 = arith.constant 0 : i32
    %c0_i32_1 = arith.constant 0 : i32
    return %arg0, %c0_i32, %c0_i32_0 : i32, i32, i32
  }
  func.func @transform_2(%arg0: i32) -> (i32, i32) {
    %c0_i32 = arith.constant 0 : i32
    %c0_i32_0 = arith.constant 0 : i32
    %c0_i32_1 = arith.constant 0 : i32
    return %c0_i32, %c0_i32_0 : i32, i32
  }
  func.func @transform_3(%arg0: i32) -> (i32, i32) {
    %c0_i32 = arith.constant 0 : i32
    %c0_i32_0 = arith.constant 0 : i32
    %c0_i32_1 = arith.constant 0 : i32
    return %c0_i32, %c0_i32_0 : i32, i32
  }
  func.func @transform_4(%arg0: i32) -> (i32, i32, i32) {
    %c0_i32 = arith.constant 0 : i32
    %c0_i32_0 = arith.constant 0 : i32
    %c0_i32_1 = arith.constant 0 : i32
    return %arg0, %c0_i32, %c0_i32_0 : i32, i32, i32
  }
}

</mosaic_0001>

<bundles_post_ra>
// kernel: tpu_custom_call.1
= control target key start
LH: loop header
LB: loop body
LE: loop exit
PB: predicated region body
PF: predicated region fallthrough
CT: control target
= control target key end

     0   :  { %9 = vsyncpa [#allocation3], 0  ;;  %s37930_s0 = inlined_call_operand.hbm [shape: f32[8,16,128], index: 0, kind: input, shape index: {}]   ;;  %s37931_s1 = inlined_call_operand.hbm [shape: f32[8,16,128], index: 1, kind: input, shape index: {}]   ;;  %s37932_s2 = inlined_call_operand.hbm [shape: f32[128,128], index: 2, kind: input, shape index: {}]   ;;  %s37933_s3 = inlined_call_operand.hbm [shape: f32[16,16], index: 3, kind: input, shape index: {}]   ;;  %s37934_s4 = inlined_call_operand.vmem [shape: f32[2,1,1], index: 4, kind: output, shape index: {}]  }
   0x1   :  { %11 = vsyncpa [#allocation3 + $0x1], 0 }
   0x2   :  { %12 = vsyncpa [#allocation5], 0 }
   0x3   :  { %14 = vsyncpa [#allocation5 + $0x1], 0 }
   0x4   :  { %15 = vsyncpa [#allocation8], 0  ;;  %s32386_s15 = smov 0   ;;  %s32388_s16 = smov 0  }
   0x5   :  { %s32390_s17 = smov 0   ;;  %s32392_s18 = smov 0  }
   0x6 LB: > { %s32405_s19 = sadd.s32 4294967295, %s32353_s18   ;;  %p41_p0 = scmp.ne.s32.totalorder %s32345_s16, %s32341_s15  ;;  %s32353_s18 = sphi %s32392_s18, %s39585_s18   ;;  %s32349_s17 = sphi %s32390_s17, %s39584_s17   ;;  %s32345_s16 = sphi %s32388_s16, %s39583_s16   ;;  %s32341_s15 = sphi %s32386_s15, %s39582_s15  }
   0x7   : > { %p37935_p1 = scmp.eq.s32.totalorder %s32405_s19, 0  ;;  %p24375_p2 = scmp.ge.s32.totalorder %s32353_s18, 1 }
   0x8   : > { %p146_p3 = scmp.lt.s32.totalorder %s32353_s18, 3  ;;  %s32355_s22 = smov [#allocation6]  }
   0x9   : > { %p32413_p4 = por %p37935_p1, %p41_p0  ;;  %s158_s23 = sshll.u32 %s32355_s22, 4  ;;  %s159_s23 = int_to_ptr.vmem [resolvable:$true] %s158_s23 }
   0xa   : > { %p32417_p5 = pnand %p24375_p2, %p146_p3  ;;  %s32356_s25 = smov [#allocation7]  }
   0xb   : > { %s38652_s20 = scalar_select %p32413_p4, 1, 0 }
   0xc   : > { %p32104_p6 = pneg %p32417_p5  ;;  %s171_s26 = sshll.u32 %s32356_s25, 4  ;;  %s172_s26 = int_to_ptr.vmem [resolvable:$true] %s171_s26 }
   0xd   : > { %s32210_s27 = scalar_lea.vmem %s159_s23, 2048  ;;  %p32218_p12 = scmp.lt.s32.totalorder %s159_s23, %s159_s23 }
   0xe   : > { %p32425_p7 = pnand %p32104_p6, %p37935_p1  ;;  %p32211_p9 = scmp.ne.s32.totalorder %s159_s23, %s32210_s27 }
   0xf   : > { %p32219_p13 = scmp.lt.s32.totalorder %s32210_s27, %s32210_s27 }
  0x10   : > { %p32201_p8 = pneg %p32425_p7 }
  0x11   : > { %p32220_p0 = por %p32219_p13, %p32218_p12 }
  0x12   : > { %p32213_p10 = pnand %p32211_p9, %p32201_p8 }
  0x14   : > { %p32214_p11 = pneg %p32213_p10 }
  0x16   : > { %p32221_p2 = pnand %p32220_p0, %p32214_p11 }
  0x18   : > { %32224 = shalt.err (!%p32221_p2)
}
  0x19   : > { %s32357_s28 = smov 128   ;;  %s32358_s29 = smov 8  }
  0x1a   : > { %32107 = dma.hbm_to_vmem [thread:$0]  (!%p32425_p7), %s37932_s2, 2048, %s159_s23, [#allocation5], %s32357_s28, %s32357_s28, %s32358_s29  }
  0x1b   : > { %s32236_s6 = scalar_lea.vmem %s172_s26, 256  ;;  %p32244_p10 = scmp.lt.s32.totalorder %s172_s26, %s172_s26 }
  0x1c   : > { %p32237_p3 = scmp.ne.s32.totalorder %s172_s26, %s32236_s6  ;;  %p32245_p11 = scmp.lt.s32.totalorder %s32236_s6, %s32236_s6 }
  0x1e   : > { %p32239_p6 = pnand %p32237_p3, %p32201_p8  ;;  %p32246_p12 = por %p32245_p11, %p32244_p10 }
  0x20   : > { %p32240_p9 = pneg %p32239_p6 }
  0x22   : > { %p32247_p13 = pnand %p32246_p12, %p32240_p9 }
  0x24   : > { %32250 = shalt.err (!%p32247_p13)
}
  0x25   : > { %32110 = dma.hbm_to_vmem [thread:$0]  (!%p32425_p7), %s37933_s3, 256, %s172_s26, [#allocation8], %s32357_s28, %s32357_s28, %s32358_s29  }
  0x26   : > { %s32454_s9 = sadd.s32 1, %s32353_s18   ;;  %s28_s10 = sadd.s32 1, %s32349_s17 }
  0x27   : > { %s25_s11 = ssub.s32 %s32353_s18, %s32454_s9  ;;  %p35_p8 = scmp.ne.s32.totalorder %s32349_s17, %s32345_s16 }
  0x28   : > { %p26_p0 = scmp.eq.s32.totalorder %s25_s11, 0  ;;  %p36_p2 = scmp.eq.s32.totalorder %s32353_s18, 0 }
  0x29   : > { %p32120_p3 = scmp.lt.s32.totalorder %s32353_s18, 2  ;;  %s185_s12 = sand.u32 1, %s32349_s17  }
  0x2a   : > { %s32465_s13 = scalar_select %p26_p0, %s32349_s17, %s28_s10  }
  0x2b   : > { %p37_p6 = por %p36_p2, %p35_p8  ;;  %s32467_s14 = sshll.u32 %s185_s12, 6 }
  0x2c   : > { %s24407_s15 = sshll.u32 %s32353_s18, 10  ;;  %s189_s25 = scalar_lea.vmem [#allocation2], %s32467_s14 }
  0x2d   : > { %s32473_s24 = scalar_lea.hbm %s37930_s0, %s24407_s15  ;;  %s197_s26 = sshll.u32 %s189_s25, 4  ;;  %s32480_s26 = int_to_ptr.vmem [resolvable:$true] %s197_s26 }
  0x2e   : > { %p32476_p7 = pnand %p32120_p3, %p37_p6  ;;  %s32485_s6 = scalar_lea.hbm %s37931_s1, %s24407_s15 }
  0x2f   : > { %s32487_s7 = scalar_lea.sflag [#allocation3], %s185_s12  ;;  %s32251_s8 = scalar_lea.hbm %s32473_s24, 1024 }
  0x30   : > { %p32252_p9 = scmp.ne.s32.totalorder %s32473_s24, %s32251_s8  ;;  %p32253_p10 = pneg %p32476_p7 }
  0x31   : > { %s32256_s22 = scalar_lea.hbm %s37930_s0, 2048  ;;  %p32257_p13 = scmp.lt.s32.totalorder %s32473_s24, %s37930_s0 }
  0x32   : > { %p32254_p11 = pnand %p32253_p10, %p32252_p9  ;;  %p32258_p8 = scmp.lt.s32.totalorder %s32256_s22, %s32251_s8 }
  0x34   : > { %p32255_p12 = pneg %p32254_p11  ;;  %p32259_p0 = por %p32258_p8, %p32257_p13 }
  0x36   : > { %p32260_p2 = pnand %p32259_p0, %p32255_p12 }
  0x38   : > { %32263 = shalt.err (!%p32260_p2)
}
  0x39   : > { %s32264_s12 = scalar_lea.vmem %s32480_s26, 1024  ;;  %s32359_s15 = smov [#allocation2]  }
  0x3a   : > { %p32265_p3 = scmp.ne.s32.totalorder %s32480_s26, %s32264_s12  ;;  %s32269_s30 = sshll.u32 %s32359_s15, 4  ;;  %s32270_s30 = int_to_ptr.vmem [resolvable:$false] %s32269_s30 }
  0x3b   : > { %s32271_s5 = scalar_lea.vmem %s32270_s30, 2048  ;;  %p32272_p11 = scmp.lt.s32.totalorder %s32480_s26, %s32270_s30 }
  0x3c   : > { %p32267_p6 = pnand %p32265_p3, %p32253_p10  ;;  %p32273_p1 = scmp.lt.s32.totalorder %s32271_s5, %s32264_s12 }
  0x3e   : > { %p32268_p9 = pneg %p32267_p6  ;;  %p32274_p4 = por %p32273_p1, %p32272_p11 }
  0x40   : > { %p32275_p13 = pnand %p32274_p4, %p32268_p9 }
  0x42   : > { %32278 = shalt.err (!%p32275_p13)
}
  0x43   : > { %32114 = dma.hbm_to_vmem [thread:$0]  (!%p32476_p7), %s32473_s24, 1024, %s32480_s26, %s32487_s7, %s32357_s28, %s32357_s28, %s32358_s29  }
  0x44   : > { %s211_s8 = scalar_lea.vmem [#allocation4], %s32467_s14  ;;  %s207_s11 = sand.u32 1, %s32353_s18  }
  0x45   : > { %s219_s10 = sshll.u32 %s211_s8, 4  ;;  %s208_s22 = scalar_lea.sflag [#allocation5], %s207_s11  ;;  %s32519_s10 = int_to_ptr.vmem [resolvable:$true] %s219_s10 }
  0x46   : > { %s32279_s23 = scalar_lea.hbm %s32485_s6, 1024  ;;  %s32284_s15 = scalar_lea.hbm %s37931_s1, 2048 }
  0x47   : > { %p32280_p1 = scmp.ne.s32.totalorder %s32485_s6, %s32279_s23  ;;  %p32285_p8 = scmp.lt.s32.totalorder %s32485_s6, %s37931_s1 }
  0x48   : > { %p32286_p0 = scmp.lt.s32.totalorder %s32284_s15, %s32279_s23 }
  0x49   : > { %p32282_p4 = pnand %p32280_p1, %p32253_p10 }
  0x4a   : > { %p32287_p2 = por %p32286_p0, %p32285_p8 }
  0x4b   : > { %p32283_p12 = pneg %p32282_p4 }
  0x4d   : > { %p32288_p3 = pnand %p32287_p2, %p32283_p12 }
  0x4f   : > { %32291 = shalt.err (!%p32288_p3)
}
  0x50   : > { %s32292_s18 = scalar_lea.vmem %s32519_s10, 1024  ;;  %s32360_s14 = smov [#allocation4]  }
  0x51   : > { %p32293_p6 = scmp.ne.s32.totalorder %s32519_s10, %s32292_s18  ;;  %s32297_s24 = sshll.u32 %s32360_s14, 4  ;;  %s32298_s24 = int_to_ptr.vmem [resolvable:$false] %s32297_s24 }
  0x52   : > { %s32299_s26 = scalar_lea.vmem %s32298_s24, 2048  ;;  %p32300_p13 = scmp.lt.s32.totalorder %s32519_s10, %s32298_s24 }
  0x53   : > { %p32295_p9 = pnand %p32293_p6, %p32253_p10  ;;  %p32301_p1 = scmp.lt.s32.totalorder %s32299_s26, %s32292_s18 }
  0x55   : > { %p32296_p11 = pneg %p32295_p9  ;;  %p32302_p4 = por %p32301_p1, %p32300_p13 }
  0x57   : > { %p32303_p8 = pnand %p32302_p4, %p32296_p11 }
  0x59   : > { %32306 = shalt.err (!%p32303_p8)
}
  0x5a   : > { %32117 = dma.hbm_to_vmem [thread:$0]  (!%p32476_p7), %s32485_s6, 1024, %s32519_s10, %s208_s22, %s32357_s28, %s32357_s28, %s32358_s29  }
  0x5b   : > { %231 = sbr.rel (%p32417_p5) target bundleno = 6980 (0x1b44), region = 36 }
  0x60   : > { %s233_s7 = sand.u32 1, %s32345_s16   ;;  %p38656_p10 = scmp.ne.s32.totalorder %s38652_s20, 0 }
  0x61   : > { %s24388_s8 = sshll.u32 %s233_s7, 6  ;;  %s234_s11 = scalar_lea.sflag [#allocation3], %s233_s7 }
  0x62   : > { %s32549_s23 = scalar_lea.vmem [#allocation2], %s24388_s8 }
  0x63   : > { %32324 = dma.done.wait (%p38656_p10), %s234_s11, 1024  }
  0x64   : > { %32326 = vsyncadd (%p38656_p10), %s234_s11, 4294966272  ;;  %s242_s27 = sand.u32 1, %s32405_s19   ;;  %s32556_s28 = scalar_lea.vmem [#allocation4], %s24388_s8 }
  0x65   : > { %s243_s25 = scalar_lea.sflag [#allocation5], %s242_s27 }
  0x66   : > { %32328 = dma.done.wait (%p38656_p10), %s243_s25, 1024  }
  0x67   : > { %32330 = vsyncadd (%p38656_p10), %s243_s25, 4294966272  ;;  %p38657_p5 = scmp.eq.s32.totalorder %s32405_s19, 0 }
  0x69   : > { %32332 = dma.done.wait (%p38657_p5), [#allocation5], 2048   ;;  %p38658_p7 = pmov %p38657_p5 }
  0x6a   : > { %p38659_p12 = pmov %p38657_p5 }
  0x6b   : > { %32334 = vsyncadd (%p38658_p7), [#allocation5], 4294965248 }
  0x6c   : > { %32336 = dma.done.wait (%p38659_p12), [#allocation8], 256   ;;  %p38660_p0 = pmov %p38657_p5 }
  0x6d   : > { %v296_v0 = vld [vmem:[#allocation6 + $0x48] sm:$0xff]  ;;  %v297_v1 = vld [vmem:[#allocation6 + $0x50] sm:$0xff]  ;;  %v298_v2 = vld [vmem:[#allocation6 + $0x58] sm:$0xff]  ;;  %vm993_vm0 = vcmask 130048   ;;  %p284_p2 = scmp.lt.s32.totalorder %s32405_s19, 1  ;;  %vm24271_vm1 = vcmask 0  }
  0x6e   : > { %32338 = vsyncadd (%p38660_p0), [#allocation8], 4294967040  ;;  %v299_v3 = vld [vmem:[#allocation6 + $0x60] sm:$0xff]  ;;  %v300_v4 = vld [vmem:[#allocation6 + $0x68] sm:$0xff]  ;;  %v32570_v6 = vand.u32 4294901760, %v298_v2  ;;  %v32580_v13 = vand.u32 4294901760, %v297_v1 }
  0x6f   : > { %v301_v5 = vld [vmem:[#allocation6 + $0x70] sm:$0xff]  ;;  %v302_v7 = vld [vmem:[#allocation6 + $0x78] sm:$0xff]  ;;  %v32574_v9 = vand.u32 4294901760, %v300_v4  ;;  %v32576_v10 = vand.u32 4294901760, %v299_v3  ;;  %v295_v11 = vld [vmem:[#allocation6 + $0x40] sm:$0xff]  ;;  %v32582_v14 = vand.u32 4294901760, %v296_v0 }
  0x70   : > { %v32572_v8 = vand.u32 4294901760, %v301_v5  ;;  %v32578_v12 = vand.u32 4294901760, %v302_v7  ;;  %v32598_v19 = vsub.f32 %v298_v2, %v32570_v6  ;;  %v294_v20 = vld [vmem:[#allocation6 + $0x38] sm:$0xff]  ;;  %v32600_v21 = vand.u32 4294901760, %v295_v11  ;;  %v293_v24 = vld [vmem:[#allocation6 + $0x30] sm:$0xff]  ;;  %v292_v34 = vld [vmem:[#allocation6 + $0x28] sm:$0xff] }
  0x71   : > { %v32588_v16 = vsub.f32 %v300_v4, %v32574_v9  ;;  %v32591_v17 = vsub.f32 %v299_v3, %v32576_v10  ;;  %v32617_v27 = vsub.f32 %v297_v1, %v32580_v13  ;;  %v32623_v29 = vsub.f32 %v296_v0, %v32582_v14  ;;  %v291_v37 = vld [vmem:[#allocation6 + $0x20] sm:$0xff]  ;;  %v290_v43 = vld [vmem:[#allocation6 + $0x18] sm:$0xff]  ;;  %v306_v54 = vld [vmem:[%s32549_s23 + $0x8] sm:$0xff]  ;;  %s39587_s19 = smov (!%p284_p2, %s32405_s19), 1 }
  0x72   : > { %v32585_v15 = vsub.f32 %v301_v5, %v32572_v8  ;;  %27050 = vmatprep.subr.mxu0 %v32578_v12  ;;  %v32595_v18 = vsub.f32 %v302_v7, %v32578_v12  ;;  %38664 = vst [vmem:[#allocation16_spill] sm:$0xff] %v32598_v19  ;;  %v32625_v30 = vand.u32 4294901760, %v294_v20  ;;  %v32633_v33 = vand.u32 4294901760, %v32598_v19  ;;  %v305_v49 = vld [vmem:[%s32549_s23] sm:$0xff]  ;;  %v289_v57 = vld [vmem:[#allocation6 + $0x10] sm:$0xff]  ;;  %v288_v63 = vld [vmem:[#allocation6 + $0x8] sm:$0xff]  ;;  %s286_s29 = scalar_lea.vmem %s37934_s4, %s39587_s19 }
  0x73   : > { %38662 = vst [vmem:[#allocation14_spill] sm:$0xff] %v32588_v16  ;;  %38663 = vst [vmem:[#allocation15_spill] sm:$0xff] %v32591_v17  ;;  %27051 = vmatpush3.msra.mxu0 %v32578_v12  ;;  %v32607_v23 = vand.u32 4294901760, %v32588_v16  ;;  %v32614_v26 = vand.u32 4294901760, %v32591_v17  ;;  %v32635_v35 = vand.u32 4294901760, %v293_v24  ;;  %v32639_v36 = vsub.f32 %v295_v11, %v32600_v21  ;;  %v287_v7 = vld [vmem:[#allocation6] sm:$0xff] }
  0x74   : > { %38661 = vst [vmem:[#allocation13_spill] sm:$0xff] %v32585_v15  ;;  %v32604_v22 = vand.u32 4294901760, %v32585_v15  ;;  %27052 = vmatprep.subr.mxu0 %v32572_v8  ;;  %v32611_v25 = vand.u32 4294901760, %v32595_v18  ;;  %38669 = vst [vmem:[#allocation21_spill] sm:$0xff] %v32617_v27  ;;  %v32649_v41 = vand.u32 4294901760, %v32617_v27  ;;  %v32653_v42 = vand.u32 4294901760, %v32623_v29 }
  0x75   : > { %38666 = vst [vmem:[#allocation18_spill] sm:$0xff] %v32607_v23  ;;  %38668 = vst [vmem:[#allocation20_spill] sm:$0xff] %v32614_v26  ;;  %27053 = vmatpush3.msra.mxu0 %v32572_v8  ;;  %v428_v32 = vsub.f32 %v32588_v16, %v32607_v23  ;;  %v435_v40 = vsub.f32 %v32591_v17, %v32614_v26  ;;  %v32655_v44 = vand.u32 4294901760, %v292_v34  ;;  %v32666_v48 = vand.u32 4294901760, %v291_v37 }
  0x76   : > { %38665 = vst [vmem:[#allocation17_spill] sm:$0xff] %v32604_v22  ;;  %38667 = vst [vmem:[#allocation19_spill] sm:$0xff] %v32611_v25  ;;  %v421_v28 = vsub.f32 %v32585_v15, %v32604_v22  ;;  %27054 = vmatprep.subr.mxu0 %v32574_v9  ;;  %v414_v31 = vsub.f32 %v32595_v18, %v32611_v25  ;;  %v442_v46 = vsub.f32 %v32598_v19, %v32633_v33 }
  0x77   : > { %38670 = vst [vmem:[#allocation22_spill] sm:$0xff] %v32623_v29  ;;  %38671 = vst [vmem:[#allocation23_spill] sm:$0xff] %v32633_v33  ;;  %27055 = vmatpush3.msra.mxu0 %v32574_v9  ;;  %v32659_v45 = vand.u32 4294901760, %v428_v32  ;;  %v32664_v47 = vsub.f32 %v294_v20, %v32625_v30  ;;  %v32673_v50 = vand.u32 4294901760, %v435_v40  ;;  %v449_v51 = vsub.f32 %v32617_v27, %v32649_v41 }
  0x78   : > { %38672 = vst [vmem:[#allocation24_spill] sm:$0xff] %v32639_v36  ;;  %27056 = vmatprep.subr.mxu0 %v32576_v10  ;;  %v32642_v38 = vand.u32 4294901760, %v414_v31  ;;  %v32644_v39 = vand.u32 4294901760, %v421_v28  ;;  %38674 = vst [vmem:[#allocation26_spill] sm:$0xff] %v32649_v41  ;;  %v32678_v52 = vand.u32 4294901760, %v32639_v36  ;;  %v32681_v53 = vsub.f32 %v293_v24, %v32635_v35 }
  0x79   : > { %27057 = vmatpush3.msra.mxu0 %v32576_v10  ;;  %38675 = vst [vmem:[#allocation27_spill] sm:$0xff] %v32653_v42  ;;  %38676 = vst [vmem:[#allocation28_spill] sm:$0xff] %v32659_v45  ;;  %v32684_v55 = vand.u32 4294901760, %v290_v43  ;;  %v456_v56 = vsub.f32 %v32623_v29, %v32653_v42  ;;  %v32692_v58 = vand.u32 4294901760, %v442_v46  ;;  %v32695_v59 = vand.u32 4294901760, %v32664_v47 }
  0x7a   : > { %38673 = vst [vmem:[#allocation25_spill] sm:$0xff] %v32644_v39  ;;  %27058 = vmatprep.subr.mxu0 %v32570_v6  ;;  %27085 = vmatprep.subr.mxu1 %v32642_v38  ;;  %38677 = vst [vmem:[#allocation29_spill] sm:$0xff] %v32664_v47  ;;  %v32698_v60 = vsub.f32 %v292_v34, %v32655_v44  ;;  %v32700_v61 = vand.u32 4294901760, %v305_v49  ;;  %v32704_v62 = vand.u32 4294901760, %v306_v54  ;;  %v32708_v0 = vand.u32 4294901760, %v449_v51 }
  0x7b   : > { %27059 = vmatpush3.msra.mxu0 %v32570_v6  ;;  %27086 = vmatpush3.msra.mxu1 %v32642_v38  ;;  %38678 = vst [vmem:[#allocation30_spill] sm:$0xff] %v32673_v50  ;;  %38679 = vst [vmem:[#allocation31_spill] sm:$0xff] %v32678_v52  ;;  %v463_v1 = vsub.f32 %v32639_v36, %v32678_v52  ;;  %v32713_v2 = vand.u32 4294901760, %v32681_v53  ;;  %v32716_v3 = vsub.f32 %v291_v37, %v32666_v48 }
  0x7c   : > { %27060 = vmatprep.subr.mxu0 %v32580_v13  ;;  %27087 = vmatprep.subr.mxu1 %v32644_v39  ;;  %38680 = vst [vmem:[#allocation32_spill] sm:$0xff] %v32681_v53  ;;  %38681 = vst [vmem:[#allocation33_spill] sm:$0xff] %v32692_v58  ;;  %v32718_v4 = vand.u32 4294901760, %v289_v57  ;;  %v32722_v5 = vand.u32 4294901760, %v456_v56  ;;  %v470_v11 = vsub.f32 %v32664_v47, %v32695_v59  ;;  %v32729_v20 = vand.u32 4294901760, %v32698_v60 }
  0x7d   : > { %27061 = vmatpush3.msra.mxu0 %v32580_v13  ;;  %27088 = vmatpush3.msra.mxu1 %v32644_v39  ;;  %38682 = vst [vmem:[#allocation34_spill] sm:$0xff] %v32695_v59  ;;  %38683 = vst [vmem:[#allocation35_spill] sm:$0xff] %v32698_v60  ;;  %v32732_v24 = vsub.f32 %v305_v49, %v32700_v61  ;;  %v32735_v28 = vsub.f32 %v290_v43, %v32684_v55  ;;  %v32737_v31 = vand.u32 4294901760, %v288_v63 }
  0x7e   : > { %27062 = vmatprep.subr.mxu0 %v32582_v14  ;;  %27089 = vmatprep.subr.mxu1 %v32659_v45  ;;  %38684 = vst [vmem:[#allocation36_spill] sm:$0xff] %v32708_v0  ;;  %38685 = vst [vmem:[#allocation37_spill] sm:$0xff] %v32713_v2  ;;  %v32742_v32 = vsub.f32 %v306_v54, %v32704_v62  ;;  %v32746_v34 = vand.u32 4294901760, %v463_v1  ;;  %v477_v37 = vsub.f32 %v32681_v53, %v32713_v2 }
  0x7f   : > { %27063 = vmatpush3.msra.mxu0 %v32582_v14  ;;  %27090 = vmatpush3.msra.mxu1 %v32659_v45  ;;  %38686 = vst [vmem:[#allocation38_spill] sm:$0xff] %v32716_v3  ;;  %38687 = vst [vmem:[#allocation39_spill] sm:$0xff] %v32722_v5  ;;  %v32751_v40 = vand.u32 4294901760, %v32716_v3  ;;  %v32753_v43 = vand.u32 4294901760, %v287_v7  ;;  %v32758_v46 = vsub.f32 %v289_v57, %v32718_v4  ;;  %v32762_v49 = vand.u32 4294901760, %v470_v11 }
  0x80   : > { %27064 = vmatprep.subr.mxu0 %v32600_v21  ;;  %27091 = vmatprep.subr.mxu1 %v32673_v50  ;;  %38688 = vst [vmem:[#allocation40_spill] sm:$0xff] %v32729_v20  ;;  %38689 = vst [vmem:[#allocation41_spill] sm:$0xff] %v32735_v28  ;;  %v484_v51 = vsub.f32 %v32698_v60, %v32729_v20  ;;  %v32768_v56 = vand.u32 4294901760, %v32735_v28  ;;  %v32774_v1 = vsub.f32 %v288_v63, %v32737_v31 }
  0x81   : > { %27065 = vmatpush3.msra.mxu0 %v32600_v21  ;;  %27092 = vmatpush3.msra.mxu1 %v32673_v50  ;;  %38690 = vst [vmem:[#allocation42_spill] sm:$0xff] %v32746_v34  ;;  %38691 = vst [vmem:[#allocation43_spill] sm:$0xff] %v32751_v40  ;;  %v32778_v11 = vand.u32 4294901760, %v477_v37  ;;  %v491_v54 = vsub.f32 %v32716_v3, %v32751_v40  ;;  %v32788_v57 = vsub.f32 %v287_v7, %v32753_v43 }
  0x82   : > { %27066 = vmatprep.subr.mxu0 %v32625_v30  ;;  %27093 = vmatprep.subr.mxu1 %v32692_v58  ;;  %38692 = vst [vmem:[#allocation44_spill] sm:$0xff] %v32758_v46  ;;  %38693 = vst [vmem:[#allocation45_spill] sm:$0xff] %v32762_v49  ;;  %v32792_v63 = vand.u32 4294901760, %v484_v51  ;;  %v38699_v37 = vand.u32 4294901760, %v32732_v24  ;;  %v38700_v7 = vand.u32 4294901760, %v32742_v32  ;;  %v32805_v50 = vand.u32 4294901760, %v32774_v1 }
  0x83   : > { %27067 = vmatpush3.msra.mxu0 %v32625_v30  ;;  %27094 = vmatpush3.msra.mxu1 %v32692_v58  ;;  %38694 = vst [vmem:[#allocation46_spill] sm:$0xff] %v32768_v56  ;;  %38695 = vst [vmem:[#allocation47_spill] sm:$0xff] %v32774_v1  ;;  %v498_v58 = vsub.f32 %v32735_v28, %v32768_v56  ;;  %v32809_v51 = vand.u32 4294901760, %v491_v54 }
  0x84   : > { %27068 = vmatprep.subr.mxu0 %v32635_v35  ;;  %27095 = vmatprep.subr.mxu1 %v32708_v0  ;;  %38696 = vst [vmem:[#allocation48_spill] sm:$0xff] %v32778_v11  ;;  %38698 = vst [vmem:[#allocation50_spill] sm:$0xff] %v32788_v57 }
  0x85   : > { %27069 = vmatpush3.msra.mxu0 %v32635_v35  ;;  %27096 = vmatpush3.msra.mxu1 %v32708_v0  ;;  %v393_v0 = vsub.f32 %v32732_v24, %v38699_v37  ;;  %38701 = vst [vmem:[#allocation51_spill] sm:$0xff] %v32805_v50  ;;  %v32820_v45 = vand.u32 4294901760, %v498_v58 }
  0x86   : > { %27070 = vmatprep.subr.mxu0 %v32655_v44  ;;  %27097 = vmatprep.subr.mxu1 %v32722_v5 }
  0x87   : > { %27071 = vmatpush3.msra.mxu0 %v32655_v44  ;;  %27098 = vmatpush3.msra.mxu1 %v32722_v5  ;;  %v32785_v5 = vand.u32 4294901760, %v32758_v46 }
  0x88   : > { %27072 = vmatprep.subr.mxu0 %v32666_v48  ;;  %27099 = vmatprep.subr.mxu1 %v32746_v34 }
  0x89   : > { %27073 = vmatpush3.msra.mxu0 %v32666_v48  ;;  %27100 = vmatpush3.msra.mxu1 %v32746_v34  ;;  %38697 = vst [vmem:[#allocation49_spill] sm:$0xff] %v32785_v5  ;;  %v403_v34 = vsub.f32 %v32742_v32, %v38700_v7  ;;  %v505_v37 = vsub.f32 %v32758_v46, %v32785_v5  ;;  %v394_v7 = vand.u32 4294901760, %v393_v0 }
  0x8a   : > { %27074 = vmatprep.subr.mxu0 %v32684_v55  ;;  %27101 = vmatprep.subr.mxu1 %v32762_v49 }
  0x8b   : > { %27075 = vmatpush3.msra.mxu0 %v32684_v55  ;;  %27102 = vmatpush3.msra.mxu1 %v32762_v49  ;;  %v32816_v49 = vand.u32 4294901760, %v32788_v57  ;;  %v404_v54 = vand.u32 4294901760, %v403_v34  ;;  %v32830_v39 = vand.u32 4294901760, %v505_v37  ;;  %v38707_v37 = vand.u32 4294901760, %v32742_v32 }
  0x8c   : > { %27076 = vmatprep.subr.mxu0 %v32718_v4  ;;  %27103 = vmatprep.subr.mxu1 %v32778_v11 }
  0x8d   : > { %27077 = vmatpush3.msra.mxu0 %v32718_v4  ;;  %27104 = vmatpush3.msra.mxu1 %v32778_v11  ;;  %38702 = vst [vmem:[#allocation52_spill] sm:$0xff] %v32816_v49  ;;  %v512_v11 = vsub.f32 %v32774_v1, %v32805_v50  ;;  %38703 = vst [vmem:[#allocation53_spill] sm:$0xff] %v32830_v39  ;;  %v519_v58 = vsub.f32 %v32788_v57, %v32816_v49 }
  0x8e   : > { %27078 = vmatprep.subr.mxu0 %v32737_v31  ;;  %27105 = vmatprep.subr.mxu1 %v32792_v63 }
  0x8f   : > { %27079 = vmatpush3.msra.mxu0 %v32737_v31  ;;  %27106 = vmatpush3.msra.mxu1 %v32792_v63  ;;  %v32836_v0 = vand.u32 4294901760, %v512_v11  ;;  %v32842_v34 = vand.u32 4294901760, %v519_v58  ;;  %v38706_v11 = vand.u32 4294901760, %v32732_v24 }
  0x90   : > { %27080 = vmatprep.subr.mxu0 %v32753_v43  ;;  %27107 = vmatprep.subr.mxu1 %v32809_v51 }
  0x91   : > { %27081 = vmatpush3.msra.mxu0 %v32753_v43  ;;  %27108 = vmatpush3.msra.mxu1 %v32809_v51  ;;  %38704 = vst [vmem:[#allocation54_spill] sm:$0xff] %v32836_v0  ;;  %38705 = vst [vmem:[#allocation55_spill] sm:$0xff] %v32842_v34 }
  0x92   : > { %27082 = vmatprep.mubr.f32.mxu0 %v394_v7  ;;  %27109 = vmatprep.subr.mxu1 %v32820_v45 }
  0x93   : > { %27120 = vmatprep.subr.mxu0 %v32595_v18  ;;  %27083 = vmatmul.mubr.f32.vlgmr.msra.gmra.mxu0 %v404_v54 }
  0x94   : > { %27110 = vmatpush3.msra.mxu1 %v32820_v45  ;;  %27121 = vmatpush3.msra.mxu0 %v32595_v18 }
  0x95   : > { %27111 = vmatprep.subr.mxu1 %v32830_v39  ;;  %27122 = vmatprep.subr.mxu0 %v32585_v15 }
  0x96   : > { %27112 = vmatpush3.msra.mxu1 %v32830_v39  ;;  %27123 = vmatpush3.msra.mxu0 %v32585_v15 }
  0x97   : > { %27113 = vmatprep.subr.mxu1 %v32836_v0  ;;  %27124 = vmatprep.subr.mxu0 %v32588_v16 }
  0x98   : > { %27114 = vmatpush3.msra.mxu1 %v32836_v0  ;;  %27125 = vmatpush3.msra.mxu0 %v32588_v16 }
  0x99   : > { %27115 = vmatprep.subr.mxu1 %v32842_v34  ;;  %27126 = vmatprep.subr.mxu0 %v32591_v17 }
  0x9a   : > { %27116 = vmatpush3.msra.mxu1 %v32842_v34  ;;  %27117 = vmatprep.mubr.f32.mxu1 %v32700_v61 }
  0x9b   : > { %27127 = vmatpush3.msra.mxu0 %v32591_v17  ;;  %27118 = vmatmul.mubr.f32.vlgmr.msra.gmra.mxu1 %v32704_v62 }
  0x9c   : > { %27128 = vmatprep.subr.mxu0 %v32598_v19  ;;  %27155 = vmatprep.subr.mxu1 %v32578_v12 }
  0x9d   : > { %27129 = vmatpush3.msra.mxu0 %v32598_v19  ;;  %27156 = vmatpush3.msra.mxu1 %v32578_v12 }
  0x9e   : > { %27130 = vmatprep.subr.mxu0 %v32617_v27  ;;  %27157 = vmatprep.subr.mxu1 %v32572_v8 }
  0x9f   : > { %27131 = vmatpush3.msra.mxu0 %v32617_v27  ;;  %27158 = vmatpush3.msra.mxu1 %v32572_v8 }
  0xa0   : > { %27132 = vmatprep.subr.mxu0 %v32623_v29  ;;  %27159 = vmatprep.subr.mxu1 %v32574_v9 }
  0xa1   : > { %27133 = vmatpush3.msra.mxu0 %v32623_v29  ;;  %27160 = vmatpush3.msra.mxu1 %v32574_v9 }
  0xa2   : > { %27134 = vmatprep.subr.mxu0 %v32639_v36  ;;  %27161 = vmatprep.subr.mxu1 %v32576_v10 }
  0xa3   : > { %27135 = vmatpush3.msra.mxu0 %v32639_v36  ;;  %27162 = vmatpush3.msra.mxu1 %v32576_v10 }
  0xa4   : > { %27136 = vmatprep.subr.mxu0 %v32664_v47  ;;  %27163 = vmatprep.subr.mxu1 %v32570_v6 }
  0xa5   : > { %27137 = vmatpush3.msra.mxu0 %v32664_v47  ;;  %27164 = vmatpush3.msra.mxu1 %v32570_v6 }
  0xa6   : > { %27138 = vmatprep.subr.mxu0 %v32681_v53  ;;  %27165 = vmatprep.subr.mxu1 %v32580_v13 }
  0xa7   : > { %27139 = vmatpush3.msra.mxu0 %v32681_v53  ;;  %27166 = vmatpush3.msra.mxu1 %v32580_v13 }
  0xa8   : > { %27140 = vmatprep.subr.mxu0 %v32698_v60  ;;  %27167 = vmatprep.subr.mxu1 %v32582_v14 }
  0xa9   : > { %27141 = vmatpush3.msra.mxu0 %v32698_v60  ;;  %27168 = vmatpush3.msra.mxu1 %v32582_v14 }
  0xaa   : > { %27142 = vmatprep.subr.mxu0 %v32716_v3  ;;  %27169 = vmatprep.subr.mxu1 %v32600_v21 }
  0xab   : > { %27143 = vmatpush3.msra.mxu0 %v32716_v3  ;;  %27170 = vmatpush3.msra.mxu1 %v32600_v21 }
  0xac   : > { %27144 = vmatprep.subr.mxu0 %v32735_v28  ;;  %27171 = vmatprep.subr.mxu1 %v32625_v30 }
  0xad   : > { %27145 = vmatpush3.msra.mxu0 %v32735_v28  ;;  %27172 = vmatpush3.msra.mxu1 %v32625_v30 }
  0xae   : > { %27146 = vmatprep.subr.mxu0 %v32758_v46  ;;  %27173 = vmatprep.subr.mxu1 %v32635_v35 }
  0xaf   : > { %27147 = vmatpush3.msra.mxu0 %v32758_v46  ;;  %27174 = vmatpush3.msra.mxu1 %v32635_v35 }
  0xb0   : > { %27148 = vmatprep.subr.mxu0 %v32774_v1  ;;  %27175 = vmatprep.subr.mxu1 %v32655_v44 }
  0xb1   : > { %27149 = vmatpush3.msra.mxu0 %v32774_v1  ;;  %27176 = vmatpush3.msra.mxu1 %v32655_v44 }
  0xb2   : > { %27150 = vmatprep.subr.mxu0 %v32788_v57  ;;  %27177 = vmatprep.subr.mxu1 %v32666_v48 }
  0xb3   : > { %27151 = vmatpush3.msra.mxu0 %v32788_v57  ;;  %27152 = vmatprep.mubr.f32.mxu0 %v32732_v24  ;;  %v303_v24 = vld [vmem:[#allocation7] sm:$0xff] }
  0xb4   : > { %27178 = vmatpush3.msra.mxu1 %v32666_v48  ;;  %27153 = vmatmul.mubr.f32.vlgmr.msra.gmra.mxu0 %v32742_v32  ;;  %v995_v32 = vsel %vm993_vm0, %v303_v24, 0 }
  0xb5   : > { %27179 = vmatprep.subr.mxu1 %v32684_v55  ;;  %27190 = vmatprep.subr.mxu0 %v32611_v25 }
  0xb6   : > { %27180 = vmatpush3.msra.mxu1 %v32684_v55  ;;  %27191 = vmatpush3.msra.mxu0 %v32611_v25 }
  0xb7   : > { %27181 = vmatprep.subr.mxu1 %v32718_v4  ;;  %27192 = vmatprep.subr.mxu0 %v32604_v22 }
  0xb8   : > { %27182 = vmatpush3.msra.mxu1 %v32718_v4  ;;  %27193 = vmatpush3.msra.mxu0 %v32604_v22 }
  0xb9   : > { %27183 = vmatprep.subr.mxu1 %v32737_v31  ;;  %27194 = vmatprep.subr.mxu0 %v32607_v23 }
  0xba   : > { %27184 = vmatpush3.msra.mxu1 %v32737_v31  ;;  %27195 = vmatpush3.msra.mxu0 %v32607_v23 }
  0xbb   : > { %27185 = vmatprep.subr.mxu1 %v32753_v43  ;;  %27196 = vmatprep.subr.mxu0 %v32614_v26 }
  0xbc   : > { %27186 = vmatpush3.msra.mxu1 %v32753_v43  ;;  %27187 = vmatprep.mubr.f32.mxu1 %v38706_v11 }
  0xbd   : > { %27197 = vmatpush3.msra.mxu0 %v32614_v26  ;;  %27188 = vmatmul.mubr.f32.vlgmr.msra.gmra.mxu1 %v38707_v37  ;;  %v304_v37 = vld [vmem:[#allocation7 + $0x8] sm:$0xff] }
  0xbe   : > { %27198 = vmatprep.subr.mxu0 %v32633_v33  ;;  %27225 = vmatprep.subr.mxu1 %v32578_v12 }
  0xbf   : > { %27199 = vmatpush3.msra.mxu0 %v32633_v33  ;;  %27226 = vmatpush3.msra.mxu1 %v32578_v12 }
  0xc0   : > { %27200 = vmatprep.subr.mxu0 %v32649_v41  ;;  %27227 = vmatprep.subr.mxu1 %v32572_v8 }
  0xc1   : > { %27201 = vmatpush3.msra.mxu0 %v32649_v41  ;;  %27228 = vmatpush3.msra.mxu1 %v32572_v8 }
  0xc2   : > { %27202 = vmatprep.subr.mxu0 %v32653_v42  ;;  %27229 = vmatprep.subr.mxu1 %v32574_v9 }
  0xc3   : > { %27203 = vmatpush3.msra.mxu0 %v32653_v42  ;;  %27230 = vmatpush3.msra.mxu1 %v32574_v9 }
  0xc4   : > { %27204 = vmatprep.subr.mxu0 %v32678_v52  ;;  %27231 = vmatprep.subr.mxu1 %v32576_v10 }
  0xc5   : > { %27205 = vmatpush3.msra.mxu0 %v32678_v52  ;;  %27232 = vmatpush3.msra.mxu1 %v32576_v10 }
  0xc6   : > { %27206 = vmatprep.subr.mxu0 %v32695_v59  ;;  %27233 = vmatprep.subr.mxu1 %v32570_v6 }
  0xc7   : > { %27207 = vmatpush3.msra.mxu0 %v32695_v59  ;;  %27234 = vmatpush3.msra.mxu1 %v32570_v6 }
  0xc8   : > { %27208 = vmatprep.subr.mxu0 %v32713_v2  ;;  %27235 = vmatprep.subr.mxu1 %v32580_v13 }
  0xc9   : > { %27209 = vmatpush3.msra.mxu0 %v32713_v2  ;;  %27236 = vmatpush3.msra.mxu1 %v32580_v13 }
  0xca   : > { %27210 = vmatprep.subr.mxu0 %v32729_v20  ;;  %27237 = vmatprep.subr.mxu1 %v32582_v14 }
  0xcb   : > { %27211 = vmatpush3.msra.mxu0 %v32729_v20  ;;  %27238 = vmatpush3.msra.mxu1 %v32582_v14 }
  0xcc   : > { %27212 = vmatprep.subr.mxu0 %v32751_v40  ;;  %27239 = vmatprep.subr.mxu1 %v32600_v21 }
  0xcd   : > { %27213 = vmatpush3.msra.mxu0 %v32751_v40  ;;  %27240 = vmatpush3.msra.mxu1 %v32600_v21 }
  0xce   : > { %27214 = vmatprep.subr.mxu0 %v32768_v56  ;;  %27241 = vmatprep.subr.mxu1 %v32625_v30 }
  0xcf   : > { %27215 = vmatpush3.msra.mxu0 %v32768_v56  ;;  %27242 = vmatpush3.msra.mxu1 %v32625_v30 }
  0xd0   : > { %27216 = vmatprep.subr.mxu0 %v32785_v5  ;;  %27243 = vmatprep.subr.mxu1 %v32635_v35 }
  0xd1   : > { %27217 = vmatpush3.msra.mxu0 %v32785_v5  ;;  %27244 = vmatpush3.msra.mxu1 %v32635_v35 }
  0xd2   : > { %27218 = vmatprep.subr.mxu0 %v32805_v50  ;;  %27245 = vmatprep.subr.mxu1 %v32655_v44 }
  0xd3   : > { %27219 = vmatpush3.msra.mxu0 %v32805_v50  ;;  %27246 = vmatpush3.msra.mxu1 %v32655_v44  ;;  %v998_v50 = vsel %vm993_vm0, %v304_v37, 0 }
  0xd4   : > { %27220 = vmatprep.subr.mxu0 %v32816_v49  ;;  %27247 = vmatprep.subr.mxu1 %v32666_v48 }
  0xd5   : > { %27221 = vmatpush3.msra.mxu0 %v32816_v49  ;;  %27222 = vmatprep.mubr.f32.mxu0 %v32700_v61 }
  0xd6   : > { %27248 = vmatpush3.msra.mxu1 %v32666_v48  ;;  %27223 = vmatmul.mubr.f32.vlgmr.msra.gmra.mxu0 %v32704_v62 }
  0xd7   : > { %27249 = vmatprep.subr.mxu1 %v32684_v55  ;;  %27257 = vmatprep.mubr.f32.mxu1 %v32700_v61  ;;  %v32986_v61 = vand.u32 4294901760, %v995_v32 }
  0xd8   : > { %27250 = vmatpush3.msra.mxu1 %v32684_v55 }
  0xd9   : > { %27251 = vmatprep.subr.mxu1 %v32718_v4  ;;  %v32989_v7 = vsub.f32 %v995_v32, %v32986_v61  ;;  %v33000_v32 = vand.u32 4294901760, %v998_v50 }
  0xda   : > { %27252 = vmatpush3.msra.mxu1 %v32718_v4 }
  0xdb   : > { %27253 = vmatprep.subr.mxu1 %v32737_v31  ;;  %v32993_v54 = vand.u32 4294901760, %v32989_v7  ;;  %v33003_v59 = vsub.f32 %v998_v50, %v33000_v32 }
  0xdc   : > { %27254 = vmatpush3.msra.mxu1 %v32737_v31 }
  0xdd   : > { %27255 = vmatprep.subr.mxu1 %v32753_v43  ;;  %v1070_v58 = vsub.f32 %v32989_v7, %v32993_v54  ;;  %v33006_v26 = vand.u32 4294901760, %v33003_v59 }
  0xde   : > { %27256 = vmatpush3.msra.mxu1 %v32753_v43 }
  0xdf   : > { %27258 = vmatmul.mubr.f32.vlgmr.msra.gmra.mxu1 %v32704_v62  ;;  %v32997_v11 = vand.u32 4294901760, %v1070_v58 }
  0xe0   : > { %27271 = vmatprep.mubr.f32.mxu1 %v32986_v61 }
  0xe1   : > { %38708 = vst [vmem:[#allocation56_spill] sm:$0xff] %v32997_v11  ;;  %27264 = vmatprep.mubr.f32.mxu0 %v32997_v11 }
 0x153   : > { %v27084_v62 = vpop.f32.mrf.mxu0 }
 0x155   : > { %v396_v24 = vpop.f32.mrf.mxu0 }
 0x15b   : > { %v27119_v49 = vpop.f32.mrf.mxu1 }
 0x15c   : > { %v564_v2 = vadd.f32 %v27119_v49, %v27084_v62  ;;  %v1080_v49 = vsub.f32 %v33003_v59, %v33006_v26 }
 0x15d   : > { %v557_v56 = vpop.f32.mrf.mxu1 }
 0x15e   : > { %v558_v58 = vadd.f32 %v557_v56, %v396_v24  ;;  %v38711_v24 = vld [vmem:[#allocation30_spill] sm:$0xff] }
 0x174   : > { %v27154_v5 = vpop.f32.mrf.mxu0 }
 0x175   : > { %v675_v42 = vadd.f32 %v27154_v5, %v564_v2  ;;  %v33010_v5 = vand.u32 4294901760, %v1080_v49 }
 0x176   : > { %v667_v40 = vpop.f32.mrf.mxu0 }
 0x177   : > { %v668_v11 = vadd.f32 %v667_v40, %v558_v58  ;;  %v38709_v40 = vld [vmem:[#allocation25_spill] sm:$0xff] }
 0x178   : > { %v38712_v58 = vld [vmem:[#allocation33_spill] sm:$0xff] }
 0x17d   : > { %v27189_v20 = vpop.f32.mrf.mxu1 }
 0x17e   : > { %v772_v33 = vadd.f32 %v27189_v20, %v675_v42 }
 0x17f   : > { %v763_v41 = vpop.f32.mrf.mxu1 }
 0x180   : > { %v764_v23 = vadd.f32 %v763_v41, %v668_v11 }
 0x196   : > { %v27224_v52 = vpop.f32.mrf.mxu0 }
 0x197   : > { %v897_v22 = vadd.f32 %v27224_v52, %v772_v33  ;;  %v307_v52 = vld [vmem:[%s32556_s28] sm:$0xff] }
 0x198   : > { %v890_v37 = vpop.f32.mrf.mxu0 }
 0x199   : > { %v891_v57 = vadd.f32 %v890_v37, %v764_v23 }
 0x19f   : > { %v27259_v25 = vpop.f32.mrf.mxu1 }
 0x1a0   : > { %v990_v1 = vadd.f32 %v27259_v25, %v897_v22 }
 0x1a1   : > { %v983_v50 = vpop.f32.mrf.mxu1 }
 0x1a2   : > { %v1029_v62 = vand.u32 4294901760, %v990_v1  ;;  %v984_v46 = vadd.f32 %v983_v50, %v891_v57  ;;  %v38710_v57 = vld [vmem:[#allocation28_spill] sm:$0xff] }
 0x1a3   : > { %v38713_v50 = vld [vmem:[#allocation36_spill] sm:$0xff] }
 0x1a4   : > { %v1117_v56 = vsub.f32 %v990_v1, %v1029_v62  ;;  %v1032_v2 = vand.u32 4294901760, %v984_v46  ;;  %27260 = vmatprep.subr.mxu0 %v1029_v62  ;;  %v33042_v1 = vand.u32 4294901760, %v307_v52 }
 0x1a5   : > { %27261 = vmatpush3.msra.mxu0 %v1029_v62 }
 0x1a6   : > { %v1124_v42 = vsub.f32 %v984_v46, %v1032_v2  ;;  %27262 = vmatprep.subr.mxu0 %v1032_v2  ;;  %v1118_v20 = vand.u32 4294901760, %v1117_v56  ;;  %v308_v46 = vld [vmem:[%s32556_s28 + $0x8] sm:$0xff]  ;;  %v33055_v37 = vsub.f32 %v307_v52, %v33042_v1 }
 0x1a7   : > { %27263 = vmatpush3.msra.mxu0 %v1032_v2  ;;  %v33046_v11 = vand.u32 4294901760, %v308_v46  ;;  %v38718_v52 = vld [vmem:[#allocation44_spill] sm:$0xff] }
 0x1a8   : > { %27274 = vmatprep.subr.mxu0 %v1117_v56  ;;  %27265 = vmatmul.mubr.f32.vlgmr.msra.gmra.mxu0 %v33010_v5  ;;  %v1119_v22 = vsub.f32 %v1117_v56, %v1118_v20  ;;  %v1125_v23 = vand.u32 4294901760, %v1124_v42 }
 0x1a9   : > { %27275 = vmatpush3.msra.mxu0 %v1117_v56  ;;  %27278 = vmatprep.mubr.f32.mxu0 %v32989_v7  ;;  %v33060_v49 = vsub.f32 %v308_v46, %v33046_v11  ;;  %v1585_v56 = vand.u32 4294901760, %v33055_v37  ;;  %v38719_v46 = vld [vmem:[#allocation47_spill] sm:$0xff] }
 0x1aa   : > { %27276 = vmatprep.subr.mxu0 %v1124_v42  ;;  %v1120_v25 = vand.u32 4294901760, %v1119_v22  ;;  %v1126_v33 = vsub.f32 %v1124_v42, %v1125_v23 }
 0x1ab   : > { %27277 = vmatpush3.msra.mxu0 %v1124_v42  ;;  %v38715_v42 = vld [vmem:[#allocation42_spill] sm:$0xff]  ;;  %v1586_v22 = vsub.f32 %v33055_v37, %v1585_v56 }
 0x1ac   : > { %27267 = vmatprep.subr.mxu1 %v1120_v25  ;;  %27288 = vmatprep.subr.mxu0 %v1118_v20  ;;  %v1127_v41 = vand.u32 4294901760, %v1126_v33 }
 0x1ad   : > { %27268 = vmatpush3.msra.mxu1 %v1120_v25  ;;  %27279 = vmatmul.mubr.f32.vlgmr.msra.gmra.mxu0 %v33003_v59  ;;  %v38717_v25 = vld [vmem:[#allocation48_spill] sm:$0xff]  ;;  %v1587_v33 = vand.u32 4294901760, %v1586_v22  ;;  %v38720_v22 = vld [vmem:[#allocation50_spill] sm:$0xff] }
 0x1ae   : > { %27289 = vmatpush3.msra.mxu0 %v1118_v20  ;;  %27269 = vmatprep.subr.mxu1 %v1127_v41  ;;  %v38716_v20 = vld [vmem:[#allocation45_spill] sm:$0xff] }
 0x1af   : > { %27290 = vmatprep.subr.mxu0 %v1125_v23  ;;  %27270 = vmatpush3.msra.mxu1 %v1127_v41 }
 0x1b0   : > { %27291 = vmatpush3.msra.mxu0 %v1125_v23  ;;  %27272 = vmatmul.mubr.f32.vlgmr.msra.gmra.mxu1 %v33000_v32 }
 0x1b1   : > { %27281 = vmatprep.subr.mxu1 %v1029_v62  ;;  %27292 = vmatprep.mubr.f32.mxu0 %v32986_v61 }
 0x1b2   : > { %27302 = vmatprep.subr.mxu0 %v32578_v12  ;;  %27282 = vmatpush3.msra.mxu1 %v1029_v62 }
 0x1b3   : > { %27293 = vmatmul.mubr.f32.vlgmr.msra.gmra.mxu0 %v33000_v32  ;;  %27283 = vmatprep.subr.mxu1 %v1032_v2 }
 0x1b4   : > { %27303 = vmatpush3.msra.mxu0 %v32578_v12  ;;  %27284 = vmatpush3.msra.mxu1 %v1032_v2 }
 0x1b5   : > { %27304 = vmatprep.subr.mxu0 %v32572_v8  ;;  %27285 = vmatprep.mubr.f32.mxu1 %v32993_v54 }
 0x1b6   : > { %27305 = vmatpush3.msra.mxu0 %v32572_v8  ;;  %27286 = vmatmul.mubr.f32.vlgmr.msra.gmra.mxu1 %v33006_v26 }
 0x1b7   : > { %27295 = vmatprep.subr.mxu1 %v1029_v62  ;;  %27306 = vmatprep.subr.mxu0 %v32574_v9 }
 0x1b8   : > { %27296 = vmatpush3.msra.mxu1 %v1029_v62  ;;  %27307 = vmatpush3.msra.mxu0 %v32574_v9  ;;  %v38714_v62 = vld [vmem:[#allocation39_spill] sm:$0xff] }
 0x1b9   : > { %27297 = vmatprep.subr.mxu1 %v1032_v2  ;;  %27308 = vmatprep.subr.mxu0 %v32576_v10 }
 0x1ba   : > { %27298 = vmatpush3.msra.mxu1 %v1032_v2  ;;  %27299 = vmatprep.mubr.f32.mxu1 %v32986_v61  ;;  %v37995_v2 = vand.u32 4294901760, %v33060_v49 }
 0x1bb   : > { %27309 = vmatpush3.msra.mxu0 %v32576_v10  ;;  %27300 = vmatmul.mubr.f32.vlgmr.msra.gmra.mxu1 %v33000_v32 }
 0x1bc   : > { %27310 = vmatprep.subr.mxu0 %v32570_v6  ;;  %27337 = vmatprep.subr.mxu1 %v32642_v38  ;;  %v1596_v23 = vsub.f32 %v33060_v49, %v37995_v2  ;;  %v38724_v2 = vld [vmem:[#allocation20_spill] sm:$0xff] }
 0x1bd   : > { %27311 = vmatpush3.msra.mxu0 %v32570_v6  ;;  %27338 = vmatpush3.msra.mxu1 %v32642_v38 }
 0x1be   : > { %27312 = vmatprep.subr.mxu0 %v32580_v13  ;;  %27339 = vmatprep.subr.mxu1 %v38709_v40  ;;  %v1597_v41 = vand.u32 4294901760, %v1596_v23  ;;  %v38721_v23 = vld [vmem:[#allocation19_spill] sm:$0xff] }
 0x1bf   : > { %27313 = vmatpush3.msra.mxu0 %v32580_v13  ;;  %27340 = vmatpush3.msra.mxu1 %v38709_v40 }
 0x1c0   : > { %27314 = vmatprep.subr.mxu0 %v32582_v14  ;;  %27341 = vmatprep.subr.mxu1 %v38710_v57 }
 0x1c1   : > { %27315 = vmatpush3.msra.mxu0 %v32582_v14  ;;  %27342 = vmatpush3.msra.mxu1 %v38710_v57 }
 0x1c2   : > { %27316 = vmatprep.subr.mxu0 %v32600_v21  ;;  %27343 = vmatprep.subr.mxu1 %v38711_v24 }
 0x1c3   : > { %27317 = vmatpush3.msra.mxu0 %v32600_v21  ;;  %27344 = vmatpush3.msra.mxu1 %v38711_v24 }
 0x1c4   : > { %27318 = vmatprep.subr.mxu0 %v32625_v30  ;;  %27345 = vmatprep.subr.mxu1 %v38712_v58 }
 0x1c5   : > { %27319 = vmatpush3.msra.mxu0 %v32625_v30  ;;  %27346 = vmatpush3.msra.mxu1 %v38712_v58 }
 0x1c6   : > { %27320 = vmatprep.subr.mxu0 %v32635_v35  ;;  %27347 = vmatprep.subr.mxu1 %v38713_v50 }
 0x1c7   : > { %27321 = vmatpush3.msra.mxu0 %v32635_v35  ;;  %27348 = vmatpush3.msra.mxu1 %v38713_v50 }
 0x1c8   : > { %27322 = vmatprep.subr.mxu0 %v32655_v44  ;;  %27349 = vmatprep.subr.mxu1 %v38714_v62 }
 0x1c9   : > { %27323 = vmatpush3.msra.mxu0 %v32655_v44  ;;  %27350 = vmatpush3.msra.mxu1 %v38714_v62 }
 0x1ca   : > { %27324 = vmatprep.subr.mxu0 %v32666_v48  ;;  %27351 = vmatprep.subr.mxu1 %v38715_v42 }
 0x1cb   : > { %27325 = vmatpush3.msra.mxu0 %v32666_v48  ;;  %27352 = vmatpush3.msra.mxu1 %v38715_v42 }
 0x1cc   : > { %27326 = vmatprep.subr.mxu0 %v32684_v55  ;;  %27353 = vmatprep.subr.mxu1 %v38716_v20 }
 0x1cd   : > { %27327 = vmatpush3.msra.mxu0 %v32684_v55  ;;  %27354 = vmatpush3.msra.mxu1 %v38716_v20 }
 0x1ce   : > { %27328 = vmatprep.subr.mxu0 %v32718_v4  ;;  %27355 = vmatprep.subr.mxu1 %v38717_v25 }
 0x1cf   : > { %27329 = vmatpush3.msra.mxu0 %v32718_v4  ;;  %27356 = vmatpush3.msra.mxu1 %v38717_v25 }
 0x1d0   : > { %27330 = vmatprep.subr.mxu0 %v32737_v31  ;;  %27357 = vmatprep.subr.mxu1 %v32792_v63 }
 0x1d1   : > { %27331 = vmatpush3.msra.mxu0 %v32737_v31  ;;  %27358 = vmatpush3.msra.mxu1 %v32792_v63 }
 0x1d2   : > { %27332 = vmatprep.subr.mxu0 %v32753_v43  ;;  %27359 = vmatprep.subr.mxu1 %v32809_v51 }
 0x1d3   : > { %27333 = vmatpush3.msra.mxu0 %v32753_v43  ;;  %27360 = vmatpush3.msra.mxu1 %v32809_v51 }
 0x1d4   : > { %27334 = vmatprep.mubr.f32.mxu0 %v1587_v33  ;;  %27361 = vmatprep.subr.mxu1 %v32820_v45  ;;  %v38722_v33 = vld [vmem:[#allocation17_spill] sm:$0xff] }
 0x1d5   : > { %27372 = vmatprep.subr.mxu0 %v32595_v18  ;;  %27335 = vmatmul.mubr.f32.vlgmr.msra.gmra.mxu0 %v1597_v41  ;;  %v38723_v41 = vld [vmem:[#allocation18_spill] sm:$0xff] }
 0x1d6   : > { %27362 = vmatpush3.msra.mxu1 %v32820_v45  ;;  %27373 = vmatpush3.msra.mxu0 %v32595_v18 }
 0x1d7   : > { %27363 = vmatprep.subr.mxu1 %v32830_v39  ;;  %27374 = vmatprep.subr.mxu0 %v32585_v15 }
 0x1d8   : > { %27364 = vmatpush3.msra.mxu1 %v32830_v39  ;;  %27375 = vmatpush3.msra.mxu0 %v32585_v15 }
 0x1d9   : > { %27365 = vmatprep.subr.mxu1 %v32836_v0  ;;  %27376 = vmatprep.subr.mxu0 %v32588_v16 }
 0x1da   : > { %27366 = vmatpush3.msra.mxu1 %v32836_v0  ;;  %27377 = vmatpush3.msra.mxu0 %v32588_v16 }
 0x1db   : > { %27367 = vmatprep.subr.mxu1 %v32842_v34  ;;  %27378 = vmatprep.subr.mxu0 %v32591_v17 }
 0x1dc   : > { %27368 = vmatpush3.msra.mxu1 %v32842_v34  ;;  %27369 = vmatprep.mubr.f32.mxu1 %v33042_v1 }
 0x1dd   : > { %27379 = vmatpush3.msra.mxu0 %v32591_v17  ;;  %27370 = vmatmul.mubr.f32.vlgmr.msra.gmra.mxu1 %v33046_v11 }
 0x1de   : > { %27380 = vmatprep.subr.mxu0 %v32598_v19  ;;  %27407 = vmatprep.subr.mxu1 %v32578_v12 }
 0x1df   : > { %27381 = vmatpush3.msra.mxu0 %v32598_v19  ;;  %27408 = vmatpush3.msra.mxu1 %v32578_v12 }
 0x1e0   : > { %27382 = vmatprep.subr.mxu0 %v32617_v27  ;;  %27409 = vmatprep.subr.mxu1 %v32572_v8 }
 0x1e1   : > { %27383 = vmatpush3.msra.mxu0 %v32617_v27  ;;  %27410 = vmatpush3.msra.mxu1 %v32572_v8 }
 0x1e2   : > { %27384 = vmatprep.subr.mxu0 %v32623_v29  ;;  %27411 = vmatprep.subr.mxu1 %v32574_v9 }
 0x1e3   : > { %27385 = vmatpush3.msra.mxu0 %v32623_v29  ;;  %27412 = vmatpush3.msra.mxu1 %v32574_v9 }
 0x1e4   : > { %27386 = vmatprep.subr.mxu0 %v32639_v36  ;;  %27413 = vmatprep.subr.mxu1 %v32576_v10 }
 0x1e5   : > { %27387 = vmatpush3.msra.mxu0 %v32639_v36  ;;  %27414 = vmatpush3.msra.mxu1 %v32576_v10 }
 0x1e6   : > { %27388 = vmatprep.subr.mxu0 %v32664_v47  ;;  %27415 = vmatprep.subr.mxu1 %v32570_v6 }
 0x1e7   : > { %27389 = vmatpush3.msra.mxu0 %v32664_v47  ;;  %27416 = vmatpush3.msra.mxu1 %v32570_v6 }
 0x1e8   : > { %27390 = vmatprep.subr.mxu0 %v32681_v53  ;;  %27417 = vmatprep.subr.mxu1 %v32580_v13 }
 0x1e9   : > { %27391 = vmatpush3.msra.mxu0 %v32681_v53  ;;  %27418 = vmatpush3.msra.mxu1 %v32580_v13 }
 0x1ea   : > { %27392 = vmatprep.subr.mxu0 %v32698_v60  ;;  %27419 = vmatprep.subr.mxu1 %v32582_v14 }
 0x1eb   : > { %27393 = vmatpush3.msra.mxu0 %v32698_v60  ;;  %27420 = vmatpush3.msra.mxu1 %v32582_v14 }
 0x1ec   : > { %27394 = vmatprep.subr.mxu0 %v32716_v3  ;;  %27421 = vmatprep.subr.mxu1 %v32600_v21 }
 0x1ed   : > { %27395 = vmatpush3.msra.mxu0 %v32716_v3  ;;  %27422 = vmatpush3.msra.mxu1 %v32600_v21 }
 0x1ee   : > { %27396 = vmatprep.subr.mxu0 %v32735_v28  ;;  %27423 = vmatprep.subr.mxu1 %v32625_v30 }
 0x1ef   : > { %27397 = vmatpush3.msra.mxu0 %v32735_v28  ;;  %27424 = vmatpush3.msra.mxu1 %v32625_v30 }
 0x1f0   : > { %27398 = vmatprep.subr.mxu0 %v38718_v52  ;;  %27425 = vmatprep.subr.mxu1 %v32635_v35 }
 0x1f1   : > { %27399 = vmatpush3.msra.mxu0 %v38718_v52  ;;  %27426 = vmatpush3.msra.mxu1 %v32635_v35 }
 0x1f2   : > { %27400 = vmatprep.subr.mxu0 %v38719_v46  ;;  %27427 = vmatprep.subr.mxu1 %v32655_v44 }
 0x1f3   : > { %27401 = vmatpush3.msra.mxu0 %v38719_v46  ;;  %27428 = vmatpush3.msra.mxu1 %v32655_v44 }
 0x1f4   : > { %27402 = vmatprep.subr.mxu0 %v38720_v22  ;;  %27429 = vmatprep.subr.mxu1 %v32666_v48 }
 0x1f5   : > { %27403 = vmatpush3.msra.mxu0 %v38720_v22  ;;  %27404 = vmatprep.mubr.f32.mxu0 %v33055_v37  ;;  %v38728_v37 = vld [vmem:[#allocation27_spill] sm:$0xff] }
 0x1f6   : > { %27430 = vmatpush3.msra.mxu1 %v32666_v48  ;;  %27405 = vmatmul.mubr.f32.vlgmr.msra.gmra.mxu0 %v33060_v49 }
 0x1f7   : > { %27431 = vmatprep.subr.mxu1 %v32684_v55  ;;  %27442 = vmatprep.subr.mxu0 %v38721_v23 }
 0x1f8   : > { %27432 = vmatpush3.msra.mxu1 %v32684_v55  ;;  %27443 = vmatpush3.msra.mxu0 %v38721_v23  ;;  %v38726_v23 = vld [vmem:[#allocation23_spill] sm:$0xff] }
 0x1f9   : > { %27433 = vmatprep.subr.mxu1 %v32718_v4  ;;  %27444 = vmatprep.subr.mxu0 %v38722_v33 }
 0x1fa   : > { %27434 = vmatpush3.msra.mxu1 %v32718_v4  ;;  %27445 = vmatpush3.msra.mxu0 %v38722_v33  ;;  %v38725_v33 = vand.u32 4294901760, %v33060_v49  ;;  %v38729_v49 = vld [vmem:[#allocation31_spill] sm:$0xff] }
 0x1fb   : > { %27435 = vmatprep.subr.mxu1 %v32737_v31  ;;  %27446 = vmatprep.subr.mxu0 %v38723_v41 }
 0x1fc   : > { %27436 = vmatpush3.msra.mxu1 %v32737_v31  ;;  %27447 = vmatpush3.msra.mxu0 %v38723_v41  ;;  %v38727_v41 = vld [vmem:[#allocation26_spill] sm:$0xff] }
 0x1fd   : > { %27437 = vmatprep.subr.mxu1 %v32753_v43  ;;  %27448 = vmatprep.subr.mxu0 %v38724_v2 }
 0x1fe   : > { %27438 = vmatpush3.msra.mxu1 %v32753_v43  ;;  %27439 = vmatprep.mubr.f32.mxu1 %v1585_v56  ;;  %v38730_v56 = vld [vmem:[#allocation34_spill] sm:$0xff] }
 0x1ff   : > { %27449 = vmatpush3.msra.mxu0 %v38724_v2  ;;  %27440 = vmatmul.mubr.f32.vlgmr.msra.gmra.mxu1 %v38725_v33  ;;  %v38731_v33 = vld [vmem:[#allocation37_spill] sm:$0xff] }
 0x200   : > { %27450 = vmatprep.subr.mxu0 %v38726_v23  ;;  %27477 = vmatprep.subr.mxu1 %v32578_v12 }
 0x201   : > { %27451 = vmatpush3.msra.mxu0 %v38726_v23  ;;  %27478 = vmatpush3.msra.mxu1 %v32578_v12 }
 0x202   : > { %27452 = vmatprep.subr.mxu0 %v38727_v41  ;;  %27479 = vmatprep.subr.mxu1 %v32572_v8 }
 0x203   : > { %27453 = vmatpush3.msra.mxu0 %v38727_v41  ;;  %27480 = vmatpush3.msra.mxu1 %v32572_v8 }
 0x204   : > { %27454 = vmatprep.subr.mxu0 %v38728_v37  ;;  %27481 = vmatprep.subr.mxu1 %v32574_v9 }
 0x205   : > { %27455 = vmatpush3.msra.mxu0 %v38728_v37  ;;  %27482 = vmatpush3.msra.mxu1 %v32574_v9  ;;  %v38732_v37 = vld [vmem:[#allocation40_spill] sm:$0xff] }
 0x206   : > { %27456 = vmatprep.subr.mxu0 %v38729_v49  ;;  %27483 = vmatprep.subr.mxu1 %v32576_v10 }
 0x207   : > { %27457 = vmatpush3.msra.mxu0 %v38729_v49  ;;  %27484 = vmatpush3.msra.mxu1 %v32576_v10  ;;  %v38733_v49 = vld [vmem:[#allocation43_spill] sm:$0xff] }
 0x208   : > { %27458 = vmatprep.subr.mxu0 %v38730_v56  ;;  %27485 = vmatprep.subr.mxu1 %v32570_v6 }
 0x209   : > { %27459 = vmatpush3.msra.mxu0 %v38730_v56  ;;  %27486 = vmatpush3.msra.mxu1 %v32570_v6  ;;  %v38734_v56 = vld [vmem:[#allocation46_spill] sm:$0xff] }
 0x20a   : > { %27460 = vmatprep.subr.mxu0 %v38731_v33  ;;  %27487 = vmatprep.subr.mxu1 %v32580_v13 }
 0x20b   : > { %27461 = vmatpush3.msra.mxu0 %v38731_v33  ;;  %27488 = vmatpush3.msra.mxu1 %v32580_v13  ;;  %v38735_v33 = vld [vmem:[#allocation49_spill] sm:$0xff] }
 0x20c   : > { %27462 = vmatprep.subr.mxu0 %v38732_v37  ;;  %27489 = vmatprep.subr.mxu1 %v32582_v14 }
 0x20d   : > { %27463 = vmatpush3.msra.mxu0 %v38732_v37  ;;  %27490 = vmatpush3.msra.mxu1 %v32582_v14  ;;  %v38736_v37 = vld [vmem:[#allocation51_spill] sm:$0xff] }
 0x20e   : > { %27464 = vmatprep.subr.mxu0 %v38733_v49  ;;  %27491 = vmatprep.subr.mxu1 %v32600_v21 }
 0x20f   : > { %27465 = vmatpush3.msra.mxu0 %v38733_v49  ;;  %27492 = vmatpush3.msra.mxu1 %v32600_v21  ;;  %v38737_v49 = vld [vmem:[#allocation52_spill] sm:$0xff] }
 0x210   : > { %27466 = vmatprep.subr.mxu0 %v38734_v56  ;;  %27493 = vmatprep.subr.mxu1 %v32625_v30 }
 0x211   : > { %27467 = vmatpush3.msra.mxu0 %v38734_v56  ;;  %27494 = vmatpush3.msra.mxu1 %v32625_v30 }
 0x212   : > { %27468 = vmatprep.subr.mxu0 %v38735_v33  ;;  %27495 = vmatprep.subr.mxu1 %v32635_v35 }
 0x213   : > { %27469 = vmatpush3.msra.mxu0 %v38735_v33  ;;  %27496 = vmatpush3.msra.mxu1 %v32635_v35 }
 0x214   : > { %27470 = vmatprep.subr.mxu0 %v38736_v37  ;;  %27497 = vmatprep.subr.mxu1 %v32655_v44 }
 0x215   : > { %27471 = vmatpush3.msra.mxu0 %v38736_v37  ;;  %27498 = vmatpush3.msra.mxu1 %v32655_v44  ;;  %v38738_v37 = vld [vmem:[#allocation56_spill] sm:$0xff] }
 0x216   : > { %27472 = vmatprep.subr.mxu0 %v38737_v49  ;;  %27499 = vmatprep.subr.mxu1 %v32666_v48 }
 0x217   : > { %27473 = vmatpush3.msra.mxu0 %v38737_v49  ;;  %27474 = vmatprep.mubr.f32.mxu0 %v33042_v1 }
 0x218   : > { %27500 = vmatpush3.msra.mxu1 %v32666_v48  ;;  %27475 = vmatmul.mubr.f32.vlgmr.msra.gmra.mxu0 %v33046_v11 }
 0x219   : > { %27501 = vmatprep.subr.mxu1 %v32684_v55  ;;  %27509 = vmatprep.mubr.f32.mxu1 %v33042_v1 }
 0x21a   : > { %27502 = vmatpush3.msra.mxu1 %v32684_v55  ;;  %27516 = vmatprep.mubr.f32.mxu0 %v38738_v37 }
 0x21b   : > { %27503 = vmatprep.subr.mxu1 %v32718_v4 }
 0x21c   : > { %27504 = vmatpush3.msra.mxu1 %v32718_v4 }
 0x21d   : > { %27505 = vmatprep.subr.mxu1 %v32737_v31 }
 0x21e   : > { %27506 = vmatpush3.msra.mxu1 %v32737_v31 }
 0x21f   : > { %27507 = vmatprep.subr.mxu1 %v32753_v43 }
 0x220   : > { %27508 = vmatpush3.msra.mxu1 %v32753_v43 }
 0x221   : > { %27510 = vmatmul.mubr.f32.vlgmr.msra.gmra.mxu1 %v33046_v11 }
 0x222   : > { %27523 = vmatprep.mubr.f32.mxu1 %v32986_v61 }
 0x268   : > { %v27266_v1 = vpop.f32.mrf.mxu0 }
 0x26a   : > { %v33248_v49 = vpop.f32.mrf.mxu0 }
 0x26b   : > { %38739 = vst [vmem:[#allocation25_spill] sm:$0xff] %v33248_v49 }
 0x26d   : > { %v27280_v37 = vpop.f32.mrf.mxu0 }
 0x26f   : > { %v33252_v23 = vpop.f32.mrf.mxu0 }
 0x270   : > { %v27273_v33 = vpop.f32.mrf.mxu1  ;;  %38741 = vst [vmem:[#allocation30_spill] sm:$0xff] %v33252_v23 }
 0x271   : > { %v1171_v56 = vadd.f32 %v27273_v33, %v27266_v1 }
 0x272   : > { %v33250_v41 = vpop.f32.mrf.mxu1 }
 0x273   : > { %38740 = vst [vmem:[#allocation28_spill] sm:$0xff] %v33250_v41  ;;  %v1254_v2 = vadd.f32 %v27280_v37, %v1171_v56  ;;  %v27294_v46 = vpop.f32.mrf.mxu0 }
 0x275   : > { %v33258_v53 = vpop.f32.mrf.mxu0 }
 0x276   : > { %v27287_v22 = vpop.f32.mrf.mxu1  ;;  %38744 = vst [vmem:[#allocation39_spill] sm:$0xff] %v33258_v53 }
 0x277   : > { %v1337_v52 = vadd.f32 %v27287_v22, %v1254_v2 }
 0x278   : > { %v33254_v28 = vpop.f32.mrf.mxu1 }
 0x279   : > { %38742 = vst [vmem:[#allocation33_spill] sm:$0xff] %v33254_v28  ;;  %v1420_v3 = vadd.f32 %v27294_v46, %v1337_v52 }
 0x27b   : > { %v27301_v11 = vpop.f32.mrf.mxu1 }
 0x27c   : > { %v33256_v60 = vadd.f32 %v27301_v11, %v1420_v3 }
 0x27d   : > { %v33260_v47 = vpop.f32.mrf.mxu1 }
 0x27e   : > { %38743 = vst [vmem:[#allocation36_spill] sm:$0xff] %v33256_v60  ;;  %38745 = vst [vmem:[#allocation42_spill] sm:$0xff] %v33260_v47 }
 0x295   : > { %v27336_v49 = vpop.f32.mrf.mxu0 }
 0x297   : > { %v1589_v33 = vpop.f32.mrf.mxu0 }
 0x29d   : > { %v27371_v1 = vpop.f32.mrf.mxu1 }
 0x29e   : > { %v1757_v56 = vadd.f32 %v27371_v1, %v27336_v49 }
 0x29f   : > { %v1750_v36 = vpop.f32.mrf.mxu1 }
 0x2a0   : > { %v1751_v2 = vadd.f32 %v1750_v36, %v1589_v33 }
 0x2b6   : > { %v27406_v41 = vpop.f32.mrf.mxu0 }
 0x2b7   : > { %v1868_v22 = vadd.f32 %v27406_v41, %v1757_v56 }
 0x2b8   : > { %v1860_v23 = vpop.f32.mrf.mxu0 }
 0x2b9   : > { %v1861_v52 = vadd.f32 %v1860_v23, %v1751_v2 }
 0x2bf   : > { %v27441_v37 = vpop.f32.mrf.mxu1 }
 0x2c0   : > { %v1965_v46 = vadd.f32 %v27441_v37, %v1868_v22 }
 0x2c1   : > { %v1956_v28 = vpop.f32.mrf.mxu1 }
 0x2c2   : > { %v1957_v11 = vadd.f32 %v1956_v28, %v1861_v52  ;;  %v38746_v52 = vld [vmem:[#allocation54_spill] sm:$0xff] }
 0x2d8   : > { %v27476_v29 = vpop.f32.mrf.mxu0 }
 0x2d9   : > { %v2090_v60 = vadd.f32 %v27476_v29, %v1965_v46  ;;  %v38747_v46 = vld [vmem:[#allocation14_spill] sm:$0xff] }
 0x2da   : > { %v2083_v3 = vpop.f32.mrf.mxu0 }
 0x2db   : > { %v2084_v27 = vadd.f32 %v2083_v3, %v1957_v11  ;;  %v38748_v3 = vld [vmem:[#allocation55_spill] sm:$0xff] }
 0x2dc   : > { %v38749_v11 = vld [vmem:[#allocation15_spill] sm:$0xff] }
 0x2e1   : > { %v27511_v53 = vpop.f32.mrf.mxu1 }
 0x2e2   : > { %v2183_v19 = vadd.f32 %v27511_v53, %v2090_v60 }
 0x2e3   : > { %v2176_v47 = vpop.f32.mrf.mxu1 }
 0x2e4   : > { %v2215_v17 = vand.u32 4294901760, %v2183_v19  ;;  %v2177_v34 = vadd.f32 %v2176_v47, %v2084_v27 }
 0x2e6   : > { %v2303_v16 = vsub.f32 %v2183_v19, %v2215_v17  ;;  %v2218_v0 = vand.u32 4294901760, %v2177_v34  ;;  %27512 = vmatprep.subr.mxu0 %v2215_v17 }
 0x2e7   : > { %27513 = vmatpush3.msra.mxu0 %v2215_v17 }
 0x2e8   : > { %v2310_v49 = vsub.f32 %v2177_v34, %v2218_v0  ;;  %27514 = vmatprep.subr.mxu0 %v2218_v0  ;;  %v2304_v36 = vand.u32 4294901760, %v2303_v16 }
 0x2e9   : > { %27515 = vmatpush3.msra.mxu0 %v2218_v0 }
 0x2ea   : > { %27526 = vmatprep.subr.mxu0 %v2303_v16  ;;  %27517 = vmatmul.mubr.f32.vlgmr.msra.gmra.mxu0 %v33010_v5  ;;  %v2305_v23 = vsub.f32 %v2303_v16, %v2304_v36  ;;  %v2311_v28 = vand.u32 4294901760, %v2310_v49 }
 0x2eb   : > { %27527 = vmatpush3.msra.mxu0 %v2303_v16  ;;  %27530 = vmatprep.mubr.f32.mxu0 %v32989_v7  ;;  %v32175_v16 = vld [vmem:[%s32549_s23] sm:$0xff] }
 0x2ec   : > { %27528 = vmatprep.subr.mxu0 %v2310_v49  ;;  %v2306_v29 = vand.u32 4294901760, %v2305_v23  ;;  %v2312_v53 = vsub.f32 %v2310_v49, %v2311_v28  ;;  %v2688_v27 = vmul.f32 %v32175_v16, %v32175_v16  ;;  %v38752_v23 = vld [vmem:[#allocation22_spill] sm:$0xff] }
 0x2ed   : > { %27529 = vmatpush3.msra.mxu0 %v2310_v49  ;;  %v38750_v49 = vld [vmem:[#allocation16_spill] sm:$0xff]  ;;  %v38757_v16 = vld [vmem:[#allocation38_spill] sm:$0xff] }
 0x2ee   : > { %27519 = vmatprep.subr.mxu1 %v2306_v29  ;;  %27540 = vmatprep.subr.mxu0 %v2304_v36  ;;  %v2313_v19 = vand.u32 4294901760, %v2312_v53  ;;  %v33292_v60 = vand.u32 4294901760, %v2688_v27  ;;  %v38755_v53 = vld [vmem:[#allocation32_spill] sm:$0xff] }
 0x2ef   : > { %27520 = vmatpush3.msra.mxu1 %v2306_v29  ;;  %27531 = vmatmul.mubr.f32.vlgmr.msra.gmra.mxu0 %v33003_v59  ;;  %v38754_v29 = vld [vmem:[#allocation29_spill] sm:$0xff] }
 0x2f0   : > { %27541 = vmatpush3.msra.mxu0 %v2304_v36  ;;  %27521 = vmatprep.subr.mxu1 %v2313_v19  ;;  %v33305_v34 = vsub.f32 %v2688_v27, %v33292_v60  ;;  %v38751_v36 = vld [vmem:[#allocation21_spill] sm:$0xff] }
 0x2f1   : > { %27542 = vmatprep.subr.mxu0 %v2311_v28  ;;  %27522 = vmatpush3.msra.mxu1 %v2313_v19  ;;  %v38756_v19 = vld [vmem:[#allocation35_spill] sm:$0xff]  ;;  %v38758_v27 = vld [vmem:[#allocation41_spill] sm:$0xff] }
 0x2f2   : > { %27543 = vmatpush3.msra.mxu0 %v2311_v28  ;;  %27524 = vmatmul.mubr.f32.vlgmr.msra.gmra.mxu1 %v33000_v32  ;;  %v2773_v33 = vand.u32 4294901760, %v33305_v34  ;;  %v38753_v28 = vld [vmem:[#allocation24_spill] sm:$0xff] }
 0x2f3   : > { %27533 = vmatprep.subr.mxu1 %v2215_v17  ;;  %27544 = vmatprep.mubr.f32.mxu0 %v32986_v61 }
 0x2f4   : > { %27554 = vmatprep.subr.mxu0 %v32578_v12  ;;  %27534 = vmatpush3.msra.mxu1 %v2215_v17  ;;  %v2774_v37 = vsub.f32 %v33305_v34, %v2773_v33 }
 0x2f5   : > { %27545 = vmatmul.mubr.f32.vlgmr.msra.gmra.mxu0 %v33000_v32  ;;  %27535 = vmatprep.subr.mxu1 %v2218_v0 }
 0x2f6   : > { %27555 = vmatpush3.msra.mxu0 %v32578_v12  ;;  %27536 = vmatpush3.msra.mxu1 %v2218_v0  ;;  %v2775_v2 = vand.u32 4294901760, %v2774_v37  ;;  %v38761_v37 = vld [vmem:[#allocation50_spill] sm:$0xff] }
 0x2f7   : > { %27556 = vmatprep.subr.mxu0 %v32572_v8  ;;  %27537 = vmatprep.mubr.f32.mxu1 %v32993_v54 }
 0x2f8   : > { %27557 = vmatpush3.msra.mxu0 %v32572_v8  ;;  %27538 = vmatmul.mubr.f32.vlgmr.msra.gmra.mxu1 %v33006_v26 }
 0x2f9   : > { %27547 = vmatprep.subr.mxu1 %v2215_v17  ;;  %27558 = vmatprep.subr.mxu0 %v32574_v9 }
 0x2fa   : > { %27548 = vmatpush3.msra.mxu1 %v2215_v17  ;;  %27559 = vmatpush3.msra.mxu0 %v32574_v9  ;;  %v32176_v17 = vld [vmem:[%s32549_s23 + $0x8] sm:$0xff] }
 0x2fb   : > { %27549 = vmatprep.subr.mxu1 %v2218_v0  ;;  %27560 = vmatprep.subr.mxu0 %v32576_v10  ;;  %v2689_v47 = vmul.f32 %v32176_v17, %v32176_v17  ;;  %v38759_v17 = vld [vmem:[#allocation44_spill] sm:$0xff] }
 0x2fc   : > { %27550 = vmatpush3.msra.mxu1 %v2218_v0  ;;  %27551 = vmatprep.mubr.f32.mxu1 %v32986_v61 }
 0x2fd   : > { %27561 = vmatpush3.msra.mxu0 %v32576_v10  ;;  %27552 = vmatmul.mubr.f32.vlgmr.msra.gmra.mxu1 %v33000_v32  ;;  %v33296_v0 = vand.u32 4294901760, %v2689_v47 }
 0x2fe   : > { %27562 = vmatprep.subr.mxu0 %v32570_v6  ;;  %27589 = vmatprep.subr.mxu1 %v32642_v38 }
 0x2ff   : > { %27563 = vmatpush3.msra.mxu0 %v32570_v6  ;;  %27590 = vmatpush3.msra.mxu1 %v32642_v38  ;;  %v33310_v41 = vsub.f32 %v2689_v47, %v33296_v0  ;;  %v38760_v47 = vld [vmem:[#allocation47_spill] sm:$0xff] }
 0x300   : > { %27564 = vmatprep.subr.mxu0 %v32580_v13  ;;  %27591 = vmatprep.subr.mxu1 %v38709_v40 }
 0x301   : > { %27565 = vmatpush3.msra.mxu0 %v32580_v13  ;;  %27592 = vmatpush3.msra.mxu1 %v38709_v40  ;;  %v38042_v1 = vand.u32 4294901760, %v33310_v41 }
 0x302   : > { %27566 = vmatprep.subr.mxu0 %v32582_v14  ;;  %27593 = vmatprep.subr.mxu1 %v38710_v57 }
 0x303   : > { %27567 = vmatpush3.msra.mxu0 %v32582_v14  ;;  %27594 = vmatpush3.msra.mxu1 %v38710_v57  ;;  %v2784_v56 = vsub.f32 %v33310_v41, %v38042_v1  ;;  %v38765_v1 = vld [vmem:[#allocation20_spill] sm:$0xff] }
 0x304   : > { %27568 = vmatprep.subr.mxu0 %v32600_v21  ;;  %27595 = vmatprep.subr.mxu1 %v38711_v24 }
 0x305   : > { %27569 = vmatpush3.msra.mxu0 %v32600_v21  ;;  %27596 = vmatpush3.msra.mxu1 %v38711_v24  ;;  %v2785_v22 = vand.u32 4294901760, %v2784_v56  ;;  %v38762_v56 = vld [vmem:[#allocation19_spill] sm:$0xff] }
 0x306   : > { %27570 = vmatprep.subr.mxu0 %v32625_v30  ;;  %27597 = vmatprep.subr.mxu1 %v38712_v58 }
 0x307   : > { %27571 = vmatpush3.msra.mxu0 %v32625_v30  ;;  %27598 = vmatpush3.msra.mxu1 %v38712_v58 }
 0x308   : > { %27572 = vmatprep.subr.mxu0 %v32635_v35  ;;  %27599 = vmatprep.subr.mxu1 %v38713_v50 }
 0x309   : > { %27573 = vmatpush3.msra.mxu0 %v32635_v35  ;;  %27600 = vmatpush3.msra.mxu1 %v38713_v50 }
 0x30a   : > { %27574 = vmatprep.subr.mxu0 %v32655_v44  ;;  %27601 = vmatprep.subr.mxu1 %v38714_v62 }
 0x30b   : > { %27575 = vmatpush3.msra.mxu0 %v32655_v44  ;;  %27602 = vmatpush3.msra.mxu1 %v38714_v62 }
 0x30c   : > { %27576 = vmatprep.subr.mxu0 %v32666_v48  ;;  %27603 = vmatprep.subr.mxu1 %v38715_v42 }
 0x30d   : > { %27577 = vmatpush3.msra.mxu0 %v32666_v48  ;;  %27604 = vmatpush3.msra.mxu1 %v38715_v42 }
 0x30e   : > { %27578 = vmatprep.subr.mxu0 %v32684_v55  ;;  %27605 = vmatprep.subr.mxu1 %v38716_v20 }
 0x30f   : > { %27579 = vmatpush3.msra.mxu0 %v32684_v55  ;;  %27606 = vmatpush3.msra.mxu1 %v38716_v20 }
 0x310   : > { %27580 = vmatprep.subr.mxu0 %v32718_v4  ;;  %27607 = vmatprep.subr.mxu1 %v38717_v25 }
 0x311   : > { %27581 = vmatpush3.msra.mxu0 %v32718_v4  ;;  %27608 = vmatpush3.msra.mxu1 %v38717_v25 }
 0x312   : > { %27582 = vmatprep.subr.mxu0 %v32737_v31  ;;  %27609 = vmatprep.subr.mxu1 %v32792_v63 }
 0x313   : > { %27583 = vmatpush3.msra.mxu0 %v32737_v31  ;;  %27610 = vmatpush3.msra.mxu1 %v32792_v63 }
 0x314   : > { %27584 = vmatprep.subr.mxu0 %v32753_v43  ;;  %27611 = vmatprep.subr.mxu1 %v32809_v51 }
 0x315   : > { %27585 = vmatpush3.msra.mxu0 %v32753_v43  ;;  %27612 = vmatpush3.msra.mxu1 %v32809_v51 }
 0x316   : > { %27586 = vmatprep.mubr.f32.mxu0 %v2775_v2  ;;  %27613 = vmatprep.subr.mxu1 %v32820_v45  ;;  %v38763_v2 = vld [vmem:[#allocation17_spill] sm:$0xff] }
 0x317   : > { %27624 = vmatprep.subr.mxu0 %v32595_v18  ;;  %27587 = vmatmul.mubr.f32.vlgmr.msra.gmra.mxu0 %v2785_v22  ;;  %v38764_v22 = vld [vmem:[#allocation18_spill] sm:$0xff] }
 0x318   : > { %27614 = vmatpush3.msra.mxu1 %v32820_v45  ;;  %27625 = vmatpush3.msra.mxu0 %v32595_v18 }
 0x319   : > { %27615 = vmatprep.subr.mxu1 %v32830_v39  ;;  %27626 = vmatprep.subr.mxu0 %v32585_v15 }
 0x31a   : > { %27616 = vmatpush3.msra.mxu1 %v32830_v39  ;;  %27627 = vmatpush3.msra.mxu0 %v32585_v15 }
 0x31b   : > { %27617 = vmatprep.subr.mxu1 %v38746_v52  ;;  %27628 = vmatprep.subr.mxu0 %v38747_v46 }
 0x31c   : > { %27618 = vmatpush3.msra.mxu1 %v38746_v52  ;;  %27629 = vmatpush3.msra.mxu0 %v38747_v46 }
 0x31d   : > { %27619 = vmatprep.subr.mxu1 %v38748_v3  ;;  %27630 = vmatprep.subr.mxu0 %v38749_v11 }
 0x31e   : > { %27620 = vmatpush3.msra.mxu1 %v38748_v3  ;;  %27621 = vmatprep.mubr.f32.mxu1 %v33292_v60 }
 0x31f   : > { %27631 = vmatpush3.msra.mxu0 %v38749_v11  ;;  %27622 = vmatmul.mubr.f32.vlgmr.msra.gmra.mxu1 %v33296_v0 }
 0x320   : > { %27632 = vmatprep.subr.mxu0 %v38750_v49  ;;  %27659 = vmatprep.subr.mxu1 %v32578_v12 }
 0x321   : > { %27633 = vmatpush3.msra.mxu0 %v38750_v49  ;;  %27660 = vmatpush3.msra.mxu1 %v32578_v12 }
 0x322   : > { %27634 = vmatprep.subr.mxu0 %v38751_v36  ;;  %27661 = vmatprep.subr.mxu1 %v32572_v8 }
 0x323   : > { %27635 = vmatpush3.msra.mxu0 %v38751_v36  ;;  %27662 = vmatpush3.msra.mxu1 %v32572_v8 }
 0x324   : > { %27636 = vmatprep.subr.mxu0 %v38752_v23  ;;  %27663 = vmatprep.subr.mxu1 %v32574_v9 }
 0x325   : > { %27637 = vmatpush3.msra.mxu0 %v38752_v23  ;;  %27664 = vmatpush3.msra.mxu1 %v32574_v9 }
 0x326   : > { %27638 = vmatprep.subr.mxu0 %v38753_v28  ;;  %27665 = vmatprep.subr.mxu1 %v32576_v10 }
 0x327   : > { %27639 = vmatpush3.msra.mxu0 %v38753_v28  ;;  %27666 = vmatpush3.msra.mxu1 %v32576_v10 }
 0x328   : > { %27640 = vmatprep.subr.mxu0 %v38754_v29  ;;  %27667 = vmatprep.subr.mxu1 %v32570_v6 }
 0x329   : > { %27641 = vmatpush3.msra.mxu0 %v38754_v29  ;;  %27668 = vmatpush3.msra.mxu1 %v32570_v6 }
 0x32a   : > { %27642 = vmatprep.subr.mxu0 %v38755_v53  ;;  %27669 = vmatprep.subr.mxu1 %v32580_v13 }
 0x32b   : > { %27643 = vmatpush3.msra.mxu0 %v38755_v53  ;;  %27670 = vmatpush3.msra.mxu1 %v32580_v13  ;;  %v38784_v53 = vld [vmem:[#allocation36_spill] sm:$0xff] }
 0x32c   : > { %27644 = vmatprep.subr.mxu0 %v38756_v19  ;;  %27671 = vmatprep.subr.mxu1 %v32582_v14  ;;  %v33508_v29 = vmul.f32 %v38784_v53, %v38784_v53 }
 0x32d   : > { %27645 = vmatpush3.msra.mxu0 %v38756_v19  ;;  %27672 = vmatpush3.msra.mxu1 %v32582_v14 }
 0x32e   : > { %27646 = vmatprep.subr.mxu0 %v38757_v16  ;;  %27673 = vmatprep.subr.mxu1 %v32600_v21  ;;  %38785 = vst [vmem:[#allocation36_spill] sm:$0xff] %v33508_v29 }
 0x32f   : > { %27647 = vmatpush3.msra.mxu0 %v38757_v16  ;;  %27674 = vmatpush3.msra.mxu1 %v32600_v21 }
 0x330   : > { %27648 = vmatprep.subr.mxu0 %v38758_v27  ;;  %27675 = vmatprep.subr.mxu1 %v32625_v30 }
 0x331   : > { %27649 = vmatpush3.msra.mxu0 %v38758_v27  ;;  %27676 = vmatpush3.msra.mxu1 %v32625_v30 }
 0x332   : > { %27650 = vmatprep.subr.mxu0 %v38759_v17  ;;  %27677 = vmatprep.subr.mxu1 %v32635_v35 }
 0x333   : > { %27651 = vmatpush3.msra.mxu0 %v38759_v17  ;;  %27678 = vmatpush3.msra.mxu1 %v32635_v35 }
 0x334   : > { %27652 = vmatprep.subr.mxu0 %v38760_v47  ;;  %27679 = vmatprep.subr.mxu1 %v32655_v44 }
 0x335   : > { %27653 = vmatpush3.msra.mxu0 %v38760_v47  ;;  %27680 = vmatpush3.msra.mxu1 %v32655_v44 }
 0x336   : > { %27654 = vmatprep.subr.mxu0 %v38761_v37  ;;  %27681 = vmatprep.subr.mxu1 %v32666_v48 }
 0x337   : > { %27655 = vmatpush3.msra.mxu0 %v38761_v37  ;;  %27656 = vmatprep.mubr.f32.mxu0 %v33305_v34  ;;  %v38769_v34 = vld [vmem:[#allocation27_spill] sm:$0xff] }
 0x338   : > { %27682 = vmatpush3.msra.mxu1 %v32666_v48  ;;  %27657 = vmatmul.mubr.f32.vlgmr.msra.gmra.mxu0 %v33310_v41 }
 0x339   : > { %27683 = vmatprep.subr.mxu1 %v32684_v55  ;;  %27694 = vmatprep.subr.mxu0 %v38762_v56 }
 0x33a   : > { %27684 = vmatpush3.msra.mxu1 %v32684_v55  ;;  %27695 = vmatpush3.msra.mxu0 %v38762_v56  ;;  %v38767_v56 = vld [vmem:[#allocation23_spill] sm:$0xff] }
 0x33b   : > { %27685 = vmatprep.subr.mxu1 %v32718_v4  ;;  %27696 = vmatprep.subr.mxu0 %v38763_v2 }
 0x33c   : > { %27686 = vmatpush3.msra.mxu1 %v32718_v4  ;;  %27697 = vmatpush3.msra.mxu0 %v38763_v2  ;;  %v38766_v2 = vand.u32 4294901760, %v33310_v41  ;;  %v38770_v41 = vld [vmem:[#allocation31_spill] sm:$0xff] }
 0x33d   : > { %27687 = vmatprep.subr.mxu1 %v32737_v31  ;;  %27698 = vmatprep.subr.mxu0 %v38764_v22 }
 0x33e   : > { %27688 = vmatpush3.msra.mxu1 %v32737_v31  ;;  %27699 = vmatpush3.msra.mxu0 %v38764_v22  ;;  %v38768_v22 = vld [vmem:[#allocation26_spill] sm:$0xff] }
 0x33f   : > { %27689 = vmatprep.subr.mxu1 %v32753_v43  ;;  %27700 = vmatprep.subr.mxu0 %v38765_v1 }
 0x340   : > { %27690 = vmatpush3.msra.mxu1 %v32753_v43  ;;  %27691 = vmatprep.mubr.f32.mxu1 %v2773_v33  ;;  %v38771_v33 = vld [vmem:[#allocation34_spill] sm:$0xff] }
 0x341   : > { %27701 = vmatpush3.msra.mxu0 %v38765_v1  ;;  %27692 = vmatmul.mubr.f32.vlgmr.msra.gmra.mxu1 %v38766_v2  ;;  %v38772_v2 = vld [vmem:[#allocation37_spill] sm:$0xff] }
 0x342   : > { %27702 = vmatprep.subr.mxu0 %v38767_v56  ;;  %27729 = vmatprep.subr.mxu1 %v32578_v12 }
 0x343   : > { %27703 = vmatpush3.msra.mxu0 %v38767_v56  ;;  %27730 = vmatpush3.msra.mxu1 %v32578_v12 }
 0x344   : > { %27704 = vmatprep.subr.mxu0 %v38768_v22  ;;  %27731 = vmatprep.subr.mxu1 %v32572_v8 }
 0x345   : > { %27705 = vmatpush3.msra.mxu0 %v38768_v22  ;;  %27732 = vmatpush3.msra.mxu1 %v32572_v8 }
 0x346   : > { %27706 = vmatprep.subr.mxu0 %v38769_v34  ;;  %27733 = vmatprep.subr.mxu1 %v32574_v9 }
 0x347   : > { %27707 = vmatpush3.msra.mxu0 %v38769_v34  ;;  %27734 = vmatpush3.msra.mxu1 %v32574_v9  ;;  %v38773_v34 = vld [vmem:[#allocation40_spill] sm:$0xff] }
 0x348   : > { %27708 = vmatprep.subr.mxu0 %v38770_v41  ;;  %27735 = vmatprep.subr.mxu1 %v32576_v10 }
 0x349   : > { %27709 = vmatpush3.msra.mxu0 %v38770_v41  ;;  %27736 = vmatpush3.msra.mxu1 %v32576_v10  ;;  %v38774_v41 = vld [vmem:[#allocation43_spill] sm:$0xff] }
 0x34a   : > { %27710 = vmatprep.subr.mxu0 %v38771_v33  ;;  %27737 = vmatprep.subr.mxu1 %v32570_v6 }
 0x34b   : > { %27711 = vmatpush3.msra.mxu0 %v38771_v33  ;;  %27738 = vmatpush3.msra.mxu1 %v32570_v6  ;;  %v38775_v33 = vld [vmem:[#allocation46_spill] sm:$0xff] }
 0x34c   : > { %27712 = vmatprep.subr.mxu0 %v38772_v2  ;;  %27739 = vmatprep.subr.mxu1 %v32580_v13 }
 0x34d   : > { %27713 = vmatpush3.msra.mxu0 %v38772_v2  ;;  %27740 = vmatpush3.msra.mxu1 %v32580_v13  ;;  %v38776_v2 = vld [vmem:[#allocation49_spill] sm:$0xff] }
 0x34e   : > { %27714 = vmatprep.subr.mxu0 %v38773_v34  ;;  %27741 = vmatprep.subr.mxu1 %v32582_v14 }
 0x34f   : > { %27715 = vmatpush3.msra.mxu0 %v38773_v34  ;;  %27742 = vmatpush3.msra.mxu1 %v32582_v14  ;;  %v38777_v34 = vld [vmem:[#allocation51_spill] sm:$0xff] }
 0x350   : > { %27716 = vmatprep.subr.mxu0 %v38774_v41  ;;  %27743 = vmatprep.subr.mxu1 %v32600_v21 }
 0x351   : > { %27717 = vmatpush3.msra.mxu0 %v38774_v41  ;;  %27744 = vmatpush3.msra.mxu1 %v32600_v21  ;;  %v38778_v41 = vld [vmem:[#allocation52_spill] sm:$0xff] }
 0x352   : > { %27718 = vmatprep.subr.mxu0 %v38775_v33  ;;  %27745 = vmatprep.subr.mxu1 %v32625_v30 }
 0x353   : > { %27719 = vmatpush3.msra.mxu0 %v38775_v33  ;;  %27746 = vmatpush3.msra.mxu1 %v32625_v30 }
 0x354   : > { %27720 = vmatprep.subr.mxu0 %v38776_v2  ;;  %27747 = vmatprep.subr.mxu1 %v32635_v35 }
 0x355   : > { %27721 = vmatpush3.msra.mxu0 %v38776_v2  ;;  %27748 = vmatpush3.msra.mxu1 %v32635_v35 }
 0x356   : > { %27722 = vmatprep.subr.mxu0 %v38777_v34  ;;  %27749 = vmatprep.subr.mxu1 %v32655_v44 }
 0x357   : > { %27723 = vmatpush3.msra.mxu0 %v38777_v34  ;;  %27750 = vmatpush3.msra.mxu1 %v32655_v44  ;;  %v38779_v34 = vld [vmem:[#allocation56_spill] sm:$0xff] }
 0x358   : > { %27724 = vmatprep.subr.mxu0 %v38778_v41  ;;  %27751 = vmatprep.subr.mxu1 %v32666_v48 }
 0x359   : > { %27725 = vmatpush3.msra.mxu0 %v38778_v41  ;;  %27726 = vmatprep.mubr.f32.mxu0 %v33292_v60 }
 0x35a   : > { %27752 = vmatpush3.msra.mxu1 %v32666_v48  ;;  %27727 = vmatmul.mubr.f32.vlgmr.msra.gmra.mxu0 %v33296_v0 }
 0x35b   : > { %27753 = vmatprep.subr.mxu1 %v32684_v55  ;;  %27761 = vmatprep.mubr.f32.mxu1 %v33292_v60 }
 0x35c   : > { %27754 = vmatpush3.msra.mxu1 %v32684_v55  ;;  %27768 = vmatprep.mubr.f32.mxu0 %v38779_v34 }
 0x35d   : > { %27755 = vmatprep.subr.mxu1 %v32718_v4 }
 0x35e   : > { %27756 = vmatpush3.msra.mxu1 %v32718_v4 }
 0x35f   : > { %27757 = vmatprep.subr.mxu1 %v32737_v31 }
 0x360   : > { %27758 = vmatpush3.msra.mxu1 %v32737_v31 }
 0x361   : > { %27759 = vmatprep.subr.mxu1 %v32753_v43 }
 0x362   : > { %27760 = vmatpush3.msra.mxu1 %v32753_v43 }
 0x363   : > { %27762 = vmatmul.mubr.f32.vlgmr.msra.gmra.mxu1 %v33296_v0 }
 0x364   : > { %27775 = vmatprep.mubr.f32.mxu1 %v32986_v61 }
 0x3aa   : > { %v27518_v60 = vpop.f32.mrf.mxu0 }
 0x3ac   : > { %v33498_v41 = vpop.f32.mrf.mxu0 }
 0x3ad   : > { %38780 = vst [vmem:[#allocation45_spill] sm:$0xff] %v33498_v41 }
 0x3af   : > { %v27532_v34 = vpop.f32.mrf.mxu0 }
 0x3b1   : > { %v33502_v56 = vpop.f32.mrf.mxu0 }
 0x3b2   : > { %v27525_v2 = vpop.f32.mrf.mxu1  ;;  %38782 = vst [vmem:[#allocation57_spill] sm:$0xff] %v33502_v56 }
 0x3b3   : > { %v2357_v33 = vadd.f32 %v27525_v2, %v27518_v60 }
 0x3b4   : > { %v33500_v22 = vpop.f32.mrf.mxu1 }
 0x3b5   : > { %38781 = vst [vmem:[#allocation48_spill] sm:$0xff] %v33500_v22  ;;  %v2440_v1 = vadd.f32 %v27532_v34, %v2357_v33  ;;  %v27546_v47 = vpop.f32.mrf.mxu0 }
 0x3b7   : > { %v33519_v33 = vpop.f32.mrf.mxu0 }
 0x3b8   : > { %v27539_v37 = vpop.f32.mrf.mxu1  ;;  %38789 = vst [vmem:[#allocation62_spill] sm:$0xff] %v33519_v33 }
 0x3b9   : > { %v2523_v17 = vadd.f32 %v27539_v37, %v2440_v1 }
 0x3ba   : > { %v33504_v27 = vpop.f32.mrf.mxu1 }
 0x3bb   : > { %38783 = vst [vmem:[#allocation58_spill] sm:$0xff] %v33504_v27  ;;  %v2606_v16 = vadd.f32 %v27546_v47, %v2523_v17 }
 0x3bd   : > { %v27553_v0 = vpop.f32.mrf.mxu1 }
 0x3be   : > { %v2685_v19 = vadd.f32 %v27553_v0, %v2606_v16 }
 0x3bf   : > { %v33521_v37 = vpop.f32.mrf.mxu1 }
 0x3c0   : > { %v33510_v41 = vmul.f32 %v2685_v19, %v2685_v19  ;;  %v33513_v2 = vmul.f32 %v2685_v19, %v38784_v53  ;;  %38790 = vst [vmem:[#allocation63_spill] sm:$0xff] %v33521_v37 }
 0x3c2   : > { %38786 = vst [vmem:[#allocation59_spill] sm:$0xff] %v33510_v41  ;;  %38787 = vst [vmem:[#allocation60_spill] sm:$0xff] %v33513_v2  ;;  %v33517_v34 = vadd.f32 %v33510_v41, %v33508_v29 }
 0x3c4   : > { %38788 = vst [vmem:[#allocation61_spill] sm:$0xff] %v33517_v34 }
 0x3d7   : > { %v27588_v1 = vpop.f32.mrf.mxu0 }
 0x3d9   : > { %v2777_v17 = vpop.f32.mrf.mxu0 }
 0x3df   : > { %v27623_v16 = vpop.f32.mrf.mxu1 }
 0x3e0   : > { %v2945_v56 = vadd.f32 %v27623_v16, %v27588_v1 }
 0x3e1   : > { %v2938_v60 = vpop.f32.mrf.mxu1 }
 0x3e2   : > { %v2939_v28 = vadd.f32 %v2938_v60, %v2777_v17  ;;  %v38791_v60 = vld [vmem:[#allocation54_spill] sm:$0xff] }
 0x3f8   : > { %v27658_v47 = vpop.f32.mrf.mxu0 }
 0x3f9   : > { %v3056_v53 = vadd.f32 %v27658_v47, %v2945_v56 }
 0x3fa   : > { %v3048_v0 = vpop.f32.mrf.mxu0 }
 0x3fb   : > { %v3049_v2 = vadd.f32 %v3048_v0, %v2939_v28  ;;  %v38792_v0 = vld [vmem:[#allocation14_spill] sm:$0xff] }
 0x401   : > { %v27693_v27 = vpop.f32.mrf.mxu1 }
 0x402   : > { %v3153_v23 = vadd.f32 %v27693_v27, %v3056_v53  ;;  %v38793_v53 = vld [vmem:[#allocation55_spill] sm:$0xff] }
 0x403   : > { %v3144_v19 = vpop.f32.mrf.mxu1 }
 0x404   : > { %v3145_v34 = vadd.f32 %v3144_v19, %v3049_v2  ;;  %v38794_v19 = vld [vmem:[#allocation15_spill] sm:$0xff] }
 0x41a   : > { %v27728_v22 = vpop.f32.mrf.mxu0 }
 0x41b   : > { %v3278_v29 = vadd.f32 %v27728_v22, %v3153_v23 }
 0x41c   : > { %v3271_v41 = vpop.f32.mrf.mxu0 }
 0x41d   : > { %v3272_v36 = vadd.f32 %v3271_v41, %v3145_v34 }
 0x423   : > { %v27763_v33 = vpop.f32.mrf.mxu1 }
 0x424   : > { %v3371_v49 = vadd.f32 %v27763_v33, %v3278_v29 }
 0x425   : > { %v3364_v37 = vpop.f32.mrf.mxu1 }
 0x426   : > { %v3403_v11 = vand.u32 4294901760, %v3371_v49  ;;  %v3365_v3 = vadd.f32 %v3364_v37, %v3272_v36 }
 0x428   : > { %v3491_v46 = vsub.f32 %v3371_v49, %v3403_v11  ;;  %v3406_v52 = vand.u32 4294901760, %v3365_v3  ;;  %27764 = vmatprep.subr.mxu0 %v3403_v11 }
 0x429   : > { %27765 = vmatpush3.msra.mxu0 %v3403_v11 }
 0x42a   : > { %v3498_v1 = vsub.f32 %v3365_v3, %v3406_v52  ;;  %27766 = vmatprep.subr.mxu0 %v3406_v52  ;;  %v3492_v17 = vand.u32 4294901760, %v3491_v46 }
 0x42b   : > { %27767 = vmatpush3.msra.mxu0 %v3406_v52 }
 0x42c   : > { %27778 = vmatprep.subr.mxu0 %v3491_v46  ;;  %27769 = vmatmul.mubr.f32.vlgmr.msra.gmra.mxu0 %v33010_v5  ;;  %v3493_v28 = vsub.f32 %v3491_v46, %v3492_v17  ;;  %v3499_v27 = vand.u32 4294901760, %v3498_v1 }
 0x42d   : > { %27779 = vmatpush3.msra.mxu0 %v3491_v46  ;;  %27782 = vmatprep.mubr.f32.mxu0 %v32989_v7  ;;  %v33544_v46 = vld [vmem:[%s32556_s28] sm:$0xff] }
 0x42e   : > { %27780 = vmatprep.subr.mxu0 %v3498_v1  ;;  %v3494_v23 = vand.u32 4294901760, %v3493_v28  ;;  %v3500_v29 = vsub.f32 %v3498_v1, %v3499_v27  ;;  %v3876_v3 = vmul.f32 %v33544_v46, %v33544_v46  ;;  %v38797_v28 = vld [vmem:[#allocation22_spill] sm:$0xff] }
 0x42f   : > { %27781 = vmatpush3.msra.mxu0 %v3498_v1  ;;  %v38795_v1 = vld [vmem:[#allocation16_spill] sm:$0xff] }
 0x430   : > { %27771 = vmatprep.subr.mxu1 %v3494_v23  ;;  %27792 = vmatprep.subr.mxu0 %v3492_v17  ;;  %v3501_v49 = vand.u32 4294901760, %v3500_v29  ;;  %v33561_v36 = vand.u32 4294901760, %v3876_v3  ;;  %v38800_v29 = vld [vmem:[#allocation32_spill] sm:$0xff] }
 0x431   : > { %27772 = vmatpush3.msra.mxu1 %v3494_v23  ;;  %27783 = vmatmul.mubr.f32.vlgmr.msra.gmra.mxu0 %v33003_v59  ;;  %v38799_v23 = vld [vmem:[#allocation29_spill] sm:$0xff] }
 0x432   : > { %27793 = vmatpush3.msra.mxu0 %v3492_v17  ;;  %27773 = vmatprep.subr.mxu1 %v3501_v49  ;;  %v33574_v22 = vsub.f32 %v3876_v3, %v33561_v36  ;;  %v38796_v17 = vld [vmem:[#allocation21_spill] sm:$0xff]  ;;  %v38802_v3 = vld [vmem:[#allocation38_spill] sm:$0xff] }
 0x433   : > { %27794 = vmatprep.subr.mxu0 %v3499_v27  ;;  %27774 = vmatpush3.msra.mxu1 %v3501_v49  ;;  %v38801_v49 = vld [vmem:[#allocation35_spill] sm:$0xff] }
 0x434   : > { %27795 = vmatpush3.msra.mxu0 %v3499_v27  ;;  %27776 = vmatmul.mubr.f32.vlgmr.msra.gmra.mxu1 %v33000_v32  ;;  %v38080_v2 = vand.u32 4294901760, %v33574_v22  ;;  %v38798_v27 = vld [vmem:[#allocation24_spill] sm:$0xff] }
 0x435   : > { %27785 = vmatprep.subr.mxu1 %v3403_v11  ;;  %27796 = vmatprep.mubr.f32.mxu0 %v32986_v61 }
 0x436   : > { %27806 = vmatprep.subr.mxu0 %v32578_v12  ;;  %27786 = vmatpush3.msra.mxu1 %v3403_v11  ;;  %v3962_v33 = vsub.f32 %v33574_v22, %v38080_v2  ;;  %v38809_v2 = vld [vmem:[#allocation18_spill] sm:$0xff] }
 0x437   : > { %27797 = vmatmul.mubr.f32.vlgmr.msra.gmra.mxu0 %v33000_v32  ;;  %27787 = vmatprep.subr.mxu1 %v3406_v52 }
 0x438   : > { %27807 = vmatpush3.msra.mxu0 %v32578_v12  ;;  %27788 = vmatpush3.msra.mxu1 %v3406_v52  ;;  %v3963_v16 = vand.u32 4294901760, %v3962_v33  ;;  %v38804_v33 = vld [vmem:[#allocation44_spill] sm:$0xff] }
 0x439   : > { %27808 = vmatprep.subr.mxu0 %v32572_v8  ;;  %27789 = vmatprep.mubr.f32.mxu1 %v32993_v54 }
 0x43a   : > { %27809 = vmatpush3.msra.mxu0 %v32572_v8  ;;  %27790 = vmatmul.mubr.f32.vlgmr.msra.gmra.mxu1 %v33006_v26 }
 0x43b   : > { %27799 = vmatprep.subr.mxu1 %v3403_v11  ;;  %27810 = vmatprep.subr.mxu0 %v32574_v9 }
 0x43c   : > { %27800 = vmatpush3.msra.mxu1 %v3403_v11  ;;  %27811 = vmatpush3.msra.mxu0 %v32574_v9 }
 0x43d   : > { %27801 = vmatprep.subr.mxu1 %v3406_v52  ;;  %27812 = vmatprep.subr.mxu0 %v32576_v10 }
 0x43e   : > { %27802 = vmatpush3.msra.mxu1 %v3406_v52  ;;  %27803 = vmatprep.mubr.f32.mxu1 %v32986_v61  ;;  %v33551_v52 = vld [vmem:[%s32556_s28 + $0x8] sm:$0xff] }
 0x43f   : > { %27813 = vmatpush3.msra.mxu0 %v32576_v10  ;;  %27804 = vmatmul.mubr.f32.vlgmr.msra.gmra.mxu1 %v33000_v32  ;;  %v3877_v11 = vmul.f32 %v33551_v52, %v33551_v52 }
 0x440   : > { %27814 = vmatprep.subr.mxu0 %v32570_v6  ;;  %27841 = vmatprep.subr.mxu1 %v32642_v38 }
 0x441   : > { %27815 = vmatpush3.msra.mxu0 %v32570_v6  ;;  %27842 = vmatpush3.msra.mxu1 %v32642_v38  ;;  %v33565_v56 = vand.u32 4294901760, %v3877_v11 }
 0x442   : > { %27816 = vmatprep.subr.mxu0 %v32580_v13  ;;  %27843 = vmatprep.subr.mxu1 %v38709_v40 }
 0x443   : > { %27817 = vmatpush3.msra.mxu0 %v32580_v13  ;;  %27844 = vmatpush3.msra.mxu1 %v38709_v40  ;;  %v33579_v41 = vsub.f32 %v3877_v11, %v33565_v56  ;;  %v38803_v11 = vld [vmem:[#allocation41_spill] sm:$0xff] }
 0x444   : > { %27818 = vmatprep.subr.mxu0 %v32582_v14  ;;  %27845 = vmatprep.subr.mxu1 %v38710_v57 }
 0x445   : > { %27819 = vmatpush3.msra.mxu0 %v32582_v14  ;;  %27846 = vmatpush3.msra.mxu1 %v38710_v57  ;;  %v38079_v34 = vand.u32 4294901760, %v33579_v41 }
 0x446   : > { %27820 = vmatprep.subr.mxu0 %v32600_v21  ;;  %27847 = vmatprep.subr.mxu1 %v38711_v24 }
 0x447   : > { %27821 = vmatpush3.msra.mxu0 %v32600_v21  ;;  %27848 = vmatpush3.msra.mxu1 %v38711_v24  ;;  %v3972_v37 = vsub.f32 %v33579_v41, %v38079_v34  ;;  %v38808_v34 = vld [vmem:[#allocation17_spill] sm:$0xff] }
 0x448   : > { %27822 = vmatprep.subr.mxu0 %v32625_v30  ;;  %27849 = vmatprep.subr.mxu1 %v38712_v58 }
 0x449   : > { %27823 = vmatpush3.msra.mxu0 %v32625_v30  ;;  %27850 = vmatpush3.msra.mxu1 %v38712_v58  ;;  %v3973_v47 = vand.u32 4294901760, %v3972_v37  ;;  %v38805_v37 = vld [vmem:[#allocation47_spill] sm:$0xff] }
 0x44a   : > { %27824 = vmatprep.subr.mxu0 %v32635_v35  ;;  %27851 = vmatprep.subr.mxu1 %v38713_v50 }
 0x44b   : > { %27825 = vmatpush3.msra.mxu0 %v32635_v35  ;;  %27852 = vmatpush3.msra.mxu1 %v38713_v50 }
 0x44c   : > { %27826 = vmatprep.subr.mxu0 %v32655_v44  ;;  %27853 = vmatprep.subr.mxu1 %v38714_v62 }
 0x44d   : > { %27827 = vmatpush3.msra.mxu0 %v32655_v44  ;;  %27854 = vmatpush3.msra.mxu1 %v38714_v62 }
 0x44e   : > { %27828 = vmatprep.subr.mxu0 %v32666_v48  ;;  %27855 = vmatprep.subr.mxu1 %v38715_v42 }
 0x44f   : > { %27829 = vmatpush3.msra.mxu0 %v32666_v48  ;;  %27856 = vmatpush3.msra.mxu1 %v38715_v42 }
 0x450   : > { %27830 = vmatprep.subr.mxu0 %v32684_v55  ;;  %27857 = vmatprep.subr.mxu1 %v38716_v20 }
 0x451   : > { %27831 = vmatpush3.msra.mxu0 %v32684_v55  ;;  %27858 = vmatpush3.msra.mxu1 %v38716_v20 }
 0x452   : > { %27832 = vmatprep.subr.mxu0 %v32718_v4  ;;  %27859 = vmatprep.subr.mxu1 %v38717_v25 }
 0x453   : > { %27833 = vmatpush3.msra.mxu0 %v32718_v4  ;;  %27860 = vmatpush3.msra.mxu1 %v38717_v25 }
 0x454   : > { %27834 = vmatprep.subr.mxu0 %v32737_v31  ;;  %27861 = vmatprep.subr.mxu1 %v32792_v63 }
 0x455   : > { %27835 = vmatpush3.msra.mxu0 %v32737_v31  ;;  %27862 = vmatpush3.msra.mxu1 %v32792_v63 }
 0x456   : > { %27836 = vmatprep.subr.mxu0 %v32753_v43  ;;  %27863 = vmatprep.subr.mxu1 %v32809_v51 }
 0x457   : > { %27837 = vmatpush3.msra.mxu0 %v32753_v43  ;;  %27864 = vmatpush3.msra.mxu1 %v32809_v51 }
 0x458   : > { %27838 = vmatprep.mubr.f32.mxu0 %v3963_v16  ;;  %27865 = vmatprep.subr.mxu1 %v32820_v45  ;;  %v38806_v16 = vld [vmem:[#allocation50_spill] sm:$0xff] }
 0x459   : > { %27876 = vmatprep.subr.mxu0 %v32595_v18  ;;  %27839 = vmatmul.mubr.f32.vlgmr.msra.gmra.mxu0 %v3973_v47  ;;  %v38807_v47 = vld [vmem:[#allocation19_spill] sm:$0xff] }
 0x45a   : > { %27866 = vmatpush3.msra.mxu1 %v32820_v45  ;;  %27877 = vmatpush3.msra.mxu0 %v32595_v18 }
 0x45b   : > { %27867 = vmatprep.subr.mxu1 %v32830_v39  ;;  %27878 = vmatprep.subr.mxu0 %v32585_v15 }
 0x45c   : > { %27868 = vmatpush3.msra.mxu1 %v32830_v39  ;;  %27879 = vmatpush3.msra.mxu0 %v32585_v15 }
 0x45d   : > { %27869 = vmatprep.subr.mxu1 %v38791_v60  ;;  %27880 = vmatprep.subr.mxu0 %v38792_v0 }
 0x45e   : > { %27870 = vmatpush3.msra.mxu1 %v38791_v60  ;;  %27881 = vmatpush3.msra.mxu0 %v38792_v0 }
 0x45f   : > { %27871 = vmatprep.subr.mxu1 %v38793_v53  ;;  %27882 = vmatprep.subr.mxu0 %v38794_v19 }
 0x460   : > { %27872 = vmatpush3.msra.mxu1 %v38793_v53  ;;  %27873 = vmatprep.mubr.f32.mxu1 %v33561_v36 }
 0x461   : > { %27883 = vmatpush3.msra.mxu0 %v38794_v19  ;;  %27874 = vmatmul.mubr.f32.vlgmr.msra.gmra.mxu1 %v33565_v56 }
 0x462   : > { %27884 = vmatprep.subr.mxu0 %v38795_v1  ;;  %27911 = vmatprep.subr.mxu1 %v32578_v12 }
 0x463   : > { %27885 = vmatpush3.msra.mxu0 %v38795_v1  ;;  %27912 = vmatpush3.msra.mxu1 %v32578_v12 }
 0x464   : > { %27886 = vmatprep.subr.mxu0 %v38796_v17  ;;  %27913 = vmatprep.subr.mxu1 %v32572_v8 }
 0x465   : > { %27887 = vmatpush3.msra.mxu0 %v38796_v17  ;;  %27914 = vmatpush3.msra.mxu1 %v32572_v8 }
 0x466   : > { %27888 = vmatprep.subr.mxu0 %v38797_v28  ;;  %27915 = vmatprep.subr.mxu1 %v32574_v9 }
 0x467   : > { %27889 = vmatpush3.msra.mxu0 %v38797_v28  ;;  %27916 = vmatpush3.msra.mxu1 %v32574_v9 }
 0x468   : > { %27890 = vmatprep.subr.mxu0 %v38798_v27  ;;  %27917 = vmatprep.subr.mxu1 %v32576_v10 }
 0x469   : > { %27891 = vmatpush3.msra.mxu0 %v38798_v27  ;;  %27918 = vmatpush3.msra.mxu1 %v32576_v10 }
 0x46a   : > { %27892 = vmatprep.subr.mxu0 %v38799_v23  ;;  %27919 = vmatprep.subr.mxu1 %v32570_v6 }
 0x46b   : > { %27893 = vmatpush3.msra.mxu0 %v38799_v23  ;;  %27920 = vmatpush3.msra.mxu1 %v32570_v6 }
 0x46c   : > { %27894 = vmatprep.subr.mxu0 %v38800_v29  ;;  %27921 = vmatprep.subr.mxu1 %v32580_v13 }
 0x46d   : > { %27895 = vmatpush3.msra.mxu0 %v38800_v29  ;;  %27922 = vmatpush3.msra.mxu1 %v32580_v13 }
 0x46e   : > { %27896 = vmatprep.subr.mxu0 %v38801_v49  ;;  %27923 = vmatprep.subr.mxu1 %v32582_v14 }
 0x46f   : > { %27897 = vmatpush3.msra.mxu0 %v38801_v49  ;;  %27924 = vmatpush3.msra.mxu1 %v32582_v14 }
 0x470   : > { %27898 = vmatprep.subr.mxu0 %v38802_v3  ;;  %27925 = vmatprep.subr.mxu1 %v32600_v21 }
 0x471   : > { %27899 = vmatpush3.msra.mxu0 %v38802_v3  ;;  %27926 = vmatpush3.msra.mxu1 %v32600_v21 }
 0x472   : > { %27900 = vmatprep.subr.mxu0 %v38803_v11  ;;  %27927 = vmatprep.subr.mxu1 %v32625_v30 }
 0x473   : > { %27901 = vmatpush3.msra.mxu0 %v38803_v11  ;;  %27928 = vmatpush3.msra.mxu1 %v32625_v30 }
 0x474   : > { %27902 = vmatprep.subr.mxu0 %v38804_v33  ;;  %27929 = vmatprep.subr.mxu1 %v32635_v35 }
 0x475   : > { %27903 = vmatpush3.msra.mxu0 %v38804_v33  ;;  %27930 = vmatpush3.msra.mxu1 %v32635_v35 }
 0x476   : > { %27904 = vmatprep.subr.mxu0 %v38805_v37  ;;  %27931 = vmatprep.subr.mxu1 %v32655_v44 }
 0x477   : > { %27905 = vmatpush3.msra.mxu0 %v38805_v37  ;;  %27932 = vmatpush3.msra.mxu1 %v32655_v44  ;;  %v38813_v37 = vld [vmem:[#allocation23_spill] sm:$0xff] }
 0x478   : > { %27906 = vmatprep.subr.mxu0 %v38806_v16  ;;  %27933 = vmatprep.subr.mxu1 %v32666_v48 }
 0x479   : > { %27907 = vmatpush3.msra.mxu0 %v38806_v16  ;;  %27908 = vmatprep.mubr.f32.mxu0 %v33574_v22  ;;  %v38810_v16 = vld [vmem:[#allocation20_spill] sm:$0xff] }
 0x47a   : > { %27934 = vmatpush3.msra.mxu1 %v32666_v48  ;;  %27909 = vmatmul.mubr.f32.vlgmr.msra.gmra.mxu0 %v33579_v41 }
 0x47b   : > { %27935 = vmatprep.subr.mxu1 %v32684_v55  ;;  %27946 = vmatprep.subr.mxu0 %v38807_v47 }
 0x47c   : > { %27936 = vmatpush3.msra.mxu1 %v32684_v55  ;;  %27947 = vmatpush3.msra.mxu0 %v38807_v47  ;;  %v38811_v47 = vand.u32 4294901760, %v33574_v22  ;;  %v38815_v22 = vld [vmem:[#allocation27_spill] sm:$0xff] }
 0x47d   : > { %27937 = vmatprep.subr.mxu1 %v32718_v4  ;;  %27948 = vmatprep.subr.mxu0 %v38808_v34 }
 0x47e   : > { %27938 = vmatpush3.msra.mxu1 %v32718_v4  ;;  %27949 = vmatpush3.msra.mxu0 %v38808_v34  ;;  %v38812_v34 = vand.u32 4294901760, %v33579_v41  ;;  %v38816_v41 = vld [vmem:[#allocation31_spill] sm:$0xff] }
 0x47f   : > { %27939 = vmatprep.subr.mxu1 %v32737_v31  ;;  %27950 = vmatprep.subr.mxu0 %v38809_v2 }
 0x480   : > { %27940 = vmatpush3.msra.mxu1 %v32737_v31  ;;  %27951 = vmatpush3.msra.mxu0 %v38809_v2  ;;  %v38814_v2 = vld [vmem:[#allocation26_spill] sm:$0xff] }
 0x481   : > { %27941 = vmatprep.subr.mxu1 %v32753_v43  ;;  %27952 = vmatprep.subr.mxu0 %v38810_v16 }
 0x482   : > { %27942 = vmatpush3.msra.mxu1 %v32753_v43  ;;  %27943 = vmatprep.mubr.f32.mxu1 %v38811_v47  ;;  %v38818_v47 = vld [vmem:[#allocation37_spill] sm:$0xff] }
 0x483   : > { %27953 = vmatpush3.msra.mxu0 %v38810_v16  ;;  %27944 = vmatmul.mubr.f32.vlgmr.msra.gmra.mxu1 %v38812_v34  ;;  %v38817_v34 = vld [vmem:[#allocation34_spill] sm:$0xff] }
 0x484   : > { %27954 = vmatprep.subr.mxu0 %v38813_v37  ;;  %27981 = vmatprep.subr.mxu1 %v32578_v12 }
 0x485   : > { %27955 = vmatpush3.msra.mxu0 %v38813_v37  ;;  %27982 = vmatpush3.msra.mxu1 %v32578_v12 }
 0x486   : > { %27956 = vmatprep.subr.mxu0 %v38814_v2  ;;  %27983 = vmatprep.subr.mxu1 %v32572_v8 }
 0x487   : > { %27957 = vmatpush3.msra.mxu0 %v38814_v2  ;;  %27984 = vmatpush3.msra.mxu1 %v32572_v8 }
 0x488   : > { %27958 = vmatprep.subr.mxu0 %v38815_v22  ;;  %27985 = vmatprep.subr.mxu1 %v32574_v9 }
 0x489   : > { %27959 = vmatpush3.msra.mxu0 %v38815_v22  ;;  %27986 = vmatpush3.msra.mxu1 %v32574_v9  ;;  %v38819_v22 = vld [vmem:[#allocation40_spill] sm:$0xff] }
 0x48a   : > { %27960 = vmatprep.subr.mxu0 %v38816_v41  ;;  %27987 = vmatprep.subr.mxu1 %v32576_v10 }
 0x48b   : > { %27961 = vmatpush3.msra.mxu0 %v38816_v41  ;;  %27988 = vmatpush3.msra.mxu1 %v32576_v10  ;;  %v38820_v41 = vld [vmem:[#allocation43_spill] sm:$0xff] }
 0x48c   : > { %27962 = vmatprep.subr.mxu0 %v38817_v34  ;;  %27989 = vmatprep.subr.mxu1 %v32570_v6 }
 0x48d   : > { %27963 = vmatpush3.msra.mxu0 %v38817_v34  ;;  %27990 = vmatpush3.msra.mxu1 %v32570_v6  ;;  %v38821_v34 = vld [vmem:[#allocation46_spill] sm:$0xff] }
 0x48e   : > { %27964 = vmatprep.subr.mxu0 %v38818_v47  ;;  %27991 = vmatprep.subr.mxu1 %v32580_v13 }
 0x48f   : > { %27965 = vmatpush3.msra.mxu0 %v38818_v47  ;;  %27992 = vmatpush3.msra.mxu1 %v32580_v13  ;;  %v38822_v47 = vld [vmem:[#allocation49_spill] sm:$0xff] }
 0x490   : > { %27966 = vmatprep.subr.mxu0 %v38819_v22  ;;  %27993 = vmatprep.subr.mxu1 %v32582_v14 }
 0x491   : > { %27967 = vmatpush3.msra.mxu0 %v38819_v22  ;;  %27994 = vmatpush3.msra.mxu1 %v32582_v14  ;;  %v38823_v22 = vld [vmem:[#allocation51_spill] sm:$0xff] }
 0x492   : > { %27968 = vmatprep.subr.mxu0 %v38820_v41  ;;  %27995 = vmatprep.subr.mxu1 %v32600_v21 }
 0x493   : > { %27969 = vmatpush3.msra.mxu0 %v38820_v41  ;;  %27996 = vmatpush3.msra.mxu1 %v32600_v21  ;;  %v38824_v41 = vld [vmem:[#allocation52_spill] sm:$0xff] }
 0x494   : > { %27970 = vmatprep.subr.mxu0 %v38821_v34  ;;  %27997 = vmatprep.subr.mxu1 %v32625_v30 }
 0x495   : > { %27971 = vmatpush3.msra.mxu0 %v38821_v34  ;;  %27998 = vmatpush3.msra.mxu1 %v32625_v30 }
 0x496   : > { %27972 = vmatprep.subr.mxu0 %v38822_v47  ;;  %27999 = vmatprep.subr.mxu1 %v32635_v35 }
 0x497   : > { %27973 = vmatpush3.msra.mxu0 %v38822_v47  ;;  %28000 = vmatpush3.msra.mxu1 %v32635_v35 }
 0x498   : > { %27974 = vmatprep.subr.mxu0 %v38823_v22  ;;  %28001 = vmatprep.subr.mxu1 %v32655_v44 }
 0x499   : > { %27975 = vmatpush3.msra.mxu0 %v38823_v22  ;;  %28002 = vmatpush3.msra.mxu1 %v32655_v44  ;;  %v38825_v22 = vld [vmem:[#allocation56_spill] sm:$0xff] }
 0x49a   : > { %27976 = vmatprep.subr.mxu0 %v38824_v41  ;;  %28003 = vmatprep.subr.mxu1 %v32666_v48 }
 0x49b   : > { %27977 = vmatpush3.msra.mxu0 %v38824_v41  ;;  %27978 = vmatprep.mubr.f32.mxu0 %v33561_v36 }
 0x49c   : > { %28004 = vmatpush3.msra.mxu1 %v32666_v48  ;;  %27979 = vmatmul.mubr.f32.vlgmr.msra.gmra.mxu0 %v33565_v56 }
 0x49d   : > { %28005 = vmatprep.subr.mxu1 %v32684_v55  ;;  %28013 = vmatprep.mubr.f32.mxu1 %v33561_v36 }
 0x49e   : > { %28006 = vmatpush3.msra.mxu1 %v32684_v55  ;;  %28020 = vmatprep.mubr.f32.mxu0 %v38825_v22 }
 0x49f   : > { %28007 = vmatprep.subr.mxu1 %v32718_v4 }
 0x4a0   : > { %28008 = vmatpush3.msra.mxu1 %v32718_v4 }
 0x4a1   : > { %28009 = vmatprep.subr.mxu1 %v32737_v31 }
 0x4a2   : > { %28010 = vmatpush3.msra.mxu1 %v32737_v31 }
 0x4a3   : > { %28011 = vmatprep.subr.mxu1 %v32753_v43 }
 0x4a4   : > { %28012 = vmatpush3.msra.mxu1 %v32753_v43 }
 0x4a5   : > { %28014 = vmatmul.mubr.f32.vlgmr.msra.gmra.mxu1 %v33565_v56 }
 0x4a6   : > { %28027 = vmatprep.mubr.f32.mxu1 %v32986_v61 }
 0x4ec   : > { %v27770_v36 = vpop.f32.mrf.mxu0 }
 0x4ee   : > { %v33767_v41 = vpop.f32.mrf.mxu0 }
 0x4ef   : > { %38826 = vst [vmem:[#allocation64_spill] sm:$0xff] %v33767_v41 }
 0x4f1   : > { %v27784_v22 = vpop.f32.mrf.mxu0 }
 0x4f3   : > { %v33771_v37 = vpop.f32.mrf.mxu0 }
 0x4f4   : > { %v27777_v47 = vpop.f32.mrf.mxu1  ;;  %38828 = vst [vmem:[#allocation66_spill] sm:$0xff] %v33771_v37 }
 0x4f5   : > { %v3545_v34 = vadd.f32 %v27777_v47, %v27770_v36 }
 0x4f6   : > { %v33769_v2 = vpop.f32.mrf.mxu1 }
 0x4f7   : > { %38827 = vst [vmem:[#allocation65_spill] sm:$0xff] %v33769_v2  ;;  %v3628_v16 = vadd.f32 %v27784_v22, %v3545_v34  ;;  %v27798_v11 = vpop.f32.mrf.mxu0 }
 0x4f9   : > { %v33779_v28 = vpop.f32.mrf.mxu0 }
 0x4fa   : > { %v27791_v33 = vpop.f32.mrf.mxu1  ;;  %38832 = vst [vmem:[#allocation69_spill] sm:$0xff] %v33779_v28 }
 0x4fb   : > { %v3711_v3 = vadd.f32 %v27791_v33, %v3628_v16 }
 0x4fc   : > { %v33773_v49 = vpop.f32.mrf.mxu1 }
 0x4fd   : > { %38829 = vst [vmem:[#allocation67_spill] sm:$0xff] %v33773_v49  ;;  %v3794_v29 = vadd.f32 %v27798_v11, %v3711_v3 }
 0x4ff   : > { %v27805_v56 = vpop.f32.mrf.mxu1 }
 0x500   : > { %v33775_v23 = vadd.f32 %v27805_v56, %v3794_v29 }
 0x501   : > { %v33781_v36 = vpop.f32.mrf.mxu1 }
 0x502   : > { %38830 = vst [vmem:[#allocation68_spill] sm:$0xff] %v33775_v23  ;;  %38833 = vst [vmem:[#allocation70_spill] sm:$0xff] %v33781_v36 }
 0x519   : > { %v27840_v47 = vpop.f32.mrf.mxu0 }
 0x51b   : > { %v3965_v2 = vpop.f32.mrf.mxu0 }
 0x521   : > { %v27875_v37 = vpop.f32.mrf.mxu1 }
 0x522   : > { %v4133_v16 = vadd.f32 %v27875_v37, %v27840_v47 }
 0x523   : > { %v4126_v34 = vpop.f32.mrf.mxu1 }
 0x524   : > { %v4127_v3 = vadd.f32 %v4126_v34, %v3965_v2 }
 0x53a   : > { %v27910_v22 = vpop.f32.mrf.mxu0 }
 0x53b   : > { %v4244_v11 = vadd.f32 %v27910_v22, %v4133_v16  ;;  %v38835_v16 = vld [vmem:[#allocation13_spill] sm:$0xff] }
 0x53c   : > { %v4236_v17 = vpop.f32.mrf.mxu0 }
 0x53d   : > { %v4237_v56 = vadd.f32 %v4236_v17, %v4127_v3  ;;  %v38836_v3 = vld [vmem:[#allocation54_spill] sm:$0xff] }
 0x543   : > { %v27945_v33 = vpop.f32.mrf.mxu1 }
 0x544   : > { %v4341_v1 = vadd.f32 %v27945_v33, %v4244_v11  ;;  %v38834_v33 = vld [vmem:[#allocation53_spill] sm:$0xff]  ;;  %v38837_v11 = vld [vmem:[#allocation14_spill] sm:$0xff] }
 0x545   : > { %v4332_v29 = vpop.f32.mrf.mxu1 }
 0x546   : > { %v4333_v41 = vadd.f32 %v4332_v29, %v4237_v56  ;;  %v38838_v29 = vld [vmem:[#allocation55_spill] sm:$0xff] }
 0x547   : > { %v38839_v56 = vld [vmem:[#allocation15_spill] sm:$0xff] }
 0x55c   : > { %v27980_v49 = vpop.f32.mrf.mxu0 }
 0x55d   : > { %v4466_v27 = vadd.f32 %v27980_v49, %v4341_v1 }
 0x55e   : > { %v4459_v19 = vpop.f32.mrf.mxu0 }
 0x55f   : > { %v4460_v23 = vadd.f32 %v4459_v19, %v4333_v41 }
 0x565   : > { %v28015_v28 = vpop.f32.mrf.mxu1 }
 0x566   : > { %v4559_v53 = vadd.f32 %v28015_v28, %v4466_v27 }
 0x567   : > { %v4552_v36 = vpop.f32.mrf.mxu1 }
 0x568   : > { %v4591_v0 = vand.u32 4294901760, %v4559_v53  ;;  %v4553_v60 = vadd.f32 %v4552_v36, %v4460_v23 }
 0x56a   : > { %v4679_v15 = vsub.f32 %v4559_v53, %v4591_v0  ;;  %v4594_v39 = vand.u32 4294901760, %v4553_v60  ;;  %28016 = vmatprep.subr.mxu0 %v4591_v0 }
 0x56b   : > { %28017 = vmatpush3.msra.mxu0 %v4591_v0 }
 0x56c   : > { %v4686_v37 = vsub.f32 %v4553_v60, %v4594_v39  ;;  %28018 = vmatprep.subr.mxu0 %v4594_v39  ;;  %v4680_v2 = vand.u32 4294901760, %v4679_v15 }
 0x56d   : > { %28019 = vmatpush3.msra.mxu0 %v4594_v39 }
 0x56e   : > { %28030 = vmatprep.subr.mxu0 %v4679_v15  ;;  %28021 = vmatmul.mubr.f32.vlgmr.msra.gmra.mxu0 %v33010_v5  ;;  %v4681_v17 = vsub.f32 %v4679_v15, %v4680_v2  ;;  %v4687_v47 = vand.u32 4294901760, %v4686_v37 }
 0x56f   : > { %28031 = vmatpush3.msra.mxu0 %v4679_v15  ;;  %28034 = vmatprep.mubr.f32.mxu0 %v32989_v7  ;;  %v32179_v15 = vld [vmem:[%s32549_s23] sm:$0xff] }
 0x570   : > { %28032 = vmatprep.subr.mxu0 %v4686_v37  ;;  %v4682_v19 = vand.u32 4294901760, %v4681_v17  ;;  %v4688_v1 = vsub.f32 %v4686_v37, %v4687_v47  ;;  %v5064_v60 = vmul.f32 %v32179_v15, %v33544_v46  ;;  %v38842_v17 = vld [vmem:[#allocation22_spill] sm:$0xff] }
 0x571   : > { %28033 = vmatpush3.msra.mxu0 %v4686_v37  ;;  %v38840_v37 = vld [vmem:[#allocation16_spill] sm:$0xff]  ;;  %v38847_v15 = vld [vmem:[#allocation38_spill] sm:$0xff] }
 0x572   : > { %28023 = vmatprep.subr.mxu1 %v4682_v19  ;;  %28044 = vmatprep.subr.mxu0 %v4680_v2  ;;  %v4689_v53 = vand.u32 4294901760, %v4688_v1  ;;  %v33815_v46 = vand.u32 4294901760, %v5064_v60  ;;  %v38845_v1 = vld [vmem:[#allocation32_spill] sm:$0xff] }
 0x573   : > { %28024 = vmatpush3.msra.mxu1 %v4682_v19  ;;  %28035 = vmatmul.mubr.f32.vlgmr.msra.gmra.mxu0 %v33003_v59  ;;  %v38844_v19 = vld [vmem:[#allocation29_spill] sm:$0xff] }
 0x574   : > { %28045 = vmatpush3.msra.mxu0 %v4680_v2  ;;  %28025 = vmatprep.subr.mxu1 %v4689_v53  ;;  %v38841_v2 = vld [vmem:[#allocation21_spill] sm:$0xff] }
 0x575   : > { %28046 = vmatprep.subr.mxu0 %v4687_v47  ;;  %28026 = vmatpush3.msra.mxu1 %v4689_v53  ;;  %v38846_v53 = vld [vmem:[#allocation35_spill] sm:$0xff] }
 0x576   : > { %28047 = vmatpush3.msra.mxu0 %v4687_v47  ;;  %28028 = vmatmul.mubr.f32.vlgmr.msra.gmra.mxu1 %v33000_v32  ;;  %v38843_v47 = vld [vmem:[#allocation24_spill] sm:$0xff] }
 0x577   : > { %28037 = vmatprep.subr.mxu1 %v4591_v0  ;;  %28048 = vmatprep.mubr.f32.mxu0 %v32986_v61 }
 0x578   : > { %28058 = vmatprep.subr.mxu0 %v32578_v12  ;;  %28038 = vmatpush3.msra.mxu1 %v4591_v0 }
 0x579   : > { %28049 = vmatmul.mubr.f32.vlgmr.msra.gmra.mxu0 %v33000_v32  ;;  %28039 = vmatprep.subr.mxu1 %v4594_v39 }
 0x57a   : > { %28059 = vmatpush3.msra.mxu0 %v32578_v12  ;;  %28040 = vmatpush3.msra.mxu1 %v4594_v39 }
 0x57b   : > { %28060 = vmatprep.subr.mxu0 %v32572_v8  ;;  %28041 = vmatprep.mubr.f32.mxu1 %v32993_v54 }
 0x57c   : > { %28061 = vmatpush3.msra.mxu0 %v32572_v8  ;;  %28042 = vmatmul.mubr.f32.vlgmr.msra.gmra.mxu1 %v33006_v26 }
 0x57d   : > { %28051 = vmatprep.subr.mxu1 %v4591_v0  ;;  %28062 = vmatprep.subr.mxu0 %v32574_v9 }
 0x57e   : > { %28052 = vmatpush3.msra.mxu1 %v4591_v0  ;;  %28063 = vmatpush3.msra.mxu0 %v32574_v9  ;;  %v32180_v0 = vld [vmem:[%s32549_s23 + $0x8] sm:$0xff] }
 0x57f   : > { %28053 = vmatprep.subr.mxu1 %v4594_v39  ;;  %28064 = vmatprep.subr.mxu0 %v32576_v10 }
 0x580   : > { %28054 = vmatpush3.msra.mxu1 %v4594_v39  ;;  %28055 = vmatprep.mubr.f32.mxu1 %v32986_v61  ;;  %v5065_v39 = vmul.f32 %v32180_v0, %v33551_v52  ;;  %v33828_v52 = vsub.f32 %v5064_v60, %v33815_v46  ;;  %v38848_v60 = vld [vmem:[#allocation41_spill] sm:$0xff]  ;;  %v38849_v0 = vld [vmem:[#allocation44_spill] sm:$0xff] }
 0x581   : > { %28065 = vmatpush3.msra.mxu0 %v32576_v10  ;;  %28056 = vmatmul.mubr.f32.vlgmr.msra.gmra.mxu1 %v33000_v32 }
 0x582   : > { %28066 = vmatprep.subr.mxu0 %v32570_v6  ;;  %28093 = vmatprep.subr.mxu1 %v32642_v38  ;;  %v33819_v28 = vand.u32 4294901760, %v5065_v39  ;;  %v5149_v23 = vand.u32 4294901760, %v33828_v52 }
 0x583   : > { %28067 = vmatpush3.msra.mxu0 %v32570_v6  ;;  %28094 = vmatpush3.msra.mxu1 %v32642_v38 }
 0x584   : > { %28068 = vmatprep.subr.mxu0 %v32580_v13  ;;  %28095 = vmatprep.subr.mxu1 %v38709_v40  ;;  %v33833_v27 = vsub.f32 %v5065_v39, %v33819_v28  ;;  %v5150_v41 = vsub.f32 %v33828_v52, %v5149_v23  ;;  %v38850_v39 = vld [vmem:[#allocation47_spill] sm:$0xff] }
 0x585   : > { %28069 = vmatpush3.msra.mxu0 %v32580_v13  ;;  %28096 = vmatpush3.msra.mxu1 %v38709_v40 }
 0x586   : > { %28070 = vmatprep.subr.mxu0 %v32582_v14  ;;  %28097 = vmatprep.subr.mxu1 %v38710_v57  ;;  %v38118_v49 = vand.u32 4294901760, %v33833_v27  ;;  %v5151_v22 = vand.u32 4294901760, %v5150_v41  ;;  %v38851_v41 = vld [vmem:[#allocation50_spill] sm:$0xff] }
 0x587   : > { %28071 = vmatpush3.msra.mxu0 %v32582_v14  ;;  %28098 = vmatpush3.msra.mxu1 %v38710_v57 }
 0x588   : > { %28072 = vmatprep.subr.mxu0 %v32600_v21  ;;  %28099 = vmatprep.subr.mxu1 %v38711_v24  ;;  %v5160_v36 = vsub.f32 %v33833_v27, %v38118_v49  ;;  %v38855_v49 = vld [vmem:[#allocation20_spill] sm:$0xff] }
 0x589   : > { %28073 = vmatpush3.msra.mxu0 %v32600_v21  ;;  %28100 = vmatpush3.msra.mxu1 %v38711_v24 }
 0x58a   : > { %28074 = vmatprep.subr.mxu0 %v32625_v30  ;;  %28101 = vmatprep.subr.mxu1 %v38712_v58  ;;  %v5161_v34 = vand.u32 4294901760, %v5160_v36  ;;  %v38852_v36 = vld [vmem:[#allocation19_spill] sm:$0xff] }
 0x58b   : > { %28075 = vmatpush3.msra.mxu0 %v32625_v30  ;;  %28102 = vmatpush3.msra.mxu1 %v38712_v58 }
 0x58c   : > { %28076 = vmatprep.subr.mxu0 %v32635_v35  ;;  %28103 = vmatprep.subr.mxu1 %v38713_v50 }
 0x58d   : > { %28077 = vmatpush3.msra.mxu0 %v32635_v35  ;;  %28104 = vmatpush3.msra.mxu1 %v38713_v50 }
 0x58e   : > { %28078 = vmatprep.subr.mxu0 %v32655_v44  ;;  %28105 = vmatprep.subr.mxu1 %v38714_v62 }
 0x58f   : > { %28079 = vmatpush3.msra.mxu0 %v32655_v44  ;;  %28106 = vmatpush3.msra.mxu1 %v38714_v62 }
 0x590   : > { %28080 = vmatprep.subr.mxu0 %v32666_v48  ;;  %28107 = vmatprep.subr.mxu1 %v38715_v42 }
 0x591   : > { %28081 = vmatpush3.msra.mxu0 %v32666_v48  ;;  %28108 = vmatpush3.msra.mxu1 %v38715_v42 }
 0x592   : > { %28082 = vmatprep.subr.mxu0 %v32684_v55  ;;  %28109 = vmatprep.subr.mxu1 %v38716_v20 }
 0x593   : > { %28083 = vmatpush3.msra.mxu0 %v32684_v55  ;;  %28110 = vmatpush3.msra.mxu1 %v38716_v20 }
 0x594   : > { %28084 = vmatprep.subr.mxu0 %v32718_v4  ;;  %28111 = vmatprep.subr.mxu1 %v38717_v25 }
 0x595   : > { %28085 = vmatpush3.msra.mxu0 %v32718_v4  ;;  %28112 = vmatpush3.msra.mxu1 %v38717_v25 }
 0x596   : > { %28086 = vmatprep.subr.mxu0 %v32737_v31  ;;  %28113 = vmatprep.subr.mxu1 %v32792_v63 }
 0x597   : > { %28087 = vmatpush3.msra.mxu0 %v32737_v31  ;;  %28114 = vmatpush3.msra.mxu1 %v32792_v63 }
 0x598   : > { %28088 = vmatprep.subr.mxu0 %v32753_v43  ;;  %28115 = vmatprep.subr.mxu1 %v32809_v51 }
 0x599   : > { %28089 = vmatpush3.msra.mxu0 %v32753_v43  ;;  %28116 = vmatpush3.msra.mxu1 %v32809_v51 }
 0x59a   : > { %28090 = vmatprep.mubr.f32.mxu0 %v5151_v22  ;;  %28117 = vmatprep.subr.mxu1 %v32820_v45  ;;  %v38853_v22 = vld [vmem:[#allocation17_spill] sm:$0xff] }
 0x59b   : > { %28128 = vmatprep.subr.mxu0 %v32595_v18  ;;  %28091 = vmatmul.mubr.f32.vlgmr.msra.gmra.mxu0 %v5161_v34  ;;  %v38854_v34 = vld [vmem:[#allocation18_spill] sm:$0xff] }
 0x59c   : > { %28118 = vmatpush3.msra.mxu1 %v32820_v45  ;;  %28129 = vmatpush3.msra.mxu0 %v32595_v18 }
 0x59d   : > { %28119 = vmatprep.subr.mxu1 %v38834_v33  ;;  %28130 = vmatprep.subr.mxu0 %v38835_v16 }
 0x59e   : > { %28120 = vmatpush3.msra.mxu1 %v38834_v33  ;;  %28131 = vmatpush3.msra.mxu0 %v38835_v16 }
 0x59f   : > { %28121 = vmatprep.subr.mxu1 %v38836_v3  ;;  %28132 = vmatprep.subr.mxu0 %v38837_v11 }
 0x5a0   : > { %28122 = vmatpush3.msra.mxu1 %v38836_v3  ;;  %28133 = vmatpush3.msra.mxu0 %v38837_v11 }
 0x5a1   : > { %28123 = vmatprep.subr.mxu1 %v38838_v29  ;;  %28134 = vmatprep.subr.mxu0 %v38839_v56 }
 0x5a2   : > { %28124 = vmatpush3.msra.mxu1 %v38838_v29  ;;  %28125 = vmatprep.mubr.f32.mxu1 %v33815_v46 }
 0x5a3   : > { %28135 = vmatpush3.msra.mxu0 %v38839_v56  ;;  %28126 = vmatmul.mubr.f32.vlgmr.msra.gmra.mxu1 %v33819_v28 }
 0x5a4   : > { %28136 = vmatprep.subr.mxu0 %v38840_v37  ;;  %28163 = vmatprep.subr.mxu1 %v32578_v12 }
 0x5a5   : > { %28137 = vmatpush3.msra.mxu0 %v38840_v37  ;;  %28164 = vmatpush3.msra.mxu1 %v32578_v12 }
 0x5a6   : > { %28138 = vmatprep.subr.mxu0 %v38841_v2  ;;  %28165 = vmatprep.subr.mxu1 %v32572_v8 }
 0x5a7   : > { %28139 = vmatpush3.msra.mxu0 %v38841_v2  ;;  %28166 = vmatpush3.msra.mxu1 %v32572_v8 }
 0x5a8   : > { %28140 = vmatprep.subr.mxu0 %v38842_v17  ;;  %28167 = vmatprep.subr.mxu1 %v32574_v9 }
 0x5a9   : > { %28141 = vmatpush3.msra.mxu0 %v38842_v17  ;;  %28168 = vmatpush3.msra.mxu1 %v32574_v9 }
 0x5aa   : > { %28142 = vmatprep.subr.mxu0 %v38843_v47  ;;  %28169 = vmatprep.subr.mxu1 %v32576_v10 }
 0x5ab   : > { %28143 = vmatpush3.msra.mxu0 %v38843_v47  ;;  %28170 = vmatpush3.msra.mxu1 %v32576_v10  ;;  %v38875_v47 = vld [vmem:[#allocation68_spill] sm:$0xff] }
 0x5ac   : > { %28144 = vmatprep.subr.mxu0 %v38844_v19  ;;  %28171 = vmatprep.subr.mxu1 %v32570_v6 }
 0x5ad   : > { %28145 = vmatpush3.msra.mxu0 %v38844_v19  ;;  %28172 = vmatpush3.msra.mxu1 %v32570_v6 }
 0x5ae   : > { %28146 = vmatprep.subr.mxu0 %v38845_v1  ;;  %28173 = vmatprep.subr.mxu1 %v32580_v13 }
 0x5af   : > { %28147 = vmatpush3.msra.mxu0 %v38845_v1  ;;  %28174 = vmatpush3.msra.mxu1 %v32580_v13  ;;  %v38874_v1 = vld [vmem:[#allocation59_spill] sm:$0xff] }
 0x5b0   : > { %28148 = vmatprep.subr.mxu0 %v38846_v53  ;;  %28175 = vmatprep.subr.mxu1 %v32582_v14 }
 0x5b1   : > { %28149 = vmatpush3.msra.mxu0 %v38846_v53  ;;  %28176 = vmatpush3.msra.mxu1 %v32582_v14 }
 0x5b2   : > { %28150 = vmatprep.subr.mxu0 %v38847_v15  ;;  %28177 = vmatprep.subr.mxu1 %v32600_v21 }
 0x5b3   : > { %28151 = vmatpush3.msra.mxu0 %v38847_v15  ;;  %28178 = vmatpush3.msra.mxu1 %v32600_v21 }
 0x5b4   : > { %28152 = vmatprep.subr.mxu0 %v38848_v60  ;;  %28179 = vmatprep.subr.mxu1 %v32625_v30 }
 0x5b5   : > { %28153 = vmatpush3.msra.mxu0 %v38848_v60  ;;  %28180 = vmatpush3.msra.mxu1 %v32625_v30 }
 0x5b6   : > { %28154 = vmatprep.subr.mxu0 %v38849_v0  ;;  %28181 = vmatprep.subr.mxu1 %v32635_v35 }
 0x5b7   : > { %28155 = vmatpush3.msra.mxu0 %v38849_v0  ;;  %28182 = vmatpush3.msra.mxu1 %v32635_v35 }
 0x5b8   : > { %28156 = vmatprep.subr.mxu0 %v38850_v39  ;;  %28183 = vmatprep.subr.mxu1 %v32655_v44 }
 0x5b9   : > { %28157 = vmatpush3.msra.mxu0 %v38850_v39  ;;  %28184 = vmatpush3.msra.mxu1 %v32655_v44 }
 0x5ba   : > { %28158 = vmatprep.subr.mxu0 %v38851_v41  ;;  %28185 = vmatprep.subr.mxu1 %v32666_v48 }
 0x5bb   : > { %28159 = vmatpush3.msra.mxu0 %v38851_v41  ;;  %28160 = vmatprep.mubr.f32.mxu0 %v33828_v52  ;;  %v38859_v52 = vld [vmem:[#allocation27_spill] sm:$0xff] }
 0x5bc   : > { %28186 = vmatpush3.msra.mxu1 %v32666_v48  ;;  %28161 = vmatmul.mubr.f32.vlgmr.msra.gmra.mxu0 %v33833_v27 }
 0x5bd   : > { %28187 = vmatprep.subr.mxu1 %v32684_v55  ;;  %28198 = vmatprep.subr.mxu0 %v38852_v36 }
 0x5be   : > { %28188 = vmatpush3.msra.mxu1 %v32684_v55  ;;  %28199 = vmatpush3.msra.mxu0 %v38852_v36  ;;  %v38857_v36 = vld [vmem:[#allocation23_spill] sm:$0xff] }
 0x5bf   : > { %28189 = vmatprep.subr.mxu1 %v32718_v4  ;;  %28200 = vmatprep.subr.mxu0 %v38853_v22 }
 0x5c0   : > { %28190 = vmatpush3.msra.mxu1 %v32718_v4  ;;  %28201 = vmatpush3.msra.mxu0 %v38853_v22  ;;  %v38856_v22 = vand.u32 4294901760, %v33833_v27  ;;  %v38860_v27 = vld [vmem:[#allocation31_spill] sm:$0xff] }
 0x5c1   : > { %28191 = vmatprep.subr.mxu1 %v32737_v31  ;;  %28202 = vmatprep.subr.mxu0 %v38854_v34 }
 0x5c2   : > { %28192 = vmatpush3.msra.mxu1 %v32737_v31  ;;  %28203 = vmatpush3.msra.mxu0 %v38854_v34  ;;  %v38858_v34 = vld [vmem:[#allocation26_spill] sm:$0xff] }
 0x5c3   : > { %28193 = vmatprep.subr.mxu1 %v32753_v43  ;;  %28204 = vmatprep.subr.mxu0 %v38855_v49 }
 0x5c4   : > { %28194 = vmatpush3.msra.mxu1 %v32753_v43  ;;  %28195 = vmatprep.mubr.f32.mxu1 %v5149_v23  ;;  %v38861_v23 = vld [vmem:[#allocation34_spill] sm:$0xff] }
 0x5c5   : > { %28205 = vmatpush3.msra.mxu0 %v38855_v49  ;;  %28196 = vmatmul.mubr.f32.vlgmr.msra.gmra.mxu1 %v38856_v22  ;;  %v38862_v22 = vld [vmem:[#allocation37_spill] sm:$0xff] }
 0x5c6   : > { %28206 = vmatprep.subr.mxu0 %v38857_v36  ;;  %28233 = vmatprep.subr.mxu1 %v32578_v12 }
 0x5c7   : > { %28207 = vmatpush3.msra.mxu0 %v38857_v36  ;;  %28234 = vmatpush3.msra.mxu1 %v32578_v12 }
 0x5c8   : > { %28208 = vmatprep.subr.mxu0 %v38858_v34  ;;  %28235 = vmatprep.subr.mxu1 %v32572_v8 }
 0x5c9   : > { %28209 = vmatpush3.msra.mxu0 %v38858_v34  ;;  %28236 = vmatpush3.msra.mxu1 %v32572_v8 }
 0x5ca   : > { %28210 = vmatprep.subr.mxu0 %v38859_v52  ;;  %28237 = vmatprep.subr.mxu1 %v32574_v9 }
 0x5cb   : > { %28211 = vmatpush3.msra.mxu0 %v38859_v52  ;;  %28238 = vmatpush3.msra.mxu1 %v32574_v9  ;;  %v38863_v52 = vld [vmem:[#allocation40_spill] sm:$0xff] }
 0x5cc   : > { %28212 = vmatprep.subr.mxu0 %v38860_v27  ;;  %28239 = vmatprep.subr.mxu1 %v32576_v10 }
 0x5cd   : > { %28213 = vmatpush3.msra.mxu0 %v38860_v27  ;;  %28240 = vmatpush3.msra.mxu1 %v32576_v10  ;;  %v38864_v27 = vld [vmem:[#allocation43_spill] sm:$0xff] }
 0x5ce   : > { %28214 = vmatprep.subr.mxu0 %v38861_v23  ;;  %28241 = vmatprep.subr.mxu1 %v32570_v6 }
 0x5cf   : > { %28215 = vmatpush3.msra.mxu0 %v38861_v23  ;;  %28242 = vmatpush3.msra.mxu1 %v32570_v6  ;;  %v38865_v23 = vld [vmem:[#allocation46_spill] sm:$0xff] }
 0x5d0   : > { %28216 = vmatprep.subr.mxu0 %v38862_v22  ;;  %28243 = vmatprep.subr.mxu1 %v32580_v13 }
 0x5d1   : > { %28217 = vmatpush3.msra.mxu0 %v38862_v22  ;;  %28244 = vmatpush3.msra.mxu1 %v32580_v13  ;;  %v38866_v22 = vld [vmem:[#allocation49_spill] sm:$0xff] }
 0x5d2   : > { %28218 = vmatprep.subr.mxu0 %v38863_v52  ;;  %28245 = vmatprep.subr.mxu1 %v32582_v14 }
 0x5d3   : > { %28219 = vmatpush3.msra.mxu0 %v38863_v52  ;;  %28246 = vmatpush3.msra.mxu1 %v32582_v14  ;;  %v38867_v52 = vld [vmem:[#allocation51_spill] sm:$0xff] }
 0x5d4   : > { %28220 = vmatprep.subr.mxu0 %v38864_v27  ;;  %28247 = vmatprep.subr.mxu1 %v32600_v21 }
 0x5d5   : > { %28221 = vmatpush3.msra.mxu0 %v38864_v27  ;;  %28248 = vmatpush3.msra.mxu1 %v32600_v21  ;;  %v38868_v27 = vld [vmem:[#allocation52_spill] sm:$0xff] }
 0x5d6   : > { %28222 = vmatprep.subr.mxu0 %v38865_v23  ;;  %28249 = vmatprep.subr.mxu1 %v32625_v30 }
 0x5d7   : > { %28223 = vmatpush3.msra.mxu0 %v38865_v23  ;;  %28250 = vmatpush3.msra.mxu1 %v32625_v30 }
 0x5d8   : > { %28224 = vmatprep.subr.mxu0 %v38866_v22  ;;  %28251 = vmatprep.subr.mxu1 %v32635_v35 }
 0x5d9   : > { %28225 = vmatpush3.msra.mxu0 %v38866_v22  ;;  %28252 = vmatpush3.msra.mxu1 %v32635_v35 }
 0x5da   : > { %28226 = vmatprep.subr.mxu0 %v38867_v52  ;;  %28253 = vmatprep.subr.mxu1 %v32655_v44 }
 0x5db   : > { %28227 = vmatpush3.msra.mxu0 %v38867_v52  ;;  %28254 = vmatpush3.msra.mxu1 %v32655_v44  ;;  %v38869_v52 = vld [vmem:[#allocation56_spill] sm:$0xff] }
 0x5dc   : > { %28228 = vmatprep.subr.mxu0 %v38868_v27  ;;  %28255 = vmatprep.subr.mxu1 %v32666_v48 }
 0x5dd   : > { %28229 = vmatpush3.msra.mxu0 %v38868_v27  ;;  %28230 = vmatprep.mubr.f32.mxu0 %v33815_v46 }
 0x5de   : > { %28256 = vmatpush3.msra.mxu1 %v32666_v48  ;;  %28231 = vmatmul.mubr.f32.vlgmr.msra.gmra.mxu0 %v33819_v28 }
 0x5df   : > { %28257 = vmatprep.subr.mxu1 %v32684_v55  ;;  %28265 = vmatprep.mubr.f32.mxu1 %v33815_v46 }
 0x5e0   : > { %28258 = vmatpush3.msra.mxu1 %v32684_v55  ;;  %28272 = vmatprep.mubr.f32.mxu0 %v38869_v52 }
 0x5e1   : > { %28259 = vmatprep.subr.mxu1 %v32718_v4 }
 0x5e2   : > { %28260 = vmatpush3.msra.mxu1 %v32718_v4 }
 0x5e3   : > { %28261 = vmatprep.subr.mxu1 %v32737_v31 }
 0x5e4   : > { %28262 = vmatpush3.msra.mxu1 %v32737_v31 }
 0x5e5   : > { %28263 = vmatprep.subr.mxu1 %v32753_v43 }
 0x5e6   : > { %28264 = vmatpush3.msra.mxu1 %v32753_v43 }
 0x5e7   : > { %28266 = vmatmul.mubr.f32.vlgmr.msra.gmra.mxu1 %v33819_v28 }
 0x5e8   : > { %28279 = vmatprep.mubr.f32.mxu1 %v32986_v61 }
 0x62e   : > { %v28022_v46 = vpop.f32.mrf.mxu0 }
 0x630   : > { %v34021_v27 = vpop.f32.mrf.mxu0 }
 0x631   : > { %38870 = vst [vmem:[#allocation71_spill] sm:$0xff] %v34021_v27  ;;  %v38876_v27 = vld [vmem:[#allocation36_spill] sm:$0xff] }
 0x632   : > { %v38877_v17 = vsub.f32 %v38875_v47, %v38876_v27 }
 0x633   : > { %v28036_v52 = vpop.f32.mrf.mxu0 }
 0x635   : > { %v34025_v36 = vpop.f32.mrf.mxu0 }
 0x636   : > { %v28029_v22 = vpop.f32.mrf.mxu1  ;;  %38872 = vst [vmem:[#allocation73_spill] sm:$0xff] %v34025_v36 }
 0x637   : > { %v4733_v23 = vadd.f32 %v28029_v22, %v28022_v46  ;;  %v38878_v22 = vld [vmem:[#allocation61_spill] sm:$0xff] }
 0x638   : > { %v34023_v34 = vpop.f32.mrf.mxu1  ;;  %v6277_v46 = vadd.f32 0.0001, %v38878_v22 }
 0x639   : > { %38871 = vst [vmem:[#allocation72_spill] sm:$0xff] %v34023_v34  ;;  %v4816_v49 = vadd.f32 %v28036_v52, %v4733_v23  ;;  %v28050_v39 = vpop.f32.mrf.mxu0 }
 0x63b   : > { %v34036_v52 = vpop.f32.mrf.mxu0 }
 0x63c   : > { %v28043_v41 = vpop.f32.mrf.mxu1  ;;  %38880 = vst [vmem:[#allocation68_spill] sm:$0xff] %v34036_v52 }
 0x63d   : > { %v4899_v0 = vadd.f32 %v28043_v41, %v4816_v49 }
 0x63e   : > { %v34027_v60 = vpop.f32.mrf.mxu1 }
 0x63f   : > { %38873 = vst [vmem:[#allocation74_spill] sm:$0xff] %v34027_v60  ;;  %v4982_v15 = vadd.f32 %v28050_v39, %v4899_v0 }
 0x641   : > { %v28057_v28 = vpop.f32.mrf.mxu1 }
 0x642   : > { %v5061_v53 = vadd.f32 %v28057_v28, %v4982_v15 }
 0x643   : > { %v34038_v49 = vpop.f32.mrf.mxu1 }
 0x644   : > { %v6261_v19 = vsub.f32 %v5061_v53, %v38874_v1  ;;  %38881 = vst [vmem:[#allocation36_spill] sm:$0xff] %v34038_v49 }
 0x646   : > { %v6279_v2 = vadd.f32 %v6261_v19, %v38877_v17 }
 0x648   : > { %v6281_v34 = vadd.f32 0.0009, %v6279_v2 }
 0x64a   : > { %v34034_v37 = vmul.f32 %v6281_v34, %v6277_v46 }
 0x64c   : > { %38879 = vst [vmem:[#allocation59_spill] sm:$0xff] %v34034_v37 }
 0x65b   : > { %v28092_v23 = vpop.f32.mrf.mxu0 }
 0x65d   : > { %v5153_v41 = vpop.f32.mrf.mxu0 }
 0x663   : > { %v28127_v0 = vpop.f32.mrf.mxu1 }
 0x664   : > { %v5321_v53 = vadd.f32 %v28127_v0, %v28092_v23 }
 0x665   : > { %v5314_v15 = vpop.f32.mrf.mxu1 }
 0x666   : > { %v5315_v47 = vadd.f32 %v5314_v15, %v5153_v41 }
 0x67c   : > { %v28162_v39 = vpop.f32.mrf.mxu0 }
 0x67d   : > { %v5432_v17 = vadd.f32 %v28162_v39, %v5321_v53 }
 0x67e   : > { %v5424_v28 = vpop.f32.mrf.mxu0 }
 0x67f   : > { %v5425_v27 = vadd.f32 %v5424_v28, %v5315_v47 }
 0x685   : > { %v28197_v1 = vpop.f32.mrf.mxu1 }
 0x686   : > { %v5529_v2 = vadd.f32 %v28197_v1, %v5432_v17 }
 0x687   : > { %v5520_v19 = vpop.f32.mrf.mxu1 }
 0x688   : > { %v5521_v22 = vadd.f32 %v5520_v19, %v5425_v27  ;;  %v38882_v19 = vld [vmem:[#allocation54_spill] sm:$0xff] }
 0x689   : > { %v38883_v27 = vld [vmem:[#allocation14_spill] sm:$0xff] }
 0x69e   : > { %v28232_v60 = vpop.f32.mrf.mxu0 }
 0x69f   : > { %v5654_v46 = vadd.f32 %v28232_v60, %v5529_v2  ;;  %v38884_v2 = vld [vmem:[#allocation55_spill] sm:$0xff] }
 0x6a0   : > { %v5647_v34 = vpop.f32.mrf.mxu0 }
 0x6a1   : > { %v5648_v36 = vadd.f32 %v5647_v34, %v5521_v22  ;;  %v38885_v34 = vld [vmem:[#allocation15_spill] sm:$0xff]  ;;  %v38886_v22 = vld [vmem:[#allocation16_spill] sm:$0xff] }
 0x6a7   : > { %v28267_v52 = vpop.f32.mrf.mxu1 }
 0x6a8   : > { %v5747_v37 = vadd.f32 %v28267_v52, %v5654_v46  ;;  %v38887_v46 = vld [vmem:[#allocation21_spill] sm:$0xff] }
 0x6a9   : > { %v5740_v49 = vpop.f32.mrf.mxu1 }
 0x6aa   : > { %v5779_v56 = vand.u32 4294901760, %v5747_v37  ;;  %v5741_v29 = vadd.f32 %v5740_v49, %v5648_v36 }
 0x6ac   : > { %v5867_v11 = vsub.f32 %v5747_v37, %v5779_v56  ;;  %v5782_v3 = vand.u32 4294901760, %v5741_v29  ;;  %28268 = vmatprep.subr.mxu0 %v5779_v56 }
 0x6ad   : > { %28269 = vmatpush3.msra.mxu0 %v5779_v56 }
 0x6ae   : > { %v5874_v23 = vsub.f32 %v5741_v29, %v5782_v3  ;;  %28270 = vmatprep.subr.mxu0 %v5782_v3  ;;  %v5868_v41 = vand.u32 4294901760, %v5867_v11 }
 0x6af   : > { %28271 = vmatpush3.msra.mxu0 %v5782_v3 }
 0x6b0   : > { %28282 = vmatprep.subr.mxu0 %v5867_v11  ;;  %28273 = vmatmul.mubr.f32.vlgmr.msra.gmra.mxu0 %v33010_v5  ;;  %v5869_v0 = vsub.f32 %v5867_v11, %v5868_v41  ;;  %v5875_v39 = vand.u32 4294901760, %v5874_v23 }
 0x6b1   : > { %28283 = vmatpush3.msra.mxu0 %v5867_v11  ;;  %28286 = vmatprep.mubr.f32.mxu0 %v32989_v7  ;;  %v24392_v11 = vld [vmem:[%s32549_s23 + $0x10] sm:$0xff] }
 0x6b2   : > { %28284 = vmatprep.subr.mxu0 %v5874_v23  ;;  %v5870_v60 = vand.u32 4294901760, %v5869_v0  ;;  %v5876_v52 = vsub.f32 %v5874_v23, %v5875_v39  ;;  %v34070_v29 = vand.u32 4294901760, %v24392_v11  ;;  %v38890_v0 = vld [vmem:[#allocation29_spill] sm:$0xff] }
 0x6b3   : > { %28285 = vmatpush3.msra.mxu0 %v5874_v23  ;;  %v38888_v23 = vld [vmem:[#allocation22_spill] sm:$0xff] }
 0x6b4   : > { %28275 = vmatprep.subr.mxu1 %v5870_v60  ;;  %28296 = vmatprep.subr.mxu0 %v5868_v41  ;;  %v5877_v37 = vand.u32 4294901760, %v5876_v52  ;;  %v34083_v36 = vsub.f32 %v24392_v11, %v34070_v29  ;;  %v38893_v52 = vld [vmem:[#allocation38_spill] sm:$0xff]  ;;  %v38895_v11 = vld [vmem:[#allocation44_spill] sm:$0xff] }
 0x6b5   : > { %28276 = vmatpush3.msra.mxu1 %v5870_v60  ;;  %28287 = vmatmul.mubr.f32.vlgmr.msra.gmra.mxu0 %v33003_v59  ;;  %v38892_v60 = vld [vmem:[#allocation35_spill] sm:$0xff] }
 0x6b6   : > { %28297 = vmatpush3.msra.mxu0 %v5868_v41  ;;  %28277 = vmatprep.subr.mxu1 %v5877_v37  ;;  %v6385_v15 = vand.u32 4294901760, %v34083_v36  ;;  %v38889_v41 = vld [vmem:[#allocation24_spill] sm:$0xff] }
 0x6b7   : > { %28298 = vmatprep.subr.mxu0 %v5875_v39  ;;  %28278 = vmatpush3.msra.mxu1 %v5877_v37  ;;  %v38894_v37 = vld [vmem:[#allocation41_spill] sm:$0xff] }
 0x6b8   : > { %28299 = vmatpush3.msra.mxu0 %v5875_v39  ;;  %28280 = vmatmul.mubr.f32.vlgmr.msra.gmra.mxu1 %v33000_v32  ;;  %v6386_v1 = vsub.f32 %v34083_v36, %v6385_v15  ;;  %v38891_v39 = vld [vmem:[#allocation32_spill] sm:$0xff] }
 0x6b9   : > { %28289 = vmatprep.subr.mxu1 %v5779_v56  ;;  %28300 = vmatprep.mubr.f32.mxu0 %v32986_v61 }
 0x6ba   : > { %28310 = vmatprep.subr.mxu0 %v32578_v12  ;;  %28290 = vmatpush3.msra.mxu1 %v5779_v56  ;;  %v6387_v47 = vand.u32 4294901760, %v6386_v1  ;;  %v38897_v1 = vld [vmem:[#allocation50_spill] sm:$0xff] }
 0x6bb   : > { %28301 = vmatmul.mubr.f32.vlgmr.msra.gmra.mxu0 %v33000_v32  ;;  %28291 = vmatprep.subr.mxu1 %v5782_v3 }
 0x6bc   : > { %28311 = vmatpush3.msra.mxu0 %v32578_v12  ;;  %28292 = vmatpush3.msra.mxu1 %v5782_v3 }
 0x6bd   : > { %28312 = vmatprep.subr.mxu0 %v32572_v8  ;;  %28293 = vmatprep.mubr.f32.mxu1 %v32993_v54 }
 0x6be   : > { %28313 = vmatpush3.msra.mxu0 %v32572_v8  ;;  %28294 = vmatmul.mubr.f32.vlgmr.msra.gmra.mxu1 %v33006_v26 }
 0x6bf   : > { %28303 = vmatprep.subr.mxu1 %v5779_v56  ;;  %28314 = vmatprep.subr.mxu0 %v32574_v9 }
 0x6c0   : > { %28304 = vmatpush3.msra.mxu1 %v5779_v56  ;;  %28315 = vmatpush3.msra.mxu0 %v32574_v9 }
 0x6c1   : > { %28305 = vmatprep.subr.mxu1 %v5782_v3  ;;  %28316 = vmatprep.subr.mxu0 %v32576_v10 }
 0x6c2   : > { %28306 = vmatpush3.msra.mxu1 %v5782_v3  ;;  %28307 = vmatprep.mubr.f32.mxu1 %v32986_v61  ;;  %v24393_v3 = vld [vmem:[%s32549_s23 + $0x18] sm:$0xff] }
 0x6c3   : > { %28317 = vmatpush3.msra.mxu0 %v32576_v10  ;;  %28308 = vmatmul.mubr.f32.vlgmr.msra.gmra.mxu1 %v33000_v32  ;;  %v34074_v56 = vand.u32 4294901760, %v24393_v3 }
 0x6c4   : > { %28318 = vmatprep.subr.mxu0 %v32570_v6  ;;  %28345 = vmatprep.subr.mxu1 %v32642_v38 }
 0x6c5   : > { %28319 = vmatpush3.msra.mxu0 %v32570_v6  ;;  %28346 = vmatpush3.msra.mxu1 %v32642_v38  ;;  %v34088_v49 = vsub.f32 %v24393_v3, %v34074_v56  ;;  %v38896_v3 = vld [vmem:[#allocation47_spill] sm:$0xff] }
 0x6c6   : > { %28320 = vmatprep.subr.mxu0 %v32580_v13  ;;  %28347 = vmatprep.subr.mxu1 %v38709_v40 }
 0x6c7   : > { %28321 = vmatpush3.msra.mxu0 %v32580_v13  ;;  %28348 = vmatpush3.msra.mxu1 %v38709_v40  ;;  %v38151_v28 = vand.u32 4294901760, %v34088_v49 }
 0x6c8   : > { %28322 = vmatprep.subr.mxu0 %v32582_v14  ;;  %28349 = vmatprep.subr.mxu1 %v38710_v57 }
 0x6c9   : > { %28323 = vmatpush3.msra.mxu0 %v32582_v14  ;;  %28350 = vmatpush3.msra.mxu1 %v38710_v57  ;;  %v6396_v53 = vsub.f32 %v34088_v49, %v38151_v28  ;;  %v38901_v28 = vld [vmem:[#allocation20_spill] sm:$0xff] }
 0x6ca   : > { %28324 = vmatprep.subr.mxu0 %v32600_v21  ;;  %28351 = vmatprep.subr.mxu1 %v38711_v24 }
 0x6cb   : > { %28325 = vmatpush3.msra.mxu0 %v32600_v21  ;;  %28352 = vmatpush3.msra.mxu1 %v38711_v24  ;;  %v6397_v17 = vand.u32 4294901760, %v6396_v53  ;;  %v38898_v53 = vld [vmem:[#allocation19_spill] sm:$0xff] }
 0x6cc   : > { %28326 = vmatprep.subr.mxu0 %v32625_v30  ;;  %28353 = vmatprep.subr.mxu1 %v38712_v58 }
 0x6cd   : > { %28327 = vmatpush3.msra.mxu0 %v32625_v30  ;;  %28354 = vmatpush3.msra.mxu1 %v38712_v58 }
 0x6ce   : > { %28328 = vmatprep.subr.mxu0 %v32635_v35  ;;  %28355 = vmatprep.subr.mxu1 %v38713_v50 }
 0x6cf   : > { %28329 = vmatpush3.msra.mxu0 %v32635_v35  ;;  %28356 = vmatpush3.msra.mxu1 %v38713_v50 }
 0x6d0   : > { %28330 = vmatprep.subr.mxu0 %v32655_v44  ;;  %28357 = vmatprep.subr.mxu1 %v38714_v62 }
 0x6d1   : > { %28331 = vmatpush3.msra.mxu0 %v32655_v44  ;;  %28358 = vmatpush3.msra.mxu1 %v38714_v62 }
 0x6d2   : > { %28332 = vmatprep.subr.mxu0 %v32666_v48  ;;  %28359 = vmatprep.subr.mxu1 %v38715_v42 }
 0x6d3   : > { %28333 = vmatpush3.msra.mxu0 %v32666_v48  ;;  %28360 = vmatpush3.msra.mxu1 %v38715_v42 }
 0x6d4   : > { %28334 = vmatprep.subr.mxu0 %v32684_v55  ;;  %28361 = vmatprep.subr.mxu1 %v38716_v20 }
 0x6d5   : > { %28335 = vmatpush3.msra.mxu0 %v32684_v55  ;;  %28362 = vmatpush3.msra.mxu1 %v38716_v20 }
 0x6d6   : > { %28336 = vmatprep.subr.mxu0 %v32718_v4  ;;  %28363 = vmatprep.subr.mxu1 %v38717_v25 }
 0x6d7   : > { %28337 = vmatpush3.msra.mxu0 %v32718_v4  ;;  %28364 = vmatpush3.msra.mxu1 %v38717_v25 }
 0x6d8   : > { %28338 = vmatprep.subr.mxu0 %v32737_v31  ;;  %28365 = vmatprep.subr.mxu1 %v32792_v63 }
 0x6d9   : > { %28339 = vmatpush3.msra.mxu0 %v32737_v31  ;;  %28366 = vmatpush3.msra.mxu1 %v32792_v63 }
 0x6da   : > { %28340 = vmatprep.subr.mxu0 %v32753_v43  ;;  %28367 = vmatprep.subr.mxu1 %v32809_v51 }
 0x6db   : > { %28341 = vmatpush3.msra.mxu0 %v32753_v43  ;;  %28368 = vmatpush3.msra.mxu1 %v32809_v51 }
 0x6dc   : > { %28342 = vmatprep.mubr.f32.mxu0 %v6387_v47  ;;  %28369 = vmatprep.subr.mxu1 %v32820_v45  ;;  %v38899_v47 = vld [vmem:[#allocation17_spill] sm:$0xff] }
 0x6dd   : > { %28380 = vmatprep.subr.mxu0 %v32595_v18  ;;  %28343 = vmatmul.mubr.f32.vlgmr.msra.gmra.mxu0 %v6397_v17  ;;  %v38900_v17 = vld [vmem:[#allocation18_spill] sm:$0xff] }
 0x6de   : > { %28370 = vmatpush3.msra.mxu1 %v32820_v45  ;;  %28381 = vmatpush3.msra.mxu0 %v32595_v18 }
 0x6df   : > { %28371 = vmatprep.subr.mxu1 %v38834_v33  ;;  %28382 = vmatprep.subr.mxu0 %v38835_v16 }
 0x6e0   : > { %28372 = vmatpush3.msra.mxu1 %v38834_v33  ;;  %28383 = vmatpush3.msra.mxu0 %v38835_v16 }
 0x6e1   : > { %28373 = vmatprep.subr.mxu1 %v38882_v19  ;;  %28384 = vmatprep.subr.mxu0 %v38883_v27 }
 0x6e2   : > { %28374 = vmatpush3.msra.mxu1 %v38882_v19  ;;  %28385 = vmatpush3.msra.mxu0 %v38883_v27 }
 0x6e3   : > { %28375 = vmatprep.subr.mxu1 %v38884_v2  ;;  %28386 = vmatprep.subr.mxu0 %v38885_v34 }
 0x6e4   : > { %28376 = vmatpush3.msra.mxu1 %v38884_v2  ;;  %28377 = vmatprep.mubr.f32.mxu1 %v34070_v29 }
 0x6e5   : > { %28387 = vmatpush3.msra.mxu0 %v38885_v34  ;;  %28378 = vmatmul.mubr.f32.vlgmr.msra.gmra.mxu1 %v34074_v56 }
 0x6e6   : > { %28388 = vmatprep.subr.mxu0 %v38886_v22  ;;  %28415 = vmatprep.subr.mxu1 %v32578_v12 }
 0x6e7   : > { %28389 = vmatpush3.msra.mxu0 %v38886_v22  ;;  %28416 = vmatpush3.msra.mxu1 %v32578_v12 }
 0x6e8   : > { %28390 = vmatprep.subr.mxu0 %v38887_v46  ;;  %28417 = vmatprep.subr.mxu1 %v32572_v8 }
 0x6e9   : > { %28391 = vmatpush3.msra.mxu0 %v38887_v46  ;;  %28418 = vmatpush3.msra.mxu1 %v32572_v8 }
 0x6ea   : > { %28392 = vmatprep.subr.mxu0 %v38888_v23  ;;  %28419 = vmatprep.subr.mxu1 %v32574_v9 }
 0x6eb   : > { %28393 = vmatpush3.msra.mxu0 %v38888_v23  ;;  %28420 = vmatpush3.msra.mxu1 %v32574_v9 }
 0x6ec   : > { %28394 = vmatprep.subr.mxu0 %v38889_v41  ;;  %28421 = vmatprep.subr.mxu1 %v32576_v10 }
 0x6ed   : > { %28395 = vmatpush3.msra.mxu0 %v38889_v41  ;;  %28422 = vmatpush3.msra.mxu1 %v32576_v10 }
 0x6ee   : > { %28396 = vmatprep.subr.mxu0 %v38890_v0  ;;  %28423 = vmatprep.subr.mxu1 %v32570_v6 }
 0x6ef   : > { %28397 = vmatpush3.msra.mxu0 %v38890_v0  ;;  %28424 = vmatpush3.msra.mxu1 %v32570_v6  ;;  %v38921_v0 = vld [vmem:[#allocation60_spill] sm:$0xff] }
 0x6f0   : > { %28398 = vmatprep.subr.mxu0 %v38891_v39  ;;  %28425 = vmatprep.subr.mxu1 %v32580_v13 }
 0x6f1   : > { %28399 = vmatpush3.msra.mxu0 %v38891_v39  ;;  %28426 = vmatpush3.msra.mxu1 %v32580_v13 }
 0x6f2   : > { %28400 = vmatprep.subr.mxu0 %v38892_v60  ;;  %28427 = vmatprep.subr.mxu1 %v32582_v14 }
 0x6f3   : > { %28401 = vmatpush3.msra.mxu0 %v38892_v60  ;;  %28428 = vmatpush3.msra.mxu1 %v32582_v14 }
 0x6f4   : > { %28402 = vmatprep.subr.mxu0 %v38893_v52  ;;  %28429 = vmatprep.subr.mxu1 %v32600_v21 }
 0x6f5   : > { %28403 = vmatpush3.msra.mxu0 %v38893_v52  ;;  %28430 = vmatpush3.msra.mxu1 %v32600_v21 }
 0x6f6   : > { %28404 = vmatprep.subr.mxu0 %v38894_v37  ;;  %28431 = vmatprep.subr.mxu1 %v32625_v30 }
 0x6f7   : > { %28405 = vmatpush3.msra.mxu0 %v38894_v37  ;;  %28432 = vmatpush3.msra.mxu1 %v32625_v30  ;;  %v38919_v37 = vld [vmem:[#allocation59_spill] sm:$0xff] }
 0x6f8   : > { %28406 = vmatprep.subr.mxu0 %v38895_v11  ;;  %28433 = vmatprep.subr.mxu1 %v32635_v35  ;;  %32159 = vrcp.f32 %v38919_v37 }
 0x6f9   : > { %28407 = vmatpush3.msra.mxu0 %v38895_v11  ;;  %28434 = vmatpush3.msra.mxu1 %v32635_v35 }
 0x6fa   : > { %28408 = vmatprep.subr.mxu0 %v38896_v3  ;;  %28435 = vmatprep.subr.mxu1 %v32655_v44 }
 0x6fb   : > { %28409 = vmatpush3.msra.mxu0 %v38896_v3  ;;  %28436 = vmatpush3.msra.mxu1 %v32655_v44 }
 0x6fc   : > { %28410 = vmatprep.subr.mxu0 %v38897_v1  ;;  %28437 = vmatprep.subr.mxu1 %v32666_v48 }
 0x6fd   : > { %28411 = vmatpush3.msra.mxu0 %v38897_v1  ;;  %28412 = vmatprep.mubr.f32.mxu0 %v34083_v36  ;;  %v38905_v36 = vld [vmem:[#allocation27_spill] sm:$0xff] }
 0x6fe   : > { %28438 = vmatpush3.msra.mxu1 %v32666_v48  ;;  %28413 = vmatmul.mubr.f32.vlgmr.msra.gmra.mxu0 %v34088_v49 }
 0x6ff   : > { %28439 = vmatprep.subr.mxu1 %v32684_v55  ;;  %28450 = vmatprep.subr.mxu0 %v38898_v53 }
 0x700   : > { %28440 = vmatpush3.msra.mxu1 %v32684_v55  ;;  %28451 = vmatpush3.msra.mxu0 %v38898_v53  ;;  %v38903_v53 = vld [vmem:[#allocation23_spill] sm:$0xff] }
 0x701   : > { %28441 = vmatprep.subr.mxu1 %v32718_v4  ;;  %28452 = vmatprep.subr.mxu0 %v38899_v47 }
 0x702   : > { %28442 = vmatpush3.msra.mxu1 %v32718_v4  ;;  %28453 = vmatpush3.msra.mxu0 %v38899_v47  ;;  %v38902_v47 = vand.u32 4294901760, %v34088_v49  ;;  %v38906_v49 = vld [vmem:[#allocation31_spill] sm:$0xff] }
 0x703   : > { %28443 = vmatprep.subr.mxu1 %v32737_v31  ;;  %28454 = vmatprep.subr.mxu0 %v38900_v17 }
 0x704   : > { %28444 = vmatpush3.msra.mxu1 %v32737_v31  ;;  %28455 = vmatpush3.msra.mxu0 %v38900_v17  ;;  %v38904_v17 = vld [vmem:[#allocation26_spill] sm:$0xff] }
 0x705   : > { %28445 = vmatprep.subr.mxu1 %v32753_v43  ;;  %28456 = vmatprep.subr.mxu0 %v38901_v28 }
 0x706   : > { %28446 = vmatpush3.msra.mxu1 %v32753_v43  ;;  %28447 = vmatprep.mubr.f32.mxu1 %v6385_v15  ;;  %v38907_v15 = vld [vmem:[#allocation34_spill] sm:$0xff] }
 0x707   : > { %28457 = vmatpush3.msra.mxu0 %v38901_v28  ;;  %28448 = vmatmul.mubr.f32.vlgmr.msra.gmra.mxu1 %v38902_v47  ;;  %v38908_v47 = vld [vmem:[#allocation37_spill] sm:$0xff] }
 0x708   : > { %28458 = vmatprep.subr.mxu0 %v38903_v53  ;;  %28485 = vmatprep.subr.mxu1 %v32578_v12 }
 0x709   : > { %28459 = vmatpush3.msra.mxu0 %v38903_v53  ;;  %28486 = vmatpush3.msra.mxu1 %v32578_v12 }
 0x70a   : > { %28460 = vmatprep.subr.mxu0 %v38904_v17  ;;  %28487 = vmatprep.subr.mxu1 %v32572_v8 }
 0x70b   : > { %28461 = vmatpush3.msra.mxu0 %v38904_v17  ;;  %28488 = vmatpush3.msra.mxu1 %v32572_v8 }
 0x70c   : > { %28462 = vmatprep.subr.mxu0 %v38905_v36  ;;  %28489 = vmatprep.subr.mxu1 %v32574_v9 }
 0x70d   : > { %28463 = vmatpush3.msra.mxu0 %v38905_v36  ;;  %28490 = vmatpush3.msra.mxu1 %v32574_v9  ;;  %v38909_v36 = vld [vmem:[#allocation40_spill] sm:$0xff] }
 0x70e   : > { %28464 = vmatprep.subr.mxu0 %v38906_v49  ;;  %28491 = vmatprep.subr.mxu1 %v32576_v10 }
 0x70f   : > { %28465 = vmatpush3.msra.mxu0 %v38906_v49  ;;  %28492 = vmatpush3.msra.mxu1 %v32576_v10  ;;  %v38910_v49 = vld [vmem:[#allocation43_spill] sm:$0xff] }
 0x710   : > { %28466 = vmatprep.subr.mxu0 %v38907_v15  ;;  %28493 = vmatprep.subr.mxu1 %v32570_v6 }
 0x711   : > { %28467 = vmatpush3.msra.mxu0 %v38907_v15  ;;  %28494 = vmatpush3.msra.mxu1 %v32570_v6  ;;  %v38911_v15 = vld [vmem:[#allocation46_spill] sm:$0xff] }
 0x712   : > { %28468 = vmatprep.subr.mxu0 %v38908_v47  ;;  %28495 = vmatprep.subr.mxu1 %v32580_v13 }
 0x713   : > { %28469 = vmatpush3.msra.mxu0 %v38908_v47  ;;  %28496 = vmatpush3.msra.mxu1 %v32580_v13  ;;  %v38912_v47 = vld [vmem:[#allocation49_spill] sm:$0xff] }
 0x714   : > { %28470 = vmatprep.subr.mxu0 %v38909_v36  ;;  %28497 = vmatprep.subr.mxu1 %v32582_v14 }
 0x715   : > { %28471 = vmatpush3.msra.mxu0 %v38909_v36  ;;  %28498 = vmatpush3.msra.mxu1 %v32582_v14  ;;  %v38913_v36 = vld [vmem:[#allocation51_spill] sm:$0xff] }
 0x716   : > { %28472 = vmatprep.subr.mxu0 %v38910_v49  ;;  %28499 = vmatprep.subr.mxu1 %v32600_v21 }
 0x717   : > { %28473 = vmatpush3.msra.mxu0 %v38910_v49  ;;  %28500 = vmatpush3.msra.mxu1 %v32600_v21  ;;  %v38914_v49 = vld [vmem:[#allocation52_spill] sm:$0xff] }
 0x718   : > { %28474 = vmatprep.subr.mxu0 %v38911_v15  ;;  %28501 = vmatprep.subr.mxu1 %v32625_v30 }
 0x719   : > { %28475 = vmatpush3.msra.mxu0 %v38911_v15  ;;  %28502 = vmatpush3.msra.mxu1 %v32625_v30 }
 0x71a   : > { %28476 = vmatprep.subr.mxu0 %v38912_v47  ;;  %28503 = vmatprep.subr.mxu1 %v32635_v35 }
 0x71b   : > { %28477 = vmatpush3.msra.mxu0 %v38912_v47  ;;  %28504 = vmatpush3.msra.mxu1 %v32635_v35 }
 0x71c   : > { %28478 = vmatprep.subr.mxu0 %v38913_v36  ;;  %28505 = vmatprep.subr.mxu1 %v32655_v44 }
 0x71d   : > { %28479 = vmatpush3.msra.mxu0 %v38913_v36  ;;  %28506 = vmatpush3.msra.mxu1 %v32655_v44  ;;  %v38915_v36 = vld [vmem:[#allocation56_spill] sm:$0xff] }
 0x71e   : > { %28480 = vmatprep.subr.mxu0 %v38914_v49  ;;  %28507 = vmatprep.subr.mxu1 %v32666_v48 }
 0x71f   : > { %28481 = vmatpush3.msra.mxu0 %v38914_v49  ;;  %28482 = vmatprep.mubr.f32.mxu0 %v34070_v29 }
 0x720   : > { %28508 = vmatpush3.msra.mxu1 %v32666_v48  ;;  %28483 = vmatmul.mubr.f32.vlgmr.msra.gmra.mxu0 %v34074_v56 }
 0x721   : > { %28509 = vmatprep.subr.mxu1 %v32684_v55  ;;  %28517 = vmatprep.mubr.f32.mxu1 %v34070_v29 }
 0x722   : > { %28510 = vmatpush3.msra.mxu1 %v32684_v55  ;;  %28524 = vmatprep.mubr.f32.mxu0 %v38915_v36 }
 0x723   : > { %28511 = vmatprep.subr.mxu1 %v32718_v4 }
 0x724   : > { %28512 = vmatpush3.msra.mxu1 %v32718_v4 }
 0x725   : > { %28513 = vmatprep.subr.mxu1 %v32737_v31 }
 0x726   : > { %28514 = vmatpush3.msra.mxu1 %v32737_v31 }
 0x727   : > { %28515 = vmatprep.subr.mxu1 %v32753_v43 }
 0x728   : > { %28516 = vmatpush3.msra.mxu1 %v32753_v43 }
 0x729   : > { %28518 = vmatmul.mubr.f32.vlgmr.msra.gmra.mxu1 %v34074_v56 }
 0x72a   : > { %28531 = vmatprep.mubr.f32.mxu1 %v32986_v61 }
 0x770   : > { %v28274_v29 = vpop.f32.mrf.mxu0 }
 0x772   : > { %v34276_v49 = vpop.f32.mrf.mxu0 }
 0x773   : > { %38916 = vst [vmem:[#allocation61_spill] sm:$0xff] %v34276_v49  ;;  %v6265_v49 = vmul.f32 2.0, %v38921_v0 }
 0x775   : > { %v28288_v36 = vpop.f32.mrf.mxu0 }
 0x777   : > { %v34280_v53 = vpop.f32.mrf.mxu0 }
 0x778   : > { %v28281_v47 = vpop.f32.mrf.mxu1  ;;  %38918 = vst [vmem:[#allocation76_spill] sm:$0xff] %v34280_v53  ;;  %v32160_v53 = vpop.eup %32159 }
 0x779   : > { %v5921_v15 = vadd.f32 %v28281_v47, %v28274_v29  ;;  %v6267_v29 = vadd.f32 0.0001, %v6265_v49 }
 0x77a   : > { %v34278_v17 = vpop.f32.mrf.mxu1 }
 0x77b   : > { %38917 = vst [vmem:[#allocation75_spill] sm:$0xff] %v34278_v17  ;;  %v6004_v28 = vadd.f32 %v28288_v36, %v5921_v15  ;;  %v28302_v3 = vpop.f32.mrf.mxu0 }
 0x77d   : > { %v34289_v15 = vpop.f32.mrf.mxu0 }
 0x77e   : > { %v28295_v1 = vpop.f32.mrf.mxu1  ;;  %38923 = vst [vmem:[#allocation77_spill] sm:$0xff] %v34289_v15 }
 0x77f   : > { %v6087_v11 = vadd.f32 %v28295_v1, %v6004_v28 }
 0x780   : > { %v34283_v52 = vpop.f32.mrf.mxu1 }
 0x781   : > { %38920 = vst [vmem:[#allocation59_spill] sm:$0xff] %v34283_v52  ;;  %v6170_v56 = vadd.f32 %v28302_v3, %v6087_v11 }
 0x783   : > { %v28309_v60 = vpop.f32.mrf.mxu1 }
 0x784   : > { %v6249_v39 = vadd.f32 %v28309_v60, %v6170_v56 }
 0x785   : > { %v34291_v37 = vpop.f32.mrf.mxu1 }
 0x786   : > { %v6263_v41 = vsub.f32 %v6249_v39, %v38921_v0  ;;  %38924 = vst [vmem:[#allocation78_spill] sm:$0xff] %v34291_v37 }
 0x788   : > { %v6269_v47 = vmul.f32 2.0, %v6263_v41 }
 0x78a   : > { %v6271_v17 = vadd.f32 0.0009, %v6269_v47 }
 0x78c   : > { %v6273_v23 = vmul.f32 %v6271_v17, %v6267_v29 }
 0x78e   : > { %v34287_v36 = vmul.f32 %v32160_v53, %v6273_v23 }
 0x790   : > { %38922 = vst [vmem:[#allocation60_spill] sm:$0xff] %v34287_v36 }
 0x79d   : > { %v28344_v28 = vpop.f32.mrf.mxu0 }
 0x79f   : > { %v6389_v1 = vpop.f32.mrf.mxu0 }
 0x7a5   : > { %v28379_v11 = vpop.f32.mrf.mxu1 }
 0x7a6   : > { %v6557_v46 = vadd.f32 %v28379_v11, %v28344_v28 }
 0x7a7   : > { %v6550_v60 = vpop.f32.mrf.mxu1 }
 0x7a8   : > { %v6551_v41 = vadd.f32 %v6550_v60, %v6389_v1 }
 0x7be   : > { %v28414_v3 = vpop.f32.mrf.mxu0 }
 0x7bf   : > { %v6668_v39 = vadd.f32 %v28414_v3, %v6557_v46 }
 0x7c0   : > { %v6660_v56 = vpop.f32.mrf.mxu0 }
 0x7c1   : > { %v6661_v17 = vadd.f32 %v6660_v56, %v6551_v41 }
 0x7c7   : > { %v28449_v52 = vpop.f32.mrf.mxu1 }
 0x7c8   : > { %v6765_v47 = vadd.f32 %v28449_v52, %v6668_v39 }
 0x7c9   : > { %v6756_v49 = vpop.f32.mrf.mxu1 }
 0x7ca   : > { %v6757_v53 = vadd.f32 %v6756_v49, %v6661_v17  ;;  %v38925_v49 = vld [vmem:[#allocation54_spill] sm:$0xff] }
 0x7cb   : > { %v38926_v17 = vld [vmem:[#allocation14_spill] sm:$0xff] }
 0x7e0   : > { %v28484_v0 = vpop.f32.mrf.mxu0 }
 0x7e1   : > { %v6890_v29 = vadd.f32 %v28484_v0, %v6765_v47  ;;  %v38927_v47 = vld [vmem:[#allocation55_spill] sm:$0xff] }
 0x7e2   : > { %v6883_v23 = vpop.f32.mrf.mxu0 }
 0x7e3   : > { %v6884_v36 = vadd.f32 %v6883_v23, %v6757_v53  ;;  %v38928_v23 = vld [vmem:[#allocation15_spill] sm:$0xff]  ;;  %v38929_v53 = vld [vmem:[#allocation16_spill] sm:$0xff] }
 0x7e9   : > { %v28519_v15 = vpop.f32.mrf.mxu1 }
 0x7ea   : > { %v6983_v22 = vadd.f32 %v28519_v15, %v6890_v29  ;;  %v38930_v29 = vld [vmem:[#allocation21_spill] sm:$0xff] }
 0x7eb   : > { %v6976_v37 = vpop.f32.mrf.mxu1 }
 0x7ec   : > { %v7015_v34 = vand.u32 4294901760, %v6983_v22  ;;  %v6977_v2 = vadd.f32 %v6976_v37, %v6884_v36 }
 0x7ee   : > { %v7103_v27 = vsub.f32 %v6983_v22, %v7015_v34  ;;  %v7018_v19 = vand.u32 4294901760, %v6977_v2  ;;  %28520 = vmatprep.subr.mxu0 %v7015_v34 }
 0x7ef   : > { %28521 = vmatpush3.msra.mxu0 %v7015_v34 }
 0x7f0   : > { %v7110_v28 = vsub.f32 %v6977_v2, %v7018_v19  ;;  %28522 = vmatprep.subr.mxu0 %v7018_v19  ;;  %v7104_v1 = vand.u32 4294901760, %v7103_v27 }
 0x7f1   : > { %28523 = vmatpush3.msra.mxu0 %v7018_v19 }
 0x7f2   : > { %28534 = vmatprep.subr.mxu0 %v7103_v27  ;;  %28525 = vmatmul.mubr.f32.vlgmr.msra.gmra.mxu0 %v33010_v5  ;;  %v7105_v46 = vsub.f32 %v7103_v27, %v7104_v1  ;;  %v7111_v52 = vand.u32 4294901760, %v7110_v28 }
 0x7f3   : > { %28535 = vmatpush3.msra.mxu0 %v7103_v27  ;;  %28538 = vmatprep.mubr.f32.mxu0 %v32989_v7  ;;  %v24394_v27 = vld [vmem:[%s32556_s28 + $0x10] sm:$0xff] }
 0x7f4   : > { %28536 = vmatprep.subr.mxu0 %v7110_v28  ;;  %v7106_v15 = vand.u32 4294901760, %v7105_v46  ;;  %v7112_v11 = vsub.f32 %v7110_v28, %v7111_v52  ;;  %v34323_v2 = vand.u32 4294901760, %v24394_v27  ;;  %v38933_v46 = vld [vmem:[#allocation29_spill] sm:$0xff] }
 0x7f5   : > { %28537 = vmatpush3.msra.mxu0 %v7110_v28  ;;  %v38931_v28 = vld [vmem:[#allocation22_spill] sm:$0xff] }
 0x7f6   : > { %28527 = vmatprep.subr.mxu1 %v7106_v15  ;;  %28548 = vmatprep.subr.mxu0 %v7104_v1  ;;  %v7113_v22 = vand.u32 4294901760, %v7112_v11  ;;  %v34336_v36 = vsub.f32 %v24394_v27, %v34323_v2  ;;  %v38936_v11 = vld [vmem:[#allocation38_spill] sm:$0xff]  ;;  %v38938_v27 = vld [vmem:[#allocation44_spill] sm:$0xff] }
 0x7f7   : > { %28528 = vmatpush3.msra.mxu1 %v7106_v15  ;;  %28539 = vmatmul.mubr.f32.vlgmr.msra.gmra.mxu0 %v33003_v59  ;;  %v38935_v15 = vld [vmem:[#allocation35_spill] sm:$0xff] }
 0x7f8   : > { %28549 = vmatpush3.msra.mxu0 %v7104_v1  ;;  %28529 = vmatprep.subr.mxu1 %v7113_v22  ;;  %v7571_v3 = vand.u32 4294901760, %v34336_v36  ;;  %v38932_v1 = vld [vmem:[#allocation24_spill] sm:$0xff] }
 0x7f9   : > { %28550 = vmatprep.subr.mxu0 %v7111_v52  ;;  %28530 = vmatpush3.msra.mxu1 %v7113_v22  ;;  %v38937_v22 = vld [vmem:[#allocation41_spill] sm:$0xff] }
 0x7fa   : > { %28551 = vmatpush3.msra.mxu0 %v7111_v52  ;;  %28532 = vmatmul.mubr.f32.vlgmr.msra.gmra.mxu1 %v33000_v32  ;;  %v7572_v56 = vsub.f32 %v34336_v36, %v7571_v3  ;;  %v38934_v52 = vld [vmem:[#allocation32_spill] sm:$0xff] }
 0x7fb   : > { %28541 = vmatprep.subr.mxu1 %v7015_v34  ;;  %28552 = vmatprep.mubr.f32.mxu0 %v32986_v61 }
 0x7fc   : > { %28562 = vmatprep.subr.mxu0 %v32578_v12  ;;  %28542 = vmatpush3.msra.mxu1 %v7015_v34  ;;  %v7573_v41 = vand.u32 4294901760, %v7572_v56  ;;  %v38940_v56 = vld [vmem:[#allocation50_spill] sm:$0xff] }
 0x7fd   : > { %28553 = vmatmul.mubr.f32.vlgmr.msra.gmra.mxu0 %v33000_v32  ;;  %28543 = vmatprep.subr.mxu1 %v7018_v19 }
 0x7fe   : > { %28563 = vmatpush3.msra.mxu0 %v32578_v12  ;;  %28544 = vmatpush3.msra.mxu1 %v7018_v19 }
 0x7ff   : > { %28564 = vmatprep.subr.mxu0 %v32572_v8  ;;  %28545 = vmatprep.mubr.f32.mxu1 %v32993_v54 }
 0x800   : > { %28565 = vmatpush3.msra.mxu0 %v32572_v8  ;;  %28546 = vmatmul.mubr.f32.vlgmr.msra.gmra.mxu1 %v33006_v26 }
 0x801   : > { %28555 = vmatprep.subr.mxu1 %v7015_v34  ;;  %28566 = vmatprep.subr.mxu0 %v32574_v9 }
 0x802   : > { %28556 = vmatpush3.msra.mxu1 %v7015_v34  ;;  %28567 = vmatpush3.msra.mxu0 %v32574_v9 }
 0x803   : > { %28557 = vmatprep.subr.mxu1 %v7018_v19  ;;  %28568 = vmatprep.subr.mxu0 %v32576_v10 }
 0x804   : > { %28558 = vmatpush3.msra.mxu1 %v7018_v19  ;;  %28559 = vmatprep.mubr.f32.mxu1 %v32986_v61  ;;  %v24395_v19 = vld [vmem:[%s32556_s28 + $0x18] sm:$0xff] }
 0x805   : > { %28569 = vmatpush3.msra.mxu0 %v32576_v10  ;;  %28560 = vmatmul.mubr.f32.vlgmr.msra.gmra.mxu1 %v33000_v32  ;;  %v34327_v34 = vand.u32 4294901760, %v24395_v19 }
 0x806   : > { %28570 = vmatprep.subr.mxu0 %v32570_v6  ;;  %28597 = vmatprep.subr.mxu1 %v32642_v38 }
 0x807   : > { %28571 = vmatpush3.msra.mxu0 %v32570_v6  ;;  %28598 = vmatpush3.msra.mxu1 %v32642_v38  ;;  %v34341_v37 = vsub.f32 %v24395_v19, %v34327_v34  ;;  %v38939_v19 = vld [vmem:[#allocation47_spill] sm:$0xff] }
 0x808   : > { %28572 = vmatprep.subr.mxu0 %v32580_v13  ;;  %28599 = vmatprep.subr.mxu1 %v38709_v40 }
 0x809   : > { %28573 = vmatpush3.msra.mxu0 %v32580_v13  ;;  %28600 = vmatpush3.msra.mxu1 %v38709_v40  ;;  %v38184_v60 = vand.u32 4294901760, %v34341_v37 }
 0x80a   : > { %28574 = vmatprep.subr.mxu0 %v32582_v14  ;;  %28601 = vmatprep.subr.mxu1 %v38710_v57 }
 0x80b   : > { %28575 = vmatpush3.msra.mxu0 %v32582_v14  ;;  %28602 = vmatpush3.msra.mxu1 %v38710_v57  ;;  %v7582_v0 = vsub.f32 %v34341_v37, %v38184_v60  ;;  %v38944_v60 = vld [vmem:[#allocation20_spill] sm:$0xff] }
 0x80c   : > { %28576 = vmatprep.subr.mxu0 %v32600_v21  ;;  %28603 = vmatprep.subr.mxu1 %v38711_v24 }
 0x80d   : > { %28577 = vmatpush3.msra.mxu0 %v32600_v21  ;;  %28604 = vmatpush3.msra.mxu1 %v38711_v24  ;;  %v7583_v39 = vand.u32 4294901760, %v7582_v0  ;;  %v38941_v0 = vld [vmem:[#allocation19_spill] sm:$0xff] }
 0x80e   : > { %28578 = vmatprep.subr.mxu0 %v32625_v30  ;;  %28605 = vmatprep.subr.mxu1 %v38712_v58 }
 0x80f   : > { %28579 = vmatpush3.msra.mxu0 %v32625_v30  ;;  %28606 = vmatpush3.msra.mxu1 %v38712_v58 }
 0x810   : > { %28580 = vmatprep.subr.mxu0 %v32635_v35  ;;  %28607 = vmatprep.subr.mxu1 %v38713_v50 }
 0x811   : > { %28581 = vmatpush3.msra.mxu0 %v32635_v35  ;;  %28608 = vmatpush3.msra.mxu1 %v38713_v50 }
 0x812   : > { %28582 = vmatprep.subr.mxu0 %v32655_v44  ;;  %28609 = vmatprep.subr.mxu1 %v38714_v62 }
 0x813   : > { %28583 = vmatpush3.msra.mxu0 %v32655_v44  ;;  %28610 = vmatpush3.msra.mxu1 %v38714_v62 }
 0x814   : > { %28584 = vmatprep.subr.mxu0 %v32666_v48  ;;  %28611 = vmatprep.subr.mxu1 %v38715_v42 }
 0x815   : > { %28585 = vmatpush3.msra.mxu0 %v32666_v48  ;;  %28612 = vmatpush3.msra.mxu1 %v38715_v42 }
 0x816   : > { %28586 = vmatprep.subr.mxu0 %v32684_v55  ;;  %28613 = vmatprep.subr.mxu1 %v38716_v20 }
 0x817   : > { %28587 = vmatpush3.msra.mxu0 %v32684_v55  ;;  %28614 = vmatpush3.msra.mxu1 %v38716_v20 }
 0x818   : > { %28588 = vmatprep.subr.mxu0 %v32718_v4  ;;  %28615 = vmatprep.subr.mxu1 %v38717_v25 }
 0x819   : > { %28589 = vmatpush3.msra.mxu0 %v32718_v4  ;;  %28616 = vmatpush3.msra.mxu1 %v38717_v25 }
 0x81a   : > { %28590 = vmatprep.subr.mxu0 %v32737_v31  ;;  %28617 = vmatprep.subr.mxu1 %v32792_v63 }
 0x81b   : > { %28591 = vmatpush3.msra.mxu0 %v32737_v31  ;;  %28618 = vmatpush3.msra.mxu1 %v32792_v63 }
 0x81c   : > { %28592 = vmatprep.subr.mxu0 %v32753_v43  ;;  %28619 = vmatprep.subr.mxu1 %v32809_v51 }
 0x81d   : > { %28593 = vmatpush3.msra.mxu0 %v32753_v43  ;;  %28620 = vmatpush3.msra.mxu1 %v32809_v51 }
 0x81e   : > { %28594 = vmatprep.mubr.f32.mxu0 %v7573_v41  ;;  %28621 = vmatprep.subr.mxu1 %v32820_v45  ;;  %v38942_v41 = vld [vmem:[#allocation17_spill] sm:$0xff] }
 0x81f   : > { %28632 = vmatprep.subr.mxu0 %v32595_v18  ;;  %28595 = vmatmul.mubr.f32.vlgmr.msra.gmra.mxu0 %v7583_v39  ;;  %v38943_v39 = vld [vmem:[#allocation18_spill] sm:$0xff] }
 0x820   : > { %28622 = vmatpush3.msra.mxu1 %v32820_v45  ;;  %28633 = vmatpush3.msra.mxu0 %v32595_v18 }
 0x821   : > { %28623 = vmatprep.subr.mxu1 %v38834_v33  ;;  %28634 = vmatprep.subr.mxu0 %v38835_v16 }
 0x822   : > { %28624 = vmatpush3.msra.mxu1 %v38834_v33  ;;  %28635 = vmatpush3.msra.mxu0 %v38835_v16 }
 0x823   : > { %28625 = vmatprep.subr.mxu1 %v38925_v49  ;;  %28636 = vmatprep.subr.mxu0 %v38926_v17 }
 0x824   : > { %28626 = vmatpush3.msra.mxu1 %v38925_v49  ;;  %28637 = vmatpush3.msra.mxu0 %v38926_v17 }
 0x825   : > { %28627 = vmatprep.subr.mxu1 %v38927_v47  ;;  %28638 = vmatprep.subr.mxu0 %v38928_v23 }
 0x826   : > { %28628 = vmatpush3.msra.mxu1 %v38927_v47  ;;  %28629 = vmatprep.mubr.f32.mxu1 %v34323_v2 }
 0x827   : > { %28639 = vmatpush3.msra.mxu0 %v38928_v23  ;;  %28630 = vmatmul.mubr.f32.vlgmr.msra.gmra.mxu1 %v34327_v34 }
 0x828   : > { %28640 = vmatprep.subr.mxu0 %v38929_v53  ;;  %28667 = vmatprep.subr.mxu1 %v32578_v12 }
 0x829   : > { %28641 = vmatpush3.msra.mxu0 %v38929_v53  ;;  %28668 = vmatpush3.msra.mxu1 %v32578_v12 }
 0x82a   : > { %28642 = vmatprep.subr.mxu0 %v38930_v29  ;;  %28669 = vmatprep.subr.mxu1 %v32572_v8 }
 0x82b   : > { %28643 = vmatpush3.msra.mxu0 %v38930_v29  ;;  %28670 = vmatpush3.msra.mxu1 %v32572_v8 }
 0x82c   : > { %28644 = vmatprep.subr.mxu0 %v38931_v28  ;;  %28671 = vmatprep.subr.mxu1 %v32574_v9 }
 0x82d   : > { %28645 = vmatpush3.msra.mxu0 %v38931_v28  ;;  %28672 = vmatpush3.msra.mxu1 %v32574_v9 }
 0x82e   : > { %28646 = vmatprep.subr.mxu0 %v38932_v1  ;;  %28673 = vmatprep.subr.mxu1 %v32576_v10 }
 0x82f   : > { %28647 = vmatpush3.msra.mxu0 %v38932_v1  ;;  %28674 = vmatpush3.msra.mxu1 %v32576_v10 }
 0x830   : > { %28648 = vmatprep.subr.mxu0 %v38933_v46  ;;  %28675 = vmatprep.subr.mxu1 %v32570_v6 }
 0x831   : > { %28649 = vmatpush3.msra.mxu0 %v38933_v46  ;;  %28676 = vmatpush3.msra.mxu1 %v32570_v6 }
 0x832   : > { %28650 = vmatprep.subr.mxu0 %v38934_v52  ;;  %28677 = vmatprep.subr.mxu1 %v32580_v13 }
 0x833   : > { %28651 = vmatpush3.msra.mxu0 %v38934_v52  ;;  %28678 = vmatpush3.msra.mxu1 %v32580_v13 }
 0x834   : > { %28652 = vmatprep.subr.mxu0 %v38935_v15  ;;  %28679 = vmatprep.subr.mxu1 %v32582_v14 }
 0x835   : > { %28653 = vmatpush3.msra.mxu0 %v38935_v15  ;;  %28680 = vmatpush3.msra.mxu1 %v32582_v14 }
 0x836   : > { %28654 = vmatprep.subr.mxu0 %v38936_v11  ;;  %28681 = vmatprep.subr.mxu1 %v32600_v21 }
 0x837   : > { %28655 = vmatpush3.msra.mxu0 %v38936_v11  ;;  %28682 = vmatpush3.msra.mxu1 %v32600_v21 }
 0x838   : > { %28656 = vmatprep.subr.mxu0 %v38937_v22  ;;  %28683 = vmatprep.subr.mxu1 %v32625_v30 }
 0x839   : > { %28657 = vmatpush3.msra.mxu0 %v38937_v22  ;;  %28684 = vmatpush3.msra.mxu1 %v32625_v30 }
 0x83a   : > { %28658 = vmatprep.subr.mxu0 %v38938_v27  ;;  %28685 = vmatprep.subr.mxu1 %v32635_v35 }
 0x83b   : > { %28659 = vmatpush3.msra.mxu0 %v38938_v27  ;;  %28686 = vmatpush3.msra.mxu1 %v32635_v35 }
 0x83c   : > { %28660 = vmatprep.subr.mxu0 %v38939_v19  ;;  %28687 = vmatprep.subr.mxu1 %v32655_v44 }
 0x83d   : > { %28661 = vmatpush3.msra.mxu0 %v38939_v19  ;;  %28688 = vmatpush3.msra.mxu1 %v32655_v44 }
 0x83e   : > { %28662 = vmatprep.subr.mxu0 %v38940_v56  ;;  %28689 = vmatprep.subr.mxu1 %v32666_v48 }
 0x83f   : > { %28663 = vmatpush3.msra.mxu0 %v38940_v56  ;;  %28664 = vmatprep.mubr.f32.mxu0 %v34336_v36  ;;  %v38948_v36 = vld [vmem:[#allocation27_spill] sm:$0xff] }
 0x840   : > { %28690 = vmatpush3.msra.mxu1 %v32666_v48  ;;  %28665 = vmatmul.mubr.f32.vlgmr.msra.gmra.mxu0 %v34341_v37 }
 0x841   : > { %28691 = vmatprep.subr.mxu1 %v32684_v55  ;;  %28702 = vmatprep.subr.mxu0 %v38941_v0 }
 0x842   : > { %28692 = vmatpush3.msra.mxu1 %v32684_v55  ;;  %28703 = vmatpush3.msra.mxu0 %v38941_v0  ;;  %v38946_v0 = vld [vmem:[#allocation23_spill] sm:$0xff] }
 0x843   : > { %28693 = vmatprep.subr.mxu1 %v32718_v4  ;;  %28704 = vmatprep.subr.mxu0 %v38942_v41 }
 0x844   : > { %28694 = vmatpush3.msra.mxu1 %v32718_v4  ;;  %28705 = vmatpush3.msra.mxu0 %v38942_v41  ;;  %v38945_v41 = vand.u32 4294901760, %v34341_v37  ;;  %v38949_v37 = vld [vmem:[#allocation31_spill] sm:$0xff] }
 0x845   : > { %28695 = vmatprep.subr.mxu1 %v32737_v31  ;;  %28706 = vmatprep.subr.mxu0 %v38943_v39 }
 0x846   : > { %28696 = vmatpush3.msra.mxu1 %v32737_v31  ;;  %28707 = vmatpush3.msra.mxu0 %v38943_v39  ;;  %v38947_v39 = vld [vmem:[#allocation26_spill] sm:$0xff] }
 0x847   : > { %28697 = vmatprep.subr.mxu1 %v32753_v43  ;;  %28708 = vmatprep.subr.mxu0 %v38944_v60 }
 0x848   : > { %28698 = vmatpush3.msra.mxu1 %v32753_v43  ;;  %28699 = vmatprep.mubr.f32.mxu1 %v7571_v3  ;;  %v38950_v3 = vld [vmem:[#allocation34_spill] sm:$0xff] }
 0x849   : > { %28709 = vmatpush3.msra.mxu0 %v38944_v60  ;;  %28700 = vmatmul.mubr.f32.vlgmr.msra.gmra.mxu1 %v38945_v41  ;;  %v38951_v41 = vld [vmem:[#allocation37_spill] sm:$0xff] }
 0x84a   : > { %28710 = vmatprep.subr.mxu0 %v38946_v0  ;;  %28737 = vmatprep.subr.mxu1 %v32578_v12 }
 0x84b   : > { %28711 = vmatpush3.msra.mxu0 %v38946_v0  ;;  %28738 = vmatpush3.msra.mxu1 %v32578_v12 }
 0x84c   : > { %28712 = vmatprep.subr.mxu0 %v38947_v39  ;;  %28739 = vmatprep.subr.mxu1 %v32572_v8 }
 0x84d   : > { %28713 = vmatpush3.msra.mxu0 %v38947_v39  ;;  %28740 = vmatpush3.msra.mxu1 %v32572_v8 }
 0x84e   : > { %28714 = vmatprep.subr.mxu0 %v38948_v36  ;;  %28741 = vmatprep.subr.mxu1 %v32574_v9 }
 0x84f   : > { %28715 = vmatpush3.msra.mxu0 %v38948_v36  ;;  %28742 = vmatpush3.msra.mxu1 %v32574_v9  ;;  %v38952_v36 = vld [vmem:[#allocation40_spill] sm:$0xff] }
 0x850   : > { %28716 = vmatprep.subr.mxu0 %v38949_v37  ;;  %28743 = vmatprep.subr.mxu1 %v32576_v10 }
 0x851   : > { %28717 = vmatpush3.msra.mxu0 %v38949_v37  ;;  %28744 = vmatpush3.msra.mxu1 %v32576_v10  ;;  %v38953_v37 = vld [vmem:[#allocation43_spill] sm:$0xff] }
 0x852   : > { %28718 = vmatprep.subr.mxu0 %v38950_v3  ;;  %28745 = vmatprep.subr.mxu1 %v32570_v6 }
 0x853   : > { %28719 = vmatpush3.msra.mxu0 %v38950_v3  ;;  %28746 = vmatpush3.msra.mxu1 %v32570_v6  ;;  %v38954_v3 = vld [vmem:[#allocation46_spill] sm:$0xff] }
 0x854   : > { %28720 = vmatprep.subr.mxu0 %v38951_v41  ;;  %28747 = vmatprep.subr.mxu1 %v32580_v13 }
 0x855   : > { %28721 = vmatpush3.msra.mxu0 %v38951_v41  ;;  %28748 = vmatpush3.msra.mxu1 %v32580_v13  ;;  %v38955_v41 = vld [vmem:[#allocation49_spill] sm:$0xff] }
 0x856   : > { %28722 = vmatprep.subr.mxu0 %v38952_v36  ;;  %28749 = vmatprep.subr.mxu1 %v32582_v14 }
 0x857   : > { %28723 = vmatpush3.msra.mxu0 %v38952_v36  ;;  %28750 = vmatpush3.msra.mxu1 %v32582_v14  ;;  %v38956_v36 = vld [vmem:[#allocation51_spill] sm:$0xff] }
 0x858   : > { %28724 = vmatprep.subr.mxu0 %v38953_v37  ;;  %28751 = vmatprep.subr.mxu1 %v32600_v21 }
 0x859   : > { %28725 = vmatpush3.msra.mxu0 %v38953_v37  ;;  %28752 = vmatpush3.msra.mxu1 %v32600_v21  ;;  %v38957_v37 = vld [vmem:[#allocation52_spill] sm:$0xff] }
 0x85a   : > { %28726 = vmatprep.subr.mxu0 %v38954_v3  ;;  %28753 = vmatprep.subr.mxu1 %v32625_v30 }
 0x85b   : > { %28727 = vmatpush3.msra.mxu0 %v38954_v3  ;;  %28754 = vmatpush3.msra.mxu1 %v32625_v30 }
 0x85c   : > { %28728 = vmatprep.subr.mxu0 %v38955_v41  ;;  %28755 = vmatprep.subr.mxu1 %v32635_v35 }
 0x85d   : > { %28729 = vmatpush3.msra.mxu0 %v38955_v41  ;;  %28756 = vmatpush3.msra.mxu1 %v32635_v35 }
 0x85e   : > { %28730 = vmatprep.subr.mxu0 %v38956_v36  ;;  %28757 = vmatprep.subr.mxu1 %v32655_v44 }
 0x85f   : > { %28731 = vmatpush3.msra.mxu0 %v38956_v36  ;;  %28758 = vmatpush3.msra.mxu1 %v32655_v44  ;;  %v38958_v36 = vld [vmem:[#allocation56_spill] sm:$0xff] }
 0x860   : > { %28732 = vmatprep.subr.mxu0 %v38957_v37  ;;  %28759 = vmatprep.subr.mxu1 %v32666_v48 }
 0x861   : > { %28733 = vmatpush3.msra.mxu0 %v38957_v37  ;;  %28734 = vmatprep.mubr.f32.mxu0 %v34323_v2 }
 0x862   : > { %28760 = vmatpush3.msra.mxu1 %v32666_v48  ;;  %28735 = vmatmul.mubr.f32.vlgmr.msra.gmra.mxu0 %v34327_v34 }
 0x863   : > { %28761 = vmatprep.subr.mxu1 %v32684_v55  ;;  %28769 = vmatprep.mubr.f32.mxu1 %v34323_v2 }
 0x864   : > { %28762 = vmatpush3.msra.mxu1 %v32684_v55  ;;  %28776 = vmatprep.mubr.f32.mxu0 %v38958_v36 }
 0x865   : > { %28763 = vmatprep.subr.mxu1 %v32718_v4 }
 0x866   : > { %28764 = vmatpush3.msra.mxu1 %v32718_v4 }
 0x867   : > { %28765 = vmatprep.subr.mxu1 %v32737_v31 }
 0x868   : > { %28766 = vmatpush3.msra.mxu1 %v32737_v31 }
 0x869   : > { %28767 = vmatprep.subr.mxu1 %v32753_v43 }
 0x86a   : > { %28768 = vmatpush3.msra.mxu1 %v32753_v43 }
 0x86b   : > { %28770 = vmatmul.mubr.f32.vlgmr.msra.gmra.mxu1 %v34327_v34 }
 0x86c   : > { %28783 = vmatprep.mubr.f32.mxu1 %v32986_v61 }
 0x8b2   : > { %v28526_v2 = vpop.f32.mrf.mxu0 }
 0x8b4   : > { %v34529_v37 = vpop.f32.mrf.mxu0 }
 0x8b5   : > { %38959 = vst [vmem:[#allocation79_spill] sm:$0xff] %v34529_v37 }
 0x8b7   : > { %v28540_v36 = vpop.f32.mrf.mxu0 }
 0x8b9   : > { %v34533_v0 = vpop.f32.mrf.mxu0 }
 0x8ba   : > { %v28533_v41 = vpop.f32.mrf.mxu1  ;;  %38961 = vst [vmem:[#allocation81_spill] sm:$0xff] %v34533_v0 }
 0x8bb   : > { %v7157_v3 = vadd.f32 %v28533_v41, %v28526_v2 }
 0x8bc   : > { %v34531_v39 = vpop.f32.mrf.mxu1 }
 0x8bd   : > { %38960 = vst [vmem:[#allocation80_spill] sm:$0xff] %v34531_v39  ;;  %v7240_v60 = vadd.f32 %v28540_v36, %v7157_v3  ;;  %v28554_v19 = vpop.f32.mrf.mxu0 }
 0x8bf   : > { %v34539_v52 = vpop.f32.mrf.mxu0 }
 0x8c0   : > { %v28547_v56 = vpop.f32.mrf.mxu1  ;;  %38964 = vst [vmem:[#allocation84_spill] sm:$0xff] %v34539_v52 }
 0x8c1   : > { %v7323_v27 = vadd.f32 %v28547_v56, %v7240_v60 }
 0x8c2   : > { %v34535_v22 = vpop.f32.mrf.mxu1 }
 0x8c3   : > { %38962 = vst [vmem:[#allocation82_spill] sm:$0xff] %v34535_v22  ;;  %v7406_v11 = vadd.f32 %v28554_v19, %v7323_v27 }
 0x8c5   : > { %v28561_v34 = vpop.f32.mrf.mxu1 }
 0x8c6   : > { %v34537_v15 = vadd.f32 %v28561_v34, %v7406_v11 }
 0x8c7   : > { %v34541_v46 = vpop.f32.mrf.mxu1 }
 0x8c8   : > { %38963 = vst [vmem:[#allocation83_spill] sm:$0xff] %v34537_v15  ;;  %38965 = vst [vmem:[#allocation85_spill] sm:$0xff] %v34541_v46 }
 0x8df   : > { %v28596_v37 = vpop.f32.mrf.mxu0 }
 0x8e1   : > { %v7575_v41 = vpop.f32.mrf.mxu0 }
 0x8e7   : > { %v28631_v2 = vpop.f32.mrf.mxu1 }
 0x8e8   : > { %v7743_v3 = vadd.f32 %v28631_v2, %v28596_v37 }
 0x8e9   : > { %v7736_v1 = vpop.f32.mrf.mxu1 }
 0x8ea   : > { %v7737_v60 = vadd.f32 %v7736_v1, %v7575_v41 }
 0x900   : > { %v28666_v39 = vpop.f32.mrf.mxu0 }
 0x901   : > { %v7854_v56 = vadd.f32 %v28666_v39, %v7743_v3 }
 0x902   : > { %v7846_v0 = vpop.f32.mrf.mxu0 }
 0x903   : > { %v7847_v27 = vadd.f32 %v7846_v0, %v7737_v60 }
 0x909   : > { %v28701_v36 = vpop.f32.mrf.mxu1 }
 0x90a   : > { %v7951_v19 = vadd.f32 %v28701_v36, %v7854_v56 }
 0x90b   : > { %v7942_v22 = vpop.f32.mrf.mxu1 }
 0x90c   : > { %v7943_v34 = vadd.f32 %v7942_v22, %v7847_v27  ;;  %v38966_v27 = vld [vmem:[#allocation54_spill] sm:$0xff] }
 0x922   : > { %v28736_v28 = vpop.f32.mrf.mxu0 }
 0x923   : > { %v8076_v15 = vadd.f32 %v28736_v28, %v7951_v19  ;;  %v38967_v19 = vld [vmem:[#allocation14_spill] sm:$0xff] }
 0x924   : > { %v8069_v11 = vpop.f32.mrf.mxu0 }
 0x925   : > { %v8070_v29 = vadd.f32 %v8069_v11, %v7943_v34  ;;  %v38968_v11 = vld [vmem:[#allocation55_spill] sm:$0xff] }
 0x926   : > { %v38969_v34 = vld [vmem:[#allocation15_spill] sm:$0xff] }
 0x92b   : > { %v28771_v52 = vpop.f32.mrf.mxu1 }
 0x92c   : > { %v8169_v53 = vadd.f32 %v28771_v52, %v8076_v15 }
 0x92d   : > { %v8162_v46 = vpop.f32.mrf.mxu1 }
 0x92e   : > { %v8201_v23 = vand.u32 4294901760, %v8169_v53  ;;  %v8163_v47 = vadd.f32 %v8162_v46, %v8070_v29 }
 0x930   : > { %v8289_v17 = vsub.f32 %v8169_v53, %v8201_v23  ;;  %v8204_v49 = vand.u32 4294901760, %v8163_v47  ;;  %28772 = vmatprep.subr.mxu0 %v8201_v23 }
 0x931   : > { %28773 = vmatpush3.msra.mxu0 %v8201_v23 }
 0x932   : > { %v8296_v37 = vsub.f32 %v8163_v47, %v8204_v49  ;;  %28774 = vmatprep.subr.mxu0 %v8204_v49  ;;  %v8290_v1 = vand.u32 4294901760, %v8289_v17 }
 0x933   : > { %28775 = vmatpush3.msra.mxu0 %v8204_v49 }
 0x934   : > { %28786 = vmatprep.subr.mxu0 %v8289_v17  ;;  %28777 = vmatmul.mubr.f32.vlgmr.msra.gmra.mxu0 %v33010_v5  ;;  %v8291_v0 = vsub.f32 %v8289_v17, %v8290_v1  ;;  %v8297_v22 = vand.u32 4294901760, %v8296_v37 }
 0x935   : > { %28787 = vmatpush3.msra.mxu0 %v8289_v17  ;;  %28790 = vmatprep.mubr.f32.mxu0 %v32989_v7  ;;  %v32181_v17 = vld [vmem:[%s32549_s23 + $0x10] sm:$0xff] }
 0x936   : > { %28788 = vmatprep.subr.mxu0 %v8296_v37  ;;  %v8292_v28 = vand.u32 4294901760, %v8291_v0  ;;  %v8298_v52 = vsub.f32 %v8296_v37, %v8297_v22  ;;  %v8674_v47 = vmul.f32 %v32181_v17, %v32181_v17  ;;  %v38972_v0 = vld [vmem:[#allocation22_spill] sm:$0xff] }
 0x937   : > { %28789 = vmatpush3.msra.mxu0 %v8296_v37  ;;  %v38970_v37 = vld [vmem:[#allocation16_spill] sm:$0xff]  ;;  %v38977_v17 = vld [vmem:[#allocation38_spill] sm:$0xff] }
 0x938   : > { %28779 = vmatprep.subr.mxu1 %v8292_v28  ;;  %28800 = vmatprep.subr.mxu0 %v8290_v1  ;;  %v8299_v53 = vand.u32 4294901760, %v8298_v52  ;;  %v38975_v52 = vld [vmem:[#allocation32_spill] sm:$0xff] }
 0x939   : > { %28780 = vmatpush3.msra.mxu1 %v8292_v28  ;;  %28791 = vmatmul.mubr.f32.vlgmr.msra.gmra.mxu0 %v33003_v59  ;;  %v38974_v28 = vld [vmem:[#allocation29_spill] sm:$0xff] }
 0x93a   : > { %28801 = vmatpush3.msra.mxu0 %v8290_v1  ;;  %28781 = vmatprep.subr.mxu1 %v8299_v53  ;;  %v38971_v1 = vld [vmem:[#allocation21_spill] sm:$0xff] }
 0x93b   : > { %28802 = vmatprep.subr.mxu0 %v8297_v22  ;;  %28782 = vmatpush3.msra.mxu1 %v8299_v53  ;;  %v38976_v53 = vld [vmem:[#allocation35_spill] sm:$0xff] }
 0x93c   : > { %28803 = vmatpush3.msra.mxu0 %v8297_v22  ;;  %28784 = vmatmul.mubr.f32.vlgmr.msra.gmra.mxu1 %v33000_v32  ;;  %v38973_v22 = vld [vmem:[#allocation24_spill] sm:$0xff] }
 0x93d   : > { %28793 = vmatprep.subr.mxu1 %v8201_v23  ;;  %28804 = vmatprep.mubr.f32.mxu0 %v32986_v61 }
 0x93e   : > { %28814 = vmatprep.subr.mxu0 %v32578_v12  ;;  %28794 = vmatpush3.msra.mxu1 %v8201_v23 }
 0x93f   : > { %28805 = vmatmul.mubr.f32.vlgmr.msra.gmra.mxu0 %v33000_v32  ;;  %28795 = vmatprep.subr.mxu1 %v8204_v49 }
 0x940   : > { %28815 = vmatpush3.msra.mxu0 %v32578_v12  ;;  %28796 = vmatpush3.msra.mxu1 %v8204_v49 }
 0x941   : > { %28816 = vmatprep.subr.mxu0 %v32572_v8  ;;  %28797 = vmatprep.mubr.f32.mxu1 %v32993_v54 }
 0x942   : > { %28817 = vmatpush3.msra.mxu0 %v32572_v8  ;;  %28798 = vmatmul.mubr.f32.vlgmr.msra.gmra.mxu1 %v33006_v26 }
 0x943   : > { %28807 = vmatprep.subr.mxu1 %v8201_v23  ;;  %28818 = vmatprep.subr.mxu0 %v32574_v9 }
 0x944   : > { %28808 = vmatpush3.msra.mxu1 %v8201_v23  ;;  %28819 = vmatpush3.msra.mxu0 %v32574_v9  ;;  %v32182_v23 = vld [vmem:[%s32549_s23 + $0x18] sm:$0xff] }
 0x945   : > { %28809 = vmatprep.subr.mxu1 %v8204_v49  ;;  %28820 = vmatprep.subr.mxu0 %v32576_v10  ;;  %v8675_v29 = vmul.f32 %v32182_v23, %v32182_v23  ;;  %v38979_v23 = vld [vmem:[#allocation44_spill] sm:$0xff] }
 0x946   : > { %28810 = vmatpush3.msra.mxu1 %v8204_v49  ;;  %28811 = vmatprep.mubr.f32.mxu1 %v32986_v61  ;;  %v34573_v49 = vand.u32 4294901760, %v8674_v47 }
 0x947   : > { %28821 = vmatpush3.msra.mxu0 %v32576_v10  ;;  %28812 = vmatmul.mubr.f32.vlgmr.msra.gmra.mxu1 %v33000_v32  ;;  %v34577_v46 = vand.u32 4294901760, %v8675_v29 }
 0x948   : > { %28822 = vmatprep.subr.mxu0 %v32570_v6  ;;  %28849 = vmatprep.subr.mxu1 %v32642_v38  ;;  %v34586_v15 = vsub.f32 %v8674_v47, %v34573_v49  ;;  %v38978_v47 = vld [vmem:[#allocation41_spill] sm:$0xff] }
 0x949   : > { %28823 = vmatpush3.msra.mxu0 %v32570_v6  ;;  %28850 = vmatpush3.msra.mxu1 %v32642_v38  ;;  %v34591_v39 = vsub.f32 %v8675_v29, %v34577_v46  ;;  %v38980_v29 = vld [vmem:[#allocation47_spill] sm:$0xff] }
 0x94a   : > { %28824 = vmatprep.subr.mxu0 %v32580_v13  ;;  %28851 = vmatprep.subr.mxu1 %v38709_v40  ;;  %v8759_v41 = vand.u32 4294901760, %v34586_v15 }
 0x94b   : > { %28825 = vmatpush3.msra.mxu0 %v32580_v13  ;;  %28852 = vmatpush3.msra.mxu1 %v38709_v40  ;;  %v38218_v2 = vand.u32 4294901760, %v34591_v39 }
 0x94c   : > { %28826 = vmatprep.subr.mxu0 %v32582_v14  ;;  %28853 = vmatprep.subr.mxu1 %v38710_v57  ;;  %v8760_v36 = vsub.f32 %v34586_v15, %v8759_v41 }
 0x94d   : > { %28827 = vmatpush3.msra.mxu0 %v32582_v14  ;;  %28854 = vmatpush3.msra.mxu1 %v38710_v57  ;;  %v8770_v3 = vsub.f32 %v34591_v39, %v38218_v2  ;;  %v38985_v2 = vld [vmem:[#allocation20_spill] sm:$0xff] }
 0x94e   : > { %28828 = vmatprep.subr.mxu0 %v32600_v21  ;;  %28855 = vmatprep.subr.mxu1 %v38711_v24  ;;  %v8761_v60 = vand.u32 4294901760, %v8760_v36  ;;  %v38981_v36 = vld [vmem:[#allocation50_spill] sm:$0xff] }
 0x94f   : > { %28829 = vmatpush3.msra.mxu0 %v32600_v21  ;;  %28856 = vmatpush3.msra.mxu1 %v38711_v24  ;;  %v8771_v56 = vand.u32 4294901760, %v8770_v3  ;;  %v38982_v3 = vld [vmem:[#allocation19_spill] sm:$0xff] }
 0x950   : > { %28830 = vmatprep.subr.mxu0 %v32625_v30  ;;  %28857 = vmatprep.subr.mxu1 %v38712_v58 }
 0x951   : > { %28831 = vmatpush3.msra.mxu0 %v32625_v30  ;;  %28858 = vmatpush3.msra.mxu1 %v38712_v58 }
 0x952   : > { %28832 = vmatprep.subr.mxu0 %v32635_v35  ;;  %28859 = vmatprep.subr.mxu1 %v38713_v50 }
 0x953   : > { %28833 = vmatpush3.msra.mxu0 %v32635_v35  ;;  %28860 = vmatpush3.msra.mxu1 %v38713_v50 }
 0x954   : > { %28834 = vmatprep.subr.mxu0 %v32655_v44  ;;  %28861 = vmatprep.subr.mxu1 %v38714_v62 }
 0x955   : > { %28835 = vmatpush3.msra.mxu0 %v32655_v44  ;;  %28862 = vmatpush3.msra.mxu1 %v38714_v62 }
 0x956   : > { %28836 = vmatprep.subr.mxu0 %v32666_v48  ;;  %28863 = vmatprep.subr.mxu1 %v38715_v42 }
 0x957   : > { %28837 = vmatpush3.msra.mxu0 %v32666_v48  ;;  %28864 = vmatpush3.msra.mxu1 %v38715_v42 }
 0x958   : > { %28838 = vmatprep.subr.mxu0 %v32684_v55  ;;  %28865 = vmatprep.subr.mxu1 %v38716_v20 }
 0x959   : > { %28839 = vmatpush3.msra.mxu0 %v32684_v55  ;;  %28866 = vmatpush3.msra.mxu1 %v38716_v20 }
 0x95a   : > { %28840 = vmatprep.subr.mxu0 %v32718_v4  ;;  %28867 = vmatprep.subr.mxu1 %v38717_v25 }
 0x95b   : > { %28841 = vmatpush3.msra.mxu0 %v32718_v4  ;;  %28868 = vmatpush3.msra.mxu1 %v38717_v25 }
 0x95c   : > { %28842 = vmatprep.subr.mxu0 %v32737_v31  ;;  %28869 = vmatprep.subr.mxu1 %v32792_v63 }
 0x95d   : > { %28843 = vmatpush3.msra.mxu0 %v32737_v31  ;;  %28870 = vmatpush3.msra.mxu1 %v32792_v63 }
 0x95e   : > { %28844 = vmatprep.subr.mxu0 %v32753_v43  ;;  %28871 = vmatprep.subr.mxu1 %v32809_v51 }
 0x95f   : > { %28845 = vmatpush3.msra.mxu0 %v32753_v43  ;;  %28872 = vmatpush3.msra.mxu1 %v32809_v51 }
 0x960   : > { %28846 = vmatprep.mubr.f32.mxu0 %v8761_v60  ;;  %28873 = vmatprep.subr.mxu1 %v32820_v45  ;;  %v38983_v60 = vld [vmem:[#allocation17_spill] sm:$0xff] }
 0x961   : > { %28884 = vmatprep.subr.mxu0 %v32595_v18  ;;  %28847 = vmatmul.mubr.f32.vlgmr.msra.gmra.mxu0 %v8771_v56  ;;  %v38984_v56 = vld [vmem:[#allocation18_spill] sm:$0xff] }
 0x962   : > { %28874 = vmatpush3.msra.mxu1 %v32820_v45  ;;  %28885 = vmatpush3.msra.mxu0 %v32595_v18 }
 0x963   : > { %28875 = vmatprep.subr.mxu1 %v38834_v33  ;;  %28886 = vmatprep.subr.mxu0 %v38835_v16 }
 0x964   : > { %28876 = vmatpush3.msra.mxu1 %v38834_v33  ;;  %28887 = vmatpush3.msra.mxu0 %v38835_v16 }
 0x965   : > { %28877 = vmatprep.subr.mxu1 %v38966_v27  ;;  %28888 = vmatprep.subr.mxu0 %v38967_v19 }
 0x966   : > { %28878 = vmatpush3.msra.mxu1 %v38966_v27  ;;  %28889 = vmatpush3.msra.mxu0 %v38967_v19 }
 0x967   : > { %28879 = vmatprep.subr.mxu1 %v38968_v11  ;;  %28890 = vmatprep.subr.mxu0 %v38969_v34 }
 0x968   : > { %28880 = vmatpush3.msra.mxu1 %v38968_v11  ;;  %28881 = vmatprep.mubr.f32.mxu1 %v34573_v49 }
 0x969   : > { %28891 = vmatpush3.msra.mxu0 %v38969_v34  ;;  %28882 = vmatmul.mubr.f32.vlgmr.msra.gmra.mxu1 %v34577_v46 }
 0x96a   : > { %28892 = vmatprep.subr.mxu0 %v38970_v37  ;;  %28919 = vmatprep.subr.mxu1 %v32578_v12 }
 0x96b   : > { %28893 = vmatpush3.msra.mxu0 %v38970_v37  ;;  %28920 = vmatpush3.msra.mxu1 %v32578_v12 }
 0x96c   : > { %28894 = vmatprep.subr.mxu0 %v38971_v1  ;;  %28921 = vmatprep.subr.mxu1 %v32572_v8 }
 0x96d   : > { %28895 = vmatpush3.msra.mxu0 %v38971_v1  ;;  %28922 = vmatpush3.msra.mxu1 %v32572_v8 }
 0x96e   : > { %28896 = vmatprep.subr.mxu0 %v38972_v0  ;;  %28923 = vmatprep.subr.mxu1 %v32574_v9 }
 0x96f   : > { %28897 = vmatpush3.msra.mxu0 %v38972_v0  ;;  %28924 = vmatpush3.msra.mxu1 %v32574_v9 }
 0x970   : > { %28898 = vmatprep.subr.mxu0 %v38973_v22  ;;  %28925 = vmatprep.subr.mxu1 %v32576_v10 }
 0x971   : > { %28899 = vmatpush3.msra.mxu0 %v38973_v22  ;;  %28926 = vmatpush3.msra.mxu1 %v32576_v10 }
 0x972   : > { %28900 = vmatprep.subr.mxu0 %v38974_v28  ;;  %28927 = vmatprep.subr.mxu1 %v32570_v6 }
 0x973   : > { %28901 = vmatpush3.msra.mxu0 %v38974_v28  ;;  %28928 = vmatpush3.msra.mxu1 %v32570_v6 }
 0x974   : > { %28902 = vmatprep.subr.mxu0 %v38975_v52  ;;  %28929 = vmatprep.subr.mxu1 %v32580_v13 }
 0x975   : > { %28903 = vmatpush3.msra.mxu0 %v38975_v52  ;;  %28930 = vmatpush3.msra.mxu1 %v32580_v13  ;;  %v39004_v52 = vld [vmem:[#allocation83_spill] sm:$0xff] }
 0x976   : > { %28904 = vmatprep.subr.mxu0 %v38976_v53  ;;  %28931 = vmatprep.subr.mxu1 %v32582_v14  ;;  %v34789_v28 = vmul.f32 %v39004_v52, %v39004_v52 }
 0x977   : > { %28905 = vmatpush3.msra.mxu0 %v38976_v53  ;;  %28932 = vmatpush3.msra.mxu1 %v32582_v14 }
 0x978   : > { %28906 = vmatprep.subr.mxu0 %v38977_v17  ;;  %28933 = vmatprep.subr.mxu1 %v32600_v21  ;;  %39005 = vst [vmem:[#allocation83_spill] sm:$0xff] %v34789_v28 }
 0x979   : > { %28907 = vmatpush3.msra.mxu0 %v38977_v17  ;;  %28934 = vmatpush3.msra.mxu1 %v32600_v21 }
 0x97a   : > { %28908 = vmatprep.subr.mxu0 %v38978_v47  ;;  %28935 = vmatprep.subr.mxu1 %v32625_v30 }
 0x97b   : > { %28909 = vmatpush3.msra.mxu0 %v38978_v47  ;;  %28936 = vmatpush3.msra.mxu1 %v32625_v30 }
 0x97c   : > { %28910 = vmatprep.subr.mxu0 %v38979_v23  ;;  %28937 = vmatprep.subr.mxu1 %v32635_v35 }
 0x97d   : > { %28911 = vmatpush3.msra.mxu0 %v38979_v23  ;;  %28938 = vmatpush3.msra.mxu1 %v32635_v35 }
 0x97e   : > { %28912 = vmatprep.subr.mxu0 %v38980_v29  ;;  %28939 = vmatprep.subr.mxu1 %v32655_v44 }
 0x97f   : > { %28913 = vmatpush3.msra.mxu0 %v38980_v29  ;;  %28940 = vmatpush3.msra.mxu1 %v32655_v44 }
 0x980   : > { %28914 = vmatprep.subr.mxu0 %v38981_v36  ;;  %28941 = vmatprep.subr.mxu1 %v32666_v48 }
 0x981   : > { %28915 = vmatpush3.msra.mxu0 %v38981_v36  ;;  %28916 = vmatprep.mubr.f32.mxu0 %v34586_v15  ;;  %v38989_v15 = vld [vmem:[#allocation27_spill] sm:$0xff] }
 0x982   : > { %28942 = vmatpush3.msra.mxu1 %v32666_v48  ;;  %28917 = vmatmul.mubr.f32.vlgmr.msra.gmra.mxu0 %v34591_v39 }
 0x983   : > { %28943 = vmatprep.subr.mxu1 %v32684_v55  ;;  %28954 = vmatprep.subr.mxu0 %v38982_v3 }
 0x984   : > { %28944 = vmatpush3.msra.mxu1 %v32684_v55  ;;  %28955 = vmatpush3.msra.mxu0 %v38982_v3  ;;  %v38987_v3 = vld [vmem:[#allocation23_spill] sm:$0xff] }
 0x985   : > { %28945 = vmatprep.subr.mxu1 %v32718_v4  ;;  %28956 = vmatprep.subr.mxu0 %v38983_v60 }
 0x986   : > { %28946 = vmatpush3.msra.mxu1 %v32718_v4  ;;  %28957 = vmatpush3.msra.mxu0 %v38983_v60  ;;  %v38986_v60 = vand.u32 4294901760, %v34591_v39  ;;  %v38990_v39 = vld [vmem:[#allocation31_spill] sm:$0xff] }
 0x987   : > { %28947 = vmatprep.subr.mxu1 %v32737_v31  ;;  %28958 = vmatprep.subr.mxu0 %v38984_v56 }
 0x988   : > { %28948 = vmatpush3.msra.mxu1 %v32737_v31  ;;  %28959 = vmatpush3.msra.mxu0 %v38984_v56  ;;  %v38988_v56 = vld [vmem:[#allocation26_spill] sm:$0xff] }
 0x989   : > { %28949 = vmatprep.subr.mxu1 %v32753_v43  ;;  %28960 = vmatprep.subr.mxu0 %v38985_v2 }
 0x98a   : > { %28950 = vmatpush3.msra.mxu1 %v32753_v43  ;;  %28951 = vmatprep.mubr.f32.mxu1 %v8759_v41  ;;  %v38991_v41 = vld [vmem:[#allocation34_spill] sm:$0xff] }
 0x98b   : > { %28961 = vmatpush3.msra.mxu0 %v38985_v2  ;;  %28952 = vmatmul.mubr.f32.vlgmr.msra.gmra.mxu1 %v38986_v60  ;;  %v38992_v60 = vld [vmem:[#allocation37_spill] sm:$0xff] }
 0x98c   : > { %28962 = vmatprep.subr.mxu0 %v38987_v3  ;;  %28989 = vmatprep.subr.mxu1 %v32578_v12 }
 0x98d   : > { %28963 = vmatpush3.msra.mxu0 %v38987_v3  ;;  %28990 = vmatpush3.msra.mxu1 %v32578_v12 }
 0x98e   : > { %28964 = vmatprep.subr.mxu0 %v38988_v56  ;;  %28991 = vmatprep.subr.mxu1 %v32572_v8 }
 0x98f   : > { %28965 = vmatpush3.msra.mxu0 %v38988_v56  ;;  %28992 = vmatpush3.msra.mxu1 %v32572_v8 }
 0x990   : > { %28966 = vmatprep.subr.mxu0 %v38989_v15  ;;  %28993 = vmatprep.subr.mxu1 %v32574_v9 }
 0x991   : > { %28967 = vmatpush3.msra.mxu0 %v38989_v15  ;;  %28994 = vmatpush3.msra.mxu1 %v32574_v9  ;;  %v38993_v15 = vld [vmem:[#allocation40_spill] sm:$0xff] }
 0x992   : > { %28968 = vmatprep.subr.mxu0 %v38990_v39  ;;  %28995 = vmatprep.subr.mxu1 %v32576_v10 }
 0x993   : > { %28969 = vmatpush3.msra.mxu0 %v38990_v39  ;;  %28996 = vmatpush3.msra.mxu1 %v32576_v10  ;;  %v38994_v39 = vld [vmem:[#allocation43_spill] sm:$0xff] }
 0x994   : > { %28970 = vmatprep.subr.mxu0 %v38991_v41  ;;  %28997 = vmatprep.subr.mxu1 %v32570_v6 }
 0x995   : > { %28971 = vmatpush3.msra.mxu0 %v38991_v41  ;;  %28998 = vmatpush3.msra.mxu1 %v32570_v6  ;;  %v38995_v41 = vld [vmem:[#allocation46_spill] sm:$0xff] }
 0x996   : > { %28972 = vmatprep.subr.mxu0 %v38992_v60  ;;  %28999 = vmatprep.subr.mxu1 %v32580_v13 }
 0x997   : > { %28973 = vmatpush3.msra.mxu0 %v38992_v60  ;;  %29000 = vmatpush3.msra.mxu1 %v32580_v13  ;;  %v38996_v60 = vld [vmem:[#allocation49_spill] sm:$0xff] }
 0x998   : > { %28974 = vmatprep.subr.mxu0 %v38993_v15  ;;  %29001 = vmatprep.subr.mxu1 %v32582_v14 }
 0x999   : > { %28975 = vmatpush3.msra.mxu0 %v38993_v15  ;;  %29002 = vmatpush3.msra.mxu1 %v32582_v14  ;;  %v38997_v15 = vld [vmem:[#allocation51_spill] sm:$0xff] }
 0x99a   : > { %28976 = vmatprep.subr.mxu0 %v38994_v39  ;;  %29003 = vmatprep.subr.mxu1 %v32600_v21 }
 0x99b   : > { %28977 = vmatpush3.msra.mxu0 %v38994_v39  ;;  %29004 = vmatpush3.msra.mxu1 %v32600_v21  ;;  %v38998_v39 = vld [vmem:[#allocation52_spill] sm:$0xff] }
 0x99c   : > { %28978 = vmatprep.subr.mxu0 %v38995_v41  ;;  %29005 = vmatprep.subr.mxu1 %v32625_v30 }
 0x99d   : > { %28979 = vmatpush3.msra.mxu0 %v38995_v41  ;;  %29006 = vmatpush3.msra.mxu1 %v32625_v30 }
 0x99e   : > { %28980 = vmatprep.subr.mxu0 %v38996_v60  ;;  %29007 = vmatprep.subr.mxu1 %v32635_v35 }
 0x99f   : > { %28981 = vmatpush3.msra.mxu0 %v38996_v60  ;;  %29008 = vmatpush3.msra.mxu1 %v32635_v35 }
 0x9a0   : > { %28982 = vmatprep.subr.mxu0 %v38997_v15  ;;  %29009 = vmatprep.subr.mxu1 %v32655_v44 }
 0x9a1   : > { %28983 = vmatpush3.msra.mxu0 %v38997_v15  ;;  %29010 = vmatpush3.msra.mxu1 %v32655_v44  ;;  %v38999_v15 = vld [vmem:[#allocation56_spill] sm:$0xff] }
 0x9a2   : > { %28984 = vmatprep.subr.mxu0 %v38998_v39  ;;  %29011 = vmatprep.subr.mxu1 %v32666_v48 }
 0x9a3   : > { %28985 = vmatpush3.msra.mxu0 %v38998_v39  ;;  %28986 = vmatprep.mubr.f32.mxu0 %v34573_v49 }
 0x9a4   : > { %29012 = vmatpush3.msra.mxu1 %v32666_v48  ;;  %28987 = vmatmul.mubr.f32.vlgmr.msra.gmra.mxu0 %v34577_v46 }
 0x9a5   : > { %29013 = vmatprep.subr.mxu1 %v32684_v55  ;;  %29021 = vmatprep.mubr.f32.mxu1 %v34573_v49 }
 0x9a6   : > { %29014 = vmatpush3.msra.mxu1 %v32684_v55  ;;  %29028 = vmatprep.mubr.f32.mxu0 %v38999_v15 }
 0x9a7   : > { %29015 = vmatprep.subr.mxu1 %v32718_v4 }
 0x9a8   : > { %29016 = vmatpush3.msra.mxu1 %v32718_v4 }
 0x9a9   : > { %29017 = vmatprep.subr.mxu1 %v32737_v31 }
 0x9aa   : > { %29018 = vmatpush3.msra.mxu1 %v32737_v31 }
 0x9ab   : > { %29019 = vmatprep.subr.mxu1 %v32753_v43 }
 0x9ac   : > { %29020 = vmatpush3.msra.mxu1 %v32753_v43 }
 0x9ad   : > { %29022 = vmatmul.mubr.f32.vlgmr.msra.gmra.mxu1 %v34577_v46 }
 0x9ae   : > { %29035 = vmatprep.mubr.f32.mxu1 %v32986_v61 }
 0x9f4   : > { %v28778_v49 = vpop.f32.mrf.mxu0 }
 0x9f6   : > { %v34779_v39 = vpop.f32.mrf.mxu0 }
 0x9f7   : > { %39000 = vst [vmem:[#allocation86_spill] sm:$0xff] %v34779_v39 }
 0x9f9   : > { %v28792_v15 = vpop.f32.mrf.mxu0 }
 0x9fb   : > { %v34783_v3 = vpop.f32.mrf.mxu0 }
 0x9fc   : > { %v28785_v60 = vpop.f32.mrf.mxu1  ;;  %39002 = vst [vmem:[#allocation88_spill] sm:$0xff] %v34783_v3 }
 0x9fd   : > { %v8343_v41 = vadd.f32 %v28785_v60, %v28778_v49 }
 0x9fe   : > { %v34781_v56 = vpop.f32.mrf.mxu1 }
 0x9ff   : > { %39001 = vst [vmem:[#allocation87_spill] sm:$0xff] %v34781_v56  ;;  %v8426_v2 = vadd.f32 %v28792_v15, %v8343_v41  ;;  %v28806_v29 = vpop.f32.mrf.mxu0 }
 0xa01   : > { %v34800_v41 = vpop.f32.mrf.mxu0 }
 0xa02   : > { %v28799_v36 = vpop.f32.mrf.mxu1  ;;  %39009 = vst [vmem:[#allocation93_spill] sm:$0xff] %v34800_v41 }
 0xa03   : > { %v8509_v23 = vadd.f32 %v28799_v36, %v8426_v2 }
 0xa04   : > { %v34785_v47 = vpop.f32.mrf.mxu1 }
 0xa05   : > { %39003 = vst [vmem:[#allocation89_spill] sm:$0xff] %v34785_v47  ;;  %v8592_v17 = vadd.f32 %v28806_v29, %v8509_v23 }
 0xa07   : > { %v28813_v46 = vpop.f32.mrf.mxu1 }
 0xa08   : > { %v8671_v53 = vadd.f32 %v28813_v46, %v8592_v17 }
 0xa09   : > { %v34802_v36 = vpop.f32.mrf.mxu1 }
 0xa0a   : > { %v34791_v39 = vmul.f32 %v8671_v53, %v8671_v53  ;;  %v34794_v60 = vmul.f32 %v8671_v53, %v39004_v52  ;;  %39010 = vst [vmem:[#allocation94_spill] sm:$0xff] %v34802_v36 }
 0xa0c   : > { %39006 = vst [vmem:[#allocation90_spill] sm:$0xff] %v34791_v39  ;;  %39007 = vst [vmem:[#allocation91_spill] sm:$0xff] %v34794_v60  ;;  %v34798_v15 = vadd.f32 %v34791_v39, %v34789_v28 }
 0xa0e   : > { %39008 = vst [vmem:[#allocation92_spill] sm:$0xff] %v34798_v15 }
 0xa21   : > { %v28848_v2 = vpop.f32.mrf.mxu0 }
 0xa23   : > { %v8763_v23 = vpop.f32.mrf.mxu0 }
 0xa29   : > { %v28883_v17 = vpop.f32.mrf.mxu1 }
 0xa2a   : > { %v8931_v3 = vadd.f32 %v28883_v17, %v28848_v2 }
 0xa2b   : > { %v8924_v49 = vpop.f32.mrf.mxu1 }
 0xa2c   : > { %v8925_v22 = vadd.f32 %v8924_v49, %v8763_v23  ;;  %v39011_v49 = vld [vmem:[#allocation54_spill] sm:$0xff] }
 0xa42   : > { %v28918_v29 = vpop.f32.mrf.mxu0 }
 0xa43   : > { %v9042_v52 = vadd.f32 %v28918_v29, %v8931_v3 }
 0xa44   : > { %v9034_v46 = vpop.f32.mrf.mxu0 }
 0xa45   : > { %v9035_v60 = vadd.f32 %v9034_v46, %v8925_v22  ;;  %v39012_v46 = vld [vmem:[#allocation14_spill] sm:$0xff] }
 0xa4b   : > { %v28953_v47 = vpop.f32.mrf.mxu1 }
 0xa4c   : > { %v9139_v0 = vadd.f32 %v28953_v47, %v9042_v52  ;;  %v39013_v52 = vld [vmem:[#allocation55_spill] sm:$0xff] }
 0xa4d   : > { %v9130_v53 = vpop.f32.mrf.mxu1 }
 0xa4e   : > { %v9131_v15 = vadd.f32 %v9130_v53, %v9035_v60  ;;  %v39014_v53 = vld [vmem:[#allocation15_spill] sm:$0xff] }
 0xa64   : > { %v28988_v56 = vpop.f32.mrf.mxu0 }
 0xa65   : > { %v9264_v28 = vadd.f32 %v28988_v56, %v9139_v0 }
 0xa66   : > { %v9257_v39 = vpop.f32.mrf.mxu0 }
 0xa67   : > { %v9258_v1 = vadd.f32 %v9257_v39, %v9131_v15 }
 0xa6d   : > { %v29023_v41 = vpop.f32.mrf.mxu1 }
 0xa6e   : > { %v9357_v37 = vadd.f32 %v29023_v41, %v9264_v28 }
 0xa6f   : > { %v9350_v36 = vpop.f32.mrf.mxu1 }
 0xa70   : > { %v9389_v34 = vand.u32 4294901760, %v9357_v37  ;;  %v9351_v11 = vadd.f32 %v9350_v36, %v9258_v1 }
 0xa72   : > { %v9477_v19 = vsub.f32 %v9357_v37, %v9389_v34  ;;  %v9392_v27 = vand.u32 4294901760, %v9351_v11  ;;  %29024 = vmatprep.subr.mxu0 %v9389_v34 }
 0xa73   : > { %29025 = vmatpush3.msra.mxu0 %v9389_v34 }
 0xa74   : > { %v9484_v2 = vsub.f32 %v9351_v11, %v9392_v27  ;;  %29026 = vmatprep.subr.mxu0 %v9392_v27  ;;  %v9478_v23 = vand.u32 4294901760, %v9477_v19 }
 0xa75   : > { %29027 = vmatpush3.msra.mxu0 %v9392_v27 }
 0xa76   : > { %29038 = vmatprep.subr.mxu0 %v9477_v19  ;;  %29029 = vmatmul.mubr.f32.vlgmr.msra.gmra.mxu0 %v33010_v5  ;;  %v9479_v22 = vsub.f32 %v9477_v19, %v9478_v23  ;;  %v9485_v47 = vand.u32 4294901760, %v9484_v2 }
 0xa77   : > { %29039 = vmatpush3.msra.mxu0 %v9477_v19  ;;  %29042 = vmatprep.mubr.f32.mxu0 %v32989_v7  ;;  %v34825_v19 = vld [vmem:[%s32556_s28 + $0x10] sm:$0xff] }
 0xa78   : > { %29040 = vmatprep.subr.mxu0 %v9484_v2  ;;  %v9480_v0 = vand.u32 4294901760, %v9479_v22  ;;  %v9486_v28 = vsub.f32 %v9484_v2, %v9485_v47  ;;  %v9862_v11 = vmul.f32 %v34825_v19, %v34825_v19  ;;  %v39017_v22 = vld [vmem:[#allocation22_spill] sm:$0xff] }
 0xa79   : > { %29041 = vmatpush3.msra.mxu0 %v9484_v2  ;;  %v39015_v2 = vld [vmem:[#allocation16_spill] sm:$0xff] }
 0xa7a   : > { %29031 = vmatprep.subr.mxu1 %v9480_v0  ;;  %29052 = vmatprep.subr.mxu0 %v9478_v23  ;;  %v9487_v37 = vand.u32 4294901760, %v9486_v28  ;;  %v34842_v1 = vand.u32 4294901760, %v9862_v11  ;;  %v39020_v28 = vld [vmem:[#allocation32_spill] sm:$0xff] }
 0xa7b   : > { %29032 = vmatpush3.msra.mxu1 %v9480_v0  ;;  %29043 = vmatmul.mubr.f32.vlgmr.msra.gmra.mxu0 %v33003_v59  ;;  %v39019_v0 = vld [vmem:[#allocation29_spill] sm:$0xff] }
 0xa7c   : > { %29053 = vmatpush3.msra.mxu0 %v9478_v23  ;;  %29033 = vmatprep.subr.mxu1 %v9487_v37  ;;  %v34855_v56 = vsub.f32 %v9862_v11, %v34842_v1  ;;  %v39016_v23 = vld [vmem:[#allocation21_spill] sm:$0xff]  ;;  %v39022_v11 = vld [vmem:[#allocation38_spill] sm:$0xff] }
 0xa7d   : > { %29054 = vmatprep.subr.mxu0 %v9485_v47  ;;  %29034 = vmatpush3.msra.mxu1 %v9487_v37  ;;  %v39021_v37 = vld [vmem:[#allocation35_spill] sm:$0xff] }
 0xa7e   : > { %29055 = vmatpush3.msra.mxu0 %v9485_v47  ;;  %29036 = vmatmul.mubr.f32.vlgmr.msra.gmra.mxu1 %v33000_v32  ;;  %v38256_v60 = vand.u32 4294901760, %v34855_v56  ;;  %v39018_v47 = vld [vmem:[#allocation24_spill] sm:$0xff] }
 0xa7f   : > { %29045 = vmatprep.subr.mxu1 %v9389_v34  ;;  %29056 = vmatprep.mubr.f32.mxu0 %v32986_v61 }
 0xa80   : > { %29066 = vmatprep.subr.mxu0 %v32578_v12  ;;  %29046 = vmatpush3.msra.mxu1 %v9389_v34  ;;  %v9948_v41 = vsub.f32 %v34855_v56, %v38256_v60  ;;  %v39029_v60 = vld [vmem:[#allocation18_spill] sm:$0xff] }
 0xa81   : > { %29057 = vmatmul.mubr.f32.vlgmr.msra.gmra.mxu0 %v33000_v32  ;;  %29047 = vmatprep.subr.mxu1 %v9392_v27 }
 0xa82   : > { %29067 = vmatpush3.msra.mxu0 %v32578_v12  ;;  %29048 = vmatpush3.msra.mxu1 %v9392_v27  ;;  %v9949_v17 = vand.u32 4294901760, %v9948_v41  ;;  %v39024_v41 = vld [vmem:[#allocation44_spill] sm:$0xff] }
 0xa83   : > { %29068 = vmatprep.subr.mxu0 %v32572_v8  ;;  %29049 = vmatprep.mubr.f32.mxu1 %v32993_v54 }
 0xa84   : > { %29069 = vmatpush3.msra.mxu0 %v32572_v8  ;;  %29050 = vmatmul.mubr.f32.vlgmr.msra.gmra.mxu1 %v33006_v26 }
 0xa85   : > { %29059 = vmatprep.subr.mxu1 %v9389_v34  ;;  %29070 = vmatprep.subr.mxu0 %v32574_v9 }
 0xa86   : > { %29060 = vmatpush3.msra.mxu1 %v9389_v34  ;;  %29071 = vmatpush3.msra.mxu0 %v32574_v9 }
 0xa87   : > { %29061 = vmatprep.subr.mxu1 %v9392_v27  ;;  %29072 = vmatprep.subr.mxu0 %v32576_v10 }
 0xa88   : > { %29062 = vmatpush3.msra.mxu1 %v9392_v27  ;;  %29063 = vmatprep.mubr.f32.mxu1 %v32986_v61  ;;  %v34832_v27 = vld [vmem:[%s32556_s28 + $0x18] sm:$0xff] }
 0xa89   : > { %29073 = vmatpush3.msra.mxu0 %v32576_v10  ;;  %29064 = vmatmul.mubr.f32.vlgmr.msra.gmra.mxu1 %v33000_v32  ;;  %v9863_v34 = vmul.f32 %v34832_v27, %v34832_v27 }
 0xa8a   : > { %29074 = vmatprep.subr.mxu0 %v32570_v6  ;;  %29101 = vmatprep.subr.mxu1 %v32642_v38 }
 0xa8b   : > { %29075 = vmatpush3.msra.mxu0 %v32570_v6  ;;  %29102 = vmatpush3.msra.mxu1 %v32642_v38  ;;  %v34846_v3 = vand.u32 4294901760, %v9863_v34 }
 0xa8c   : > { %29076 = vmatprep.subr.mxu0 %v32580_v13  ;;  %29103 = vmatprep.subr.mxu1 %v38709_v40 }
 0xa8d   : > { %29077 = vmatpush3.msra.mxu0 %v32580_v13  ;;  %29104 = vmatpush3.msra.mxu1 %v38709_v40  ;;  %v34860_v39 = vsub.f32 %v9863_v34, %v34846_v3  ;;  %v39023_v34 = vld [vmem:[#allocation41_spill] sm:$0xff] }
 0xa8e   : > { %29078 = vmatprep.subr.mxu0 %v32582_v14  ;;  %29105 = vmatprep.subr.mxu1 %v38710_v57 }
 0xa8f   : > { %29079 = vmatpush3.msra.mxu0 %v32582_v14  ;;  %29106 = vmatpush3.msra.mxu1 %v38710_v57  ;;  %v38255_v15 = vand.u32 4294901760, %v34860_v39 }
 0xa90   : > { %29080 = vmatprep.subr.mxu0 %v32600_v21  ;;  %29107 = vmatprep.subr.mxu1 %v38711_v24 }
 0xa91   : > { %29081 = vmatpush3.msra.mxu0 %v32600_v21  ;;  %29108 = vmatpush3.msra.mxu1 %v38711_v24  ;;  %v9958_v36 = vsub.f32 %v34860_v39, %v38255_v15  ;;  %v39028_v15 = vld [vmem:[#allocation17_spill] sm:$0xff] }
 0xa92   : > { %29082 = vmatprep.subr.mxu0 %v32625_v30  ;;  %29109 = vmatprep.subr.mxu1 %v38712_v58 }
 0xa93   : > { %29083 = vmatpush3.msra.mxu0 %v32625_v30  ;;  %29110 = vmatpush3.msra.mxu1 %v38712_v58  ;;  %v9959_v29 = vand.u32 4294901760, %v9958_v36  ;;  %v39025_v36 = vld [vmem:[#allocation47_spill] sm:$0xff] }
 0xa94   : > { %29084 = vmatprep.subr.mxu0 %v32635_v35  ;;  %29111 = vmatprep.subr.mxu1 %v38713_v50 }
 0xa95   : > { %29085 = vmatpush3.msra.mxu0 %v32635_v35  ;;  %29112 = vmatpush3.msra.mxu1 %v38713_v50 }
 0xa96   : > { %29086 = vmatprep.subr.mxu0 %v32655_v44  ;;  %29113 = vmatprep.subr.mxu1 %v38714_v62 }
 0xa97   : > { %29087 = vmatpush3.msra.mxu0 %v32655_v44  ;;  %29114 = vmatpush3.msra.mxu1 %v38714_v62 }
 0xa98   : > { %29088 = vmatprep.subr.mxu0 %v32666_v48  ;;  %29115 = vmatprep.subr.mxu1 %v38715_v42 }
 0xa99   : > { %29089 = vmatpush3.msra.mxu0 %v32666_v48  ;;  %29116 = vmatpush3.msra.mxu1 %v38715_v42 }
 0xa9a   : > { %29090 = vmatprep.subr.mxu0 %v32684_v55  ;;  %29117 = vmatprep.subr.mxu1 %v38716_v20 }
 0xa9b   : > { %29091 = vmatpush3.msra.mxu0 %v32684_v55  ;;  %29118 = vmatpush3.msra.mxu1 %v38716_v20 }
 0xa9c   : > { %29092 = vmatprep.subr.mxu0 %v32718_v4  ;;  %29119 = vmatprep.subr.mxu1 %v38717_v25 }
 0xa9d   : > { %29093 = vmatpush3.msra.mxu0 %v32718_v4  ;;  %29120 = vmatpush3.msra.mxu1 %v38717_v25 }
 0xa9e   : > { %29094 = vmatprep.subr.mxu0 %v32737_v31  ;;  %29121 = vmatprep.subr.mxu1 %v32792_v63 }
 0xa9f   : > { %29095 = vmatpush3.msra.mxu0 %v32737_v31  ;;  %29122 = vmatpush3.msra.mxu1 %v32792_v63 }
 0xaa0   : > { %29096 = vmatprep.subr.mxu0 %v32753_v43  ;;  %29123 = vmatprep.subr.mxu1 %v32809_v51 }
 0xaa1   : > { %29097 = vmatpush3.msra.mxu0 %v32753_v43  ;;  %29124 = vmatpush3.msra.mxu1 %v32809_v51 }
 0xaa2   : > { %29098 = vmatprep.mubr.f32.mxu0 %v9949_v17  ;;  %29125 = vmatprep.subr.mxu1 %v32820_v45  ;;  %v39026_v17 = vld [vmem:[#allocation50_spill] sm:$0xff] }
 0xaa3   : > { %29136 = vmatprep.subr.mxu0 %v32595_v18  ;;  %29099 = vmatmul.mubr.f32.vlgmr.msra.gmra.mxu0 %v9959_v29  ;;  %v39027_v29 = vld [vmem:[#allocation19_spill] sm:$0xff] }
 0xaa4   : > { %29126 = vmatpush3.msra.mxu1 %v32820_v45  ;;  %29137 = vmatpush3.msra.mxu0 %v32595_v18 }
 0xaa5   : > { %29127 = vmatprep.subr.mxu1 %v38834_v33  ;;  %29138 = vmatprep.subr.mxu0 %v38835_v16 }
 0xaa6   : > { %29128 = vmatpush3.msra.mxu1 %v38834_v33  ;;  %29139 = vmatpush3.msra.mxu0 %v38835_v16 }
 0xaa7   : > { %29129 = vmatprep.subr.mxu1 %v39011_v49  ;;  %29140 = vmatprep.subr.mxu0 %v39012_v46 }
 0xaa8   : > { %29130 = vmatpush3.msra.mxu1 %v39011_v49  ;;  %29141 = vmatpush3.msra.mxu0 %v39012_v46 }
 0xaa9   : > { %29131 = vmatprep.subr.mxu1 %v39013_v52  ;;  %29142 = vmatprep.subr.mxu0 %v39014_v53 }
 0xaaa   : > { %29132 = vmatpush3.msra.mxu1 %v39013_v52  ;;  %29133 = vmatprep.mubr.f32.mxu1 %v34842_v1 }
 0xaab   : > { %29143 = vmatpush3.msra.mxu0 %v39014_v53  ;;  %29134 = vmatmul.mubr.f32.vlgmr.msra.gmra.mxu1 %v34846_v3 }
 0xaac   : > { %29144 = vmatprep.subr.mxu0 %v39015_v2  ;;  %29171 = vmatprep.subr.mxu1 %v32578_v12 }
 0xaad   : > { %29145 = vmatpush3.msra.mxu0 %v39015_v2  ;;  %29172 = vmatpush3.msra.mxu1 %v32578_v12 }
 0xaae   : > { %29146 = vmatprep.subr.mxu0 %v39016_v23  ;;  %29173 = vmatprep.subr.mxu1 %v32572_v8 }
 0xaaf   : > { %29147 = vmatpush3.msra.mxu0 %v39016_v23  ;;  %29174 = vmatpush3.msra.mxu1 %v32572_v8 }
 0xab0   : > { %29148 = vmatprep.subr.mxu0 %v39017_v22  ;;  %29175 = vmatprep.subr.mxu1 %v32574_v9 }
 0xab1   : > { %29149 = vmatpush3.msra.mxu0 %v39017_v22  ;;  %29176 = vmatpush3.msra.mxu1 %v32574_v9 }
 0xab2   : > { %29150 = vmatprep.subr.mxu0 %v39018_v47  ;;  %29177 = vmatprep.subr.mxu1 %v32576_v10 }
 0xab3   : > { %29151 = vmatpush3.msra.mxu0 %v39018_v47  ;;  %29178 = vmatpush3.msra.mxu1 %v32576_v10 }
 0xab4   : > { %29152 = vmatprep.subr.mxu0 %v39019_v0  ;;  %29179 = vmatprep.subr.mxu1 %v32570_v6 }
 0xab5   : > { %29153 = vmatpush3.msra.mxu0 %v39019_v0  ;;  %29180 = vmatpush3.msra.mxu1 %v32570_v6 }
 0xab6   : > { %29154 = vmatprep.subr.mxu0 %v39020_v28  ;;  %29181 = vmatprep.subr.mxu1 %v32580_v13 }
 0xab7   : > { %29155 = vmatpush3.msra.mxu0 %v39020_v28  ;;  %29182 = vmatpush3.msra.mxu1 %v32580_v13 }
 0xab8   : > { %29156 = vmatprep.subr.mxu0 %v39021_v37  ;;  %29183 = vmatprep.subr.mxu1 %v32582_v14 }
 0xab9   : > { %29157 = vmatpush3.msra.mxu0 %v39021_v37  ;;  %29184 = vmatpush3.msra.mxu1 %v32582_v14 }
 0xaba   : > { %29158 = vmatprep.subr.mxu0 %v39022_v11  ;;  %29185 = vmatprep.subr.mxu1 %v32600_v21 }
 0xabb   : > { %29159 = vmatpush3.msra.mxu0 %v39022_v11  ;;  %29186 = vmatpush3.msra.mxu1 %v32600_v21 }
 0xabc   : > { %29160 = vmatprep.subr.mxu0 %v39023_v34  ;;  %29187 = vmatprep.subr.mxu1 %v32625_v30 }
 0xabd   : > { %29161 = vmatpush3.msra.mxu0 %v39023_v34  ;;  %29188 = vmatpush3.msra.mxu1 %v32625_v30 }
 0xabe   : > { %29162 = vmatprep.subr.mxu0 %v39024_v41  ;;  %29189 = vmatprep.subr.mxu1 %v32635_v35 }
 0xabf   : > { %29163 = vmatpush3.msra.mxu0 %v39024_v41  ;;  %29190 = vmatpush3.msra.mxu1 %v32635_v35 }
 0xac0   : > { %29164 = vmatprep.subr.mxu0 %v39025_v36  ;;  %29191 = vmatprep.subr.mxu1 %v32655_v44 }
 0xac1   : > { %29165 = vmatpush3.msra.mxu0 %v39025_v36  ;;  %29192 = vmatpush3.msra.mxu1 %v32655_v44  ;;  %v39033_v36 = vld [vmem:[#allocation23_spill] sm:$0xff] }
 0xac2   : > { %29166 = vmatprep.subr.mxu0 %v39026_v17  ;;  %29193 = vmatprep.subr.mxu1 %v32666_v48 }
 0xac3   : > { %29167 = vmatpush3.msra.mxu0 %v39026_v17  ;;  %29168 = vmatprep.mubr.f32.mxu0 %v34855_v56  ;;  %v39030_v17 = vld [vmem:[#allocation20_spill] sm:$0xff] }
 0xac4   : > { %29194 = vmatpush3.msra.mxu1 %v32666_v48  ;;  %29169 = vmatmul.mubr.f32.vlgmr.msra.gmra.mxu0 %v34860_v39 }
 0xac5   : > { %29195 = vmatprep.subr.mxu1 %v32684_v55  ;;  %29206 = vmatprep.subr.mxu0 %v39027_v29 }
 0xac6   : > { %29196 = vmatpush3.msra.mxu1 %v32684_v55  ;;  %29207 = vmatpush3.msra.mxu0 %v39027_v29  ;;  %v39031_v29 = vand.u32 4294901760, %v34855_v56  ;;  %v39035_v56 = vld [vmem:[#allocation27_spill] sm:$0xff] }
 0xac7   : > { %29197 = vmatprep.subr.mxu1 %v32718_v4  ;;  %29208 = vmatprep.subr.mxu0 %v39028_v15 }
 0xac8   : > { %29198 = vmatpush3.msra.mxu1 %v32718_v4  ;;  %29209 = vmatpush3.msra.mxu0 %v39028_v15  ;;  %v39032_v15 = vand.u32 4294901760, %v34860_v39  ;;  %v39036_v39 = vld [vmem:[#allocation31_spill] sm:$0xff] }
 0xac9   : > { %29199 = vmatprep.subr.mxu1 %v32737_v31  ;;  %29210 = vmatprep.subr.mxu0 %v39029_v60 }
 0xaca   : > { %29200 = vmatpush3.msra.mxu1 %v32737_v31  ;;  %29211 = vmatpush3.msra.mxu0 %v39029_v60  ;;  %v39034_v60 = vld [vmem:[#allocation26_spill] sm:$0xff] }
 0xacb   : > { %29201 = vmatprep.subr.mxu1 %v32753_v43  ;;  %29212 = vmatprep.subr.mxu0 %v39030_v17 }
 0xacc   : > { %29202 = vmatpush3.msra.mxu1 %v32753_v43  ;;  %29203 = vmatprep.mubr.f32.mxu1 %v39031_v29  ;;  %v39038_v29 = vld [vmem:[#allocation37_spill] sm:$0xff] }
 0xacd   : > { %29213 = vmatpush3.msra.mxu0 %v39030_v17  ;;  %29204 = vmatmul.mubr.f32.vlgmr.msra.gmra.mxu1 %v39032_v15  ;;  %v39037_v15 = vld [vmem:[#allocation34_spill] sm:$0xff] }
 0xace   : > { %29214 = vmatprep.subr.mxu0 %v39033_v36  ;;  %29241 = vmatprep.subr.mxu1 %v32578_v12 }
 0xacf   : > { %29215 = vmatpush3.msra.mxu0 %v39033_v36  ;;  %29242 = vmatpush3.msra.mxu1 %v32578_v12 }
 0xad0   : > { %29216 = vmatprep.subr.mxu0 %v39034_v60  ;;  %29243 = vmatprep.subr.mxu1 %v32572_v8 }
 0xad1   : > { %29217 = vmatpush3.msra.mxu0 %v39034_v60  ;;  %29244 = vmatpush3.msra.mxu1 %v32572_v8 }
 0xad2   : > { %29218 = vmatprep.subr.mxu0 %v39035_v56  ;;  %29245 = vmatprep.subr.mxu1 %v32574_v9 }
 0xad3   : > { %29219 = vmatpush3.msra.mxu0 %v39035_v56  ;;  %29246 = vmatpush3.msra.mxu1 %v32574_v9  ;;  %v39039_v56 = vld [vmem:[#allocation40_spill] sm:$0xff] }
 0xad4   : > { %29220 = vmatprep.subr.mxu0 %v39036_v39  ;;  %29247 = vmatprep.subr.mxu1 %v32576_v10 }
 0xad5   : > { %29221 = vmatpush3.msra.mxu0 %v39036_v39  ;;  %29248 = vmatpush3.msra.mxu1 %v32576_v10  ;;  %v39040_v39 = vld [vmem:[#allocation43_spill] sm:$0xff] }
 0xad6   : > { %29222 = vmatprep.subr.mxu0 %v39037_v15  ;;  %29249 = vmatprep.subr.mxu1 %v32570_v6 }
 0xad7   : > { %29223 = vmatpush3.msra.mxu0 %v39037_v15  ;;  %29250 = vmatpush3.msra.mxu1 %v32570_v6  ;;  %v39041_v15 = vld [vmem:[#allocation46_spill] sm:$0xff] }
 0xad8   : > { %29224 = vmatprep.subr.mxu0 %v39038_v29  ;;  %29251 = vmatprep.subr.mxu1 %v32580_v13 }
 0xad9   : > { %29225 = vmatpush3.msra.mxu0 %v39038_v29  ;;  %29252 = vmatpush3.msra.mxu1 %v32580_v13  ;;  %v39042_v29 = vld [vmem:[#allocation49_spill] sm:$0xff] }
 0xada   : > { %29226 = vmatprep.subr.mxu0 %v39039_v56  ;;  %29253 = vmatprep.subr.mxu1 %v32582_v14 }
 0xadb   : > { %29227 = vmatpush3.msra.mxu0 %v39039_v56  ;;  %29254 = vmatpush3.msra.mxu1 %v32582_v14  ;;  %v39043_v56 = vld [vmem:[#allocation51_spill] sm:$0xff] }
 0xadc   : > { %29228 = vmatprep.subr.mxu0 %v39040_v39  ;;  %29255 = vmatprep.subr.mxu1 %v32600_v21 }
 0xadd   : > { %29229 = vmatpush3.msra.mxu0 %v39040_v39  ;;  %29256 = vmatpush3.msra.mxu1 %v32600_v21  ;;  %v39044_v39 = vld [vmem:[#allocation52_spill] sm:$0xff] }
 0xade   : > { %29230 = vmatprep.subr.mxu0 %v39041_v15  ;;  %29257 = vmatprep.subr.mxu1 %v32625_v30 }
 0xadf   : > { %29231 = vmatpush3.msra.mxu0 %v39041_v15  ;;  %29258 = vmatpush3.msra.mxu1 %v32625_v30 }
 0xae0   : > { %29232 = vmatprep.subr.mxu0 %v39042_v29  ;;  %29259 = vmatprep.subr.mxu1 %v32635_v35 }
 0xae1   : > { %29233 = vmatpush3.msra.mxu0 %v39042_v29  ;;  %29260 = vmatpush3.msra.mxu1 %v32635_v35 }
 0xae2   : > { %29234 = vmatprep.subr.mxu0 %v39043_v56  ;;  %29261 = vmatprep.subr.mxu1 %v32655_v44 }
 0xae3   : > { %29235 = vmatpush3.msra.mxu0 %v39043_v56  ;;  %29262 = vmatpush3.msra.mxu1 %v32655_v44  ;;  %v39045_v56 = vld [vmem:[#allocation56_spill] sm:$0xff] }
 0xae4   : > { %29236 = vmatprep.subr.mxu0 %v39044_v39  ;;  %29263 = vmatprep.subr.mxu1 %v32666_v48 }
 0xae5   : > { %29237 = vmatpush3.msra.mxu0 %v39044_v39  ;;  %29238 = vmatprep.mubr.f32.mxu0 %v34842_v1 }
 0xae6   : > { %29264 = vmatpush3.msra.mxu1 %v32666_v48  ;;  %29239 = vmatmul.mubr.f32.vlgmr.msra.gmra.mxu0 %v34846_v3 }
 0xae7   : > { %29265 = vmatprep.subr.mxu1 %v32684_v55  ;;  %29273 = vmatprep.mubr.f32.mxu1 %v34842_v1 }
 0xae8   : > { %29266 = vmatpush3.msra.mxu1 %v32684_v55  ;;  %29280 = vmatprep.mubr.f32.mxu0 %v39045_v56 }
 0xae9   : > { %29267 = vmatprep.subr.mxu1 %v32718_v4 }
 0xaea   : > { %29268 = vmatpush3.msra.mxu1 %v32718_v4 }
 0xaeb   : > { %29269 = vmatprep.subr.mxu1 %v32737_v31 }
 0xaec   : > { %29270 = vmatpush3.msra.mxu1 %v32737_v31 }
 0xaed   : > { %29271 = vmatprep.subr.mxu1 %v32753_v43 }
 0xaee   : > { %29272 = vmatpush3.msra.mxu1 %v32753_v43 }
 0xaef   : > { %29274 = vmatmul.mubr.f32.vlgmr.msra.gmra.mxu1 %v34846_v3 }
 0xaf0   : > { %29287 = vmatprep.mubr.f32.mxu1 %v32986_v61 }
 0xb36   : > { %v29030_v1 = vpop.f32.mrf.mxu0 }
 0xb38   : > { %v35048_v39 = vpop.f32.mrf.mxu0 }
 0xb39   : > { %39046 = vst [vmem:[#allocation95_spill] sm:$0xff] %v35048_v39 }
 0xb3b   : > { %v29044_v56 = vpop.f32.mrf.mxu0 }
 0xb3d   : > { %v35052_v36 = vpop.f32.mrf.mxu0 }
 0xb3e   : > { %v29037_v29 = vpop.f32.mrf.mxu1  ;;  %39048 = vst [vmem:[#allocation97_spill] sm:$0xff] %v35052_v36 }
 0xb3f   : > { %v9531_v15 = vadd.f32 %v29037_v29, %v29030_v1 }
 0xb40   : > { %v35050_v60 = vpop.f32.mrf.mxu1 }
 0xb41   : > { %39047 = vst [vmem:[#allocation96_spill] sm:$0xff] %v35050_v60  ;;  %v9614_v17 = vadd.f32 %v29044_v56, %v9531_v15  ;;  %v29058_v34 = vpop.f32.mrf.mxu0 }
 0xb43   : > { %v35060_v22 = vpop.f32.mrf.mxu0 }
 0xb44   : > { %v29051_v41 = vpop.f32.mrf.mxu1  ;;  %39052 = vst [vmem:[#allocation100_spill] sm:$0xff] %v35060_v22 }
 0xb45   : > { %v9697_v11 = vadd.f32 %v29051_v41, %v9614_v17 }
 0xb46   : > { %v35054_v37 = vpop.f32.mrf.mxu1 }
 0xb47   : > { %39049 = vst [vmem:[#allocation98_spill] sm:$0xff] %v35054_v37  ;;  %v9780_v28 = vadd.f32 %v29058_v34, %v9697_v11 }
 0xb49   : > { %v29065_v3 = vpop.f32.mrf.mxu1 }
 0xb4a   : > { %v35056_v0 = vadd.f32 %v29065_v3, %v9780_v28 }
 0xb4b   : > { %v35062_v1 = vpop.f32.mrf.mxu1 }
 0xb4c   : > { %39050 = vst [vmem:[#allocation99_spill] sm:$0xff] %v35056_v0  ;;  %39053 = vst [vmem:[#allocation101_spill] sm:$0xff] %v35062_v1 }
 0xb63   : > { %v29100_v29 = vpop.f32.mrf.mxu0 }
 0xb65   : > { %v9951_v60 = vpop.f32.mrf.mxu0 }
 0xb6b   : > { %v29135_v36 = vpop.f32.mrf.mxu1 }
 0xb6c   : > { %v10119_v17 = vadd.f32 %v29135_v36, %v29100_v29 }
 0xb6d   : > { %v10112_v15 = vpop.f32.mrf.mxu1 }
 0xb6e   : > { %v10113_v11 = vadd.f32 %v10112_v15, %v9951_v60 }
 0xb84   : > { %v29170_v56 = vpop.f32.mrf.mxu0 }
 0xb85   : > { %v10230_v34 = vadd.f32 %v29170_v56, %v10119_v17  ;;  %v39055_v17 = vld [vmem:[#allocation13_spill] sm:$0xff] }
 0xb86   : > { %v10222_v23 = vpop.f32.mrf.mxu0 }
 0xb87   : > { %v10223_v3 = vadd.f32 %v10222_v23, %v10113_v11  ;;  %v39056_v11 = vld [vmem:[#allocation54_spill] sm:$0xff] }
 0xb8d   : > { %v29205_v41 = vpop.f32.mrf.mxu1 }
 0xb8e   : > { %v10327_v2 = vadd.f32 %v29205_v41, %v10230_v34  ;;  %v39054_v41 = vld [vmem:[#allocation53_spill] sm:$0xff]  ;;  %v39057_v34 = vld [vmem:[#allocation14_spill] sm:$0xff] }
 0xb8f   : > { %v10318_v28 = vpop.f32.mrf.mxu1 }
 0xb90   : > { %v10319_v39 = vadd.f32 %v10318_v28, %v10223_v3  ;;  %v39058_v28 = vld [vmem:[#allocation55_spill] sm:$0xff] }
 0xb91   : > { %v39059_v3 = vld [vmem:[#allocation15_spill] sm:$0xff] }
 0xba6   : > { %v29240_v37 = vpop.f32.mrf.mxu0 }
 0xba7   : > { %v10452_v47 = vadd.f32 %v29240_v37, %v10327_v2 }
 0xba8   : > { %v10445_v53 = vpop.f32.mrf.mxu0 }
 0xba9   : > { %v10446_v0 = vadd.f32 %v10445_v53, %v10319_v39 }
 0xbaf   : > { %v29275_v22 = vpop.f32.mrf.mxu1 }
 0xbb0   : > { %v10545_v52 = vadd.f32 %v29275_v22, %v10452_v47 }
 0xbb1   : > { %v10538_v1 = vpop.f32.mrf.mxu1 }
 0xbb2   : > { %v10577_v46 = vand.u32 4294901760, %v10545_v52  ;;  %v10539_v49 = vadd.f32 %v10538_v1, %v10446_v0 }
 0xbb4   : > { %v10665_v16 = vsub.f32 %v10545_v52, %v10577_v46  ;;  %v10580_v33 = vand.u32 4294901760, %v10539_v49  ;;  %29276 = vmatprep.subr.mxu0 %v10577_v46 }
 0xbb5   : > { %29277 = vmatpush3.msra.mxu0 %v10577_v46 }
 0xbb6   : > { %v10672_v36 = vsub.f32 %v10539_v49, %v10580_v33  ;;  %29278 = vmatprep.subr.mxu0 %v10580_v33  ;;  %v10666_v60 = vand.u32 4294901760, %v10665_v16 }
 0xbb7   : > { %29279 = vmatpush3.msra.mxu0 %v10580_v33 }
 0xbb8   : > { %29290 = vmatprep.subr.mxu0 %v10665_v16  ;;  %29281 = vmatmul.mubr.f32.vlgmr.msra.gmra.mxu0 %v33010_v5  ;;  %v10667_v23 = vsub.f32 %v10665_v16, %v10666_v60  ;;  %v10673_v29 = vand.u32 4294901760, %v10672_v36 }
 0xbb9   : > { %29291 = vmatpush3.msra.mxu0 %v10665_v16  ;;  %29294 = vmatprep.mubr.f32.mxu0 %v32989_v7  ;;  %v32185_v16 = vld [vmem:[%s32549_s23 + $0x10] sm:$0xff] }
 0xbba   : > { %29292 = vmatprep.subr.mxu0 %v10672_v36  ;;  %v10668_v53 = vand.u32 4294901760, %v10667_v23  ;;  %v10674_v2 = vsub.f32 %v10672_v36, %v10673_v29  ;;  %v11050_v49 = vmul.f32 %v32185_v16, %v34825_v19  ;;  %v39062_v23 = vld [vmem:[#allocation22_spill] sm:$0xff] }
 0xbbb   : > { %29293 = vmatpush3.msra.mxu0 %v10672_v36  ;;  %v39060_v36 = vld [vmem:[#allocation16_spill] sm:$0xff]  ;;  %v39067_v16 = vld [vmem:[#allocation38_spill] sm:$0xff] }
 0xbbc   : > { %29283 = vmatprep.subr.mxu1 %v10668_v53  ;;  %29304 = vmatprep.subr.mxu0 %v10666_v60  ;;  %v10675_v52 = vand.u32 4294901760, %v10674_v2  ;;  %v35096_v19 = vand.u32 4294901760, %v11050_v49  ;;  %v39065_v2 = vld [vmem:[#allocation32_spill] sm:$0xff] }
 0xbbd   : > { %29284 = vmatpush3.msra.mxu1 %v10668_v53  ;;  %29295 = vmatmul.mubr.f32.vlgmr.msra.gmra.mxu0 %v33003_v59  ;;  %v39064_v53 = vld [vmem:[#allocation29_spill] sm:$0xff] }
 0xbbe   : > { %29305 = vmatpush3.msra.mxu0 %v10666_v60  ;;  %29285 = vmatprep.subr.mxu1 %v10675_v52  ;;  %v39061_v60 = vld [vmem:[#allocation21_spill] sm:$0xff] }
 0xbbf   : > { %29306 = vmatprep.subr.mxu0 %v10673_v29  ;;  %29286 = vmatpush3.msra.mxu1 %v10675_v52  ;;  %v39066_v52 = vld [vmem:[#allocation35_spill] sm:$0xff] }
 0xbc0   : > { %29307 = vmatpush3.msra.mxu0 %v10673_v29  ;;  %29288 = vmatmul.mubr.f32.vlgmr.msra.gmra.mxu1 %v33000_v32  ;;  %v39063_v29 = vld [vmem:[#allocation24_spill] sm:$0xff] }
 0xbc1   : > { %29297 = vmatprep.subr.mxu1 %v10577_v46  ;;  %29308 = vmatprep.mubr.f32.mxu0 %v32986_v61 }
 0xbc2   : > { %29318 = vmatprep.subr.mxu0 %v32578_v12  ;;  %29298 = vmatpush3.msra.mxu1 %v10577_v46 }
 0xbc3   : > { %29309 = vmatmul.mubr.f32.vlgmr.msra.gmra.mxu0 %v33000_v32  ;;  %29299 = vmatprep.subr.mxu1 %v10580_v33 }
 0xbc4   : > { %29319 = vmatpush3.msra.mxu0 %v32578_v12  ;;  %29300 = vmatpush3.msra.mxu1 %v10580_v33 }
 0xbc5   : > { %29320 = vmatprep.subr.mxu0 %v32572_v8  ;;  %29301 = vmatprep.mubr.f32.mxu1 %v32993_v54 }
 0xbc6   : > { %29321 = vmatpush3.msra.mxu0 %v32572_v8  ;;  %29302 = vmatmul.mubr.f32.vlgmr.msra.gmra.mxu1 %v33006_v26 }
 0xbc7   : > { %29311 = vmatprep.subr.mxu1 %v10577_v46  ;;  %29322 = vmatprep.subr.mxu0 %v32574_v9 }
 0xbc8   : > { %29312 = vmatpush3.msra.mxu1 %v10577_v46  ;;  %29323 = vmatpush3.msra.mxu0 %v32574_v9  ;;  %v32186_v46 = vld [vmem:[%s32549_s23 + $0x18] sm:$0xff] }
 0xbc9   : > { %29313 = vmatprep.subr.mxu1 %v10580_v33  ;;  %29324 = vmatprep.subr.mxu0 %v32576_v10 }
 0xbca   : > { %29314 = vmatpush3.msra.mxu1 %v10580_v33  ;;  %29315 = vmatprep.mubr.f32.mxu1 %v32986_v61  ;;  %v11051_v33 = vmul.f32 %v32186_v46, %v34832_v27  ;;  %v35109_v27 = vsub.f32 %v11050_v49, %v35096_v19  ;;  %v39068_v49 = vld [vmem:[#allocation41_spill] sm:$0xff]  ;;  %v39069_v46 = vld [vmem:[#allocation44_spill] sm:$0xff] }
 0xbcb   : > { %29325 = vmatpush3.msra.mxu0 %v32576_v10  ;;  %29316 = vmatmul.mubr.f32.vlgmr.msra.gmra.mxu1 %v33000_v32 }
 0xbcc   : > { %29326 = vmatprep.subr.mxu0 %v32570_v6  ;;  %29353 = vmatprep.subr.mxu1 %v32642_v38  ;;  %v35100_v22 = vand.u32 4294901760, %v11051_v33  ;;  %v11135_v0 = vand.u32 4294901760, %v35109_v27 }
 0xbcd   : > { %29327 = vmatpush3.msra.mxu0 %v32570_v6  ;;  %29354 = vmatpush3.msra.mxu1 %v32642_v38 }
 0xbce   : > { %29328 = vmatprep.subr.mxu0 %v32580_v13  ;;  %29355 = vmatprep.subr.mxu1 %v38709_v40  ;;  %v35114_v47 = vsub.f32 %v11051_v33, %v35100_v22  ;;  %v11136_v39 = vsub.f32 %v35109_v27, %v11135_v0  ;;  %v39070_v33 = vld [vmem:[#allocation47_spill] sm:$0xff] }
 0xbcf   : > { %29329 = vmatpush3.msra.mxu0 %v32580_v13  ;;  %29356 = vmatpush3.msra.mxu1 %v38709_v40 }
 0xbd0   : > { %29330 = vmatprep.subr.mxu0 %v32582_v14  ;;  %29357 = vmatprep.subr.mxu1 %v38710_v57  ;;  %v38292_v37 = vand.u32 4294901760, %v35114_v47  ;;  %v11137_v56 = vand.u32 4294901760, %v11136_v39  ;;  %v39071_v39 = vld [vmem:[#allocation50_spill] sm:$0xff] }
 0xbd1   : > { %29331 = vmatpush3.msra.mxu0 %v32582_v14  ;;  %29358 = vmatpush3.msra.mxu1 %v38710_v57 }
 0xbd2   : > { %29332 = vmatprep.subr.mxu0 %v32600_v21  ;;  %29359 = vmatprep.subr.mxu1 %v38711_v24  ;;  %v11146_v1 = vsub.f32 %v35114_v47, %v38292_v37  ;;  %v39075_v37 = vld [vmem:[#allocation20_spill] sm:$0xff] }
 0xbd3   : > { %29333 = vmatpush3.msra.mxu0 %v32600_v21  ;;  %29360 = vmatpush3.msra.mxu1 %v38711_v24 }
 0xbd4   : > { %29334 = vmatprep.subr.mxu0 %v32625_v30  ;;  %29361 = vmatprep.subr.mxu1 %v38712_v58  ;;  %v11147_v15 = vand.u32 4294901760, %v11146_v1  ;;  %v39072_v1 = vld [vmem:[#allocation19_spill] sm:$0xff] }
 0xbd5   : > { %29335 = vmatpush3.msra.mxu0 %v32625_v30  ;;  %29362 = vmatpush3.msra.mxu1 %v38712_v58 }
 0xbd6   : > { %29336 = vmatprep.subr.mxu0 %v32635_v35  ;;  %29363 = vmatprep.subr.mxu1 %v38713_v50 }
 0xbd7   : > { %29337 = vmatpush3.msra.mxu0 %v32635_v35  ;;  %29364 = vmatpush3.msra.mxu1 %v38713_v50 }
 0xbd8   : > { %29338 = vmatprep.subr.mxu0 %v32655_v44  ;;  %29365 = vmatprep.subr.mxu1 %v38714_v62 }
 0xbd9   : > { %29339 = vmatpush3.msra.mxu0 %v32655_v44  ;;  %29366 = vmatpush3.msra.mxu1 %v38714_v62 }
 0xbda   : > { %29340 = vmatprep.subr.mxu0 %v32666_v48  ;;  %29367 = vmatprep.subr.mxu1 %v38715_v42 }
 0xbdb   : > { %29341 = vmatpush3.msra.mxu0 %v32666_v48  ;;  %29368 = vmatpush3.msra.mxu1 %v38715_v42 }
 0xbdc   : > { %29342 = vmatprep.subr.mxu0 %v32684_v55  ;;  %29369 = vmatprep.subr.mxu1 %v38716_v20 }
 0xbdd   : > { %29343 = vmatpush3.msra.mxu0 %v32684_v55  ;;  %29370 = vmatpush3.msra.mxu1 %v38716_v20 }
 0xbde   : > { %29344 = vmatprep.subr.mxu0 %v32718_v4  ;;  %29371 = vmatprep.subr.mxu1 %v38717_v25 }
 0xbdf   : > { %29345 = vmatpush3.msra.mxu0 %v32718_v4  ;;  %29372 = vmatpush3.msra.mxu1 %v38717_v25 }
 0xbe0   : > { %29346 = vmatprep.subr.mxu0 %v32737_v31  ;;  %29373 = vmatprep.subr.mxu1 %v32792_v63 }
 0xbe1   : > { %29347 = vmatpush3.msra.mxu0 %v32737_v31  ;;  %29374 = vmatpush3.msra.mxu1 %v32792_v63 }
 0xbe2   : > { %29348 = vmatprep.subr.mxu0 %v32753_v43  ;;  %29375 = vmatprep.subr.mxu1 %v32809_v51 }
 0xbe3   : > { %29349 = vmatpush3.msra.mxu0 %v32753_v43  ;;  %29376 = vmatpush3.msra.mxu1 %v32809_v51 }
 0xbe4   : > { %29350 = vmatprep.mubr.f32.mxu0 %v11137_v56  ;;  %29377 = vmatprep.subr.mxu1 %v32820_v45  ;;  %v39073_v56 = vld [vmem:[#allocation17_spill] sm:$0xff] }
 0xbe5   : > { %29388 = vmatprep.subr.mxu0 %v32595_v18  ;;  %29351 = vmatmul.mubr.f32.vlgmr.msra.gmra.mxu0 %v11147_v15  ;;  %v39074_v15 = vld [vmem:[#allocation18_spill] sm:$0xff] }
 0xbe6   : > { %29378 = vmatpush3.msra.mxu1 %v32820_v45  ;;  %29389 = vmatpush3.msra.mxu0 %v32595_v18 }
 0xbe7   : > { %29379 = vmatprep.subr.mxu1 %v39054_v41  ;;  %29390 = vmatprep.subr.mxu0 %v39055_v17 }
 0xbe8   : > { %29380 = vmatpush3.msra.mxu1 %v39054_v41  ;;  %29391 = vmatpush3.msra.mxu0 %v39055_v17 }
 0xbe9   : > { %29381 = vmatprep.subr.mxu1 %v39056_v11  ;;  %29392 = vmatprep.subr.mxu0 %v39057_v34 }
 0xbea   : > { %29382 = vmatpush3.msra.mxu1 %v39056_v11  ;;  %29393 = vmatpush3.msra.mxu0 %v39057_v34 }
 0xbeb   : > { %29383 = vmatprep.subr.mxu1 %v39058_v28  ;;  %29394 = vmatprep.subr.mxu0 %v39059_v3 }
 0xbec   : > { %29384 = vmatpush3.msra.mxu1 %v39058_v28  ;;  %29385 = vmatprep.mubr.f32.mxu1 %v35096_v19 }
 0xbed   : > { %29395 = vmatpush3.msra.mxu0 %v39059_v3  ;;  %29386 = vmatmul.mubr.f32.vlgmr.msra.gmra.mxu1 %v35100_v22 }
 0xbee   : > { %29396 = vmatprep.subr.mxu0 %v39060_v36  ;;  %29423 = vmatprep.subr.mxu1 %v32578_v12 }
 0xbef   : > { %29397 = vmatpush3.msra.mxu0 %v39060_v36  ;;  %29424 = vmatpush3.msra.mxu1 %v32578_v12 }
 0xbf0   : > { %29398 = vmatprep.subr.mxu0 %v39061_v60  ;;  %29425 = vmatprep.subr.mxu1 %v32572_v8 }
 0xbf1   : > { %29399 = vmatpush3.msra.mxu0 %v39061_v60  ;;  %29426 = vmatpush3.msra.mxu1 %v32572_v8 }
 0xbf2   : > { %29400 = vmatprep.subr.mxu0 %v39062_v23  ;;  %29427 = vmatprep.subr.mxu1 %v32574_v9 }
 0xbf3   : > { %29401 = vmatpush3.msra.mxu0 %v39062_v23  ;;  %29428 = vmatpush3.msra.mxu1 %v32574_v9 }
 0xbf4   : > { %29402 = vmatprep.subr.mxu0 %v39063_v29  ;;  %29429 = vmatprep.subr.mxu1 %v32576_v10 }
 0xbf5   : > { %29403 = vmatpush3.msra.mxu0 %v39063_v29  ;;  %29430 = vmatpush3.msra.mxu1 %v32576_v10  ;;  %v39095_v29 = vld [vmem:[#allocation99_spill] sm:$0xff] }
 0xbf6   : > { %29404 = vmatprep.subr.mxu0 %v39064_v53  ;;  %29431 = vmatprep.subr.mxu1 %v32570_v6 }
 0xbf7   : > { %29405 = vmatpush3.msra.mxu0 %v39064_v53  ;;  %29432 = vmatpush3.msra.mxu1 %v32570_v6 }
 0xbf8   : > { %29406 = vmatprep.subr.mxu0 %v39065_v2  ;;  %29433 = vmatprep.subr.mxu1 %v32580_v13 }
 0xbf9   : > { %29407 = vmatpush3.msra.mxu0 %v39065_v2  ;;  %29434 = vmatpush3.msra.mxu1 %v32580_v13  ;;  %v39094_v2 = vld [vmem:[#allocation90_spill] sm:$0xff] }
 0xbfa   : > { %29408 = vmatprep.subr.mxu0 %v39066_v52  ;;  %29435 = vmatprep.subr.mxu1 %v32582_v14 }
 0xbfb   : > { %29409 = vmatpush3.msra.mxu0 %v39066_v52  ;;  %29436 = vmatpush3.msra.mxu1 %v32582_v14 }
 0xbfc   : > { %29410 = vmatprep.subr.mxu0 %v39067_v16  ;;  %29437 = vmatprep.subr.mxu1 %v32600_v21 }
 0xbfd   : > { %29411 = vmatpush3.msra.mxu0 %v39067_v16  ;;  %29438 = vmatpush3.msra.mxu1 %v32600_v21 }
 0xbfe   : > { %29412 = vmatprep.subr.mxu0 %v39068_v49  ;;  %29439 = vmatprep.subr.mxu1 %v32625_v30 }
 0xbff   : > { %29413 = vmatpush3.msra.mxu0 %v39068_v49  ;;  %29440 = vmatpush3.msra.mxu1 %v32625_v30 }
 0xc00   : > { %29414 = vmatprep.subr.mxu0 %v39069_v46  ;;  %29441 = vmatprep.subr.mxu1 %v32635_v35 }
 0xc01   : > { %29415 = vmatpush3.msra.mxu0 %v39069_v46  ;;  %29442 = vmatpush3.msra.mxu1 %v32635_v35 }
 0xc02   : > { %29416 = vmatprep.subr.mxu0 %v39070_v33  ;;  %29443 = vmatprep.subr.mxu1 %v32655_v44 }
 0xc03   : > { %29417 = vmatpush3.msra.mxu0 %v39070_v33  ;;  %29444 = vmatpush3.msra.mxu1 %v32655_v44 }
 0xc04   : > { %29418 = vmatprep.subr.mxu0 %v39071_v39  ;;  %29445 = vmatprep.subr.mxu1 %v32666_v48 }
 0xc05   : > { %29419 = vmatpush3.msra.mxu0 %v39071_v39  ;;  %29420 = vmatprep.mubr.f32.mxu0 %v35109_v27  ;;  %v39079_v27 = vld [vmem:[#allocation27_spill] sm:$0xff] }
 0xc06   : > { %29446 = vmatpush3.msra.mxu1 %v32666_v48  ;;  %29421 = vmatmul.mubr.f32.vlgmr.msra.gmra.mxu0 %v35114_v47 }
 0xc07   : > { %29447 = vmatprep.subr.mxu1 %v32684_v55  ;;  %29458 = vmatprep.subr.mxu0 %v39072_v1 }
 0xc08   : > { %29448 = vmatpush3.msra.mxu1 %v32684_v55  ;;  %29459 = vmatpush3.msra.mxu0 %v39072_v1  ;;  %v39077_v1 = vld [vmem:[#allocation23_spill] sm:$0xff] }
 0xc09   : > { %29449 = vmatprep.subr.mxu1 %v32718_v4  ;;  %29460 = vmatprep.subr.mxu0 %v39073_v56 }
 0xc0a   : > { %29450 = vmatpush3.msra.mxu1 %v32718_v4  ;;  %29461 = vmatpush3.msra.mxu0 %v39073_v56  ;;  %v39076_v56 = vand.u32 4294901760, %v35114_v47  ;;  %v39080_v47 = vld [vmem:[#allocation31_spill] sm:$0xff] }
 0xc0b   : > { %29451 = vmatprep.subr.mxu1 %v32737_v31  ;;  %29462 = vmatprep.subr.mxu0 %v39074_v15 }
 0xc0c   : > { %29452 = vmatpush3.msra.mxu1 %v32737_v31  ;;  %29463 = vmatpush3.msra.mxu0 %v39074_v15  ;;  %v39078_v15 = vld [vmem:[#allocation26_spill] sm:$0xff] }
 0xc0d   : > { %29453 = vmatprep.subr.mxu1 %v32753_v43  ;;  %29464 = vmatprep.subr.mxu0 %v39075_v37 }
 0xc0e   : > { %29454 = vmatpush3.msra.mxu1 %v32753_v43  ;;  %29455 = vmatprep.mubr.f32.mxu1 %v11135_v0  ;;  %v39081_v0 = vld [vmem:[#allocation34_spill] sm:$0xff] }
 0xc0f   : > { %29465 = vmatpush3.msra.mxu0 %v39075_v37  ;;  %29456 = vmatmul.mubr.f32.vlgmr.msra.gmra.mxu1 %v39076_v56  ;;  %v39082_v56 = vld [vmem:[#allocation37_spill] sm:$0xff] }
 0xc10   : > { %29466 = vmatprep.subr.mxu0 %v39077_v1  ;;  %29493 = vmatprep.subr.mxu1 %v32578_v12 }
 0xc11   : > { %29467 = vmatpush3.msra.mxu0 %v39077_v1  ;;  %29494 = vmatpush3.msra.mxu1 %v32578_v12 }
 0xc12   : > { %29468 = vmatprep.subr.mxu0 %v39078_v15  ;;  %29495 = vmatprep.subr.mxu1 %v32572_v8 }
 0xc13   : > { %29469 = vmatpush3.msra.mxu0 %v39078_v15  ;;  %29496 = vmatpush3.msra.mxu1 %v32572_v8 }
 0xc14   : > { %29470 = vmatprep.subr.mxu0 %v39079_v27  ;;  %29497 = vmatprep.subr.mxu1 %v32574_v9 }
 0xc15   : > { %29471 = vmatpush3.msra.mxu0 %v39079_v27  ;;  %29498 = vmatpush3.msra.mxu1 %v32574_v9  ;;  %v39083_v27 = vld [vmem:[#allocation40_spill] sm:$0xff] }
 0xc16   : > { %29472 = vmatprep.subr.mxu0 %v39080_v47  ;;  %29499 = vmatprep.subr.mxu1 %v32576_v10 }
 0xc17   : > { %29473 = vmatpush3.msra.mxu0 %v39080_v47  ;;  %29500 = vmatpush3.msra.mxu1 %v32576_v10  ;;  %v39084_v47 = vld [vmem:[#allocation43_spill] sm:$0xff] }
 0xc18   : > { %29474 = vmatprep.subr.mxu0 %v39081_v0  ;;  %29501 = vmatprep.subr.mxu1 %v32570_v6 }
 0xc19   : > { %29475 = vmatpush3.msra.mxu0 %v39081_v0  ;;  %29502 = vmatpush3.msra.mxu1 %v32570_v6  ;;  %v39085_v0 = vld [vmem:[#allocation46_spill] sm:$0xff] }
 0xc1a   : > { %29476 = vmatprep.subr.mxu0 %v39082_v56  ;;  %29503 = vmatprep.subr.mxu1 %v32580_v13 }
 0xc1b   : > { %29477 = vmatpush3.msra.mxu0 %v39082_v56  ;;  %29504 = vmatpush3.msra.mxu1 %v32580_v13  ;;  %v39086_v56 = vld [vmem:[#allocation49_spill] sm:$0xff] }
 0xc1c   : > { %29478 = vmatprep.subr.mxu0 %v39083_v27  ;;  %29505 = vmatprep.subr.mxu1 %v32582_v14 }
 0xc1d   : > { %29479 = vmatpush3.msra.mxu0 %v39083_v27  ;;  %29506 = vmatpush3.msra.mxu1 %v32582_v14  ;;  %v39087_v27 = vld [vmem:[#allocation51_spill] sm:$0xff] }
 0xc1e   : > { %29480 = vmatprep.subr.mxu0 %v39084_v47  ;;  %29507 = vmatprep.subr.mxu1 %v32600_v21 }
 0xc1f   : > { %29481 = vmatpush3.msra.mxu0 %v39084_v47  ;;  %29508 = vmatpush3.msra.mxu1 %v32600_v21  ;;  %v39088_v47 = vld [vmem:[#allocation52_spill] sm:$0xff] }
 0xc20   : > { %29482 = vmatprep.subr.mxu0 %v39085_v0  ;;  %29509 = vmatprep.subr.mxu1 %v32625_v30 }
 0xc21   : > { %29483 = vmatpush3.msra.mxu0 %v39085_v0  ;;  %29510 = vmatpush3.msra.mxu1 %v32625_v30 }
 0xc22   : > { %29484 = vmatprep.subr.mxu0 %v39086_v56  ;;  %29511 = vmatprep.subr.mxu1 %v32635_v35 }
 0xc23   : > { %29485 = vmatpush3.msra.mxu0 %v39086_v56  ;;  %29512 = vmatpush3.msra.mxu1 %v32635_v35 }
 0xc24   : > { %29486 = vmatprep.subr.mxu0 %v39087_v27  ;;  %29513 = vmatprep.subr.mxu1 %v32655_v44 }
 0xc25   : > { %29487 = vmatpush3.msra.mxu0 %v39087_v27  ;;  %29514 = vmatpush3.msra.mxu1 %v32655_v44  ;;  %v39089_v27 = vld [vmem:[#allocation56_spill] sm:$0xff] }
 0xc26   : > { %29488 = vmatprep.subr.mxu0 %v39088_v47  ;;  %29515 = vmatprep.subr.mxu1 %v32666_v48 }
 0xc27   : > { %29489 = vmatpush3.msra.mxu0 %v39088_v47  ;;  %29490 = vmatprep.mubr.f32.mxu0 %v35096_v19 }
 0xc28   : > { %29516 = vmatpush3.msra.mxu1 %v32666_v48  ;;  %29491 = vmatmul.mubr.f32.vlgmr.msra.gmra.mxu0 %v35100_v22 }
 0xc29   : > { %29517 = vmatprep.subr.mxu1 %v32684_v55  ;;  %29525 = vmatprep.mubr.f32.mxu1 %v35096_v19 }
 0xc2a   : > { %29518 = vmatpush3.msra.mxu1 %v32684_v55  ;;  %29532 = vmatprep.mubr.f32.mxu0 %v39089_v27 }
 0xc2b   : > { %29519 = vmatprep.subr.mxu1 %v32718_v4 }
 0xc2c   : > { %29520 = vmatpush3.msra.mxu1 %v32718_v4 }
 0xc2d   : > { %29521 = vmatprep.subr.mxu1 %v32737_v31 }
 0xc2e   : > { %29522 = vmatpush3.msra.mxu1 %v32737_v31 }
 0xc2f   : > { %29523 = vmatprep.subr.mxu1 %v32753_v43 }
 0xc30   : > { %29524 = vmatpush3.msra.mxu1 %v32753_v43 }
 0xc31   : > { %29526 = vmatmul.mubr.f32.vlgmr.msra.gmra.mxu1 %v35100_v22 }
 0xc32   : > { %29539 = vmatprep.mubr.f32.mxu1 %v32986_v61 }
 0xc78   : > { %v29282_v19 = vpop.f32.mrf.mxu0 }
 0xc7a   : > { %v35302_v47 = vpop.f32.mrf.mxu0 }
 0xc7b   : > { %39090 = vst [vmem:[#allocation102_spill] sm:$0xff] %v35302_v47  ;;  %v39096_v47 = vld [vmem:[#allocation83_spill] sm:$0xff] }
 0xc7c   : > { %v39097_v23 = vsub.f32 %v39095_v29, %v39096_v47 }
 0xc7d   : > { %v29296_v27 = vpop.f32.mrf.mxu0 }
 0xc7f   : > { %v35306_v1 = vpop.f32.mrf.mxu0 }
 0xc80   : > { %v29289_v56 = vpop.f32.mrf.mxu1  ;;  %39092 = vst [vmem:[#allocation104_spill] sm:$0xff] %v35306_v1 }
 0xc81   : > { %v10719_v0 = vadd.f32 %v29289_v56, %v29282_v19  ;;  %v39098_v56 = vld [vmem:[#allocation92_spill] sm:$0xff] }
 0xc82   : > { %v35304_v15 = vpop.f32.mrf.mxu1  ;;  %v12263_v19 = vadd.f32 0.0001, %v39098_v56 }
 0xc83   : > { %39091 = vst [vmem:[#allocation103_spill] sm:$0xff] %v35304_v15  ;;  %v10802_v37 = vadd.f32 %v29296_v27, %v10719_v0  ;;  %v29310_v33 = vpop.f32.mrf.mxu0 }
 0xc85   : > { %v35317_v27 = vpop.f32.mrf.mxu0 }
 0xc86   : > { %v29303_v39 = vpop.f32.mrf.mxu1  ;;  %39100 = vst [vmem:[#allocation99_spill] sm:$0xff] %v35317_v27 }
 0xc87   : > { %v10885_v46 = vadd.f32 %v29303_v39, %v10802_v37 }
 0xc88   : > { %v35308_v49 = vpop.f32.mrf.mxu1 }
 0xc89   : > { %39093 = vst [vmem:[#allocation105_spill] sm:$0xff] %v35308_v49  ;;  %v10968_v16 = vadd.f32 %v29310_v33, %v10885_v46 }
 0xc8b   : > { %v29317_v22 = vpop.f32.mrf.mxu1 }
 0xc8c   : > { %v11047_v52 = vadd.f32 %v29317_v22, %v10968_v16 }
 0xc8d   : > { %v35319_v37 = vpop.f32.mrf.mxu1 }
 0xc8e   : > { %v12247_v53 = vsub.f32 %v11047_v52, %v39094_v2  ;;  %39101 = vst [vmem:[#allocation83_spill] sm:$0xff] %v35319_v37 }
 0xc90   : > { %v12265_v60 = vadd.f32 %v12247_v53, %v39097_v23 }
 0xc92   : > { %v12267_v15 = vadd.f32 0.0009, %v12265_v60 }
 0xc94   : > { %v35315_v36 = vmul.f32 %v12267_v15, %v12263_v19 }
 0xc96   : > { %39099 = vst [vmem:[#allocation90_spill] sm:$0xff] %v35315_v36 }
 0xca5   : > { %v29352_v0 = vpop.f32.mrf.mxu0 }
 0xca7   : > { %v11139_v39 = vpop.f32.mrf.mxu0 }
 0xcad   : > { %v29387_v46 = vpop.f32.mrf.mxu1 }
 0xcae   : > { %v11307_v52 = vadd.f32 %v29387_v46, %v29352_v0 }
 0xcaf   : > { %v11300_v16 = vpop.f32.mrf.mxu1 }
 0xcb0   : > { %v11301_v29 = vadd.f32 %v11300_v16, %v11139_v39 }
 0xcc6   : > { %v29422_v33 = vpop.f32.mrf.mxu0 }
 0xcc7   : > { %v11418_v23 = vadd.f32 %v29422_v33, %v11307_v52 }
 0xcc8   : > { %v11410_v22 = vpop.f32.mrf.mxu0 }
 0xcc9   : > { %v11411_v47 = vadd.f32 %v11410_v22, %v11301_v29 }
 0xccf   : > { %v29457_v2 = vpop.f32.mrf.mxu1 }
 0xcd0   : > { %v11515_v60 = vadd.f32 %v29457_v2, %v11418_v23 }
 0xcd1   : > { %v11506_v53 = vpop.f32.mrf.mxu1 }
 0xcd2   : > { %v11507_v56 = vadd.f32 %v11506_v53, %v11411_v47  ;;  %v39102_v53 = vld [vmem:[#allocation54_spill] sm:$0xff] }
 0xcd3   : > { %v39103_v47 = vld [vmem:[#allocation14_spill] sm:$0xff] }
 0xce8   : > { %v29492_v49 = vpop.f32.mrf.mxu0 }
 0xce9   : > { %v11640_v19 = vadd.f32 %v29492_v49, %v11515_v60  ;;  %v39104_v60 = vld [vmem:[#allocation55_spill] sm:$0xff] }
 0xcea   : > { %v11633_v15 = vpop.f32.mrf.mxu0 }
 0xceb   : > { %v11634_v1 = vadd.f32 %v11633_v15, %v11507_v56  ;;  %v39105_v15 = vld [vmem:[#allocation15_spill] sm:$0xff]  ;;  %v39106_v56 = vld [vmem:[#allocation16_spill] sm:$0xff] }
 0xcf1   : > { %v29527_v27 = vpop.f32.mrf.mxu1 }
 0xcf2   : > { %v11733_v36 = vadd.f32 %v29527_v27, %v11640_v19  ;;  %v39107_v19 = vld [vmem:[#allocation21_spill] sm:$0xff] }
 0xcf3   : > { %v11726_v37 = vpop.f32.mrf.mxu1 }
 0xcf4   : > { %v11765_v3 = vand.u32 4294901760, %v11733_v36  ;;  %v11727_v28 = vadd.f32 %v11726_v37, %v11634_v1 }
 0xcf6   : > { %v11853_v34 = vsub.f32 %v11733_v36, %v11765_v3  ;;  %v11768_v11 = vand.u32 4294901760, %v11727_v28  ;;  %29528 = vmatprep.subr.mxu0 %v11765_v3 }
 0xcf7   : > { %29529 = vmatpush3.msra.mxu0 %v11765_v3 }
 0xcf8   : > { %v11860_v0 = vsub.f32 %v11727_v28, %v11768_v11  ;;  %29530 = vmatprep.subr.mxu0 %v11768_v11  ;;  %v11854_v39 = vand.u32 4294901760, %v11853_v34 }
 0xcf9   : > { %29531 = vmatpush3.msra.mxu0 %v11768_v11 }
 0xcfa   : > { %29542 = vmatprep.subr.mxu0 %v11853_v34  ;;  %29533 = vmatmul.mubr.f32.vlgmr.msra.gmra.mxu0 %v33010_v5  ;;  %v11855_v46 = vsub.f32 %v11853_v34, %v11854_v39  ;;  %v11861_v33 = vand.u32 4294901760, %v11860_v0 }
 0xcfb   : > { %29543 = vmatpush3.msra.mxu0 %v11853_v34  ;;  %29546 = vmatprep.mubr.f32.mxu0 %v32989_v7  ;;  %v24396_v34 = vld [vmem:[%s32549_s23 + $0x20] sm:$0xff] }
 0xcfc   : > { %29544 = vmatprep.subr.mxu0 %v11860_v0  ;;  %v11856_v49 = vand.u32 4294901760, %v11855_v46  ;;  %v11862_v27 = vsub.f32 %v11860_v0, %v11861_v33  ;;  %v35351_v28 = vand.u32 4294901760, %v24396_v34  ;;  %v39110_v46 = vld [vmem:[#allocation29_spill] sm:$0xff] }
 0xcfd   : > { %29545 = vmatpush3.msra.mxu0 %v11860_v0  ;;  %v39108_v0 = vld [vmem:[#allocation22_spill] sm:$0xff] }
 0xcfe   : > { %29535 = vmatprep.subr.mxu1 %v11856_v49  ;;  %29556 = vmatprep.subr.mxu0 %v11854_v39  ;;  %v11863_v36 = vand.u32 4294901760, %v11862_v27  ;;  %v35364_v1 = vsub.f32 %v24396_v34, %v35351_v28  ;;  %v39113_v27 = vld [vmem:[#allocation38_spill] sm:$0xff]  ;;  %v39115_v34 = vld [vmem:[#allocation44_spill] sm:$0xff] }
 0xcff   : > { %29536 = vmatpush3.msra.mxu1 %v11856_v49  ;;  %29547 = vmatmul.mubr.f32.vlgmr.msra.gmra.mxu0 %v33003_v59  ;;  %v39112_v49 = vld [vmem:[#allocation35_spill] sm:$0xff] }
 0xd00   : > { %29557 = vmatpush3.msra.mxu0 %v11854_v39  ;;  %29537 = vmatprep.subr.mxu1 %v11863_v36  ;;  %v12373_v16 = vand.u32 4294901760, %v35364_v1  ;;  %v39109_v39 = vld [vmem:[#allocation24_spill] sm:$0xff] }
 0xd01   : > { %29558 = vmatprep.subr.mxu0 %v11861_v33  ;;  %29538 = vmatpush3.msra.mxu1 %v11863_v36  ;;  %v39114_v36 = vld [vmem:[#allocation41_spill] sm:$0xff] }
 0xd02   : > { %29559 = vmatpush3.msra.mxu0 %v11861_v33  ;;  %29540 = vmatmul.mubr.f32.vlgmr.msra.gmra.mxu1 %v33000_v32  ;;  %v12374_v2 = vsub.f32 %v35364_v1, %v12373_v16  ;;  %v39111_v33 = vld [vmem:[#allocation32_spill] sm:$0xff] }
 0xd03   : > { %29549 = vmatprep.subr.mxu1 %v11765_v3  ;;  %29560 = vmatprep.mubr.f32.mxu0 %v32986_v61 }
 0xd04   : > { %29570 = vmatprep.subr.mxu0 %v32578_v12  ;;  %29550 = vmatpush3.msra.mxu1 %v11765_v3  ;;  %v12375_v29 = vand.u32 4294901760, %v12374_v2  ;;  %v39117_v2 = vld [vmem:[#allocation50_spill] sm:$0xff] }
 0xd05   : > { %29561 = vmatmul.mubr.f32.vlgmr.msra.gmra.mxu0 %v33000_v32  ;;  %29551 = vmatprep.subr.mxu1 %v11768_v11 }
 0xd06   : > { %29571 = vmatpush3.msra.mxu0 %v32578_v12  ;;  %29552 = vmatpush3.msra.mxu1 %v11768_v11 }
 0xd07   : > { %29572 = vmatprep.subr.mxu0 %v32572_v8  ;;  %29553 = vmatprep.mubr.f32.mxu1 %v32993_v54 }
 0xd08   : > { %29573 = vmatpush3.msra.mxu0 %v32572_v8  ;;  %29554 = vmatmul.mubr.f32.vlgmr.msra.gmra.mxu1 %v33006_v26 }
 0xd09   : > { %29563 = vmatprep.subr.mxu1 %v11765_v3  ;;  %29574 = vmatprep.subr.mxu0 %v32574_v9 }
 0xd0a   : > { %29564 = vmatpush3.msra.mxu1 %v11765_v3  ;;  %29575 = vmatpush3.msra.mxu0 %v32574_v9 }
 0xd0b   : > { %29565 = vmatprep.subr.mxu1 %v11768_v11  ;;  %29576 = vmatprep.subr.mxu0 %v32576_v10 }
 0xd0c   : > { %29566 = vmatpush3.msra.mxu1 %v11768_v11  ;;  %29567 = vmatprep.mubr.f32.mxu1 %v32986_v61  ;;  %v24397_v11 = vld [vmem:[%s32549_s23 + $0x28] sm:$0xff] }
 0xd0d   : > { %29577 = vmatpush3.msra.mxu0 %v32576_v10  ;;  %29568 = vmatmul.mubr.f32.vlgmr.msra.gmra.mxu1 %v33000_v32  ;;  %v35355_v3 = vand.u32 4294901760, %v24397_v11 }
 0xd0e   : > { %29578 = vmatprep.subr.mxu0 %v32570_v6  ;;  %29605 = vmatprep.subr.mxu1 %v32642_v38 }
 0xd0f   : > { %29579 = vmatpush3.msra.mxu0 %v32570_v6  ;;  %29606 = vmatpush3.msra.mxu1 %v32642_v38  ;;  %v35369_v37 = vsub.f32 %v24397_v11, %v35355_v3  ;;  %v39116_v11 = vld [vmem:[#allocation47_spill] sm:$0xff] }
 0xd10   : > { %29580 = vmatprep.subr.mxu0 %v32580_v13  ;;  %29607 = vmatprep.subr.mxu1 %v38709_v40 }
 0xd11   : > { %29581 = vmatpush3.msra.mxu0 %v32580_v13  ;;  %29608 = vmatpush3.msra.mxu1 %v38709_v40  ;;  %v38325_v22 = vand.u32 4294901760, %v35369_v37 }
 0xd12   : > { %29582 = vmatprep.subr.mxu0 %v32582_v14  ;;  %29609 = vmatprep.subr.mxu1 %v38710_v57 }
 0xd13   : > { %29583 = vmatpush3.msra.mxu0 %v32582_v14  ;;  %29610 = vmatpush3.msra.mxu1 %v38710_v57  ;;  %v12384_v52 = vsub.f32 %v35369_v37, %v38325_v22  ;;  %v39121_v22 = vld [vmem:[#allocation20_spill] sm:$0xff] }
 0xd14   : > { %29584 = vmatprep.subr.mxu0 %v32600_v21  ;;  %29611 = vmatprep.subr.mxu1 %v38711_v24 }
 0xd15   : > { %29585 = vmatpush3.msra.mxu0 %v32600_v21  ;;  %29612 = vmatpush3.msra.mxu1 %v38711_v24  ;;  %v12385_v23 = vand.u32 4294901760, %v12384_v52  ;;  %v39118_v52 = vld [vmem:[#allocation19_spill] sm:$0xff] }
 0xd16   : > { %29586 = vmatprep.subr.mxu0 %v32625_v30  ;;  %29613 = vmatprep.subr.mxu1 %v38712_v58 }
 0xd17   : > { %29587 = vmatpush3.msra.mxu0 %v32625_v30  ;;  %29614 = vmatpush3.msra.mxu1 %v38712_v58 }
 0xd18   : > { %29588 = vmatprep.subr.mxu0 %v32635_v35  ;;  %29615 = vmatprep.subr.mxu1 %v38713_v50 }
 0xd19   : > { %29589 = vmatpush3.msra.mxu0 %v32635_v35  ;;  %29616 = vmatpush3.msra.mxu1 %v38713_v50 }
 0xd1a   : > { %29590 = vmatprep.subr.mxu0 %v32655_v44  ;;  %29617 = vmatprep.subr.mxu1 %v38714_v62 }
 0xd1b   : > { %29591 = vmatpush3.msra.mxu0 %v32655_v44  ;;  %29618 = vmatpush3.msra.mxu1 %v38714_v62 }
 0xd1c   : > { %29592 = vmatprep.subr.mxu0 %v32666_v48  ;;  %29619 = vmatprep.subr.mxu1 %v38715_v42 }
 0xd1d   : > { %29593 = vmatpush3.msra.mxu0 %v32666_v48  ;;  %29620 = vmatpush3.msra.mxu1 %v38715_v42 }
 0xd1e   : > { %29594 = vmatprep.subr.mxu0 %v32684_v55  ;;  %29621 = vmatprep.subr.mxu1 %v38716_v20 }
 0xd1f   : > { %29595 = vmatpush3.msra.mxu0 %v32684_v55  ;;  %29622 = vmatpush3.msra.mxu1 %v38716_v20 }
 0xd20   : > { %29596 = vmatprep.subr.mxu0 %v32718_v4  ;;  %29623 = vmatprep.subr.mxu1 %v38717_v25 }
 0xd21   : > { %29597 = vmatpush3.msra.mxu0 %v32718_v4  ;;  %29624 = vmatpush3.msra.mxu1 %v38717_v25 }
 0xd22   : > { %29598 = vmatprep.subr.mxu0 %v32737_v31  ;;  %29625 = vmatprep.subr.mxu1 %v32792_v63 }
 0xd23   : > { %29599 = vmatpush3.msra.mxu0 %v32737_v31  ;;  %29626 = vmatpush3.msra.mxu1 %v32792_v63 }
 0xd24   : > { %29600 = vmatprep.subr.mxu0 %v32753_v43  ;;  %29627 = vmatprep.subr.mxu1 %v32809_v51 }
 0xd25   : > { %29601 = vmatpush3.msra.mxu0 %v32753_v43  ;;  %29628 = vmatpush3.msra.mxu1 %v32809_v51 }
 0xd26   : > { %29602 = vmatprep.mubr.f32.mxu0 %v12375_v29  ;;  %29629 = vmatprep.subr.mxu1 %v32820_v45  ;;  %v39119_v29 = vld [vmem:[#allocation17_spill] sm:$0xff] }
 0xd27   : > { %29640 = vmatprep.subr.mxu0 %v32595_v18  ;;  %29603 = vmatmul.mubr.f32.vlgmr.msra.gmra.mxu0 %v12385_v23  ;;  %v39120_v23 = vld [vmem:[#allocation18_spill] sm:$0xff] }
 0xd28   : > { %29630 = vmatpush3.msra.mxu1 %v32820_v45  ;;  %29641 = vmatpush3.msra.mxu0 %v32595_v18 }
 0xd29   : > { %29631 = vmatprep.subr.mxu1 %v39054_v41  ;;  %29642 = vmatprep.subr.mxu0 %v39055_v17 }
 0xd2a   : > { %29632 = vmatpush3.msra.mxu1 %v39054_v41  ;;  %29643 = vmatpush3.msra.mxu0 %v39055_v17 }
 0xd2b   : > { %29633 = vmatprep.subr.mxu1 %v39102_v53  ;;  %29644 = vmatprep.subr.mxu0 %v39103_v47 }
 0xd2c   : > { %29634 = vmatpush3.msra.mxu1 %v39102_v53  ;;  %29645 = vmatpush3.msra.mxu0 %v39103_v47 }
 0xd2d   : > { %29635 = vmatprep.subr.mxu1 %v39104_v60  ;;  %29646 = vmatprep.subr.mxu0 %v39105_v15 }
 0xd2e   : > { %29636 = vmatpush3.msra.mxu1 %v39104_v60  ;;  %29637 = vmatprep.mubr.f32.mxu1 %v35351_v28 }
 0xd2f   : > { %29647 = vmatpush3.msra.mxu0 %v39105_v15  ;;  %29638 = vmatmul.mubr.f32.vlgmr.msra.gmra.mxu1 %v35355_v3 }
 0xd30   : > { %29648 = vmatprep.subr.mxu0 %v39106_v56  ;;  %29675 = vmatprep.subr.mxu1 %v32578_v12 }
 0xd31   : > { %29649 = vmatpush3.msra.mxu0 %v39106_v56  ;;  %29676 = vmatpush3.msra.mxu1 %v32578_v12 }
 0xd32   : > { %29650 = vmatprep.subr.mxu0 %v39107_v19  ;;  %29677 = vmatprep.subr.mxu1 %v32572_v8 }
 0xd33   : > { %29651 = vmatpush3.msra.mxu0 %v39107_v19  ;;  %29678 = vmatpush3.msra.mxu1 %v32572_v8 }
 0xd34   : > { %29652 = vmatprep.subr.mxu0 %v39108_v0  ;;  %29679 = vmatprep.subr.mxu1 %v32574_v9 }
 0xd35   : > { %29653 = vmatpush3.msra.mxu0 %v39108_v0  ;;  %29680 = vmatpush3.msra.mxu1 %v32574_v9 }
 0xd36   : > { %29654 = vmatprep.subr.mxu0 %v39109_v39  ;;  %29681 = vmatprep.subr.mxu1 %v32576_v10 }
 0xd37   : > { %29655 = vmatpush3.msra.mxu0 %v39109_v39  ;;  %29682 = vmatpush3.msra.mxu1 %v32576_v10 }
 0xd38   : > { %29656 = vmatprep.subr.mxu0 %v39110_v46  ;;  %29683 = vmatprep.subr.mxu1 %v32570_v6 }
 0xd39   : > { %29657 = vmatpush3.msra.mxu0 %v39110_v46  ;;  %29684 = vmatpush3.msra.mxu1 %v32570_v6  ;;  %v39141_v46 = vld [vmem:[#allocation91_spill] sm:$0xff] }
 0xd3a   : > { %29658 = vmatprep.subr.mxu0 %v39111_v33  ;;  %29685 = vmatprep.subr.mxu1 %v32580_v13 }
 0xd3b   : > { %29659 = vmatpush3.msra.mxu0 %v39111_v33  ;;  %29686 = vmatpush3.msra.mxu1 %v32580_v13 }
 0xd3c   : > { %29660 = vmatprep.subr.mxu0 %v39112_v49  ;;  %29687 = vmatprep.subr.mxu1 %v32582_v14 }
 0xd3d   : > { %29661 = vmatpush3.msra.mxu0 %v39112_v49  ;;  %29688 = vmatpush3.msra.mxu1 %v32582_v14 }
 0xd3e   : > { %29662 = vmatprep.subr.mxu0 %v39113_v27  ;;  %29689 = vmatprep.subr.mxu1 %v32600_v21 }
 0xd3f   : > { %29663 = vmatpush3.msra.mxu0 %v39113_v27  ;;  %29690 = vmatpush3.msra.mxu1 %v32600_v21 }
 0xd40   : > { %29664 = vmatprep.subr.mxu0 %v39114_v36  ;;  %29691 = vmatprep.subr.mxu1 %v32625_v30 }
 0xd41   : > { %29665 = vmatpush3.msra.mxu0 %v39114_v36  ;;  %29692 = vmatpush3.msra.mxu1 %v32625_v30  ;;  %v39139_v36 = vld [vmem:[#allocation90_spill] sm:$0xff] }
 0xd42   : > { %29666 = vmatprep.subr.mxu0 %v39115_v34  ;;  %29693 = vmatprep.subr.mxu1 %v32635_v35  ;;  %32161 = vrcp.f32 %v39139_v36 }
 0xd43   : > { %29667 = vmatpush3.msra.mxu0 %v39115_v34  ;;  %29694 = vmatpush3.msra.mxu1 %v32635_v35 }
 0xd44   : > { %29668 = vmatprep.subr.mxu0 %v39116_v11  ;;  %29695 = vmatprep.subr.mxu1 %v32655_v44 }
 0xd45   : > { %29669 = vmatpush3.msra.mxu0 %v39116_v11  ;;  %29696 = vmatpush3.msra.mxu1 %v32655_v44 }
 0xd46   : > { %29670 = vmatprep.subr.mxu0 %v39117_v2  ;;  %29697 = vmatprep.subr.mxu1 %v32666_v48 }
 0xd47   : > { %29671 = vmatpush3.msra.mxu0 %v39117_v2  ;;  %29672 = vmatprep.mubr.f32.mxu0 %v35364_v1  ;;  %v39125_v1 = vld [vmem:[#allocation27_spill] sm:$0xff] }
 0xd48   : > { %29698 = vmatpush3.msra.mxu1 %v32666_v48  ;;  %29673 = vmatmul.mubr.f32.vlgmr.msra.gmra.mxu0 %v35369_v37 }
 0xd49   : > { %29699 = vmatprep.subr.mxu1 %v32684_v55  ;;  %29710 = vmatprep.subr.mxu0 %v39118_v52 }
 0xd4a   : > { %29700 = vmatpush3.msra.mxu1 %v32684_v55  ;;  %29711 = vmatpush3.msra.mxu0 %v39118_v52  ;;  %v39123_v52 = vld [vmem:[#allocation23_spill] sm:$0xff] }
 0xd4b   : > { %29701 = vmatprep.subr.mxu1 %v32718_v4  ;;  %29712 = vmatprep.subr.mxu0 %v39119_v29 }
 0xd4c   : > { %29702 = vmatpush3.msra.mxu1 %v32718_v4  ;;  %29713 = vmatpush3.msra.mxu0 %v39119_v29  ;;  %v39122_v29 = vand.u32 4294901760, %v35369_v37  ;;  %v39126_v37 = vld [vmem:[#allocation31_spill] sm:$0xff] }
 0xd4d   : > { %29703 = vmatprep.subr.mxu1 %v32737_v31  ;;  %29714 = vmatprep.subr.mxu0 %v39120_v23 }
 0xd4e   : > { %29704 = vmatpush3.msra.mxu1 %v32737_v31  ;;  %29715 = vmatpush3.msra.mxu0 %v39120_v23  ;;  %v39124_v23 = vld [vmem:[#allocation26_spill] sm:$0xff] }
 0xd4f   : > { %29705 = vmatprep.subr.mxu1 %v32753_v43  ;;  %29716 = vmatprep.subr.mxu0 %v39121_v22 }
 0xd50   : > { %29706 = vmatpush3.msra.mxu1 %v32753_v43  ;;  %29707 = vmatprep.mubr.f32.mxu1 %v12373_v16  ;;  %v39127_v16 = vld [vmem:[#allocation34_spill] sm:$0xff] }
 0xd51   : > { %29717 = vmatpush3.msra.mxu0 %v39121_v22  ;;  %29708 = vmatmul.mubr.f32.vlgmr.msra.gmra.mxu1 %v39122_v29  ;;  %v39128_v29 = vld [vmem:[#allocation37_spill] sm:$0xff] }
 0xd52   : > { %29718 = vmatprep.subr.mxu0 %v39123_v52  ;;  %29745 = vmatprep.subr.mxu1 %v32578_v12 }
 0xd53   : > { %29719 = vmatpush3.msra.mxu0 %v39123_v52  ;;  %29746 = vmatpush3.msra.mxu1 %v32578_v12 }
 0xd54   : > { %29720 = vmatprep.subr.mxu0 %v39124_v23  ;;  %29747 = vmatprep.subr.mxu1 %v32572_v8 }
 0xd55   : > { %29721 = vmatpush3.msra.mxu0 %v39124_v23  ;;  %29748 = vmatpush3.msra.mxu1 %v32572_v8 }
 0xd56   : > { %29722 = vmatprep.subr.mxu0 %v39125_v1  ;;  %29749 = vmatprep.subr.mxu1 %v32574_v9 }
 0xd57   : > { %29723 = vmatpush3.msra.mxu0 %v39125_v1  ;;  %29750 = vmatpush3.msra.mxu1 %v32574_v9  ;;  %v39129_v1 = vld [vmem:[#allocation40_spill] sm:$0xff] }
 0xd58   : > { %29724 = vmatprep.subr.mxu0 %v39126_v37  ;;  %29751 = vmatprep.subr.mxu1 %v32576_v10 }
 0xd59   : > { %29725 = vmatpush3.msra.mxu0 %v39126_v37  ;;  %29752 = vmatpush3.msra.mxu1 %v32576_v10  ;;  %v39130_v37 = vld [vmem:[#allocation43_spill] sm:$0xff] }
 0xd5a   : > { %29726 = vmatprep.subr.mxu0 %v39127_v16  ;;  %29753 = vmatprep.subr.mxu1 %v32570_v6 }
 0xd5b   : > { %29727 = vmatpush3.msra.mxu0 %v39127_v16  ;;  %29754 = vmatpush3.msra.mxu1 %v32570_v6  ;;  %v39131_v16 = vld [vmem:[#allocation46_spill] sm:$0xff] }
 0xd5c   : > { %29728 = vmatprep.subr.mxu0 %v39128_v29  ;;  %29755 = vmatprep.subr.mxu1 %v32580_v13 }
 0xd5d   : > { %29729 = vmatpush3.msra.mxu0 %v39128_v29  ;;  %29756 = vmatpush3.msra.mxu1 %v32580_v13  ;;  %v39132_v29 = vld [vmem:[#allocation49_spill] sm:$0xff] }
 0xd5e   : > { %29730 = vmatprep.subr.mxu0 %v39129_v1  ;;  %29757 = vmatprep.subr.mxu1 %v32582_v14 }
 0xd5f   : > { %29731 = vmatpush3.msra.mxu0 %v39129_v1  ;;  %29758 = vmatpush3.msra.mxu1 %v32582_v14  ;;  %v39133_v1 = vld [vmem:[#allocation51_spill] sm:$0xff] }
 0xd60   : > { %29732 = vmatprep.subr.mxu0 %v39130_v37  ;;  %29759 = vmatprep.subr.mxu1 %v32600_v21 }
 0xd61   : > { %29733 = vmatpush3.msra.mxu0 %v39130_v37  ;;  %29760 = vmatpush3.msra.mxu1 %v32600_v21  ;;  %v39134_v37 = vld [vmem:[#allocation52_spill] sm:$0xff] }
 0xd62   : > { %29734 = vmatprep.subr.mxu0 %v39131_v16  ;;  %29761 = vmatprep.subr.mxu1 %v32625_v30 }
 0xd63   : > { %29735 = vmatpush3.msra.mxu0 %v39131_v16  ;;  %29762 = vmatpush3.msra.mxu1 %v32625_v30 }
 0xd64   : > { %29736 = vmatprep.subr.mxu0 %v39132_v29  ;;  %29763 = vmatprep.subr.mxu1 %v32635_v35 }
 0xd65   : > { %29737 = vmatpush3.msra.mxu0 %v39132_v29  ;;  %29764 = vmatpush3.msra.mxu1 %v32635_v35 }
 0xd66   : > { %29738 = vmatprep.subr.mxu0 %v39133_v1  ;;  %29765 = vmatprep.subr.mxu1 %v32655_v44 }
 0xd67   : > { %29739 = vmatpush3.msra.mxu0 %v39133_v1  ;;  %29766 = vmatpush3.msra.mxu1 %v32655_v44  ;;  %v39135_v1 = vld [vmem:[#allocation56_spill] sm:$0xff] }
 0xd68   : > { %29740 = vmatprep.subr.mxu0 %v39134_v37  ;;  %29767 = vmatprep.subr.mxu1 %v32666_v48 }
 0xd69   : > { %29741 = vmatpush3.msra.mxu0 %v39134_v37  ;;  %29742 = vmatprep.mubr.f32.mxu0 %v35351_v28 }
 0xd6a   : > { %29768 = vmatpush3.msra.mxu1 %v32666_v48  ;;  %29743 = vmatmul.mubr.f32.vlgmr.msra.gmra.mxu0 %v35355_v3 }
 0xd6b   : > { %29769 = vmatprep.subr.mxu1 %v32684_v55  ;;  %29777 = vmatprep.mubr.f32.mxu1 %v35351_v28 }
 0xd6c   : > { %29770 = vmatpush3.msra.mxu1 %v32684_v55  ;;  %29784 = vmatprep.mubr.f32.mxu0 %v39135_v1 }
 0xd6d   : > { %29771 = vmatprep.subr.mxu1 %v32718_v4 }
 0xd6e   : > { %29772 = vmatpush3.msra.mxu1 %v32718_v4 }
 0xd6f   : > { %29773 = vmatprep.subr.mxu1 %v32737_v31 }
 0xd70   : > { %29774 = vmatpush3.msra.mxu1 %v32737_v31 }
 0xd71   : > { %29775 = vmatprep.subr.mxu1 %v32753_v43 }
 0xd72   : > { %29776 = vmatpush3.msra.mxu1 %v32753_v43 }
 0xd73   : > { %29778 = vmatmul.mubr.f32.vlgmr.msra.gmra.mxu1 %v35355_v3 }
 0xd74   : > { %29791 = vmatprep.mubr.f32.mxu1 %v32986_v61 }
 0xdba   : > { %v29534_v28 = vpop.f32.mrf.mxu0 }
 0xdbc   : > { %v35557_v37 = vpop.f32.mrf.mxu0 }
 0xdbd   : > { %39136 = vst [vmem:[#allocation92_spill] sm:$0xff] %v35557_v37  ;;  %v12251_v37 = vmul.f32 2.0, %v39141_v46 }
 0xdbf   : > { %v29548_v1 = vpop.f32.mrf.mxu0  ;;  %v12253_v0 = vadd.f32 0.0001, %v12251_v37 }
 0xdc1   : > { %v35561_v52 = vpop.f32.mrf.mxu0 }
 0xdc2   : > { %v29541_v29 = vpop.f32.mrf.mxu1  ;;  %39138 = vst [vmem:[#allocation107_spill] sm:$0xff] %v35561_v52 }
 0xdc3   : > { %v11907_v16 = vadd.f32 %v29541_v29, %v29534_v28  ;;  %v39142_v28 = vld [vmem:[#allocation60_spill] sm:$0xff] }
 0xdc4   : > { %v35559_v23 = vpop.f32.mrf.mxu1 }
 0xdc5   : > { %39137 = vst [vmem:[#allocation106_spill] sm:$0xff] %v35559_v23  ;;  %v11990_v22 = vadd.f32 %v29548_v1, %v11907_v16  ;;  %v29562_v11 = vpop.f32.mrf.mxu0  ;;  %v6289_v23 = vsub.f32 1.0, %v39142_v28  ;;  %v32162_v16 = vpop.eup %32161 }
 0xdc7   : > { %v6291_v19 = vmul.f32 0.5, %v6289_v23 }
 0xdc8   : > { %v29555_v2 = vpop.f32.mrf.mxu1 }
 0xdc9   : > { %v12073_v34 = vadd.f32 %v29555_v2, %v11990_v22  ;;  %v6293_v56 = vmax.f32 %v6291_v19, 0.0 }
 0xdca   : > { %v35564_v27 = vpop.f32.mrf.mxu1 }
 0xdcb   : > { %39140 = vst [vmem:[#allocation90_spill] sm:$0xff] %v35564_v27  ;;  %v12156_v3 = vadd.f32 %v29562_v11, %v12073_v34  ;;  %v6295_v34 = vmin.f32 %v6293_v56, 1.0 }
 0xdcd   : > { %v29569_v49 = vpop.f32.mrf.mxu1 }
 0xdce   : > { %v12235_v33 = vadd.f32 %v29569_v49, %v12156_v3  ;;  %v35571_v3 = vpop.f32.mrf.mxu0 }
 0xdcf   : > { %39144 = vst [vmem:[#allocation60_spill] sm:$0xff] %v35571_v3 }
 0xdd0   : > { %v12249_v39 = vsub.f32 %v12235_v33, %v39141_v46 }
 0xdd2   : > { %v12255_v29 = vmul.f32 2.0, %v12249_v39  ;;  %v35573_v39 = vpop.f32.mrf.mxu1 }
 0xdd3   : > { %39145 = vst [vmem:[#allocation108_spill] sm:$0xff] %v35573_v39 }
 0xdd4   : > { %v12257_v52 = vadd.f32 0.0009, %v12255_v29 }
 0xdd6   : > { %v12259_v1 = vmul.f32 %v12257_v52, %v12253_v0 }
 0xdd8   : > { %v12273_v22 = vmul.f32 %v32162_v16, %v12259_v1 }
 0xdda   : > { %v12275_v2 = vsub.f32 1.0, %v12273_v22 }
 0xddc   : > { %v12277_v36 = vmul.f32 0.5, %v12275_v2 }
 0xdde   : > { %v12279_v27 = vmax.f32 %v12277_v36, 0.0 }
 0xde0   : > { %v12281_v11 = vmin.f32 %v12279_v27, 1.0 }
 0xde2   : > { %v35569_v49 = vadd.f32 %v12281_v11, %v6295_v34 }
 0xde4   : > { %39143 = vst [vmem:[#allocation91_spill] sm:$0xff] %v35569_v49 }
 0xde7   : > { %v29604_v46 = vpop.f32.mrf.mxu0 }
 0xde9   : > { %v12377_v33 = vpop.f32.mrf.mxu0 }
 0xdef   : > { %v29639_v37 = vpop.f32.mrf.mxu1 }
 0xdf0   : > { %v12545_v28 = vadd.f32 %v29639_v37, %v29604_v46 }
 0xdf1   : > { %v12538_v0 = vpop.f32.mrf.mxu1 }
 0xdf2   : > { %v12539_v16 = vadd.f32 %v12538_v0, %v12377_v33 }
 0xe08   : > { %v29674_v29 = vpop.f32.mrf.mxu0 }
 0xe09   : > { %v12656_v19 = vadd.f32 %v29674_v29, %v12545_v28 }
 0xe0a   : > { %v12648_v52 = vpop.f32.mrf.mxu0 }
 0xe0b   : > { %v12649_v56 = vadd.f32 %v12648_v52, %v12539_v16 }
 0xe11   : > { %v29709_v23 = vpop.f32.mrf.mxu1 }
 0xe12   : > { %v12753_v27 = vadd.f32 %v29709_v23, %v12656_v19 }
 0xe13   : > { %v12744_v22 = vpop.f32.mrf.mxu1 }
 0xe14   : > { %v12745_v36 = vadd.f32 %v12744_v22, %v12649_v56  ;;  %v39146_v56 = vld [vmem:[#allocation54_spill] sm:$0xff] }
 0xe2a   : > { %v29744_v1 = vpop.f32.mrf.mxu0 }
 0xe2b   : > { %v12878_v34 = vadd.f32 %v29744_v1, %v12753_v27  ;;  %v39147_v27 = vld [vmem:[#allocation14_spill] sm:$0xff] }
 0xe2c   : > { %v12871_v2 = vpop.f32.mrf.mxu0 }
 0xe2d   : > { %v12872_v3 = vadd.f32 %v12871_v2, %v12745_v36  ;;  %v39148_v2 = vld [vmem:[#allocation55_spill] sm:$0xff] }
 0xe2e   : > { %v39149_v36 = vld [vmem:[#allocation15_spill] sm:$0xff] }
 0xe33   : > { %v29779_v11 = vpop.f32.mrf.mxu1 }
 0xe34   : > { %v12971_v49 = vadd.f32 %v29779_v11, %v12878_v34  ;;  %v39150_v34 = vld [vmem:[#allocation16_spill] sm:$0xff]  ;;  %v39151_v11 = vld [vmem:[#allocation21_spill] sm:$0xff] }
 0xe35   : > { %v12964_v39 = vpop.f32.mrf.mxu1 }
 0xe36   : > { %v13003_v15 = vand.u32 4294901760, %v12971_v49  ;;  %v12965_v60 = vadd.f32 %v12964_v39, %v12872_v3 }
 0xe38   : > { %v13091_v47 = vsub.f32 %v12971_v49, %v13003_v15  ;;  %v13006_v53 = vand.u32 4294901760, %v12965_v60  ;;  %29780 = vmatprep.subr.mxu0 %v13003_v15 }
 0xe39   : > { %29781 = vmatpush3.msra.mxu0 %v13003_v15 }
 0xe3a   : > { %v13098_v46 = vsub.f32 %v12965_v60, %v13006_v53  ;;  %29782 = vmatprep.subr.mxu0 %v13006_v53  ;;  %v13092_v33 = vand.u32 4294901760, %v13091_v47 }
 0xe3b   : > { %29783 = vmatpush3.msra.mxu0 %v13006_v53 }
 0xe3c   : > { %29794 = vmatprep.subr.mxu0 %v13091_v47  ;;  %29785 = vmatmul.mubr.f32.vlgmr.msra.gmra.mxu0 %v33010_v5  ;;  %v13093_v37 = vsub.f32 %v13091_v47, %v13092_v33  ;;  %v13099_v29 = vand.u32 4294901760, %v13098_v46 }
 0xe3d   : > { %29795 = vmatpush3.msra.mxu0 %v13091_v47  ;;  %29798 = vmatprep.mubr.f32.mxu0 %v32989_v7  ;;  %v24398_v47 = vld [vmem:[%s32556_s28 + $0x20] sm:$0xff] }
 0xe3e   : > { %29796 = vmatprep.subr.mxu0 %v13098_v46  ;;  %v13094_v0 = vand.u32 4294901760, %v13093_v37  ;;  %v13100_v52 = vsub.f32 %v13098_v46, %v13099_v29  ;;  %v35605_v60 = vand.u32 4294901760, %v24398_v47  ;;  %v39154_v37 = vld [vmem:[#allocation29_spill] sm:$0xff] }
 0xe3f   : > { %29797 = vmatpush3.msra.mxu0 %v13098_v46  ;;  %v39152_v46 = vld [vmem:[#allocation22_spill] sm:$0xff] }
 0xe40   : > { %29787 = vmatprep.subr.mxu1 %v13094_v0  ;;  %29808 = vmatprep.subr.mxu0 %v13092_v33  ;;  %v13101_v49 = vand.u32 4294901760, %v13100_v52  ;;  %v35618_v3 = vsub.f32 %v24398_v47, %v35605_v60  ;;  %v39157_v52 = vld [vmem:[#allocation38_spill] sm:$0xff]  ;;  %v39159_v47 = vld [vmem:[#allocation44_spill] sm:$0xff] }
 0xe41   : > { %29788 = vmatpush3.msra.mxu1 %v13094_v0  ;;  %29799 = vmatmul.mubr.f32.vlgmr.msra.gmra.mxu0 %v33003_v59  ;;  %v39156_v0 = vld [vmem:[#allocation35_spill] sm:$0xff] }
 0xe42   : > { %29809 = vmatpush3.msra.mxu0 %v13092_v33  ;;  %29789 = vmatprep.subr.mxu1 %v13101_v49  ;;  %v13559_v23 = vand.u32 4294901760, %v35618_v3  ;;  %v39153_v33 = vld [vmem:[#allocation24_spill] sm:$0xff] }
 0xe43   : > { %29810 = vmatprep.subr.mxu0 %v13099_v29  ;;  %29790 = vmatpush3.msra.mxu1 %v13101_v49  ;;  %v39158_v49 = vld [vmem:[#allocation41_spill] sm:$0xff] }
 0xe44   : > { %29811 = vmatpush3.msra.mxu0 %v13099_v29  ;;  %29792 = vmatmul.mubr.f32.vlgmr.msra.gmra.mxu1 %v33000_v32  ;;  %v13560_v1 = vsub.f32 %v35618_v3, %v13559_v23  ;;  %v39155_v29 = vld [vmem:[#allocation32_spill] sm:$0xff] }
 0xe45   : > { %29801 = vmatprep.subr.mxu1 %v13003_v15  ;;  %29812 = vmatprep.mubr.f32.mxu0 %v32986_v61 }
 0xe46   : > { %29822 = vmatprep.subr.mxu0 %v32578_v12  ;;  %29802 = vmatpush3.msra.mxu1 %v13003_v15  ;;  %v13561_v19 = vand.u32 4294901760, %v13560_v1  ;;  %v39161_v1 = vld [vmem:[#allocation50_spill] sm:$0xff] }
 0xe47   : > { %29813 = vmatmul.mubr.f32.vlgmr.msra.gmra.mxu0 %v33000_v32  ;;  %29803 = vmatprep.subr.mxu1 %v13006_v53 }
 0xe48   : > { %29823 = vmatpush3.msra.mxu0 %v32578_v12  ;;  %29804 = vmatpush3.msra.mxu1 %v13006_v53 }
 0xe49   : > { %29824 = vmatprep.subr.mxu0 %v32572_v8  ;;  %29805 = vmatprep.mubr.f32.mxu1 %v32993_v54 }
 0xe4a   : > { %29825 = vmatpush3.msra.mxu0 %v32572_v8  ;;  %29806 = vmatmul.mubr.f32.vlgmr.msra.gmra.mxu1 %v33006_v26 }
 0xe4b   : > { %29815 = vmatprep.subr.mxu1 %v13003_v15  ;;  %29826 = vmatprep.subr.mxu0 %v32574_v9 }
 0xe4c   : > { %29816 = vmatpush3.msra.mxu1 %v13003_v15  ;;  %29827 = vmatpush3.msra.mxu0 %v32574_v9 }
 0xe4d   : > { %29817 = vmatprep.subr.mxu1 %v13006_v53  ;;  %29828 = vmatprep.subr.mxu0 %v32576_v10 }
 0xe4e   : > { %29818 = vmatpush3.msra.mxu1 %v13006_v53  ;;  %29819 = vmatprep.mubr.f32.mxu1 %v32986_v61  ;;  %v24399_v53 = vld [vmem:[%s32556_s28 + $0x28] sm:$0xff] }
 0xe4f   : > { %29829 = vmatpush3.msra.mxu0 %v32576_v10  ;;  %29820 = vmatmul.mubr.f32.vlgmr.msra.gmra.mxu1 %v33000_v32  ;;  %v35609_v15 = vand.u32 4294901760, %v24399_v53 }
 0xe50   : > { %29830 = vmatprep.subr.mxu0 %v32570_v6  ;;  %29857 = vmatprep.subr.mxu1 %v32642_v38 }
 0xe51   : > { %29831 = vmatpush3.msra.mxu0 %v32570_v6  ;;  %29858 = vmatpush3.msra.mxu1 %v32642_v38  ;;  %v35623_v39 = vsub.f32 %v24399_v53, %v35609_v15  ;;  %v39160_v53 = vld [vmem:[#allocation47_spill] sm:$0xff] }
 0xe52   : > { %29832 = vmatprep.subr.mxu0 %v32580_v13  ;;  %29859 = vmatprep.subr.mxu1 %v38709_v40 }
 0xe53   : > { %29833 = vmatpush3.msra.mxu0 %v32580_v13  ;;  %29860 = vmatpush3.msra.mxu1 %v38709_v40  ;;  %v38358_v28 = vand.u32 4294901760, %v35623_v39 }
 0xe54   : > { %29834 = vmatprep.subr.mxu0 %v32582_v14  ;;  %29861 = vmatprep.subr.mxu1 %v38710_v57 }
 0xe55   : > { %29835 = vmatpush3.msra.mxu0 %v32582_v14  ;;  %29862 = vmatpush3.msra.mxu1 %v38710_v57  ;;  %v13570_v16 = vsub.f32 %v35623_v39, %v38358_v28  ;;  %v39165_v28 = vld [vmem:[#allocation20_spill] sm:$0xff] }
 0xe56   : > { %29836 = vmatprep.subr.mxu0 %v32600_v21  ;;  %29863 = vmatprep.subr.mxu1 %v38711_v24 }
 0xe57   : > { %29837 = vmatpush3.msra.mxu0 %v32600_v21  ;;  %29864 = vmatpush3.msra.mxu1 %v38711_v24  ;;  %v13571_v22 = vand.u32 4294901760, %v13570_v16  ;;  %v39162_v16 = vld [vmem:[#allocation19_spill] sm:$0xff] }
 0xe58   : > { %29838 = vmatprep.subr.mxu0 %v32625_v30  ;;  %29865 = vmatprep.subr.mxu1 %v38712_v58 }
 0xe59   : > { %29839 = vmatpush3.msra.mxu0 %v32625_v30  ;;  %29866 = vmatpush3.msra.mxu1 %v38712_v58 }
 0xe5a   : > { %29840 = vmatprep.subr.mxu0 %v32635_v35  ;;  %29867 = vmatprep.subr.mxu1 %v38713_v50 }
 0xe5b   : > { %29841 = vmatpush3.msra.mxu0 %v32635_v35  ;;  %29868 = vmatpush3.msra.mxu1 %v38713_v50 }
 0xe5c   : > { %29842 = vmatprep.subr.mxu0 %v32655_v44  ;;  %29869 = vmatprep.subr.mxu1 %v38714_v62 }
 0xe5d   : > { %29843 = vmatpush3.msra.mxu0 %v32655_v44  ;;  %29870 = vmatpush3.msra.mxu1 %v38714_v62 }
 0xe5e   : > { %29844 = vmatprep.subr.mxu0 %v32666_v48  ;;  %29871 = vmatprep.subr.mxu1 %v38715_v42 }
 0xe5f   : > { %29845 = vmatpush3.msra.mxu0 %v32666_v48  ;;  %29872 = vmatpush3.msra.mxu1 %v38715_v42 }
 0xe60   : > { %29846 = vmatprep.subr.mxu0 %v32684_v55  ;;  %29873 = vmatprep.subr.mxu1 %v38716_v20 }
 0xe61   : > { %29847 = vmatpush3.msra.mxu0 %v32684_v55  ;;  %29874 = vmatpush3.msra.mxu1 %v38716_v20 }
 0xe62   : > { %29848 = vmatprep.subr.mxu0 %v32718_v4  ;;  %29875 = vmatprep.subr.mxu1 %v38717_v25 }
 0xe63   : > { %29849 = vmatpush3.msra.mxu0 %v32718_v4  ;;  %29876 = vmatpush3.msra.mxu1 %v38717_v25 }
 0xe64   : > { %29850 = vmatprep.subr.mxu0 %v32737_v31  ;;  %29877 = vmatprep.subr.mxu1 %v32792_v63 }
 0xe65   : > { %29851 = vmatpush3.msra.mxu0 %v32737_v31  ;;  %29878 = vmatpush3.msra.mxu1 %v32792_v63 }
 0xe66   : > { %29852 = vmatprep.subr.mxu0 %v32753_v43  ;;  %29879 = vmatprep.subr.mxu1 %v32809_v51 }
 0xe67   : > { %29853 = vmatpush3.msra.mxu0 %v32753_v43  ;;  %29880 = vmatpush3.msra.mxu1 %v32809_v51 }
 0xe68   : > { %29854 = vmatprep.mubr.f32.mxu0 %v13561_v19  ;;  %29881 = vmatprep.subr.mxu1 %v32820_v45  ;;  %v39163_v19 = vld [vmem:[#allocation17_spill] sm:$0xff] }
 0xe69   : > { %29892 = vmatprep.subr.mxu0 %v32595_v18  ;;  %29855 = vmatmul.mubr.f32.vlgmr.msra.gmra.mxu0 %v13571_v22  ;;  %v39164_v22 = vld [vmem:[#allocation18_spill] sm:$0xff] }
 0xe6a   : > { %29882 = vmatpush3.msra.mxu1 %v32820_v45  ;;  %29893 = vmatpush3.msra.mxu0 %v32595_v18 }
 0xe6b   : > { %29883 = vmatprep.subr.mxu1 %v39054_v41  ;;  %29894 = vmatprep.subr.mxu0 %v39055_v17 }
 0xe6c   : > { %29884 = vmatpush3.msra.mxu1 %v39054_v41  ;;  %29895 = vmatpush3.msra.mxu0 %v39055_v17 }
 0xe6d   : > { %29885 = vmatprep.subr.mxu1 %v39146_v56  ;;  %29896 = vmatprep.subr.mxu0 %v39147_v27 }
 0xe6e   : > { %29886 = vmatpush3.msra.mxu1 %v39146_v56  ;;  %29897 = vmatpush3.msra.mxu0 %v39147_v27 }
 0xe6f   : > { %29887 = vmatprep.subr.mxu1 %v39148_v2  ;;  %29898 = vmatprep.subr.mxu0 %v39149_v36 }
 0xe70   : > { %29888 = vmatpush3.msra.mxu1 %v39148_v2  ;;  %29889 = vmatprep.mubr.f32.mxu1 %v35605_v60 }
 0xe71   : > { %29899 = vmatpush3.msra.mxu0 %v39149_v36  ;;  %29890 = vmatmul.mubr.f32.vlgmr.msra.gmra.mxu1 %v35609_v15 }
 0xe72   : > { %29900 = vmatprep.subr.mxu0 %v39150_v34  ;;  %29927 = vmatprep.subr.mxu1 %v32578_v12 }
 0xe73   : > { %29901 = vmatpush3.msra.mxu0 %v39150_v34  ;;  %29928 = vmatpush3.msra.mxu1 %v32578_v12 }
 0xe74   : > { %29902 = vmatprep.subr.mxu0 %v39151_v11  ;;  %29929 = vmatprep.subr.mxu1 %v32572_v8 }
 0xe75   : > { %29903 = vmatpush3.msra.mxu0 %v39151_v11  ;;  %29930 = vmatpush3.msra.mxu1 %v32572_v8 }
 0xe76   : > { %29904 = vmatprep.subr.mxu0 %v39152_v46  ;;  %29931 = vmatprep.subr.mxu1 %v32574_v9 }
 0xe77   : > { %29905 = vmatpush3.msra.mxu0 %v39152_v46  ;;  %29932 = vmatpush3.msra.mxu1 %v32574_v9 }
 0xe78   : > { %29906 = vmatprep.subr.mxu0 %v39153_v33  ;;  %29933 = vmatprep.subr.mxu1 %v32576_v10 }
 0xe79   : > { %29907 = vmatpush3.msra.mxu0 %v39153_v33  ;;  %29934 = vmatpush3.msra.mxu1 %v32576_v10 }
 0xe7a   : > { %29908 = vmatprep.subr.mxu0 %v39154_v37  ;;  %29935 = vmatprep.subr.mxu1 %v32570_v6 }
 0xe7b   : > { %29909 = vmatpush3.msra.mxu0 %v39154_v37  ;;  %29936 = vmatpush3.msra.mxu1 %v32570_v6 }
 0xe7c   : > { %29910 = vmatprep.subr.mxu0 %v39155_v29  ;;  %29937 = vmatprep.subr.mxu1 %v32580_v13 }
 0xe7d   : > { %29911 = vmatpush3.msra.mxu0 %v39155_v29  ;;  %29938 = vmatpush3.msra.mxu1 %v32580_v13 }
 0xe7e   : > { %29912 = vmatprep.subr.mxu0 %v39156_v0  ;;  %29939 = vmatprep.subr.mxu1 %v32582_v14 }
 0xe7f   : > { %29913 = vmatpush3.msra.mxu0 %v39156_v0  ;;  %29940 = vmatpush3.msra.mxu1 %v32582_v14 }
 0xe80   : > { %29914 = vmatprep.subr.mxu0 %v39157_v52  ;;  %29941 = vmatprep.subr.mxu1 %v32600_v21 }
 0xe81   : > { %29915 = vmatpush3.msra.mxu0 %v39157_v52  ;;  %29942 = vmatpush3.msra.mxu1 %v32600_v21 }
 0xe82   : > { %29916 = vmatprep.subr.mxu0 %v39158_v49  ;;  %29943 = vmatprep.subr.mxu1 %v32625_v30 }
 0xe83   : > { %29917 = vmatpush3.msra.mxu0 %v39158_v49  ;;  %29944 = vmatpush3.msra.mxu1 %v32625_v30 }
 0xe84   : > { %29918 = vmatprep.subr.mxu0 %v39159_v47  ;;  %29945 = vmatprep.subr.mxu1 %v32635_v35 }
 0xe85   : > { %29919 = vmatpush3.msra.mxu0 %v39159_v47  ;;  %29946 = vmatpush3.msra.mxu1 %v32635_v35 }
 0xe86   : > { %29920 = vmatprep.subr.mxu0 %v39160_v53  ;;  %29947 = vmatprep.subr.mxu1 %v32655_v44 }
 0xe87   : > { %29921 = vmatpush3.msra.mxu0 %v39160_v53  ;;  %29948 = vmatpush3.msra.mxu1 %v32655_v44 }
 0xe88   : > { %29922 = vmatprep.subr.mxu0 %v39161_v1  ;;  %29949 = vmatprep.subr.mxu1 %v32666_v48 }
 0xe89   : > { %29923 = vmatpush3.msra.mxu0 %v39161_v1  ;;  %29924 = vmatprep.mubr.f32.mxu0 %v35618_v3  ;;  %v39169_v3 = vld [vmem:[#allocation27_spill] sm:$0xff] }
 0xe8a   : > { %29950 = vmatpush3.msra.mxu1 %v32666_v48  ;;  %29925 = vmatmul.mubr.f32.vlgmr.msra.gmra.mxu0 %v35623_v39 }
 0xe8b   : > { %29951 = vmatprep.subr.mxu1 %v32684_v55  ;;  %29962 = vmatprep.subr.mxu0 %v39162_v16 }
 0xe8c   : > { %29952 = vmatpush3.msra.mxu1 %v32684_v55  ;;  %29963 = vmatpush3.msra.mxu0 %v39162_v16  ;;  %v39167_v16 = vld [vmem:[#allocation23_spill] sm:$0xff] }
 0xe8d   : > { %29953 = vmatprep.subr.mxu1 %v32718_v4  ;;  %29964 = vmatprep.subr.mxu0 %v39163_v19 }
 0xe8e   : > { %29954 = vmatpush3.msra.mxu1 %v32718_v4  ;;  %29965 = vmatpush3.msra.mxu0 %v39163_v19  ;;  %v39166_v19 = vand.u32 4294901760, %v35623_v39  ;;  %v39170_v39 = vld [vmem:[#allocation31_spill] sm:$0xff] }
 0xe8f   : > { %29955 = vmatprep.subr.mxu1 %v32737_v31  ;;  %29966 = vmatprep.subr.mxu0 %v39164_v22 }
 0xe90   : > { %29956 = vmatpush3.msra.mxu1 %v32737_v31  ;;  %29967 = vmatpush3.msra.mxu0 %v39164_v22  ;;  %v39168_v22 = vld [vmem:[#allocation26_spill] sm:$0xff] }
 0xe91   : > { %29957 = vmatprep.subr.mxu1 %v32753_v43  ;;  %29968 = vmatprep.subr.mxu0 %v39165_v28 }
 0xe92   : > { %29958 = vmatpush3.msra.mxu1 %v32753_v43  ;;  %29959 = vmatprep.mubr.f32.mxu1 %v13559_v23  ;;  %v39171_v23 = vld [vmem:[#allocation34_spill] sm:$0xff] }
 0xe93   : > { %29969 = vmatpush3.msra.mxu0 %v39165_v28  ;;  %29960 = vmatmul.mubr.f32.vlgmr.msra.gmra.mxu1 %v39166_v19  ;;  %v39172_v19 = vld [vmem:[#allocation37_spill] sm:$0xff] }
 0xe94   : > { %29970 = vmatprep.subr.mxu0 %v39167_v16  ;;  %29997 = vmatprep.subr.mxu1 %v32578_v12 }
 0xe95   : > { %29971 = vmatpush3.msra.mxu0 %v39167_v16  ;;  %29998 = vmatpush3.msra.mxu1 %v32578_v12 }
 0xe96   : > { %29972 = vmatprep.subr.mxu0 %v39168_v22  ;;  %29999 = vmatprep.subr.mxu1 %v32572_v8 }
 0xe97   : > { %29973 = vmatpush3.msra.mxu0 %v39168_v22  ;;  %30000 = vmatpush3.msra.mxu1 %v32572_v8 }
 0xe98   : > { %29974 = vmatprep.subr.mxu0 %v39169_v3  ;;  %30001 = vmatprep.subr.mxu1 %v32574_v9 }
 0xe99   : > { %29975 = vmatpush3.msra.mxu0 %v39169_v3  ;;  %30002 = vmatpush3.msra.mxu1 %v32574_v9  ;;  %v39173_v3 = vld [vmem:[#allocation40_spill] sm:$0xff] }
 0xe9a   : > { %29976 = vmatprep.subr.mxu0 %v39170_v39  ;;  %30003 = vmatprep.subr.mxu1 %v32576_v10 }
 0xe9b   : > { %29977 = vmatpush3.msra.mxu0 %v39170_v39  ;;  %30004 = vmatpush3.msra.mxu1 %v32576_v10  ;;  %v39174_v39 = vld [vmem:[#allocation43_spill] sm:$0xff] }
 0xe9c   : > { %29978 = vmatprep.subr.mxu0 %v39171_v23  ;;  %30005 = vmatprep.subr.mxu1 %v32570_v6 }
 0xe9d   : > { %29979 = vmatpush3.msra.mxu0 %v39171_v23  ;;  %30006 = vmatpush3.msra.mxu1 %v32570_v6  ;;  %v39175_v23 = vld [vmem:[#allocation46_spill] sm:$0xff] }
 0xe9e   : > { %29980 = vmatprep.subr.mxu0 %v39172_v19  ;;  %30007 = vmatprep.subr.mxu1 %v32580_v13 }
 0xe9f   : > { %29981 = vmatpush3.msra.mxu0 %v39172_v19  ;;  %30008 = vmatpush3.msra.mxu1 %v32580_v13  ;;  %v39176_v19 = vld [vmem:[#allocation49_spill] sm:$0xff] }
 0xea0   : > { %29982 = vmatprep.subr.mxu0 %v39173_v3  ;;  %30009 = vmatprep.subr.mxu1 %v32582_v14 }
 0xea1   : > { %29983 = vmatpush3.msra.mxu0 %v39173_v3  ;;  %30010 = vmatpush3.msra.mxu1 %v32582_v14  ;;  %v39177_v3 = vld [vmem:[#allocation51_spill] sm:$0xff] }
 0xea2   : > { %29984 = vmatprep.subr.mxu0 %v39174_v39  ;;  %30011 = vmatprep.subr.mxu1 %v32600_v21 }
 0xea3   : > { %29985 = vmatpush3.msra.mxu0 %v39174_v39  ;;  %30012 = vmatpush3.msra.mxu1 %v32600_v21  ;;  %v39178_v39 = vld [vmem:[#allocation52_spill] sm:$0xff] }
 0xea4   : > { %29986 = vmatprep.subr.mxu0 %v39175_v23  ;;  %30013 = vmatprep.subr.mxu1 %v32625_v30 }
 0xea5   : > { %29987 = vmatpush3.msra.mxu0 %v39175_v23  ;;  %30014 = vmatpush3.msra.mxu1 %v32625_v30 }
 0xea6   : > { %29988 = vmatprep.subr.mxu0 %v39176_v19  ;;  %30015 = vmatprep.subr.mxu1 %v32635_v35 }
 0xea7   : > { %29989 = vmatpush3.msra.mxu0 %v39176_v19  ;;  %30016 = vmatpush3.msra.mxu1 %v32635_v35 }
 0xea8   : > { %29990 = vmatprep.subr.mxu0 %v39177_v3  ;;  %30017 = vmatprep.subr.mxu1 %v32655_v44 }
 0xea9   : > { %29991 = vmatpush3.msra.mxu0 %v39177_v3  ;;  %30018 = vmatpush3.msra.mxu1 %v32655_v44  ;;  %v39179_v3 = vld [vmem:[#allocation56_spill] sm:$0xff] }
 0xeaa   : > { %29992 = vmatprep.subr.mxu0 %v39178_v39  ;;  %30019 = vmatprep.subr.mxu1 %v32666_v48 }
 0xeab   : > { %29993 = vmatpush3.msra.mxu0 %v39178_v39  ;;  %29994 = vmatprep.mubr.f32.mxu0 %v35605_v60 }
 0xeac   : > { %30020 = vmatpush3.msra.mxu1 %v32666_v48  ;;  %29995 = vmatmul.mubr.f32.vlgmr.msra.gmra.mxu0 %v35609_v15 }
 0xead   : > { %30021 = vmatprep.subr.mxu1 %v32684_v55  ;;  %30029 = vmatprep.mubr.f32.mxu1 %v35605_v60 }
 0xeae   : > { %30022 = vmatpush3.msra.mxu1 %v32684_v55  ;;  %30036 = vmatprep.mubr.f32.mxu0 %v39179_v3 }
 0xeaf   : > { %30023 = vmatprep.subr.mxu1 %v32718_v4 }
 0xeb0   : > { %30024 = vmatpush3.msra.mxu1 %v32718_v4 }
 0xeb1   : > { %30025 = vmatprep.subr.mxu1 %v32737_v31 }
 0xeb2   : > { %30026 = vmatpush3.msra.mxu1 %v32737_v31 }
 0xeb3   : > { %30027 = vmatprep.subr.mxu1 %v32753_v43 }
 0xeb4   : > { %30028 = vmatpush3.msra.mxu1 %v32753_v43 }
 0xeb5   : > { %30030 = vmatmul.mubr.f32.vlgmr.msra.gmra.mxu1 %v35609_v15 }
 0xeb6   : > { %30043 = vmatprep.mubr.f32.mxu1 %v32986_v61 }
 0xefc   : > { %v29786_v60 = vpop.f32.mrf.mxu0 }
 0xefe   : > { %v13047_v39 = vpop.f32.mrf.mxu0 }
 0xf01   : > { %v29800_v19 = vpop.f32.mrf.mxu0 }
 0xf03   : > { %v13220_v23 = vpop.f32.mrf.mxu0 }
 0xf04   : > { %v29793_v3 = vpop.f32.mrf.mxu1 }
 0xf05   : > { %v13145_v22 = vadd.f32 %v29793_v3, %v29786_v60 }
 0xf06   : > { %v13138_v16 = vpop.f32.mrf.mxu1 }
 0xf07   : > { %v13228_v28 = vadd.f32 %v29800_v19, %v13145_v22  ;;  %v13139_v1 = vadd.f32 %v13138_v16, %v13047_v39  ;;  %v29814_v53 = vpop.f32.mrf.mxu0 }
 0xf09   : > { %v13221_v47 = vadd.f32 %v13220_v23, %v13139_v1  ;;  %v13387_v29 = vpop.f32.mrf.mxu0 }
 0xf0a   : > { %v29807_v49 = vpop.f32.mrf.mxu1 }
 0xf0b   : > { %v13311_v52 = vadd.f32 %v29807_v49, %v13228_v28 }
 0xf0c   : > { %v13302_v0 = vpop.f32.mrf.mxu1 }
 0xf0d   : > { %v13394_v37 = vadd.f32 %v29814_v53, %v13311_v52  ;;  %v13303_v33 = vadd.f32 %v13302_v0, %v13221_v47 }
 0xf0f   : > { %v13388_v15 = vadd.f32 %v13387_v29, %v13303_v33  ;;  %v29821_v46 = vpop.f32.mrf.mxu1 }
 0xf10   : > { %v35811_v11 = vadd.f32 %v29821_v46, %v13394_v37 }
 0xf11   : > { %v13466_v34 = vpop.f32.mrf.mxu1 }
 0xf12   : > { %39180 = vst [vmem:[#allocation109_spill] sm:$0xff] %v35811_v11  ;;  %v35813_v36 = vadd.f32 %v13466_v34, %v13388_v15 }
 0xf14   : > { %39181 = vst [vmem:[#allocation110_spill] sm:$0xff] %v35813_v36 }
 0xf29   : > { %v29856_v2 = vpop.f32.mrf.mxu0 }
 0xf2b   : > { %v13563_v3 = vpop.f32.mrf.mxu0 }
 0xf31   : > { %v29891_v60 = vpop.f32.mrf.mxu1 }
 0xf32   : > { %v13731_v23 = vadd.f32 %v29891_v60, %v29856_v2 }
 0xf33   : > { %v13724_v16 = vpop.f32.mrf.mxu1 }
 0xf34   : > { %v13725_v49 = vadd.f32 %v13724_v16, %v13563_v3 }
 0xf4a   : > { %v29926_v22 = vpop.f32.mrf.mxu0 }
 0xf4b   : > { %v13842_v19 = vadd.f32 %v29926_v22, %v13731_v23 }
 0xf4c   : > { %v13834_v39 = vpop.f32.mrf.mxu0 }
 0xf4d   : > { %v13835_v0 = vadd.f32 %v13834_v39, %v13725_v49 }
 0xf53   : > { %v29961_v1 = vpop.f32.mrf.mxu1 }
 0xf54   : > { %v13939_v33 = vadd.f32 %v29961_v1, %v13842_v19 }
 0xf55   : > { %v13930_v52 = vpop.f32.mrf.mxu1 }
 0xf56   : > { %v13931_v46 = vadd.f32 %v13930_v52, %v13835_v0 }
 0xf6c   : > { %v29996_v28 = vpop.f32.mrf.mxu0 }
 0xf6d   : > { %v14064_v37 = vadd.f32 %v29996_v28, %v13939_v33 }
 0xf6e   : > { %v14057_v29 = vpop.f32.mrf.mxu0 }
 0xf6f   : > { %v14058_v34 = vadd.f32 %v14057_v29, %v13931_v46 }
 0xf75   : > { %v30031_v47 = vpop.f32.mrf.mxu1 }
 0xf76   : > { %v14157_v53 = vadd.f32 %v30031_v47, %v14064_v37  ;;  %v39182_v47 = vld [vmem:[#allocation54_spill] sm:$0xff] }
 0xf77   : > { %v14150_v15 = vpop.f32.mrf.mxu1 }
 0xf78   : > { %v14189_v36 = vand.u32 4294901760, %v14157_v53  ;;  %v14151_v11 = vadd.f32 %v14150_v15, %v14058_v34  ;;  %v39183_v34 = vld [vmem:[#allocation14_spill] sm:$0xff]  ;;  %v39185_v15 = vld [vmem:[#allocation15_spill] sm:$0xff] }
 0xf7a   : > { %v14277_v27 = vsub.f32 %v14157_v53, %v14189_v36  ;;  %v14192_v56 = vand.u32 4294901760, %v14151_v11  ;;  %30032 = vmatprep.subr.mxu0 %v14189_v36  ;;  %v39184_v53 = vld [vmem:[#allocation55_spill] sm:$0xff] }
 0xf7b   : > { %30033 = vmatpush3.msra.mxu0 %v14189_v36 }
 0xf7c   : > { %v14284_v2 = vsub.f32 %v14151_v11, %v14192_v56  ;;  %30034 = vmatprep.subr.mxu0 %v14192_v56  ;;  %v14278_v3 = vand.u32 4294901760, %v14277_v27 }
 0xf7d   : > { %30035 = vmatpush3.msra.mxu0 %v14192_v56 }
 0xf7e   : > { %30046 = vmatprep.subr.mxu0 %v14277_v27  ;;  %30037 = vmatmul.mubr.f32.vlgmr.msra.gmra.mxu0 %v33010_v5  ;;  %v14279_v60 = vsub.f32 %v14277_v27, %v14278_v3  ;;  %v14285_v22 = vand.u32 4294901760, %v14284_v2 }
 0xf7f   : > { %30047 = vmatpush3.msra.mxu0 %v14277_v27  ;;  %30050 = vmatprep.mubr.f32.mxu0 %v32989_v7  ;;  %v32187_v27 = vld [vmem:[%s32549_s23 + $0x20] sm:$0xff] }
 0xf80   : > { %30048 = vmatprep.subr.mxu0 %v14284_v2  ;;  %v14280_v16 = vand.u32 4294901760, %v14279_v60  ;;  %v14286_v39 = vsub.f32 %v14284_v2, %v14285_v22  ;;  %v14662_v11 = vmul.f32 %v32187_v27, %v32187_v27  ;;  %v39188_v60 = vld [vmem:[#allocation22_spill] sm:$0xff] }
 0xf81   : > { %30049 = vmatpush3.msra.mxu0 %v14284_v2  ;;  %v39186_v2 = vld [vmem:[#allocation16_spill] sm:$0xff]  ;;  %v39193_v27 = vld [vmem:[#allocation38_spill] sm:$0xff] }
 0xf82   : > { %30039 = vmatprep.subr.mxu1 %v14280_v16  ;;  %30060 = vmatprep.subr.mxu0 %v14278_v3  ;;  %v14287_v1 = vand.u32 4294901760, %v14286_v39  ;;  %v39191_v39 = vld [vmem:[#allocation32_spill] sm:$0xff] }
 0xf83   : > { %30040 = vmatpush3.msra.mxu1 %v14280_v16  ;;  %30051 = vmatmul.mubr.f32.vlgmr.msra.gmra.mxu0 %v33003_v59  ;;  %v39190_v16 = vld [vmem:[#allocation29_spill] sm:$0xff] }
 0xf84   : > { %30061 = vmatpush3.msra.mxu0 %v14278_v3  ;;  %30041 = vmatprep.subr.mxu1 %v14287_v1  ;;  %v39187_v3 = vld [vmem:[#allocation21_spill] sm:$0xff] }
 0xf85   : > { %30062 = vmatprep.subr.mxu0 %v14285_v22  ;;  %30042 = vmatpush3.msra.mxu1 %v14287_v1  ;;  %v39192_v1 = vld [vmem:[#allocation35_spill] sm:$0xff] }
 0xf86   : > { %30063 = vmatpush3.msra.mxu0 %v14285_v22  ;;  %30044 = vmatmul.mubr.f32.vlgmr.msra.gmra.mxu1 %v33000_v32  ;;  %v39189_v22 = vld [vmem:[#allocation24_spill] sm:$0xff] }
 0xf87   : > { %30053 = vmatprep.subr.mxu1 %v14189_v36  ;;  %30064 = vmatprep.mubr.f32.mxu0 %v32986_v61 }
 0xf88   : > { %30074 = vmatprep.subr.mxu0 %v32578_v12  ;;  %30054 = vmatpush3.msra.mxu1 %v14189_v36 }
 0xf89   : > { %30065 = vmatmul.mubr.f32.vlgmr.msra.gmra.mxu0 %v33000_v32  ;;  %30055 = vmatprep.subr.mxu1 %v14192_v56 }
 0xf8a   : > { %30075 = vmatpush3.msra.mxu0 %v32578_v12  ;;  %30056 = vmatpush3.msra.mxu1 %v14192_v56 }
 0xf8b   : > { %30076 = vmatprep.subr.mxu0 %v32572_v8  ;;  %30057 = vmatprep.mubr.f32.mxu1 %v32993_v54 }
 0xf8c   : > { %30077 = vmatpush3.msra.mxu0 %v32572_v8  ;;  %30058 = vmatmul.mubr.f32.vlgmr.msra.gmra.mxu1 %v33006_v26 }
 0xf8d   : > { %30067 = vmatprep.subr.mxu1 %v14189_v36  ;;  %30078 = vmatprep.subr.mxu0 %v32574_v9 }
 0xf8e   : > { %30068 = vmatpush3.msra.mxu1 %v14189_v36  ;;  %30079 = vmatpush3.msra.mxu0 %v32574_v9  ;;  %v32188_v36 = vld [vmem:[%s32549_s23 + $0x28] sm:$0xff] }
 0xf8f   : > { %30069 = vmatprep.subr.mxu1 %v14192_v56  ;;  %30080 = vmatprep.subr.mxu0 %v32576_v10  ;;  %v14663_v23 = vmul.f32 %v32188_v36, %v32188_v36  ;;  %v39195_v36 = vld [vmem:[#allocation44_spill] sm:$0xff] }
 0xf90   : > { %30070 = vmatpush3.msra.mxu1 %v14192_v56  ;;  %30071 = vmatprep.mubr.f32.mxu1 %v32986_v61  ;;  %v35845_v56 = vand.u32 4294901760, %v14662_v11 }
 0xf91   : > { %30081 = vmatpush3.msra.mxu0 %v32576_v10  ;;  %30072 = vmatmul.mubr.f32.vlgmr.msra.gmra.mxu1 %v33000_v32  ;;  %v35849_v28 = vand.u32 4294901760, %v14663_v23 }
 0xf92   : > { %30082 = vmatprep.subr.mxu0 %v32570_v6  ;;  %30109 = vmatprep.subr.mxu1 %v32642_v38  ;;  %v35858_v49 = vsub.f32 %v14662_v11, %v35845_v56  ;;  %v39194_v11 = vld [vmem:[#allocation41_spill] sm:$0xff] }
 0xf93   : > { %30083 = vmatpush3.msra.mxu0 %v32570_v6  ;;  %30110 = vmatpush3.msra.mxu1 %v32642_v38  ;;  %v35863_v19 = vsub.f32 %v14663_v23, %v35849_v28  ;;  %v39196_v23 = vld [vmem:[#allocation47_spill] sm:$0xff] }
 0xf94   : > { %30084 = vmatprep.subr.mxu0 %v32580_v13  ;;  %30111 = vmatprep.subr.mxu1 %v38709_v40  ;;  %v14747_v52 = vand.u32 4294901760, %v35858_v49 }
 0xf95   : > { %30085 = vmatpush3.msra.mxu0 %v32580_v13  ;;  %30112 = vmatpush3.msra.mxu1 %v38709_v40  ;;  %v38393_v0 = vand.u32 4294901760, %v35863_v19 }
 0xf96   : > { %30086 = vmatprep.subr.mxu0 %v32582_v14  ;;  %30113 = vmatprep.subr.mxu1 %v38710_v57  ;;  %v14748_v33 = vsub.f32 %v35858_v49, %v14747_v52 }
 0xf97   : > { %30087 = vmatpush3.msra.mxu0 %v32582_v14  ;;  %30114 = vmatpush3.msra.mxu1 %v38710_v57  ;;  %v14758_v29 = vsub.f32 %v35863_v19, %v38393_v0  ;;  %v39201_v0 = vld [vmem:[#allocation20_spill] sm:$0xff] }
 0xf98   : > { %30088 = vmatprep.subr.mxu0 %v32600_v21  ;;  %30115 = vmatprep.subr.mxu1 %v38711_v24  ;;  %v14749_v46 = vand.u32 4294901760, %v14748_v33  ;;  %v39197_v33 = vld [vmem:[#allocation50_spill] sm:$0xff] }
 0xf99   : > { %30089 = vmatpush3.msra.mxu0 %v32600_v21  ;;  %30116 = vmatpush3.msra.mxu1 %v38711_v24  ;;  %v14759_v37 = vand.u32 4294901760, %v14758_v29  ;;  %v39198_v29 = vld [vmem:[#allocation19_spill] sm:$0xff] }
 0xf9a   : > { %30090 = vmatprep.subr.mxu0 %v32625_v30  ;;  %30117 = vmatprep.subr.mxu1 %v38712_v58 }
 0xf9b   : > { %30091 = vmatpush3.msra.mxu0 %v32625_v30  ;;  %30118 = vmatpush3.msra.mxu1 %v38712_v58 }
 0xf9c   : > { %30092 = vmatprep.subr.mxu0 %v32635_v35  ;;  %30119 = vmatprep.subr.mxu1 %v38713_v50 }
 0xf9d   : > { %30093 = vmatpush3.msra.mxu0 %v32635_v35  ;;  %30120 = vmatpush3.msra.mxu1 %v38713_v50 }
 0xf9e   : > { %30094 = vmatprep.subr.mxu0 %v32655_v44  ;;  %30121 = vmatprep.subr.mxu1 %v38714_v62 }
 0xf9f   : > { %30095 = vmatpush3.msra.mxu0 %v32655_v44  ;;  %30122 = vmatpush3.msra.mxu1 %v38714_v62 }
 0xfa0   : > { %30096 = vmatprep.subr.mxu0 %v32666_v48  ;;  %30123 = vmatprep.subr.mxu1 %v38715_v42 }
 0xfa1   : > { %30097 = vmatpush3.msra.mxu0 %v32666_v48  ;;  %30124 = vmatpush3.msra.mxu1 %v38715_v42 }
 0xfa2   : > { %30098 = vmatprep.subr.mxu0 %v32684_v55  ;;  %30125 = vmatprep.subr.mxu1 %v38716_v20 }
 0xfa3   : > { %30099 = vmatpush3.msra.mxu0 %v32684_v55  ;;  %30126 = vmatpush3.msra.mxu1 %v38716_v20 }
 0xfa4   : > { %30100 = vmatprep.subr.mxu0 %v32718_v4  ;;  %30127 = vmatprep.subr.mxu1 %v38717_v25 }
 0xfa5   : > { %30101 = vmatpush3.msra.mxu0 %v32718_v4  ;;  %30128 = vmatpush3.msra.mxu1 %v38717_v25 }
 0xfa6   : > { %30102 = vmatprep.subr.mxu0 %v32737_v31  ;;  %30129 = vmatprep.subr.mxu1 %v32792_v63 }
 0xfa7   : > { %30103 = vmatpush3.msra.mxu0 %v32737_v31  ;;  %30130 = vmatpush3.msra.mxu1 %v32792_v63 }
 0xfa8   : > { %30104 = vmatprep.subr.mxu0 %v32753_v43  ;;  %30131 = vmatprep.subr.mxu1 %v32809_v51 }
 0xfa9   : > { %30105 = vmatpush3.msra.mxu0 %v32753_v43  ;;  %30132 = vmatpush3.msra.mxu1 %v32809_v51 }
 0xfaa   : > { %30106 = vmatprep.mubr.f32.mxu0 %v14749_v46  ;;  %30133 = vmatprep.subr.mxu1 %v32820_v45  ;;  %v39199_v46 = vld [vmem:[#allocation17_spill] sm:$0xff] }
 0xfab   : > { %30144 = vmatprep.subr.mxu0 %v32595_v18  ;;  %30107 = vmatmul.mubr.f32.vlgmr.msra.gmra.mxu0 %v14759_v37  ;;  %v39200_v37 = vld [vmem:[#allocation18_spill] sm:$0xff] }
 0xfac   : > { %30134 = vmatpush3.msra.mxu1 %v32820_v45  ;;  %30145 = vmatpush3.msra.mxu0 %v32595_v18 }
 0xfad   : > { %30135 = vmatprep.subr.mxu1 %v39054_v41  ;;  %30146 = vmatprep.subr.mxu0 %v39055_v17 }
 0xfae   : > { %30136 = vmatpush3.msra.mxu1 %v39054_v41  ;;  %30147 = vmatpush3.msra.mxu0 %v39055_v17 }
 0xfaf   : > { %30137 = vmatprep.subr.mxu1 %v39182_v47  ;;  %30148 = vmatprep.subr.mxu0 %v39183_v34 }
 0xfb0   : > { %30138 = vmatpush3.msra.mxu1 %v39182_v47  ;;  %30149 = vmatpush3.msra.mxu0 %v39183_v34 }
 0xfb1   : > { %30139 = vmatprep.subr.mxu1 %v39184_v53  ;;  %30150 = vmatprep.subr.mxu0 %v39185_v15 }
 0xfb2   : > { %30140 = vmatpush3.msra.mxu1 %v39184_v53  ;;  %30141 = vmatprep.mubr.f32.mxu1 %v35845_v56 }
 0xfb3   : > { %30151 = vmatpush3.msra.mxu0 %v39185_v15  ;;  %30142 = vmatmul.mubr.f32.vlgmr.msra.gmra.mxu1 %v35849_v28  ;;  %v39216_v15 = vld [vmem:[#allocation109_spill] sm:$0xff] }
 0xfb4   : > { %30152 = vmatprep.subr.mxu0 %v39186_v2  ;;  %30179 = vmatprep.subr.mxu1 %v32578_v12  ;;  %v36053_v53 = vmul.f32 %v39216_v15, %v39216_v15 }
 0xfb5   : > { %30153 = vmatpush3.msra.mxu0 %v39186_v2  ;;  %30180 = vmatpush3.msra.mxu1 %v32578_v12 }
 0xfb6   : > { %30154 = vmatprep.subr.mxu0 %v39187_v3  ;;  %30181 = vmatprep.subr.mxu1 %v32572_v8  ;;  %39217 = vst [vmem:[#allocation109_spill] sm:$0xff] %v36053_v53 }
 0xfb7   : > { %30155 = vmatpush3.msra.mxu0 %v39187_v3  ;;  %30182 = vmatpush3.msra.mxu1 %v32572_v8 }
 0xfb8   : > { %30156 = vmatprep.subr.mxu0 %v39188_v60  ;;  %30183 = vmatprep.subr.mxu1 %v32574_v9 }
 0xfb9   : > { %30157 = vmatpush3.msra.mxu0 %v39188_v60  ;;  %30184 = vmatpush3.msra.mxu1 %v32574_v9 }
 0xfba   : > { %30158 = vmatprep.subr.mxu0 %v39189_v22  ;;  %30185 = vmatprep.subr.mxu1 %v32576_v10 }
 0xfbb   : > { %30159 = vmatpush3.msra.mxu0 %v39189_v22  ;;  %30186 = vmatpush3.msra.mxu1 %v32576_v10 }
 0xfbc   : > { %30160 = vmatprep.subr.mxu0 %v39190_v16  ;;  %30187 = vmatprep.subr.mxu1 %v32570_v6 }
 0xfbd   : > { %30161 = vmatpush3.msra.mxu0 %v39190_v16  ;;  %30188 = vmatpush3.msra.mxu1 %v32570_v6 }
 0xfbe   : > { %30162 = vmatprep.subr.mxu0 %v39191_v39  ;;  %30189 = vmatprep.subr.mxu1 %v32580_v13 }
 0xfbf   : > { %30163 = vmatpush3.msra.mxu0 %v39191_v39  ;;  %30190 = vmatpush3.msra.mxu1 %v32580_v13 }
 0xfc0   : > { %30164 = vmatprep.subr.mxu0 %v39192_v1  ;;  %30191 = vmatprep.subr.mxu1 %v32582_v14 }
 0xfc1   : > { %30165 = vmatpush3.msra.mxu0 %v39192_v1  ;;  %30192 = vmatpush3.msra.mxu1 %v32582_v14 }
 0xfc2   : > { %30166 = vmatprep.subr.mxu0 %v39193_v27  ;;  %30193 = vmatprep.subr.mxu1 %v32600_v21 }
 0xfc3   : > { %30167 = vmatpush3.msra.mxu0 %v39193_v27  ;;  %30194 = vmatpush3.msra.mxu1 %v32600_v21 }
 0xfc4   : > { %30168 = vmatprep.subr.mxu0 %v39194_v11  ;;  %30195 = vmatprep.subr.mxu1 %v32625_v30 }
 0xfc5   : > { %30169 = vmatpush3.msra.mxu0 %v39194_v11  ;;  %30196 = vmatpush3.msra.mxu1 %v32625_v30 }
 0xfc6   : > { %30170 = vmatprep.subr.mxu0 %v39195_v36  ;;  %30197 = vmatprep.subr.mxu1 %v32635_v35 }
 0xfc7   : > { %30171 = vmatpush3.msra.mxu0 %v39195_v36  ;;  %30198 = vmatpush3.msra.mxu1 %v32635_v35 }
 0xfc8   : > { %30172 = vmatprep.subr.mxu0 %v39196_v23  ;;  %30199 = vmatprep.subr.mxu1 %v32655_v44 }
 0xfc9   : > { %30173 = vmatpush3.msra.mxu0 %v39196_v23  ;;  %30200 = vmatpush3.msra.mxu1 %v32655_v44 }
 0xfca   : > { %30174 = vmatprep.subr.mxu0 %v39197_v33  ;;  %30201 = vmatprep.subr.mxu1 %v32666_v48 }
 0xfcb   : > { %30175 = vmatpush3.msra.mxu0 %v39197_v33  ;;  %30176 = vmatprep.mubr.f32.mxu0 %v35858_v49  ;;  %v39205_v49 = vld [vmem:[#allocation27_spill] sm:$0xff] }
 0xfcc   : > { %30202 = vmatpush3.msra.mxu1 %v32666_v48  ;;  %30177 = vmatmul.mubr.f32.vlgmr.msra.gmra.mxu0 %v35863_v19 }
 0xfcd   : > { %30203 = vmatprep.subr.mxu1 %v32684_v55  ;;  %30214 = vmatprep.subr.mxu0 %v39198_v29 }
 0xfce   : > { %30204 = vmatpush3.msra.mxu1 %v32684_v55  ;;  %30215 = vmatpush3.msra.mxu0 %v39198_v29  ;;  %v39203_v29 = vld [vmem:[#allocation23_spill] sm:$0xff] }
 0xfcf   : > { %30205 = vmatprep.subr.mxu1 %v32718_v4  ;;  %30216 = vmatprep.subr.mxu0 %v39199_v46 }
 0xfd0   : > { %30206 = vmatpush3.msra.mxu1 %v32718_v4  ;;  %30217 = vmatpush3.msra.mxu0 %v39199_v46  ;;  %v39202_v46 = vand.u32 4294901760, %v35863_v19  ;;  %v39206_v19 = vld [vmem:[#allocation31_spill] sm:$0xff] }
 0xfd1   : > { %30207 = vmatprep.subr.mxu1 %v32737_v31  ;;  %30218 = vmatprep.subr.mxu0 %v39200_v37 }
 0xfd2   : > { %30208 = vmatpush3.msra.mxu1 %v32737_v31  ;;  %30219 = vmatpush3.msra.mxu0 %v39200_v37  ;;  %v39204_v37 = vld [vmem:[#allocation26_spill] sm:$0xff] }
 0xfd3   : > { %30209 = vmatprep.subr.mxu1 %v32753_v43  ;;  %30220 = vmatprep.subr.mxu0 %v39201_v0 }
 0xfd4   : > { %30210 = vmatpush3.msra.mxu1 %v32753_v43  ;;  %30211 = vmatprep.mubr.f32.mxu1 %v14747_v52  ;;  %v39207_v52 = vld [vmem:[#allocation34_spill] sm:$0xff] }
 0xfd5   : > { %30221 = vmatpush3.msra.mxu0 %v39201_v0  ;;  %30212 = vmatmul.mubr.f32.vlgmr.msra.gmra.mxu1 %v39202_v46  ;;  %v39208_v46 = vld [vmem:[#allocation37_spill] sm:$0xff] }
 0xfd6   : > { %30222 = vmatprep.subr.mxu0 %v39203_v29  ;;  %30249 = vmatprep.subr.mxu1 %v32578_v12 }
 0xfd7   : > { %30223 = vmatpush3.msra.mxu0 %v39203_v29  ;;  %30250 = vmatpush3.msra.mxu1 %v32578_v12 }
 0xfd8   : > { %30224 = vmatprep.subr.mxu0 %v39204_v37  ;;  %30251 = vmatprep.subr.mxu1 %v32572_v8 }
 0xfd9   : > { %30225 = vmatpush3.msra.mxu0 %v39204_v37  ;;  %30252 = vmatpush3.msra.mxu1 %v32572_v8 }
 0xfda   : > { %30226 = vmatprep.subr.mxu0 %v39205_v49  ;;  %30253 = vmatprep.subr.mxu1 %v32574_v9 }
 0xfdb   : > { %30227 = vmatpush3.msra.mxu0 %v39205_v49  ;;  %30254 = vmatpush3.msra.mxu1 %v32574_v9  ;;  %v39209_v49 = vld [vmem:[#allocation40_spill] sm:$0xff] }
 0xfdc   : > { %30228 = vmatprep.subr.mxu0 %v39206_v19  ;;  %30255 = vmatprep.subr.mxu1 %v32576_v10 }
 0xfdd   : > { %30229 = vmatpush3.msra.mxu0 %v39206_v19  ;;  %30256 = vmatpush3.msra.mxu1 %v32576_v10  ;;  %v39210_v19 = vld [vmem:[#allocation43_spill] sm:$0xff] }
 0xfde   : > { %30230 = vmatprep.subr.mxu0 %v39207_v52  ;;  %30257 = vmatprep.subr.mxu1 %v32570_v6 }
 0xfdf   : > { %30231 = vmatpush3.msra.mxu0 %v39207_v52  ;;  %30258 = vmatpush3.msra.mxu1 %v32570_v6  ;;  %v39211_v52 = vld [vmem:[#allocation46_spill] sm:$0xff] }
 0xfe0   : > { %30232 = vmatprep.subr.mxu0 %v39208_v46  ;;  %30259 = vmatprep.subr.mxu1 %v32580_v13 }
 0xfe1   : > { %30233 = vmatpush3.msra.mxu0 %v39208_v46  ;;  %30260 = vmatpush3.msra.mxu1 %v32580_v13  ;;  %v39212_v46 = vld [vmem:[#allocation49_spill] sm:$0xff] }
 0xfe2   : > { %30234 = vmatprep.subr.mxu0 %v39209_v49  ;;  %30261 = vmatprep.subr.mxu1 %v32582_v14 }
 0xfe3   : > { %30235 = vmatpush3.msra.mxu0 %v39209_v49  ;;  %30262 = vmatpush3.msra.mxu1 %v32582_v14  ;;  %v39213_v49 = vld [vmem:[#allocation51_spill] sm:$0xff] }
 0xfe4   : > { %30236 = vmatprep.subr.mxu0 %v39210_v19  ;;  %30263 = vmatprep.subr.mxu1 %v32600_v21 }
 0xfe5   : > { %30237 = vmatpush3.msra.mxu0 %v39210_v19  ;;  %30264 = vmatpush3.msra.mxu1 %v32600_v21  ;;  %v39214_v19 = vld [vmem:[#allocation52_spill] sm:$0xff] }
 0xfe6   : > { %30238 = vmatprep.subr.mxu0 %v39211_v52  ;;  %30265 = vmatprep.subr.mxu1 %v32625_v30 }
 0xfe7   : > { %30239 = vmatpush3.msra.mxu0 %v39211_v52  ;;  %30266 = vmatpush3.msra.mxu1 %v32625_v30 }
 0xfe8   : > { %30240 = vmatprep.subr.mxu0 %v39212_v46  ;;  %30267 = vmatprep.subr.mxu1 %v32635_v35 }
 0xfe9   : > { %30241 = vmatpush3.msra.mxu0 %v39212_v46  ;;  %30268 = vmatpush3.msra.mxu1 %v32635_v35 }
 0xfea   : > { %30242 = vmatprep.subr.mxu0 %v39213_v49  ;;  %30269 = vmatprep.subr.mxu1 %v32655_v44 }
 0xfeb   : > { %30243 = vmatpush3.msra.mxu0 %v39213_v49  ;;  %30270 = vmatpush3.msra.mxu1 %v32655_v44  ;;  %v39215_v49 = vld [vmem:[#allocation56_spill] sm:$0xff] }
 0xfec   : > { %30244 = vmatprep.subr.mxu0 %v39214_v19  ;;  %30271 = vmatprep.subr.mxu1 %v32666_v48 }
 0xfed   : > { %30245 = vmatpush3.msra.mxu0 %v39214_v19  ;;  %30246 = vmatprep.mubr.f32.mxu0 %v35845_v56 }
 0xfee   : > { %30272 = vmatpush3.msra.mxu1 %v32666_v48  ;;  %30247 = vmatmul.mubr.f32.vlgmr.msra.gmra.mxu0 %v35849_v28 }
 0xfef   : > { %30273 = vmatprep.subr.mxu1 %v32684_v55  ;;  %30281 = vmatprep.mubr.f32.mxu1 %v35845_v56 }
 0xff0   : > { %30274 = vmatpush3.msra.mxu1 %v32684_v55  ;;  %30288 = vmatprep.mubr.f32.mxu0 %v39215_v49 }
 0xff1   : > { %30275 = vmatprep.subr.mxu1 %v32718_v4 }
 0xff2   : > { %30276 = vmatpush3.msra.mxu1 %v32718_v4 }
 0xff3   : > { %30277 = vmatprep.subr.mxu1 %v32737_v31 }
 0xff4   : > { %30278 = vmatpush3.msra.mxu1 %v32737_v31 }
 0xff5   : > { %30279 = vmatprep.subr.mxu1 %v32753_v43 }
 0xff6   : > { %30280 = vmatpush3.msra.mxu1 %v32753_v43 }
 0xff7   : > { %30282 = vmatmul.mubr.f32.vlgmr.msra.gmra.mxu1 %v35849_v28 }
 0xff8   : > { %30295 = vmatprep.mubr.f32.mxu1 %v32986_v61 }
0x103e   : > { %v30038_v56 = vpop.f32.mrf.mxu0 }
0x1040   : > { %v14233_v19 = vpop.f32.mrf.mxu0 }
0x1043   : > { %v30052_v46 = vpop.f32.mrf.mxu0 }
0x1045   : > { %v14406_v52 = vpop.f32.mrf.mxu0 }
0x1046   : > { %v30045_v49 = vpop.f32.mrf.mxu1 }
0x1047   : > { %v14331_v37 = vadd.f32 %v30045_v49, %v30038_v56 }
0x1048   : > { %v14324_v29 = vpop.f32.mrf.mxu1 }
0x1049   : > { %v14414_v0 = vadd.f32 %v30052_v46, %v14331_v37  ;;  %v14325_v33 = vadd.f32 %v14324_v29, %v14233_v19  ;;  %v30066_v23 = vpop.f32.mrf.mxu0  ;;  %v39220_v37 = vld [vmem:[#allocation110_spill] sm:$0xff] }
0x104b   : > { %v14407_v36 = vadd.f32 %v14406_v52, %v14325_v33  ;;  %v14573_v39 = vpop.f32.mrf.mxu0 }
0x104c   : > { %v30059_v11 = vpop.f32.mrf.mxu1 }
0x104d   : > { %v14497_v27 = vadd.f32 %v30059_v11, %v14414_v0  ;;  %v36062_v0 = vmul.f32 %v39220_v37, %v39220_v37 }
0x104e   : > { %v14488_v1 = vpop.f32.mrf.mxu1 }
0x104f   : > { %v14580_v16 = vadd.f32 %v30066_v23, %v14497_v27  ;;  %v14489_v22 = vadd.f32 %v14488_v1, %v14407_v36  ;;  %39221 = vst [vmem:[#allocation110_spill] sm:$0xff] %v36062_v0 }
0x1051   : > { %v14574_v28 = vadd.f32 %v14573_v39, %v14489_v22  ;;  %v30073_v60 = vpop.f32.mrf.mxu1 }
0x1052   : > { %v14659_v3 = vadd.f32 %v30073_v60, %v14580_v16 }
0x1053   : > { %v14652_v2 = vpop.f32.mrf.mxu1 }
0x1054   : > { %v36055_v49 = vmul.f32 %v14659_v3, %v14659_v3  ;;  %v36058_v29 = vmul.f32 %v14659_v3, %v39216_v15  ;;  %v14653_v33 = vadd.f32 %v14652_v2, %v14574_v28 }
0x1056   : > { %39218 = vst [vmem:[#allocation111_spill] sm:$0xff] %v36055_v49  ;;  %39219 = vst [vmem:[#allocation112_spill] sm:$0xff] %v36058_v29  ;;  %v36066_v22 = vadd.f32 %v36055_v49, %v36053_v53  ;;  %v36068_v60 = vmul.f32 %v14653_v33, %v14653_v33  ;;  %v36071_v16 = vmul.f32 %v14653_v33, %v39220_v37 }
0x1058   : > { %39222 = vst [vmem:[#allocation113_spill] sm:$0xff] %v36066_v22  ;;  %39223 = vst [vmem:[#allocation114_spill] sm:$0xff] %v36068_v60  ;;  %v36075_v39 = vadd.f32 %v36068_v60, %v36062_v0 }
0x1059   : > { %39224 = vst [vmem:[#allocation115_spill] sm:$0xff] %v36071_v16 }
0x105a   : > { %39225 = vst [vmem:[#allocation116_spill] sm:$0xff] %v36075_v39 }
0x106b   : > { %v30108_v15 = vpop.f32.mrf.mxu0 }
0x106d   : > { %v14751_v3 = vpop.f32.mrf.mxu0 }
0x1073   : > { %v30143_v2 = vpop.f32.mrf.mxu1 }
0x1074   : > { %v14919_v23 = vadd.f32 %v30143_v2, %v30108_v15 }
0x1075   : > { %v14912_v27 = vpop.f32.mrf.mxu1 }
0x1076   : > { %v14913_v52 = vadd.f32 %v14912_v27, %v14751_v3 }
0x108c   : > { %v30178_v1 = vpop.f32.mrf.mxu0 }
0x108d   : > { %v15030_v46 = vadd.f32 %v30178_v1, %v14919_v23 }
0x108e   : > { %v15022_v11 = vpop.f32.mrf.mxu0 }
0x108f   : > { %v15023_v28 = vadd.f32 %v15022_v11, %v14913_v52 }
0x1095   : > { %v30213_v36 = vpop.f32.mrf.mxu1 }
0x1096   : > { %v15127_v29 = vadd.f32 %v30213_v36, %v15030_v46 }
0x1097   : > { %v15118_v56 = vpop.f32.mrf.mxu1 }
0x1098   : > { %v15119_v37 = vadd.f32 %v15118_v56, %v15023_v28  ;;  %v39226_v56 = vld [vmem:[#allocation54_spill] sm:$0xff] }
0x1099   : > { %v39227_v28 = vld [vmem:[#allocation14_spill] sm:$0xff] }
0x10ae   : > { %v30248_v19 = vpop.f32.mrf.mxu0 }
0x10af   : > { %v15252_v16 = vadd.f32 %v30248_v19, %v15127_v29 }
0x10b0   : > { %v15245_v33 = vpop.f32.mrf.mxu0 }
0x10b1   : > { %v15246_v60 = vadd.f32 %v15245_v33, %v15119_v37  ;;  %v39228_v33 = vld [vmem:[#allocation55_spill] sm:$0xff] }
0x10b2   : > { %v39229_v37 = vld [vmem:[#allocation15_spill] sm:$0xff] }
0x10b7   : > { %v30283_v22 = vpop.f32.mrf.mxu1 }
0x10b8   : > { %v15345_v39 = vadd.f32 %v30283_v22, %v15252_v16 }
0x10b9   : > { %v15338_v49 = vpop.f32.mrf.mxu1 }
0x10ba   : > { %v15377_v0 = vand.u32 4294901760, %v15345_v39  ;;  %v15339_v53 = vadd.f32 %v15338_v49, %v15246_v60 }
0x10bc   : > { %v15465_v34 = vsub.f32 %v15345_v39, %v15377_v0  ;;  %v15380_v47 = vand.u32 4294901760, %v15339_v53  ;;  %30284 = vmatprep.subr.mxu0 %v15377_v0 }
0x10bd   : > { %30285 = vmatpush3.msra.mxu0 %v15377_v0 }
0x10be   : > { %v15472_v15 = vsub.f32 %v15339_v53, %v15380_v47  ;;  %30286 = vmatprep.subr.mxu0 %v15380_v47  ;;  %v15466_v3 = vand.u32 4294901760, %v15465_v34 }
0x10bf   : > { %30287 = vmatpush3.msra.mxu0 %v15380_v47 }
0x10c0   : > { %30298 = vmatprep.subr.mxu0 %v15465_v34  ;;  %30289 = vmatmul.mubr.f32.vlgmr.msra.gmra.mxu0 %v33010_v5  ;;  %v15467_v2 = vsub.f32 %v15465_v34, %v15466_v3  ;;  %v15473_v1 = vand.u32 4294901760, %v15472_v15 }
0x10c1   : > { %30299 = vmatpush3.msra.mxu0 %v15465_v34  ;;  %30302 = vmatprep.mubr.f32.mxu0 %v32989_v7  ;;  %v36098_v34 = vld [vmem:[%s32556_s28 + $0x20] sm:$0xff] }
0x10c2   : > { %30300 = vmatprep.subr.mxu0 %v15472_v15  ;;  %v15468_v29 = vand.u32 4294901760, %v15467_v2  ;;  %v15474_v22 = vsub.f32 %v15472_v15, %v15473_v1  ;;  %v15850_v53 = vmul.f32 %v36098_v34, %v36098_v34  ;;  %v39232_v2 = vld [vmem:[#allocation22_spill] sm:$0xff] }
0x10c3   : > { %30301 = vmatpush3.msra.mxu0 %v15472_v15  ;;  %v39230_v15 = vld [vmem:[#allocation16_spill] sm:$0xff] }
0x10c4   : > { %30291 = vmatprep.subr.mxu1 %v15468_v29  ;;  %30312 = vmatprep.subr.mxu0 %v15466_v3  ;;  %v15475_v49 = vand.u32 4294901760, %v15474_v22  ;;  %v36115_v60 = vand.u32 4294901760, %v15850_v53  ;;  %v39235_v22 = vld [vmem:[#allocation32_spill] sm:$0xff] }
0x10c5   : > { %30292 = vmatpush3.msra.mxu1 %v15468_v29  ;;  %30303 = vmatmul.mubr.f32.vlgmr.msra.gmra.mxu0 %v33003_v59  ;;  %v39234_v29 = vld [vmem:[#allocation29_spill] sm:$0xff] }
0x10c6   : > { %30313 = vmatpush3.msra.mxu0 %v15466_v3  ;;  %30293 = vmatprep.subr.mxu1 %v15475_v49  ;;  %v36128_v39 = vsub.f32 %v15850_v53, %v36115_v60  ;;  %v39231_v3 = vld [vmem:[#allocation21_spill] sm:$0xff]  ;;  %v39237_v53 = vld [vmem:[#allocation38_spill] sm:$0xff] }
0x10c7   : > { %30314 = vmatprep.subr.mxu0 %v15473_v1  ;;  %30294 = vmatpush3.msra.mxu1 %v15475_v49  ;;  %v39236_v49 = vld [vmem:[#allocation35_spill] sm:$0xff] }
0x10c8   : > { %30315 = vmatpush3.msra.mxu0 %v15473_v1  ;;  %30296 = vmatmul.mubr.f32.vlgmr.msra.gmra.mxu1 %v33000_v32  ;;  %v38435_v11 = vand.u32 4294901760, %v36128_v39  ;;  %v39233_v1 = vld [vmem:[#allocation24_spill] sm:$0xff] }
0x10c9   : > { %30305 = vmatprep.subr.mxu1 %v15377_v0  ;;  %30316 = vmatprep.mubr.f32.mxu0 %v32986_v61 }
0x10ca   : > { %30326 = vmatprep.subr.mxu0 %v32578_v12  ;;  %30306 = vmatpush3.msra.mxu1 %v15377_v0  ;;  %v15936_v23 = vsub.f32 %v36128_v39, %v38435_v11  ;;  %v39244_v11 = vld [vmem:[#allocation18_spill] sm:$0xff] }
0x10cb   : > { %30317 = vmatmul.mubr.f32.vlgmr.msra.gmra.mxu0 %v33000_v32  ;;  %30307 = vmatprep.subr.mxu1 %v15380_v47 }
0x10cc   : > { %30327 = vmatpush3.msra.mxu0 %v32578_v12  ;;  %30308 = vmatpush3.msra.mxu1 %v15380_v47  ;;  %v15937_v52 = vand.u32 4294901760, %v15936_v23  ;;  %v39239_v23 = vld [vmem:[#allocation44_spill] sm:$0xff] }
0x10cd   : > { %30328 = vmatprep.subr.mxu0 %v32572_v8  ;;  %30309 = vmatprep.mubr.f32.mxu1 %v32993_v54 }
0x10ce   : > { %30329 = vmatpush3.msra.mxu0 %v32572_v8  ;;  %30310 = vmatmul.mubr.f32.vlgmr.msra.gmra.mxu1 %v33006_v26 }
0x10cf   : > { %30319 = vmatprep.subr.mxu1 %v15377_v0  ;;  %30330 = vmatprep.subr.mxu0 %v32574_v9 }
0x10d0   : > { %30320 = vmatpush3.msra.mxu1 %v15377_v0  ;;  %30331 = vmatpush3.msra.mxu0 %v32574_v9 }
0x10d1   : > { %30321 = vmatprep.subr.mxu1 %v15380_v47  ;;  %30332 = vmatprep.subr.mxu0 %v32576_v10 }
0x10d2   : > { %30322 = vmatpush3.msra.mxu1 %v15380_v47  ;;  %30323 = vmatprep.mubr.f32.mxu1 %v32986_v61  ;;  %v36105_v47 = vld [vmem:[%s32556_s28 + $0x28] sm:$0xff] }
0x10d3   : > { %30333 = vmatpush3.msra.mxu0 %v32576_v10  ;;  %30324 = vmatmul.mubr.f32.vlgmr.msra.gmra.mxu1 %v33000_v32  ;;  %v15851_v0 = vmul.f32 %v36105_v47, %v36105_v47 }
0x10d4   : > { %30334 = vmatprep.subr.mxu0 %v32570_v6  ;;  %30361 = vmatprep.subr.mxu1 %v32642_v38 }
0x10d5   : > { %30335 = vmatpush3.msra.mxu0 %v32570_v6  ;;  %30362 = vmatpush3.msra.mxu1 %v32642_v38  ;;  %v36119_v16 = vand.u32 4294901760, %v15851_v0 }
0x10d6   : > { %30336 = vmatprep.subr.mxu0 %v32580_v13  ;;  %30363 = vmatprep.subr.mxu1 %v38709_v40 }
0x10d7   : > { %30337 = vmatpush3.msra.mxu0 %v32580_v13  ;;  %30364 = vmatpush3.msra.mxu1 %v38709_v40  ;;  %v36133_v27 = vsub.f32 %v15851_v0, %v36119_v16  ;;  %v39238_v0 = vld [vmem:[#allocation41_spill] sm:$0xff] }
0x10d8   : > { %30338 = vmatprep.subr.mxu0 %v32582_v14  ;;  %30365 = vmatprep.subr.mxu1 %v38710_v57 }
0x10d9   : > { %30339 = vmatpush3.msra.mxu0 %v32582_v14  ;;  %30366 = vmatpush3.msra.mxu1 %v38710_v57  ;;  %v38434_v36 = vand.u32 4294901760, %v36133_v27 }
0x10da   : > { %30340 = vmatprep.subr.mxu0 %v32600_v21  ;;  %30367 = vmatprep.subr.mxu1 %v38711_v24 }
0x10db   : > { %30341 = vmatpush3.msra.mxu0 %v32600_v21  ;;  %30368 = vmatpush3.msra.mxu1 %v38711_v24  ;;  %v15946_v19 = vsub.f32 %v36133_v27, %v38434_v36  ;;  %v39243_v36 = vld [vmem:[#allocation17_spill] sm:$0xff] }
0x10dc   : > { %30342 = vmatprep.subr.mxu0 %v32625_v30  ;;  %30369 = vmatprep.subr.mxu1 %v38712_v58 }
0x10dd   : > { %30343 = vmatpush3.msra.mxu0 %v32625_v30  ;;  %30370 = vmatpush3.msra.mxu1 %v38712_v58  ;;  %v15947_v46 = vand.u32 4294901760, %v15946_v19  ;;  %v39240_v19 = vld [vmem:[#allocation47_spill] sm:$0xff] }
0x10de   : > { %30344 = vmatprep.subr.mxu0 %v32635_v35  ;;  %30371 = vmatprep.subr.mxu1 %v38713_v50 }
0x10df   : > { %30345 = vmatpush3.msra.mxu0 %v32635_v35  ;;  %30372 = vmatpush3.msra.mxu1 %v38713_v50 }
0x10e0   : > { %30346 = vmatprep.subr.mxu0 %v32655_v44  ;;  %30373 = vmatprep.subr.mxu1 %v38714_v62 }
0x10e1   : > { %30347 = vmatpush3.msra.mxu0 %v32655_v44  ;;  %30374 = vmatpush3.msra.mxu1 %v38714_v62 }
0x10e2   : > { %30348 = vmatprep.subr.mxu0 %v32666_v48  ;;  %30375 = vmatprep.subr.mxu1 %v38715_v42 }
0x10e3   : > { %30349 = vmatpush3.msra.mxu0 %v32666_v48  ;;  %30376 = vmatpush3.msra.mxu1 %v38715_v42 }
0x10e4   : > { %30350 = vmatprep.subr.mxu0 %v32684_v55  ;;  %30377 = vmatprep.subr.mxu1 %v38716_v20 }
0x10e5   : > { %30351 = vmatpush3.msra.mxu0 %v32684_v55  ;;  %30378 = vmatpush3.msra.mxu1 %v38716_v20 }
0x10e6   : > { %30352 = vmatprep.subr.mxu0 %v32718_v4  ;;  %30379 = vmatprep.subr.mxu1 %v38717_v25 }
0x10e7   : > { %30353 = vmatpush3.msra.mxu0 %v32718_v4  ;;  %30380 = vmatpush3.msra.mxu1 %v38717_v25 }
0x10e8   : > { %30354 = vmatprep.subr.mxu0 %v32737_v31  ;;  %30381 = vmatprep.subr.mxu1 %v32792_v63 }
0x10e9   : > { %30355 = vmatpush3.msra.mxu0 %v32737_v31  ;;  %30382 = vmatpush3.msra.mxu1 %v32792_v63 }
0x10ea   : > { %30356 = vmatprep.subr.mxu0 %v32753_v43  ;;  %30383 = vmatprep.subr.mxu1 %v32809_v51 }
0x10eb   : > { %30357 = vmatpush3.msra.mxu0 %v32753_v43  ;;  %30384 = vmatpush3.msra.mxu1 %v32809_v51 }
0x10ec   : > { %30358 = vmatprep.mubr.f32.mxu0 %v15937_v52  ;;  %30385 = vmatprep.subr.mxu1 %v32820_v45  ;;  %v39241_v52 = vld [vmem:[#allocation50_spill] sm:$0xff] }
0x10ed   : > { %30396 = vmatprep.subr.mxu0 %v32595_v18  ;;  %30359 = vmatmul.mubr.f32.vlgmr.msra.gmra.mxu0 %v15947_v46  ;;  %v39242_v46 = vld [vmem:[#allocation19_spill] sm:$0xff] }
0x10ee   : > { %30386 = vmatpush3.msra.mxu1 %v32820_v45  ;;  %30397 = vmatpush3.msra.mxu0 %v32595_v18 }
0x10ef   : > { %30387 = vmatprep.subr.mxu1 %v39054_v41  ;;  %30398 = vmatprep.subr.mxu0 %v39055_v17 }
0x10f0   : > { %30388 = vmatpush3.msra.mxu1 %v39054_v41  ;;  %30399 = vmatpush3.msra.mxu0 %v39055_v17 }
0x10f1   : > { %30389 = vmatprep.subr.mxu1 %v39226_v56  ;;  %30400 = vmatprep.subr.mxu0 %v39227_v28 }
0x10f2   : > { %30390 = vmatpush3.msra.mxu1 %v39226_v56  ;;  %30401 = vmatpush3.msra.mxu0 %v39227_v28 }
0x10f3   : > { %30391 = vmatprep.subr.mxu1 %v39228_v33  ;;  %30402 = vmatprep.subr.mxu0 %v39229_v37 }
0x10f4   : > { %30392 = vmatpush3.msra.mxu1 %v39228_v33  ;;  %30393 = vmatprep.mubr.f32.mxu1 %v36115_v60 }
0x10f5   : > { %30403 = vmatpush3.msra.mxu0 %v39229_v37  ;;  %30394 = vmatmul.mubr.f32.vlgmr.msra.gmra.mxu1 %v36119_v16 }
0x10f6   : > { %30404 = vmatprep.subr.mxu0 %v39230_v15  ;;  %30431 = vmatprep.subr.mxu1 %v32578_v12 }
0x10f7   : > { %30405 = vmatpush3.msra.mxu0 %v39230_v15  ;;  %30432 = vmatpush3.msra.mxu1 %v32578_v12 }
0x10f8   : > { %30406 = vmatprep.subr.mxu0 %v39231_v3  ;;  %30433 = vmatprep.subr.mxu1 %v32572_v8 }
0x10f9   : > { %30407 = vmatpush3.msra.mxu0 %v39231_v3  ;;  %30434 = vmatpush3.msra.mxu1 %v32572_v8 }
0x10fa   : > { %30408 = vmatprep.subr.mxu0 %v39232_v2  ;;  %30435 = vmatprep.subr.mxu1 %v32574_v9 }
0x10fb   : > { %30409 = vmatpush3.msra.mxu0 %v39232_v2  ;;  %30436 = vmatpush3.msra.mxu1 %v32574_v9 }
0x10fc   : > { %30410 = vmatprep.subr.mxu0 %v39233_v1  ;;  %30437 = vmatprep.subr.mxu1 %v32576_v10 }
0x10fd   : > { %30411 = vmatpush3.msra.mxu0 %v39233_v1  ;;  %30438 = vmatpush3.msra.mxu1 %v32576_v10 }
0x10fe   : > { %30412 = vmatprep.subr.mxu0 %v39234_v29  ;;  %30439 = vmatprep.subr.mxu1 %v32570_v6 }
0x10ff   : > { %30413 = vmatpush3.msra.mxu0 %v39234_v29  ;;  %30440 = vmatpush3.msra.mxu1 %v32570_v6 }
0x1100   : > { %30414 = vmatprep.subr.mxu0 %v39235_v22  ;;  %30441 = vmatprep.subr.mxu1 %v32580_v13 }
0x1101   : > { %30415 = vmatpush3.msra.mxu0 %v39235_v22  ;;  %30442 = vmatpush3.msra.mxu1 %v32580_v13 }
0x1102   : > { %30416 = vmatprep.subr.mxu0 %v39236_v49  ;;  %30443 = vmatprep.subr.mxu1 %v32582_v14 }
0x1103   : > { %30417 = vmatpush3.msra.mxu0 %v39236_v49  ;;  %30444 = vmatpush3.msra.mxu1 %v32582_v14 }
0x1104   : > { %30418 = vmatprep.subr.mxu0 %v39237_v53  ;;  %30445 = vmatprep.subr.mxu1 %v32600_v21 }
0x1105   : > { %30419 = vmatpush3.msra.mxu0 %v39237_v53  ;;  %30446 = vmatpush3.msra.mxu1 %v32600_v21 }
0x1106   : > { %30420 = vmatprep.subr.mxu0 %v39238_v0  ;;  %30447 = vmatprep.subr.mxu1 %v32625_v30 }
0x1107   : > { %30421 = vmatpush3.msra.mxu0 %v39238_v0  ;;  %30448 = vmatpush3.msra.mxu1 %v32625_v30 }
0x1108   : > { %30422 = vmatprep.subr.mxu0 %v39239_v23  ;;  %30449 = vmatprep.subr.mxu1 %v32635_v35 }
0x1109   : > { %30423 = vmatpush3.msra.mxu0 %v39239_v23  ;;  %30450 = vmatpush3.msra.mxu1 %v32635_v35 }
0x110a   : > { %30424 = vmatprep.subr.mxu0 %v39240_v19  ;;  %30451 = vmatprep.subr.mxu1 %v32655_v44 }
0x110b   : > { %30425 = vmatpush3.msra.mxu0 %v39240_v19  ;;  %30452 = vmatpush3.msra.mxu1 %v32655_v44  ;;  %v39248_v19 = vld [vmem:[#allocation23_spill] sm:$0xff] }
0x110c   : > { %30426 = vmatprep.subr.mxu0 %v39241_v52  ;;  %30453 = vmatprep.subr.mxu1 %v32666_v48 }
0x110d   : > { %30427 = vmatpush3.msra.mxu0 %v39241_v52  ;;  %30428 = vmatprep.mubr.f32.mxu0 %v36128_v39  ;;  %v39245_v52 = vld [vmem:[#allocation20_spill] sm:$0xff] }
0x110e   : > { %30454 = vmatpush3.msra.mxu1 %v32666_v48  ;;  %30429 = vmatmul.mubr.f32.vlgmr.msra.gmra.mxu0 %v36133_v27 }
0x110f   : > { %30455 = vmatprep.subr.mxu1 %v32684_v55  ;;  %30466 = vmatprep.subr.mxu0 %v39242_v46 }
0x1110   : > { %30456 = vmatpush3.msra.mxu1 %v32684_v55  ;;  %30467 = vmatpush3.msra.mxu0 %v39242_v46  ;;  %v39246_v46 = vand.u32 4294901760, %v36128_v39  ;;  %v39250_v39 = vld [vmem:[#allocation27_spill] sm:$0xff] }
0x1111   : > { %30457 = vmatprep.subr.mxu1 %v32718_v4  ;;  %30468 = vmatprep.subr.mxu0 %v39243_v36 }
0x1112   : > { %30458 = vmatpush3.msra.mxu1 %v32718_v4  ;;  %30469 = vmatpush3.msra.mxu0 %v39243_v36  ;;  %v39247_v36 = vand.u32 4294901760, %v36133_v27  ;;  %v39251_v27 = vld [vmem:[#allocation31_spill] sm:$0xff] }
0x1113   : > { %30459 = vmatprep.subr.mxu1 %v32737_v31  ;;  %30470 = vmatprep.subr.mxu0 %v39244_v11 }
0x1114   : > { %30460 = vmatpush3.msra.mxu1 %v32737_v31  ;;  %30471 = vmatpush3.msra.mxu0 %v39244_v11  ;;  %v39249_v11 = vld [vmem:[#allocation26_spill] sm:$0xff] }
0x1115   : > { %30461 = vmatprep.subr.mxu1 %v32753_v43  ;;  %30472 = vmatprep.subr.mxu0 %v39245_v52 }
0x1116   : > { %30462 = vmatpush3.msra.mxu1 %v32753_v43  ;;  %30463 = vmatprep.mubr.f32.mxu1 %v39246_v46  ;;  %v39253_v46 = vld [vmem:[#allocation37_spill] sm:$0xff] }
0x1117   : > { %30473 = vmatpush3.msra.mxu0 %v39245_v52  ;;  %30464 = vmatmul.mubr.f32.vlgmr.msra.gmra.mxu1 %v39247_v36  ;;  %v39252_v36 = vld [vmem:[#allocation34_spill] sm:$0xff] }
0x1118   : > { %30474 = vmatprep.subr.mxu0 %v39248_v19  ;;  %30501 = vmatprep.subr.mxu1 %v32578_v12 }
0x1119   : > { %30475 = vmatpush3.msra.mxu0 %v39248_v19  ;;  %30502 = vmatpush3.msra.mxu1 %v32578_v12 }
0x111a   : > { %30476 = vmatprep.subr.mxu0 %v39249_v11  ;;  %30503 = vmatprep.subr.mxu1 %v32572_v8 }
0x111b   : > { %30477 = vmatpush3.msra.mxu0 %v39249_v11  ;;  %30504 = vmatpush3.msra.mxu1 %v32572_v8 }
0x111c   : > { %30478 = vmatprep.subr.mxu0 %v39250_v39  ;;  %30505 = vmatprep.subr.mxu1 %v32574_v9 }
0x111d   : > { %30479 = vmatpush3.msra.mxu0 %v39250_v39  ;;  %30506 = vmatpush3.msra.mxu1 %v32574_v9  ;;  %v39254_v39 = vld [vmem:[#allocation40_spill] sm:$0xff] }
0x111e   : > { %30480 = vmatprep.subr.mxu0 %v39251_v27  ;;  %30507 = vmatprep.subr.mxu1 %v32576_v10 }
0x111f   : > { %30481 = vmatpush3.msra.mxu0 %v39251_v27  ;;  %30508 = vmatpush3.msra.mxu1 %v32576_v10  ;;  %v39255_v27 = vld [vmem:[#allocation43_spill] sm:$0xff] }
0x1120   : > { %30482 = vmatprep.subr.mxu0 %v39252_v36  ;;  %30509 = vmatprep.subr.mxu1 %v32570_v6 }
0x1121   : > { %30483 = vmatpush3.msra.mxu0 %v39252_v36  ;;  %30510 = vmatpush3.msra.mxu1 %v32570_v6  ;;  %v39256_v36 = vld [vmem:[#allocation46_spill] sm:$0xff] }
0x1122   : > { %30484 = vmatprep.subr.mxu0 %v39253_v46  ;;  %30511 = vmatprep.subr.mxu1 %v32580_v13 }
0x1123   : > { %30485 = vmatpush3.msra.mxu0 %v39253_v46  ;;  %30512 = vmatpush3.msra.mxu1 %v32580_v13  ;;  %v39257_v46 = vld [vmem:[#allocation49_spill] sm:$0xff] }
0x1124   : > { %30486 = vmatprep.subr.mxu0 %v39254_v39  ;;  %30513 = vmatprep.subr.mxu1 %v32582_v14 }
0x1125   : > { %30487 = vmatpush3.msra.mxu0 %v39254_v39  ;;  %30514 = vmatpush3.msra.mxu1 %v32582_v14  ;;  %v39258_v39 = vld [vmem:[#allocation51_spill] sm:$0xff] }
0x1126   : > { %30488 = vmatprep.subr.mxu0 %v39255_v27  ;;  %30515 = vmatprep.subr.mxu1 %v32600_v21 }
0x1127   : > { %30489 = vmatpush3.msra.mxu0 %v39255_v27  ;;  %30516 = vmatpush3.msra.mxu1 %v32600_v21  ;;  %v39259_v27 = vld [vmem:[#allocation52_spill] sm:$0xff] }
0x1128   : > { %30490 = vmatprep.subr.mxu0 %v39256_v36  ;;  %30517 = vmatprep.subr.mxu1 %v32625_v30 }
0x1129   : > { %30491 = vmatpush3.msra.mxu0 %v39256_v36  ;;  %30518 = vmatpush3.msra.mxu1 %v32625_v30 }
0x112a   : > { %30492 = vmatprep.subr.mxu0 %v39257_v46  ;;  %30519 = vmatprep.subr.mxu1 %v32635_v35 }
0x112b   : > { %30493 = vmatpush3.msra.mxu0 %v39257_v46  ;;  %30520 = vmatpush3.msra.mxu1 %v32635_v35 }
0x112c   : > { %30494 = vmatprep.subr.mxu0 %v39258_v39  ;;  %30521 = vmatprep.subr.mxu1 %v32655_v44 }
0x112d   : > { %30495 = vmatpush3.msra.mxu0 %v39258_v39  ;;  %30522 = vmatpush3.msra.mxu1 %v32655_v44  ;;  %v39260_v39 = vld [vmem:[#allocation56_spill] sm:$0xff] }
0x112e   : > { %30496 = vmatprep.subr.mxu0 %v39259_v27  ;;  %30523 = vmatprep.subr.mxu1 %v32666_v48 }
0x112f   : > { %30497 = vmatpush3.msra.mxu0 %v39259_v27  ;;  %30498 = vmatprep.mubr.f32.mxu0 %v36115_v60 }
0x1130   : > { %30524 = vmatpush3.msra.mxu1 %v32666_v48  ;;  %30499 = vmatmul.mubr.f32.vlgmr.msra.gmra.mxu0 %v36119_v16 }
0x1131   : > { %30525 = vmatprep.subr.mxu1 %v32684_v55  ;;  %30533 = vmatprep.mubr.f32.mxu1 %v36115_v60 }
0x1132   : > { %30526 = vmatpush3.msra.mxu1 %v32684_v55  ;;  %30540 = vmatprep.mubr.f32.mxu0 %v39260_v39 }
0x1133   : > { %30527 = vmatprep.subr.mxu1 %v32718_v4 }
0x1134   : > { %30528 = vmatpush3.msra.mxu1 %v32718_v4 }
0x1135   : > { %30529 = vmatprep.subr.mxu1 %v32737_v31 }
0x1136   : > { %30530 = vmatpush3.msra.mxu1 %v32737_v31 }
0x1137   : > { %30531 = vmatprep.subr.mxu1 %v32753_v43 }
0x1138   : > { %30532 = vmatpush3.msra.mxu1 %v32753_v43 }
0x1139   : > { %30534 = vmatmul.mubr.f32.vlgmr.msra.gmra.mxu1 %v36119_v16 }
0x113a   : > { %30547 = vmatprep.mubr.f32.mxu1 %v32986_v61 }
0x1180   : > { %v30290_v60 = vpop.f32.mrf.mxu0 }
0x1182   : > { %v15421_v27 = vpop.f32.mrf.mxu0 }
0x1185   : > { %v30304_v46 = vpop.f32.mrf.mxu0 }
0x1187   : > { %v15594_v36 = vpop.f32.mrf.mxu0 }
0x1188   : > { %v30297_v39 = vpop.f32.mrf.mxu1 }
0x1189   : > { %v15519_v11 = vadd.f32 %v30297_v39, %v30290_v60 }
0x118a   : > { %v15512_v19 = vpop.f32.mrf.mxu1 }
0x118b   : > { %v15602_v52 = vadd.f32 %v30304_v46, %v15519_v11  ;;  %v15513_v23 = vadd.f32 %v15512_v19, %v15421_v27  ;;  %v30318_v0 = vpop.f32.mrf.mxu0 }
0x118d   : > { %v15595_v53 = vadd.f32 %v15594_v36, %v15513_v23  ;;  %v15761_v1 = vpop.f32.mrf.mxu0 }
0x118e   : > { %v30311_v49 = vpop.f32.mrf.mxu1 }
0x118f   : > { %v15685_v22 = vadd.f32 %v30311_v49, %v15602_v52 }
0x1190   : > { %v15676_v29 = vpop.f32.mrf.mxu1 }
0x1191   : > { %v15768_v2 = vadd.f32 %v30318_v0, %v15685_v22  ;;  %v15677_v3 = vadd.f32 %v15676_v29, %v15595_v53 }
0x1193   : > { %v15762_v16 = vadd.f32 %v15761_v1, %v15677_v3  ;;  %v30325_v15 = vpop.f32.mrf.mxu1 }
0x1194   : > { %v36321_v37 = vadd.f32 %v30325_v15, %v15768_v2 }
0x1195   : > { %v15840_v33 = vpop.f32.mrf.mxu1 }
0x1196   : > { %39261 = vst [vmem:[#allocation117_spill] sm:$0xff] %v36321_v37  ;;  %v36325_v39 = vadd.f32 %v15840_v33, %v15762_v16 }
0x1198   : > { %39263 = vst [vmem:[#allocation118_spill] sm:$0xff] %v36325_v39 }
0x11ad   : > { %v30360_v23 = vpop.f32.mrf.mxu0 }
0x11af   : > { %v15939_v27 = vpop.f32.mrf.mxu0 }
0x11b5   : > { %v30395_v49 = vpop.f32.mrf.mxu1 }
0x11b6   : > { %v16107_v3 = vadd.f32 %v30395_v49, %v30360_v23 }
0x11b7   : > { %v16100_v36 = vpop.f32.mrf.mxu1 }
0x11b8   : > { %v16101_v15 = vadd.f32 %v16100_v36, %v15939_v27 }
0x11ce   : > { %v30430_v52 = vpop.f32.mrf.mxu0 }
0x11cf   : > { %v16218_v2 = vadd.f32 %v30430_v52, %v16107_v3 }
0x11d0   : > { %v16210_v22 = vpop.f32.mrf.mxu0 }
0x11d1   : > { %v16211_v0 = vadd.f32 %v16210_v22, %v16101_v15 }
0x11d7   : > { %v30465_v29 = vpop.f32.mrf.mxu1 }
0x11d8   : > { %v16315_v46 = vadd.f32 %v30465_v29, %v16218_v2 }
0x11d9   : > { %v16306_v53 = vpop.f32.mrf.mxu1 }
0x11da   : > { %v16307_v33 = vadd.f32 %v16306_v53, %v16211_v0  ;;  %v39265_v53 = vld [vmem:[#allocation53_spill] sm:$0xff] }
0x11db   : > { %v39266_v0 = vld [vmem:[#allocation13_spill] sm:$0xff] }
0x11f0   : > { %v30500_v1 = vpop.f32.mrf.mxu0 }
0x11f1   : > { %v16440_v16 = vadd.f32 %v30500_v1, %v16315_v46  ;;  %v39267_v46 = vld [vmem:[#allocation54_spill] sm:$0xff] }
0x11f2   : > { %v16433_v60 = vpop.f32.mrf.mxu0 }
0x11f3   : > { %v16434_v28 = vadd.f32 %v16433_v60, %v16307_v33  ;;  %v39268_v60 = vld [vmem:[#allocation14_spill] sm:$0xff]  ;;  %v39269_v33 = vld [vmem:[#allocation55_spill] sm:$0xff] }
0x11f9   : > { %v30535_v56 = vpop.f32.mrf.mxu1 }
0x11fa   : > { %v16533_v19 = vadd.f32 %v30535_v56, %v16440_v16  ;;  %v39270_v16 = vld [vmem:[#allocation15_spill] sm:$0xff] }
0x11fb   : > { %v16526_v11 = vpop.f32.mrf.mxu1 }
0x11fc   : > { %v16565_v39 = vand.u32 4294901760, %v16533_v19  ;;  %v16527_v37 = vadd.f32 %v16526_v11, %v16434_v28 }
0x11fe   : > { %v16653_v17 = vsub.f32 %v16533_v19, %v16565_v39  ;;  %v16568_v41 = vand.u32 4294901760, %v16527_v37  ;;  %30536 = vmatprep.subr.mxu0 %v16565_v39 }
0x11ff   : > { %30537 = vmatpush3.msra.mxu0 %v16565_v39 }
0x1200   : > { %v16660_v23 = vsub.f32 %v16527_v37, %v16568_v41  ;;  %30538 = vmatprep.subr.mxu0 %v16568_v41  ;;  %v16654_v27 = vand.u32 4294901760, %v16653_v17 }
0x1201   : > { %30539 = vmatpush3.msra.mxu0 %v16568_v41 }
0x1202   : > { %30550 = vmatprep.subr.mxu0 %v16653_v17  ;;  %30541 = vmatmul.mubr.f32.vlgmr.msra.gmra.mxu0 %v33010_v5  ;;  %v16655_v49 = vsub.f32 %v16653_v17, %v16654_v27  ;;  %v16661_v52 = vand.u32 4294901760, %v16660_v23 }
0x1203   : > { %30551 = vmatpush3.msra.mxu0 %v16653_v17  ;;  %30554 = vmatprep.mubr.f32.mxu0 %v32989_v7  ;;  %v32191_v17 = vld [vmem:[%s32549_s23 + $0x20] sm:$0xff] }
0x1204   : > { %30552 = vmatprep.subr.mxu0 %v16660_v23  ;;  %v16656_v56 = vand.u32 4294901760, %v16655_v49  ;;  %v16662_v36 = vsub.f32 %v16660_v23, %v16661_v52  ;;  %v17038_v37 = vmul.f32 %v32191_v17, %v36098_v34  ;;  %v39273_v49 = vld [vmem:[#allocation22_spill] sm:$0xff] }
0x1205   : > { %30553 = vmatpush3.msra.mxu0 %v16660_v23  ;;  %v39271_v23 = vld [vmem:[#allocation16_spill] sm:$0xff]  ;;  %v39278_v17 = vld [vmem:[#allocation38_spill] sm:$0xff] }
0x1206   : > { %30543 = vmatprep.subr.mxu1 %v16656_v56  ;;  %30564 = vmatprep.subr.mxu0 %v16654_v27  ;;  %v16663_v28 = vand.u32 4294901760, %v16662_v36  ;;  %v36361_v34 = vand.u32 4294901760, %v17038_v37  ;;  %v39276_v36 = vld [vmem:[#allocation32_spill] sm:$0xff] }
0x1207   : > { %30544 = vmatpush3.msra.mxu1 %v16656_v56  ;;  %30555 = vmatmul.mubr.f32.vlgmr.msra.gmra.mxu0 %v33003_v59  ;;  %v39275_v56 = vld [vmem:[#allocation29_spill] sm:$0xff] }
0x1208   : > { %30565 = vmatpush3.msra.mxu0 %v16654_v27  ;;  %30545 = vmatprep.subr.mxu1 %v16663_v28  ;;  %v39272_v27 = vld [vmem:[#allocation21_spill] sm:$0xff] }
0x1209   : > { %30566 = vmatprep.subr.mxu0 %v16661_v52  ;;  %30546 = vmatpush3.msra.mxu1 %v16663_v28  ;;  %v39277_v28 = vld [vmem:[#allocation35_spill] sm:$0xff] }
0x120a   : > { %30567 = vmatpush3.msra.mxu0 %v16661_v52  ;;  %30548 = vmatmul.mubr.f32.vlgmr.msra.gmra.mxu1 %v33000_v32  ;;  %v39274_v52 = vld [vmem:[#allocation24_spill] sm:$0xff] }
0x120b   : > { %30557 = vmatprep.subr.mxu1 %v16565_v39  ;;  %30568 = vmatprep.mubr.f32.mxu0 %v32986_v61 }
0x120c   : > { %30578 = vmatprep.subr.mxu0 %v32578_v12  ;;  %30558 = vmatpush3.msra.mxu1 %v16565_v39 }
0x120d   : > { %30569 = vmatmul.mubr.f32.vlgmr.msra.gmra.mxu0 %v33000_v32  ;;  %30559 = vmatprep.subr.mxu1 %v16568_v41 }
0x120e   : > { %30579 = vmatpush3.msra.mxu0 %v32578_v12  ;;  %30560 = vmatpush3.msra.mxu1 %v16568_v41 }
0x120f   : > { %30580 = vmatprep.subr.mxu0 %v32572_v8  ;;  %30561 = vmatprep.mubr.f32.mxu1 %v32993_v54 }
0x1210   : > { %30581 = vmatpush3.msra.mxu0 %v32572_v8  ;;  %30562 = vmatmul.mubr.f32.vlgmr.msra.gmra.mxu1 %v33006_v26 }
0x1211   : > { %30571 = vmatprep.subr.mxu1 %v16565_v39  ;;  %30582 = vmatprep.subr.mxu0 %v32574_v9 }
0x1212   : > { %30572 = vmatpush3.msra.mxu1 %v16565_v39  ;;  %30583 = vmatpush3.msra.mxu0 %v32574_v9  ;;  %v32192_v39 = vld [vmem:[%s32549_s23 + $0x28] sm:$0xff] }
0x1213   : > { %30573 = vmatprep.subr.mxu1 %v16568_v41  ;;  %30584 = vmatprep.subr.mxu0 %v32576_v10 }
0x1214   : > { %30574 = vmatpush3.msra.mxu1 %v16568_v41  ;;  %30575 = vmatprep.mubr.f32.mxu1 %v32986_v61  ;;  %v17039_v41 = vmul.f32 %v32192_v39, %v36105_v47  ;;  %v36374_v47 = vsub.f32 %v17038_v37, %v36361_v34  ;;  %v39279_v37 = vld [vmem:[#allocation41_spill] sm:$0xff]  ;;  %v39280_v39 = vld [vmem:[#allocation44_spill] sm:$0xff] }
0x1215   : > { %30585 = vmatpush3.msra.mxu0 %v32576_v10  ;;  %30576 = vmatmul.mubr.f32.vlgmr.msra.gmra.mxu1 %v33000_v32 }
0x1216   : > { %30586 = vmatprep.subr.mxu0 %v32570_v6  ;;  %30613 = vmatprep.subr.mxu1 %v32642_v38  ;;  %v36365_v11 = vand.u32 4294901760, %v17039_v41  ;;  %v17123_v22 = vand.u32 4294901760, %v36374_v47 }
0x1217   : > { %30587 = vmatpush3.msra.mxu0 %v32570_v6  ;;  %30614 = vmatpush3.msra.mxu1 %v32642_v38 }
0x1218   : > { %30588 = vmatprep.subr.mxu0 %v32580_v13  ;;  %30615 = vmatprep.subr.mxu1 %v38709_v40  ;;  %v36379_v19 = vsub.f32 %v17039_v41, %v36365_v11  ;;  %v17124_v3 = vsub.f32 %v36374_v47, %v17123_v22  ;;  %v39281_v41 = vld [vmem:[#allocation47_spill] sm:$0xff] }
0x1219   : > { %30589 = vmatpush3.msra.mxu0 %v32580_v13  ;;  %30616 = vmatpush3.msra.mxu1 %v38709_v40 }
0x121a   : > { %30590 = vmatprep.subr.mxu0 %v32582_v14  ;;  %30617 = vmatprep.subr.mxu1 %v38710_v57  ;;  %v38472_v29 = vand.u32 4294901760, %v36379_v19  ;;  %v17125_v15 = vand.u32 4294901760, %v17124_v3  ;;  %v39282_v3 = vld [vmem:[#allocation50_spill] sm:$0xff] }
0x121b   : > { %30591 = vmatpush3.msra.mxu0 %v32582_v14  ;;  %30618 = vmatpush3.msra.mxu1 %v38710_v57 }
0x121c   : > { %30592 = vmatprep.subr.mxu0 %v32600_v21  ;;  %30619 = vmatprep.subr.mxu1 %v38711_v24  ;;  %v17134_v1 = vsub.f32 %v36379_v19, %v38472_v29  ;;  %v39286_v29 = vld [vmem:[#allocation20_spill] sm:$0xff] }
0x121d   : > { %30593 = vmatpush3.msra.mxu0 %v32600_v21  ;;  %30620 = vmatpush3.msra.mxu1 %v38711_v24 }
0x121e   : > { %30594 = vmatprep.subr.mxu0 %v32625_v30  ;;  %30621 = vmatprep.subr.mxu1 %v38712_v58  ;;  %v17135_v2 = vand.u32 4294901760, %v17134_v1  ;;  %v39283_v1 = vld [vmem:[#allocation19_spill] sm:$0xff] }
0x121f   : > { %30595 = vmatpush3.msra.mxu0 %v32625_v30  ;;  %30622 = vmatpush3.msra.mxu1 %v38712_v58 }
0x1220   : > { %30596 = vmatprep.subr.mxu0 %v32635_v35  ;;  %30623 = vmatprep.subr.mxu1 %v38713_v50 }
0x1221   : > { %30597 = vmatpush3.msra.mxu0 %v32635_v35  ;;  %30624 = vmatpush3.msra.mxu1 %v38713_v50 }
0x1222   : > { %30598 = vmatprep.subr.mxu0 %v32655_v44  ;;  %30625 = vmatprep.subr.mxu1 %v38714_v62 }
0x1223   : > { %30599 = vmatpush3.msra.mxu0 %v32655_v44  ;;  %30626 = vmatpush3.msra.mxu1 %v38714_v62 }
0x1224   : > { %30600 = vmatprep.subr.mxu0 %v32666_v48  ;;  %30627 = vmatprep.subr.mxu1 %v38715_v42 }
0x1225   : > { %30601 = vmatpush3.msra.mxu0 %v32666_v48  ;;  %30628 = vmatpush3.msra.mxu1 %v38715_v42 }
0x1226   : > { %30602 = vmatprep.subr.mxu0 %v32684_v55  ;;  %30629 = vmatprep.subr.mxu1 %v38716_v20 }
0x1227   : > { %30603 = vmatpush3.msra.mxu0 %v32684_v55  ;;  %30630 = vmatpush3.msra.mxu1 %v38716_v20 }
0x1228   : > { %30604 = vmatprep.subr.mxu0 %v32718_v4  ;;  %30631 = vmatprep.subr.mxu1 %v38717_v25 }
0x1229   : > { %30605 = vmatpush3.msra.mxu0 %v32718_v4  ;;  %30632 = vmatpush3.msra.mxu1 %v38717_v25 }
0x122a   : > { %30606 = vmatprep.subr.mxu0 %v32737_v31  ;;  %30633 = vmatprep.subr.mxu1 %v32792_v63 }
0x122b   : > { %30607 = vmatpush3.msra.mxu0 %v32737_v31  ;;  %30634 = vmatpush3.msra.mxu1 %v32792_v63 }
0x122c   : > { %30608 = vmatprep.subr.mxu0 %v32753_v43  ;;  %30635 = vmatprep.subr.mxu1 %v32809_v51 }
0x122d   : > { %30609 = vmatpush3.msra.mxu0 %v32753_v43  ;;  %30636 = vmatpush3.msra.mxu1 %v32809_v51 }
0x122e   : > { %30610 = vmatprep.mubr.f32.mxu0 %v17125_v15  ;;  %30637 = vmatprep.subr.mxu1 %v32820_v45  ;;  %v39284_v15 = vld [vmem:[#allocation17_spill] sm:$0xff] }
0x122f   : > { %30648 = vmatprep.subr.mxu0 %v32595_v18  ;;  %30611 = vmatmul.mubr.f32.vlgmr.msra.gmra.mxu0 %v17135_v2  ;;  %v39285_v2 = vld [vmem:[#allocation18_spill] sm:$0xff] }
0x1230   : > { %30638 = vmatpush3.msra.mxu1 %v32820_v45  ;;  %30649 = vmatpush3.msra.mxu0 %v32595_v18 }
0x1231   : > { %30639 = vmatprep.subr.mxu1 %v39265_v53  ;;  %30650 = vmatprep.subr.mxu0 %v39266_v0 }
0x1232   : > { %30640 = vmatpush3.msra.mxu1 %v39265_v53  ;;  %30651 = vmatpush3.msra.mxu0 %v39266_v0 }
0x1233   : > { %30641 = vmatprep.subr.mxu1 %v39267_v46  ;;  %30652 = vmatprep.subr.mxu0 %v39268_v60 }
0x1234   : > { %30642 = vmatpush3.msra.mxu1 %v39267_v46  ;;  %30653 = vmatpush3.msra.mxu0 %v39268_v60  ;;  %v39302_v46 = vld [vmem:[#allocation117_spill] sm:$0xff] }
0x1235   : > { %30643 = vmatprep.subr.mxu1 %v39269_v33  ;;  %30654 = vmatprep.subr.mxu0 %v39270_v16 }
0x1236   : > { %30644 = vmatpush3.msra.mxu1 %v39269_v33  ;;  %30645 = vmatprep.mubr.f32.mxu1 %v36361_v34 }
0x1237   : > { %30655 = vmatpush3.msra.mxu0 %v39270_v16  ;;  %30646 = vmatmul.mubr.f32.vlgmr.msra.gmra.mxu1 %v36365_v11  ;;  %v39301_v16 = vld [vmem:[#allocation111_spill] sm:$0xff] }
0x1238   : > { %30656 = vmatprep.subr.mxu0 %v39271_v23  ;;  %30683 = vmatprep.subr.mxu1 %v32578_v12 }
0x1239   : > { %30657 = vmatpush3.msra.mxu0 %v39271_v23  ;;  %30684 = vmatpush3.msra.mxu1 %v32578_v12 }
0x123a   : > { %30658 = vmatprep.subr.mxu0 %v39272_v27  ;;  %30685 = vmatprep.subr.mxu1 %v32572_v8 }
0x123b   : > { %30659 = vmatpush3.msra.mxu0 %v39272_v27  ;;  %30686 = vmatpush3.msra.mxu1 %v32572_v8 }
0x123c   : > { %30660 = vmatprep.subr.mxu0 %v39273_v49  ;;  %30687 = vmatprep.subr.mxu1 %v32574_v9 }
0x123d   : > { %30661 = vmatpush3.msra.mxu0 %v39273_v49  ;;  %30688 = vmatpush3.msra.mxu1 %v32574_v9 }
0x123e   : > { %30662 = vmatprep.subr.mxu0 %v39274_v52  ;;  %30689 = vmatprep.subr.mxu1 %v32576_v10 }
0x123f   : > { %30663 = vmatpush3.msra.mxu0 %v39274_v52  ;;  %30690 = vmatpush3.msra.mxu1 %v32576_v10 }
0x1240   : > { %30664 = vmatprep.subr.mxu0 %v39275_v56  ;;  %30691 = vmatprep.subr.mxu1 %v32570_v6 }
0x1241   : > { %30665 = vmatpush3.msra.mxu0 %v39275_v56  ;;  %30692 = vmatpush3.msra.mxu1 %v32570_v6 }
0x1242   : > { %30666 = vmatprep.subr.mxu0 %v39276_v36  ;;  %30693 = vmatprep.subr.mxu1 %v32580_v13 }
0x1243   : > { %30667 = vmatpush3.msra.mxu0 %v39276_v36  ;;  %30694 = vmatpush3.msra.mxu1 %v32580_v13 }
0x1244   : > { %30668 = vmatprep.subr.mxu0 %v39277_v28  ;;  %30695 = vmatprep.subr.mxu1 %v32582_v14 }
0x1245   : > { %30669 = vmatpush3.msra.mxu0 %v39277_v28  ;;  %30696 = vmatpush3.msra.mxu1 %v32582_v14 }
0x1246   : > { %30670 = vmatprep.subr.mxu0 %v39278_v17  ;;  %30697 = vmatprep.subr.mxu1 %v32600_v21 }
0x1247   : > { %30671 = vmatpush3.msra.mxu0 %v39278_v17  ;;  %30698 = vmatpush3.msra.mxu1 %v32600_v21 }
0x1248   : > { %30672 = vmatprep.subr.mxu0 %v39279_v37  ;;  %30699 = vmatprep.subr.mxu1 %v32625_v30 }
0x1249   : > { %30673 = vmatpush3.msra.mxu0 %v39279_v37  ;;  %30700 = vmatpush3.msra.mxu1 %v32625_v30 }
0x124a   : > { %30674 = vmatprep.subr.mxu0 %v39280_v39  ;;  %30701 = vmatprep.subr.mxu1 %v32635_v35 }
0x124b   : > { %30675 = vmatpush3.msra.mxu0 %v39280_v39  ;;  %30702 = vmatpush3.msra.mxu1 %v32635_v35 }
0x124c   : > { %30676 = vmatprep.subr.mxu0 %v39281_v41  ;;  %30703 = vmatprep.subr.mxu1 %v32655_v44 }
0x124d   : > { %30677 = vmatpush3.msra.mxu0 %v39281_v41  ;;  %30704 = vmatpush3.msra.mxu1 %v32655_v44 }
0x124e   : > { %30678 = vmatprep.subr.mxu0 %v39282_v3  ;;  %30705 = vmatprep.subr.mxu1 %v32666_v48 }
0x124f   : > { %30679 = vmatpush3.msra.mxu0 %v39282_v3  ;;  %30680 = vmatprep.mubr.f32.mxu0 %v36374_v47  ;;  %v39290_v47 = vld [vmem:[#allocation27_spill] sm:$0xff] }
0x1250   : > { %30706 = vmatpush3.msra.mxu1 %v32666_v48  ;;  %30681 = vmatmul.mubr.f32.vlgmr.msra.gmra.mxu0 %v36379_v19 }
0x1251   : > { %30707 = vmatprep.subr.mxu1 %v32684_v55  ;;  %30718 = vmatprep.subr.mxu0 %v39283_v1 }
0x1252   : > { %30708 = vmatpush3.msra.mxu1 %v32684_v55  ;;  %30719 = vmatpush3.msra.mxu0 %v39283_v1  ;;  %v39288_v1 = vld [vmem:[#allocation23_spill] sm:$0xff] }
0x1253   : > { %30709 = vmatprep.subr.mxu1 %v32718_v4  ;;  %30720 = vmatprep.subr.mxu0 %v39284_v15 }
0x1254   : > { %30710 = vmatpush3.msra.mxu1 %v32718_v4  ;;  %30721 = vmatpush3.msra.mxu0 %v39284_v15  ;;  %v39287_v15 = vand.u32 4294901760, %v36379_v19  ;;  %v39291_v19 = vld [vmem:[#allocation31_spill] sm:$0xff] }
0x1255   : > { %30711 = vmatprep.subr.mxu1 %v32737_v31  ;;  %30722 = vmatprep.subr.mxu0 %v39285_v2 }
0x1256   : > { %30712 = vmatpush3.msra.mxu1 %v32737_v31  ;;  %30723 = vmatpush3.msra.mxu0 %v39285_v2  ;;  %v39289_v2 = vld [vmem:[#allocation26_spill] sm:$0xff] }
0x1257   : > { %30713 = vmatprep.subr.mxu1 %v32753_v43  ;;  %30724 = vmatprep.subr.mxu0 %v39286_v29 }
0x1258   : > { %30714 = vmatpush3.msra.mxu1 %v32753_v43  ;;  %30715 = vmatprep.mubr.f32.mxu1 %v17123_v22  ;;  %v39292_v22 = vld [vmem:[#allocation34_spill] sm:$0xff] }
0x1259   : > { %30725 = vmatpush3.msra.mxu0 %v39286_v29  ;;  %30716 = vmatmul.mubr.f32.vlgmr.msra.gmra.mxu1 %v39287_v15  ;;  %v39293_v15 = vld [vmem:[#allocation37_spill] sm:$0xff] }
0x125a   : > { %30726 = vmatprep.subr.mxu0 %v39288_v1  ;;  %30753 = vmatprep.subr.mxu1 %v32578_v12 }
0x125b   : > { %30727 = vmatpush3.msra.mxu0 %v39288_v1  ;;  %30754 = vmatpush3.msra.mxu1 %v32578_v12 }
0x125c   : > { %30728 = vmatprep.subr.mxu0 %v39289_v2  ;;  %30755 = vmatprep.subr.mxu1 %v32572_v8 }
0x125d   : > { %30729 = vmatpush3.msra.mxu0 %v39289_v2  ;;  %30756 = vmatpush3.msra.mxu1 %v32572_v8 }
0x125e   : > { %30730 = vmatprep.subr.mxu0 %v39290_v47  ;;  %30757 = vmatprep.subr.mxu1 %v32574_v9 }
0x125f   : > { %30731 = vmatpush3.msra.mxu0 %v39290_v47  ;;  %30758 = vmatpush3.msra.mxu1 %v32574_v9  ;;  %v39294_v47 = vld [vmem:[#allocation40_spill] sm:$0xff] }
0x1260   : > { %30732 = vmatprep.subr.mxu0 %v39291_v19  ;;  %30759 = vmatprep.subr.mxu1 %v32576_v10 }
0x1261   : > { %30733 = vmatpush3.msra.mxu0 %v39291_v19  ;;  %30760 = vmatpush3.msra.mxu1 %v32576_v10  ;;  %v39295_v19 = vld [vmem:[#allocation43_spill] sm:$0xff] }
0x1262   : > { %30734 = vmatprep.subr.mxu0 %v39292_v22  ;;  %30761 = vmatprep.subr.mxu1 %v32570_v6 }
0x1263   : > { %30735 = vmatpush3.msra.mxu0 %v39292_v22  ;;  %30762 = vmatpush3.msra.mxu1 %v32570_v6  ;;  %v39296_v22 = vld [vmem:[#allocation46_spill] sm:$0xff] }
0x1264   : > { %30736 = vmatprep.subr.mxu0 %v39293_v15  ;;  %30763 = vmatprep.subr.mxu1 %v32580_v13 }
0x1265   : > { %30737 = vmatpush3.msra.mxu0 %v39293_v15  ;;  %30764 = vmatpush3.msra.mxu1 %v32580_v13  ;;  %v39297_v15 = vld [vmem:[#allocation49_spill] sm:$0xff] }
0x1266   : > { %30738 = vmatprep.subr.mxu0 %v39294_v47  ;;  %30765 = vmatprep.subr.mxu1 %v32582_v14 }
0x1267   : > { %30739 = vmatpush3.msra.mxu0 %v39294_v47  ;;  %30766 = vmatpush3.msra.mxu1 %v32582_v14  ;;  %v39298_v47 = vld [vmem:[#allocation51_spill] sm:$0xff] }
0x1268   : > { %30740 = vmatprep.subr.mxu0 %v39295_v19  ;;  %30767 = vmatprep.subr.mxu1 %v32600_v21 }
0x1269   : > { %30741 = vmatpush3.msra.mxu0 %v39295_v19  ;;  %30768 = vmatpush3.msra.mxu1 %v32600_v21  ;;  %v39299_v19 = vld [vmem:[#allocation52_spill] sm:$0xff] }
0x126a   : > { %30742 = vmatprep.subr.mxu0 %v39296_v22  ;;  %30769 = vmatprep.subr.mxu1 %v32625_v30 }
0x126b   : > { %30743 = vmatpush3.msra.mxu0 %v39296_v22  ;;  %30770 = vmatpush3.msra.mxu1 %v32625_v30 }
0x126c   : > { %30744 = vmatprep.subr.mxu0 %v39297_v15  ;;  %30771 = vmatprep.subr.mxu1 %v32635_v35 }
0x126d   : > { %30745 = vmatpush3.msra.mxu0 %v39297_v15  ;;  %30772 = vmatpush3.msra.mxu1 %v32635_v35 }
0x126e   : > { %30746 = vmatprep.subr.mxu0 %v39298_v47  ;;  %30773 = vmatprep.subr.mxu1 %v32655_v44 }
0x126f   : > { %30747 = vmatpush3.msra.mxu0 %v39298_v47  ;;  %30774 = vmatpush3.msra.mxu1 %v32655_v44  ;;  %v39300_v47 = vld [vmem:[#allocation56_spill] sm:$0xff] }
0x1270   : > { %30748 = vmatprep.subr.mxu0 %v39299_v19  ;;  %30775 = vmatprep.subr.mxu1 %v32666_v48 }
0x1271   : > { %30749 = vmatpush3.msra.mxu0 %v39299_v19  ;;  %30750 = vmatprep.mubr.f32.mxu0 %v36361_v34 }
0x1272   : > { %30776 = vmatpush3.msra.mxu1 %v32666_v48  ;;  %30751 = vmatmul.mubr.f32.vlgmr.msra.gmra.mxu0 %v36365_v11 }
0x1273   : > { %30777 = vmatprep.subr.mxu1 %v32684_v55  ;;  %30785 = vmatprep.mubr.f32.mxu1 %v36361_v34 }
0x1274   : > { %30778 = vmatpush3.msra.mxu1 %v32684_v55  ;;  %30792 = vmatprep.mubr.f32.mxu0 %v39300_v47 }
0x1275   : > { %30779 = vmatprep.subr.mxu1 %v32718_v4 }
0x1276   : > { %30780 = vmatpush3.msra.mxu1 %v32718_v4 }
0x1277   : > { %30781 = vmatprep.subr.mxu1 %v32737_v31 }
0x1278   : > { %30782 = vmatpush3.msra.mxu1 %v32737_v31 }
0x1279   : > { %30783 = vmatprep.subr.mxu1 %v32753_v43 }
0x127a   : > { %30784 = vmatpush3.msra.mxu1 %v32753_v43 }
0x127b   : > { %30786 = vmatmul.mubr.f32.vlgmr.msra.gmra.mxu1 %v36365_v11 }
0x127c   : > { %30799 = vmatprep.mubr.f32.mxu1 %v32986_v61 }
0x12c2   : > { %v30542_v34 = vpop.f32.mrf.mxu0 }
0x12c4   : > { %v16609_v19 = vpop.f32.mrf.mxu0 }
0x12c7   : > { %v30556_v15 = vpop.f32.mrf.mxu0 }
0x12c9   : > { %v16782_v22 = vpop.f32.mrf.mxu0 }
0x12ca   : > { %v30549_v47 = vpop.f32.mrf.mxu1 }
0x12cb   : > { %v16707_v2 = vadd.f32 %v30549_v47, %v30542_v34  ;;  %v39303_v47 = vld [vmem:[#allocation109_spill] sm:$0xff] }
0x12cc   : > { %v16700_v1 = vpop.f32.mrf.mxu1  ;;  %v39304_v34 = vsub.f32 %v39302_v46, %v39303_v47 }
0x12cd   : > { %v16790_v29 = vadd.f32 %v30556_v15, %v16707_v2  ;;  %v16701_v3 = vadd.f32 %v16700_v1, %v16609_v19  ;;  %v30570_v41 = vpop.f32.mrf.mxu0  ;;  %v39305_v1 = vld [vmem:[#allocation114_spill] sm:$0xff] }
0x12ce   : > { %v39308_v15 = vld [vmem:[#allocation110_spill] sm:$0xff] }
0x12cf   : > { %v16783_v39 = vadd.f32 %v16782_v22, %v16701_v3  ;;  %v16949_v36 = vpop.f32.mrf.mxu0  ;;  %v39306_v3 = vld [vmem:[#allocation113_spill] sm:$0xff] }
0x12d0   : > { %v30563_v37 = vpop.f32.mrf.mxu1  ;;  %v18251_v22 = vadd.f32 0.0001, %v39306_v3 }
0x12d1   : > { %v16873_v17 = vadd.f32 %v30563_v37, %v16790_v29  ;;  %v39307_v37 = vld [vmem:[#allocation118_spill] sm:$0xff] }
0x12d2   : > { %v16864_v28 = vpop.f32.mrf.mxu1 }
0x12d3   : > { %v16956_v56 = vadd.f32 %v30570_v41, %v16873_v17  ;;  %v16865_v52 = vadd.f32 %v16864_v28, %v16783_v39  ;;  %v39309_v17 = vsub.f32 %v39307_v37, %v39308_v15 }
0x12d5   : > { %v16950_v11 = vadd.f32 %v16949_v36, %v16865_v52  ;;  %v30577_v49 = vpop.f32.mrf.mxu1  ;;  %v39310_v52 = vld [vmem:[#allocation116_spill] sm:$0xff] }
0x12d6   : > { %v17035_v27 = vadd.f32 %v30577_v49, %v16956_v56  ;;  %v18250_v36 = vadd.f32 0.0001, %v39310_v52 }
0x12d7   : > { %v17028_v23 = vpop.f32.mrf.mxu1 }
0x12d8   : > { %v18235_v33 = vsub.f32 %v17035_v27, %v39301_v16  ;;  %v17029_v60 = vadd.f32 %v17028_v23, %v16950_v11 }
0x12da   : > { %v18253_v2 = vadd.f32 %v18235_v33, %v39304_v34  ;;  %v18234_v19 = vsub.f32 %v17029_v60, %v39305_v1 }
0x12dc   : > { %v18255_v29 = vadd.f32 0.0009, %v18253_v2  ;;  %v18252_v28 = vadd.f32 %v18234_v19, %v39309_v17 }
0x12de   : > { %v36577_v49 = vmul.f32 %v18255_v29, %v18251_v22  ;;  %v18254_v56 = vadd.f32 0.0009, %v18252_v28 }
0x12e0   : > { %39311 = vst [vmem:[#allocation111_spill] sm:$0xff] %v36577_v49  ;;  %v36579_v16 = vmul.f32 %v18254_v56, %v18250_v36 }
0x12e2   : > { %39312 = vst [vmem:[#allocation117_spill] sm:$0xff] %v36579_v16 }
0x12ef   : > { %v30612_v23 = vpop.f32.mrf.mxu0 }
0x12f1   : > { %v17127_v27 = vpop.f32.mrf.mxu0 }
0x12f7   : > { %v30647_v46 = vpop.f32.mrf.mxu1 }
0x12f8   : > { %v17295_v11 = vadd.f32 %v30647_v46, %v30612_v23 }
0x12f9   : > { %v17288_v39 = vpop.f32.mrf.mxu1 }
0x12fa   : > { %v17289_v34 = vadd.f32 %v17288_v39, %v17127_v27 }
0x1310   : > { %v30682_v33 = vpop.f32.mrf.mxu0 }
0x1311   : > { %v17406_v2 = vadd.f32 %v30682_v33, %v17295_v11 }
0x1312   : > { %v17398_v60 = vpop.f32.mrf.mxu0 }
0x1313   : > { %v17399_v19 = vadd.f32 %v17398_v60, %v17289_v34 }
0x1319   : > { %v30717_v41 = vpop.f32.mrf.mxu1 }
0x131a   : > { %v17503_v3 = vadd.f32 %v30717_v41, %v17406_v2 }
0x131b   : > { %v17494_v1 = vpop.f32.mrf.mxu1 }
0x131c   : > { %v17495_v22 = vadd.f32 %v17494_v1, %v17399_v19 }
0x1332   : > { %v30752_v47 = vpop.f32.mrf.mxu0 }
0x1333   : > { %v17628_v29 = vadd.f32 %v30752_v47, %v17503_v3 }
0x1334   : > { %v17621_v37 = vpop.f32.mrf.mxu0 }
0x1335   : > { %v17622_v17 = vadd.f32 %v17621_v37, %v17495_v22 }
0x133b   : > { %v30787_v15 = vpop.f32.mrf.mxu1 }
0x133c   : > { %v17721_v28 = vadd.f32 %v30787_v15, %v17628_v29  ;;  %v39313_v15 = vld [vmem:[#allocation54_spill] sm:$0xff] }
0x133d   : > { %v17714_v52 = vpop.f32.mrf.mxu1 }
0x133e   : > { %v17753_v36 = vand.u32 4294901760, %v17721_v28  ;;  %v17715_v56 = vadd.f32 %v17714_v52, %v17622_v17  ;;  %v39314_v17 = vld [vmem:[#allocation14_spill] sm:$0xff]  ;;  %v39316_v52 = vld [vmem:[#allocation15_spill] sm:$0xff] }
0x1340   : > { %v17841_v16 = vsub.f32 %v17721_v28, %v17753_v36  ;;  %v17756_v49 = vand.u32 4294901760, %v17715_v56  ;;  %30788 = vmatprep.subr.mxu0 %v17753_v36  ;;  %v39315_v28 = vld [vmem:[#allocation55_spill] sm:$0xff] }
0x1341   : > { %30789 = vmatpush3.msra.mxu0 %v17753_v36 }
0x1342   : > { %v17848_v23 = vsub.f32 %v17715_v56, %v17756_v49  ;;  %30790 = vmatprep.subr.mxu0 %v17756_v49  ;;  %v17842_v27 = vand.u32 4294901760, %v17841_v16  ;;  %v39318_v56 = vld [vmem:[#allocation21_spill] sm:$0xff] }
0x1343   : > { %30791 = vmatpush3.msra.mxu0 %v17756_v49 }
0x1344   : > { %30802 = vmatprep.subr.mxu0 %v17841_v16  ;;  %30793 = vmatmul.mubr.f32.vlgmr.msra.gmra.mxu0 %v33010_v5  ;;  %v17843_v46 = vsub.f32 %v17841_v16, %v17842_v27  ;;  %v17849_v33 = vand.u32 4294901760, %v17848_v23 }
0x1345   : > { %30803 = vmatpush3.msra.mxu0 %v17841_v16  ;;  %30806 = vmatprep.mubr.f32.mxu0 %v32989_v7  ;;  %v24400_v16 = vld [vmem:[%s32549_s23 + $0x30] sm:$0xff] }
0x1346   : > { %30804 = vmatprep.subr.mxu0 %v17848_v23  ;;  %v17844_v39 = vand.u32 4294901760, %v17843_v46  ;;  %v17850_v60 = vsub.f32 %v17848_v23, %v17849_v33  ;;  %v36611_v11 = vand.u32 4294901760, %v24400_v16  ;;  %v39321_v46 = vld [vmem:[#allocation29_spill] sm:$0xff] }
0x1347   : > { %30805 = vmatpush3.msra.mxu0 %v17848_v23  ;;  %v39319_v23 = vld [vmem:[#allocation22_spill] sm:$0xff] }
0x1348   : > { %30795 = vmatprep.subr.mxu1 %v17844_v39  ;;  %30816 = vmatprep.subr.mxu0 %v17842_v27  ;;  %v17851_v41 = vand.u32 4294901760, %v17850_v60  ;;  %v36624_v34 = vsub.f32 %v24400_v16, %v36611_v11  ;;  %v39324_v60 = vld [vmem:[#allocation38_spill] sm:$0xff]  ;;  %v39326_v16 = vld [vmem:[#allocation44_spill] sm:$0xff] }
0x1349   : > { %30796 = vmatpush3.msra.mxu1 %v17844_v39  ;;  %30807 = vmatmul.mubr.f32.vlgmr.msra.gmra.mxu0 %v33003_v59  ;;  %v39323_v39 = vld [vmem:[#allocation35_spill] sm:$0xff] }
0x134a   : > { %30817 = vmatpush3.msra.mxu0 %v17842_v27  ;;  %30797 = vmatprep.subr.mxu1 %v17851_v41  ;;  %v18361_v1 = vand.u32 4294901760, %v36624_v34  ;;  %v39320_v27 = vld [vmem:[#allocation24_spill] sm:$0xff] }
0x134b   : > { %30818 = vmatprep.subr.mxu0 %v17849_v33  ;;  %30798 = vmatpush3.msra.mxu1 %v17851_v41  ;;  %v39325_v41 = vld [vmem:[#allocation41_spill] sm:$0xff] }
0x134c   : > { %30819 = vmatpush3.msra.mxu0 %v17849_v33  ;;  %30800 = vmatmul.mubr.f32.vlgmr.msra.gmra.mxu1 %v33000_v32  ;;  %v18362_v3 = vsub.f32 %v36624_v34, %v18361_v1  ;;  %v39322_v33 = vld [vmem:[#allocation32_spill] sm:$0xff] }
0x134d   : > { %30809 = vmatprep.subr.mxu1 %v17753_v36  ;;  %30820 = vmatprep.mubr.f32.mxu0 %v32986_v61 }
0x134e   : > { %30830 = vmatprep.subr.mxu0 %v32578_v12  ;;  %30810 = vmatpush3.msra.mxu1 %v17753_v36  ;;  %v18363_v22 = vand.u32 4294901760, %v18362_v3  ;;  %v39328_v3 = vld [vmem:[#allocation50_spill] sm:$0xff] }
0x134f   : > { %30821 = vmatmul.mubr.f32.vlgmr.msra.gmra.mxu0 %v33000_v32  ;;  %30811 = vmatprep.subr.mxu1 %v17756_v49 }
0x1350   : > { %30831 = vmatpush3.msra.mxu0 %v32578_v12  ;;  %30812 = vmatpush3.msra.mxu1 %v17756_v49 }
0x1351   : > { %30832 = vmatprep.subr.mxu0 %v32572_v8  ;;  %30813 = vmatprep.mubr.f32.mxu1 %v32993_v54 }
0x1352   : > { %30833 = vmatpush3.msra.mxu0 %v32572_v8  ;;  %30814 = vmatmul.mubr.f32.vlgmr.msra.gmra.mxu1 %v33006_v26 }
0x1353   : > { %30823 = vmatprep.subr.mxu1 %v17753_v36  ;;  %30834 = vmatprep.subr.mxu0 %v32574_v9 }
0x1354   : > { %30824 = vmatpush3.msra.mxu1 %v17753_v36  ;;  %30835 = vmatpush3.msra.mxu0 %v32574_v9  ;;  %v39317_v36 = vld [vmem:[#allocation16_spill] sm:$0xff] }
0x1355   : > { %30825 = vmatprep.subr.mxu1 %v17756_v49  ;;  %30836 = vmatprep.subr.mxu0 %v32576_v10 }
0x1356   : > { %30826 = vmatpush3.msra.mxu1 %v17756_v49  ;;  %30827 = vmatprep.mubr.f32.mxu1 %v32986_v61  ;;  %v24401_v49 = vld [vmem:[%s32549_s23 + $0x38] sm:$0xff] }
0x1357   : > { %30837 = vmatpush3.msra.mxu0 %v32576_v10  ;;  %30828 = vmatmul.mubr.f32.vlgmr.msra.gmra.mxu1 %v33000_v32  ;;  %v36615_v47 = vand.u32 4294901760, %v24401_v49 }
0x1358   : > { %30838 = vmatprep.subr.mxu0 %v32570_v6  ;;  %30865 = vmatprep.subr.mxu1 %v32642_v38 }
0x1359   : > { %30839 = vmatpush3.msra.mxu0 %v32570_v6  ;;  %30866 = vmatpush3.msra.mxu1 %v32642_v38  ;;  %v36629_v2 = vsub.f32 %v24401_v49, %v36615_v47  ;;  %v39327_v49 = vld [vmem:[#allocation47_spill] sm:$0xff] }
0x135a   : > { %30840 = vmatprep.subr.mxu0 %v32580_v13  ;;  %30867 = vmatprep.subr.mxu1 %v38709_v40 }
0x135b   : > { %30841 = vmatpush3.msra.mxu0 %v32580_v13  ;;  %30868 = vmatpush3.msra.mxu1 %v38709_v40  ;;  %v38505_v19 = vand.u32 4294901760, %v36629_v2 }
0x135c   : > { %30842 = vmatprep.subr.mxu0 %v32582_v14  ;;  %30869 = vmatprep.subr.mxu1 %v38710_v57 }
0x135d   : > { %30843 = vmatpush3.msra.mxu0 %v32582_v14  ;;  %30870 = vmatpush3.msra.mxu1 %v38710_v57  ;;  %v18372_v37 = vsub.f32 %v36629_v2, %v38505_v19  ;;  %v39332_v19 = vld [vmem:[#allocation20_spill] sm:$0xff] }
0x135e   : > { %30844 = vmatprep.subr.mxu0 %v32600_v21  ;;  %30871 = vmatprep.subr.mxu1 %v38711_v24 }
0x135f   : > { %30845 = vmatpush3.msra.mxu0 %v32600_v21  ;;  %30872 = vmatpush3.msra.mxu1 %v38711_v24  ;;  %v18373_v29 = vand.u32 4294901760, %v18372_v37  ;;  %v39329_v37 = vld [vmem:[#allocation19_spill] sm:$0xff] }
0x1360   : > { %30846 = vmatprep.subr.mxu0 %v32625_v30  ;;  %30873 = vmatprep.subr.mxu1 %v38712_v58 }
0x1361   : > { %30847 = vmatpush3.msra.mxu0 %v32625_v30  ;;  %30874 = vmatpush3.msra.mxu1 %v38712_v58 }
0x1362   : > { %30848 = vmatprep.subr.mxu0 %v32635_v35  ;;  %30875 = vmatprep.subr.mxu1 %v38713_v50 }
0x1363   : > { %30849 = vmatpush3.msra.mxu0 %v32635_v35  ;;  %30876 = vmatpush3.msra.mxu1 %v38713_v50 }
0x1364   : > { %30850 = vmatprep.subr.mxu0 %v32655_v44  ;;  %30877 = vmatprep.subr.mxu1 %v38714_v62 }
0x1365   : > { %30851 = vmatpush3.msra.mxu0 %v32655_v44  ;;  %30878 = vmatpush3.msra.mxu1 %v38714_v62 }
0x1366   : > { %30852 = vmatprep.subr.mxu0 %v32666_v48  ;;  %30879 = vmatprep.subr.mxu1 %v38715_v42 }
0x1367   : > { %30853 = vmatpush3.msra.mxu0 %v32666_v48  ;;  %30880 = vmatpush3.msra.mxu1 %v38715_v42 }
0x1368   : > { %30854 = vmatprep.subr.mxu0 %v32684_v55  ;;  %30881 = vmatprep.subr.mxu1 %v38716_v20 }
0x1369   : > { %30855 = vmatpush3.msra.mxu0 %v32684_v55  ;;  %30882 = vmatpush3.msra.mxu1 %v38716_v20 }
0x136a   : > { %30856 = vmatprep.subr.mxu0 %v32718_v4  ;;  %30883 = vmatprep.subr.mxu1 %v38717_v25 }
0x136b   : > { %30857 = vmatpush3.msra.mxu0 %v32718_v4  ;;  %30884 = vmatpush3.msra.mxu1 %v38717_v25 }
0x136c   : > { %30858 = vmatprep.subr.mxu0 %v32737_v31  ;;  %30885 = vmatprep.subr.mxu1 %v32792_v63 }
0x136d   : > { %30859 = vmatpush3.msra.mxu0 %v32737_v31  ;;  %30886 = vmatpush3.msra.mxu1 %v32792_v63 }
0x136e   : > { %30860 = vmatprep.subr.mxu0 %v32753_v43  ;;  %30887 = vmatprep.subr.mxu1 %v32809_v51 }
0x136f   : > { %30861 = vmatpush3.msra.mxu0 %v32753_v43  ;;  %30888 = vmatpush3.msra.mxu1 %v32809_v51 }
0x1370   : > { %30862 = vmatprep.mubr.f32.mxu0 %v18363_v22  ;;  %30889 = vmatprep.subr.mxu1 %v32820_v45  ;;  %v39330_v22 = vld [vmem:[#allocation17_spill] sm:$0xff] }
0x1371   : > { %30900 = vmatprep.subr.mxu0 %v32595_v18  ;;  %30863 = vmatmul.mubr.f32.vlgmr.msra.gmra.mxu0 %v18373_v29  ;;  %v39331_v29 = vld [vmem:[#allocation18_spill] sm:$0xff] }
0x1372   : > { %30890 = vmatpush3.msra.mxu1 %v32820_v45  ;;  %30901 = vmatpush3.msra.mxu0 %v32595_v18 }
0x1373   : > { %30891 = vmatprep.subr.mxu1 %v39265_v53  ;;  %30902 = vmatprep.subr.mxu0 %v39266_v0 }
0x1374   : > { %30892 = vmatpush3.msra.mxu1 %v39265_v53  ;;  %30903 = vmatpush3.msra.mxu0 %v39266_v0 }
0x1375   : > { %30893 = vmatprep.subr.mxu1 %v39313_v15  ;;  %30904 = vmatprep.subr.mxu0 %v39314_v17 }
0x1376   : > { %30894 = vmatpush3.msra.mxu1 %v39313_v15  ;;  %30905 = vmatpush3.msra.mxu0 %v39314_v17 }
0x1377   : > { %30895 = vmatprep.subr.mxu1 %v39315_v28  ;;  %30906 = vmatprep.subr.mxu0 %v39316_v52 }
0x1378   : > { %30896 = vmatpush3.msra.mxu1 %v39315_v28  ;;  %30897 = vmatprep.mubr.f32.mxu1 %v36611_v11 }
0x1379   : > { %30907 = vmatpush3.msra.mxu0 %v39316_v52  ;;  %30898 = vmatmul.mubr.f32.vlgmr.msra.gmra.mxu1 %v36615_v47 }
0x137a   : > { %30908 = vmatprep.subr.mxu0 %v39317_v36  ;;  %30935 = vmatprep.subr.mxu1 %v32578_v12 }
0x137b   : > { %30909 = vmatpush3.msra.mxu0 %v39317_v36  ;;  %30936 = vmatpush3.msra.mxu1 %v32578_v12 }
0x137c   : > { %30910 = vmatprep.subr.mxu0 %v39318_v56  ;;  %30937 = vmatprep.subr.mxu1 %v32572_v8 }
0x137d   : > { %30911 = vmatpush3.msra.mxu0 %v39318_v56  ;;  %30938 = vmatpush3.msra.mxu1 %v32572_v8 }
0x137e   : > { %30912 = vmatprep.subr.mxu0 %v39319_v23  ;;  %30939 = vmatprep.subr.mxu1 %v32574_v9 }
0x137f   : > { %30913 = vmatpush3.msra.mxu0 %v39319_v23  ;;  %30940 = vmatpush3.msra.mxu1 %v32574_v9  ;;  %v39348_v23 = vld [vmem:[#allocation117_spill] sm:$0xff] }
0x1380   : > { %30914 = vmatprep.subr.mxu0 %v39320_v27  ;;  %30941 = vmatprep.subr.mxu1 %v32576_v10 }
0x1381   : > { %30915 = vmatpush3.msra.mxu0 %v39320_v27  ;;  %30942 = vmatpush3.msra.mxu1 %v32576_v10 }
0x1382   : > { %30916 = vmatprep.subr.mxu0 %v39321_v46  ;;  %30943 = vmatprep.subr.mxu1 %v32570_v6 }
0x1383   : > { %30917 = vmatpush3.msra.mxu0 %v39321_v46  ;;  %30944 = vmatpush3.msra.mxu1 %v32570_v6 }
0x1384   : > { %30918 = vmatprep.subr.mxu0 %v39322_v33  ;;  %30945 = vmatprep.subr.mxu1 %v32580_v13 }
0x1385   : > { %30919 = vmatpush3.msra.mxu0 %v39322_v33  ;;  %30946 = vmatpush3.msra.mxu1 %v32580_v13 }
0x1386   : > { %30920 = vmatprep.subr.mxu0 %v39323_v39  ;;  %30947 = vmatprep.subr.mxu1 %v32582_v14 }
0x1387   : > { %30921 = vmatpush3.msra.mxu0 %v39323_v39  ;;  %30948 = vmatpush3.msra.mxu1 %v32582_v14  ;;  %v39347_v39 = vld [vmem:[#allocation111_spill] sm:$0xff] }
0x1388   : > { %30922 = vmatprep.subr.mxu0 %v39324_v60  ;;  %30949 = vmatprep.subr.mxu1 %v32600_v21  ;;  %32163 = vrcp.f32 %v39347_v39 }
0x1389   : > { %30923 = vmatpush3.msra.mxu0 %v39324_v60  ;;  %30950 = vmatpush3.msra.mxu1 %v32600_v21  ;;  %32165 = vrcp.f32 %v39348_v23 }
0x138a   : > { %30924 = vmatprep.subr.mxu0 %v39325_v41  ;;  %30951 = vmatprep.subr.mxu1 %v32625_v30 }
0x138b   : > { %30925 = vmatpush3.msra.mxu0 %v39325_v41  ;;  %30952 = vmatpush3.msra.mxu1 %v32625_v30 }
0x138c   : > { %30926 = vmatprep.subr.mxu0 %v39326_v16  ;;  %30953 = vmatprep.subr.mxu1 %v32635_v35 }
0x138d   : > { %30927 = vmatpush3.msra.mxu0 %v39326_v16  ;;  %30954 = vmatpush3.msra.mxu1 %v32635_v35 }
0x138e   : > { %30928 = vmatprep.subr.mxu0 %v39327_v49  ;;  %30955 = vmatprep.subr.mxu1 %v32655_v44 }
0x138f   : > { %30929 = vmatpush3.msra.mxu0 %v39327_v49  ;;  %30956 = vmatpush3.msra.mxu1 %v32655_v44 }
0x1390   : > { %30930 = vmatprep.subr.mxu0 %v39328_v3  ;;  %30957 = vmatprep.subr.mxu1 %v32666_v48 }
0x1391   : > { %30931 = vmatpush3.msra.mxu0 %v39328_v3  ;;  %30932 = vmatprep.mubr.f32.mxu0 %v36624_v34  ;;  %v39336_v34 = vld [vmem:[#allocation27_spill] sm:$0xff] }
0x1392   : > { %30958 = vmatpush3.msra.mxu1 %v32666_v48  ;;  %30933 = vmatmul.mubr.f32.vlgmr.msra.gmra.mxu0 %v36629_v2 }
0x1393   : > { %30959 = vmatprep.subr.mxu1 %v32684_v55  ;;  %30970 = vmatprep.subr.mxu0 %v39329_v37 }
0x1394   : > { %30960 = vmatpush3.msra.mxu1 %v32684_v55  ;;  %30971 = vmatpush3.msra.mxu0 %v39329_v37  ;;  %v39334_v37 = vld [vmem:[#allocation23_spill] sm:$0xff] }
0x1395   : > { %30961 = vmatprep.subr.mxu1 %v32718_v4  ;;  %30972 = vmatprep.subr.mxu0 %v39330_v22 }
0x1396   : > { %30962 = vmatpush3.msra.mxu1 %v32718_v4  ;;  %30973 = vmatpush3.msra.mxu0 %v39330_v22  ;;  %v39333_v22 = vand.u32 4294901760, %v36629_v2  ;;  %v39337_v2 = vld [vmem:[#allocation31_spill] sm:$0xff] }
0x1397   : > { %30963 = vmatprep.subr.mxu1 %v32737_v31  ;;  %30974 = vmatprep.subr.mxu0 %v39331_v29 }
0x1398   : > { %30964 = vmatpush3.msra.mxu1 %v32737_v31  ;;  %30975 = vmatpush3.msra.mxu0 %v39331_v29  ;;  %v39335_v29 = vld [vmem:[#allocation26_spill] sm:$0xff] }
0x1399   : > { %30965 = vmatprep.subr.mxu1 %v32753_v43  ;;  %30976 = vmatprep.subr.mxu0 %v39332_v19 }
0x139a   : > { %30966 = vmatpush3.msra.mxu1 %v32753_v43  ;;  %30967 = vmatprep.mubr.f32.mxu1 %v18361_v1  ;;  %v39338_v1 = vld [vmem:[#allocation34_spill] sm:$0xff] }
0x139b   : > { %30977 = vmatpush3.msra.mxu0 %v39332_v19  ;;  %30968 = vmatmul.mubr.f32.vlgmr.msra.gmra.mxu1 %v39333_v22  ;;  %v39339_v22 = vld [vmem:[#allocation37_spill] sm:$0xff] }
0x139c   : > { %30978 = vmatprep.subr.mxu0 %v39334_v37  ;;  %31005 = vmatprep.subr.mxu1 %v32578_v12 }
0x139d   : > { %30979 = vmatpush3.msra.mxu0 %v39334_v37  ;;  %31006 = vmatpush3.msra.mxu1 %v32578_v12 }
0x139e   : > { %30980 = vmatprep.subr.mxu0 %v39335_v29  ;;  %31007 = vmatprep.subr.mxu1 %v32572_v8 }
0x139f   : > { %30981 = vmatpush3.msra.mxu0 %v39335_v29  ;;  %31008 = vmatpush3.msra.mxu1 %v32572_v8 }
0x13a0   : > { %30982 = vmatprep.subr.mxu0 %v39336_v34  ;;  %31009 = vmatprep.subr.mxu1 %v32574_v9 }
0x13a1   : > { %30983 = vmatpush3.msra.mxu0 %v39336_v34  ;;  %31010 = vmatpush3.msra.mxu1 %v32574_v9  ;;  %v39340_v34 = vld [vmem:[#allocation40_spill] sm:$0xff] }
0x13a2   : > { %30984 = vmatprep.subr.mxu0 %v39337_v2  ;;  %31011 = vmatprep.subr.mxu1 %v32576_v10 }
0x13a3   : > { %30985 = vmatpush3.msra.mxu0 %v39337_v2  ;;  %31012 = vmatpush3.msra.mxu1 %v32576_v10  ;;  %v39341_v2 = vld [vmem:[#allocation43_spill] sm:$0xff] }
0x13a4   : > { %30986 = vmatprep.subr.mxu0 %v39338_v1  ;;  %31013 = vmatprep.subr.mxu1 %v32570_v6 }
0x13a5   : > { %30987 = vmatpush3.msra.mxu0 %v39338_v1  ;;  %31014 = vmatpush3.msra.mxu1 %v32570_v6  ;;  %v39342_v1 = vld [vmem:[#allocation46_spill] sm:$0xff] }
0x13a6   : > { %30988 = vmatprep.subr.mxu0 %v39339_v22  ;;  %31015 = vmatprep.subr.mxu1 %v32580_v13 }
0x13a7   : > { %30989 = vmatpush3.msra.mxu0 %v39339_v22  ;;  %31016 = vmatpush3.msra.mxu1 %v32580_v13  ;;  %v39343_v22 = vld [vmem:[#allocation49_spill] sm:$0xff] }
0x13a8   : > { %30990 = vmatprep.subr.mxu0 %v39340_v34  ;;  %31017 = vmatprep.subr.mxu1 %v32582_v14 }
0x13a9   : > { %30991 = vmatpush3.msra.mxu0 %v39340_v34  ;;  %31018 = vmatpush3.msra.mxu1 %v32582_v14  ;;  %v39344_v34 = vld [vmem:[#allocation51_spill] sm:$0xff] }
0x13aa   : > { %30992 = vmatprep.subr.mxu0 %v39341_v2  ;;  %31019 = vmatprep.subr.mxu1 %v32600_v21 }
0x13ab   : > { %30993 = vmatpush3.msra.mxu0 %v39341_v2  ;;  %31020 = vmatpush3.msra.mxu1 %v32600_v21  ;;  %v39345_v2 = vld [vmem:[#allocation52_spill] sm:$0xff] }
0x13ac   : > { %30994 = vmatprep.subr.mxu0 %v39342_v1  ;;  %31021 = vmatprep.subr.mxu1 %v32625_v30 }
0x13ad   : > { %30995 = vmatpush3.msra.mxu0 %v39342_v1  ;;  %31022 = vmatpush3.msra.mxu1 %v32625_v30 }
0x13ae   : > { %30996 = vmatprep.subr.mxu0 %v39343_v22  ;;  %31023 = vmatprep.subr.mxu1 %v32635_v35 }
0x13af   : > { %30997 = vmatpush3.msra.mxu0 %v39343_v22  ;;  %31024 = vmatpush3.msra.mxu1 %v32635_v35 }
0x13b0   : > { %30998 = vmatprep.subr.mxu0 %v39344_v34  ;;  %31025 = vmatprep.subr.mxu1 %v32655_v44 }
0x13b1   : > { %30999 = vmatpush3.msra.mxu0 %v39344_v34  ;;  %31026 = vmatpush3.msra.mxu1 %v32655_v44  ;;  %v39346_v34 = vld [vmem:[#allocation56_spill] sm:$0xff] }
0x13b2   : > { %31000 = vmatprep.subr.mxu0 %v39345_v2  ;;  %31027 = vmatprep.subr.mxu1 %v32666_v48 }
0x13b3   : > { %31001 = vmatpush3.msra.mxu0 %v39345_v2  ;;  %31002 = vmatprep.mubr.f32.mxu0 %v36611_v11 }
0x13b4   : > { %31028 = vmatpush3.msra.mxu1 %v32666_v48  ;;  %31003 = vmatmul.mubr.f32.vlgmr.msra.gmra.mxu0 %v36615_v47 }
0x13b5   : > { %31029 = vmatprep.subr.mxu1 %v32684_v55  ;;  %31037 = vmatprep.mubr.f32.mxu1 %v36611_v11 }
0x13b6   : > { %31030 = vmatpush3.msra.mxu1 %v32684_v55  ;;  %31044 = vmatprep.mubr.f32.mxu0 %v39346_v34 }
0x13b7   : > { %31031 = vmatprep.subr.mxu1 %v32718_v4 }
0x13b8   : > { %31032 = vmatpush3.msra.mxu1 %v32718_v4 }
0x13b9   : > { %31033 = vmatprep.subr.mxu1 %v32737_v31 }
0x13ba   : > { %31034 = vmatpush3.msra.mxu1 %v32737_v31 }
0x13bb   : > { %31035 = vmatprep.subr.mxu1 %v32753_v43 }
0x13bc   : > { %31036 = vmatpush3.msra.mxu1 %v32753_v43 }
0x13bd   : > { %31038 = vmatmul.mubr.f32.vlgmr.msra.gmra.mxu1 %v36615_v47 }
0x13be   : > { %31051 = vmatprep.mubr.f32.mxu1 %v32986_v61 }
0x1404   : > { %v30794_v11 = vpop.f32.mrf.mxu0 }
0x1406   : > { %v17797_v2 = vpop.f32.mrf.mxu0 }
0x1409   : > { %v30808_v22 = vpop.f32.mrf.mxu0 }
0x140b   : > { %v17970_v1 = vpop.f32.mrf.mxu0 }
0x140c   : > { %v30801_v34 = vpop.f32.mrf.mxu1 }
0x140d   : > { %v17895_v29 = vadd.f32 %v30801_v34, %v30794_v11  ;;  %v39349_v34 = vld [vmem:[#allocation112_spill] sm:$0xff] }
0x140e   : > { %v17888_v37 = vpop.f32.mrf.mxu1  ;;  %v18239_v11 = vmul.f32 2.0, %v39349_v34 }
0x140f   : > { %v17978_v19 = vadd.f32 %v30808_v22, %v17895_v29  ;;  %v17889_v3 = vadd.f32 %v17888_v37, %v17797_v2  ;;  %v30822_v49 = vpop.f32.mrf.mxu0 }
0x1411   : > { %v17971_v16 = vadd.f32 %v17970_v1, %v17889_v3  ;;  %v18137_v46 = vpop.f32.mrf.mxu0  ;;  %v39350_v3 = vld [vmem:[#allocation115_spill] sm:$0xff] }
0x1412   : > { %v30815_v41 = vpop.f32.mrf.mxu1  ;;  %v18238_v2 = vmul.f32 2.0, %v39350_v3 }
0x1413   : > { %v18061_v60 = vadd.f32 %v30815_v41, %v17978_v19  ;;  %v18241_v41 = vadd.f32 0.0001, %v18239_v11 }
0x1414   : > { %v18052_v33 = vpop.f32.mrf.mxu1 }
0x1415   : > { %v18144_v47 = vadd.f32 %v30822_v49, %v18061_v60  ;;  %v18053_v27 = vadd.f32 %v18052_v33, %v17971_v16  ;;  %v18240_v33 = vadd.f32 0.0001, %v18238_v2 }
0x1417   : > { %v18138_v56 = vadd.f32 %v18137_v46, %v18053_v27  ;;  %v30829_v36 = vpop.f32.mrf.mxu1  ;;  %v32164_v27 = vpop.eup %32163 }
0x1418   : > { %v18223_v52 = vadd.f32 %v30829_v36, %v18144_v47  ;;  %v32166_v49 = vpop.eup %32165 }
0x1419   : > { %v18216_v28 = vpop.f32.mrf.mxu1 }
0x141a   : > { %v18237_v37 = vsub.f32 %v18223_v52, %v39349_v34  ;;  %v18217_v29 = vadd.f32 %v18216_v28, %v18138_v56  ;;  %v39352_v34 = vld [vmem:[#allocation91_spill] sm:$0xff] }
0x141c   : > { %v18243_v19 = vmul.f32 2.0, %v18237_v37  ;;  %v18236_v39 = vsub.f32 %v18217_v29, %v39350_v3 }
0x141e   : > { %v18245_v1 = vadd.f32 0.0009, %v18243_v19  ;;  %v18242_v60 = vmul.f32 2.0, %v18236_v39 }
0x1420   : > { %v18247_v16 = vmul.f32 %v18245_v1, %v18241_v41  ;;  %v18244_v23 = vadd.f32 0.0009, %v18242_v60 }
0x1422   : > { %v18261_v46 = vmul.f32 %v32164_v27, %v18247_v16  ;;  %v18246_v36 = vmul.f32 %v18244_v23, %v18240_v33 }
0x1424   : > { %v36823_v22 = vmul.f32 %v32166_v49, %v18246_v36  ;;  %v18263_v47 = vsub.f32 1.0, %v18261_v46 }
0x1426   : > { %39351 = vst [vmem:[#allocation109_spill] sm:$0xff] %v36823_v22  ;;  %v18265_v52 = vmul.f32 0.5, %v18263_v47 }
0x1428   : > { %v18267_v28 = vmax.f32 %v18265_v52, 0.0 }
0x142a   : > { %v18269_v56 = vmin.f32 %v18267_v28, 1.0 }
0x142c   : > { %v36826_v37 = vadd.f32 %v18269_v56, %v39352_v34 }
0x142e   : > { %39353 = vst [vmem:[#allocation114_spill] sm:$0xff] %v36826_v37 }
0x1431   : > { %v30864_v29 = vpop.f32.mrf.mxu0 }
0x1433   : > { %v18365_v11 = vpop.f32.mrf.mxu0 }
0x1439   : > { %v30899_v3 = vpop.f32.mrf.mxu1 }
0x143a   : > { %v18533_v1 = vadd.f32 %v30899_v3, %v30864_v29 }
0x143b   : > { %v18526_v2 = vpop.f32.mrf.mxu1 }
0x143c   : > { %v18527_v33 = vadd.f32 %v18526_v2, %v18365_v11 }
0x1452   : > { %v30934_v19 = vpop.f32.mrf.mxu0 }
0x1453   : > { %v18644_v16 = vadd.f32 %v30934_v19, %v18533_v1 }
0x1454   : > { %v18636_v39 = vpop.f32.mrf.mxu0 }
0x1455   : > { %v18637_v27 = vadd.f32 %v18636_v39, %v18527_v33 }
0x145b   : > { %v30969_v41 = vpop.f32.mrf.mxu1 }
0x145c   : > { %v18741_v46 = vadd.f32 %v30969_v41, %v18644_v16 }
0x145d   : > { %v18732_v23 = vpop.f32.mrf.mxu1 }
0x145e   : > { %v18733_v49 = vadd.f32 %v18732_v23, %v18637_v27 }
0x1474   : > { %v31004_v60 = vpop.f32.mrf.mxu0 }
0x1475   : > { %v18866_v47 = vadd.f32 %v31004_v60, %v18741_v46 }
0x1476   : > { %v18859_v36 = vpop.f32.mrf.mxu0 }
0x1477   : > { %v18860_v28 = vadd.f32 %v18859_v36, %v18733_v49  ;;  %v39354_v49 = vld [vmem:[#allocation54_spill] sm:$0xff] }
0x147d   : > { %v31039_v52 = vpop.f32.mrf.mxu1 }
0x147e   : > { %v18959_v56 = vadd.f32 %v31039_v52, %v18866_v47  ;;  %v39355_v47 = vld [vmem:[#allocation14_spill] sm:$0xff]  ;;  %v39356_v52 = vld [vmem:[#allocation55_spill] sm:$0xff] }
0x147f   : > { %v18952_v34 = vpop.f32.mrf.mxu1 }
0x1480   : > { %v18991_v37 = vand.u32 4294901760, %v18959_v56  ;;  %v18953_v22 = vadd.f32 %v18952_v34, %v18860_v28  ;;  %v39357_v28 = vld [vmem:[#allocation15_spill] sm:$0xff]  ;;  %v39359_v34 = vld [vmem:[#allocation21_spill] sm:$0xff] }
0x1482   : > { %v19079_v17 = vsub.f32 %v18959_v56, %v18991_v37  ;;  %v18994_v15 = vand.u32 4294901760, %v18953_v22  ;;  %31040 = vmatprep.subr.mxu0 %v18991_v37  ;;  %v39358_v56 = vld [vmem:[#allocation16_spill] sm:$0xff] }
0x1483   : > { %31041 = vmatpush3.msra.mxu0 %v18991_v37 }
0x1484   : > { %v19086_v29 = vsub.f32 %v18953_v22, %v18994_v15  ;;  %31042 = vmatprep.subr.mxu0 %v18994_v15  ;;  %v19080_v11 = vand.u32 4294901760, %v19079_v17 }
0x1485   : > { %31043 = vmatpush3.msra.mxu0 %v18994_v15 }
0x1486   : > { %31054 = vmatprep.subr.mxu0 %v19079_v17  ;;  %31045 = vmatmul.mubr.f32.vlgmr.msra.gmra.mxu0 %v33010_v5  ;;  %v19081_v3 = vsub.f32 %v19079_v17, %v19080_v11  ;;  %v19087_v19 = vand.u32 4294901760, %v19086_v29 }
0x1487   : > { %31055 = vmatpush3.msra.mxu0 %v19079_v17  ;;  %31058 = vmatprep.mubr.f32.mxu0 %v32989_v7  ;;  %v24402_v17 = vld [vmem:[%s32556_s28 + $0x30] sm:$0xff] }
0x1488   : > { %31056 = vmatprep.subr.mxu0 %v19086_v29  ;;  %v19082_v2 = vand.u32 4294901760, %v19081_v3  ;;  %v19088_v39 = vsub.f32 %v19086_v29, %v19087_v19  ;;  %v36858_v22 = vand.u32 4294901760, %v24402_v17  ;;  %v39362_v3 = vld [vmem:[#allocation29_spill] sm:$0xff] }
0x1489   : > { %31057 = vmatpush3.msra.mxu0 %v19086_v29  ;;  %v39360_v29 = vld [vmem:[#allocation22_spill] sm:$0xff] }
0x148a   : > { %31047 = vmatprep.subr.mxu1 %v19082_v2  ;;  %31068 = vmatprep.subr.mxu0 %v19080_v11  ;;  %v19089_v41 = vand.u32 4294901760, %v19088_v39  ;;  %v36871_v1 = vsub.f32 %v24402_v17, %v36858_v22  ;;  %v39365_v39 = vld [vmem:[#allocation38_spill] sm:$0xff]  ;;  %v39367_v17 = vld [vmem:[#allocation44_spill] sm:$0xff] }
0x148b   : > { %31048 = vmatpush3.msra.mxu1 %v19082_v2  ;;  %31059 = vmatmul.mubr.f32.vlgmr.msra.gmra.mxu0 %v33003_v59  ;;  %v39364_v2 = vld [vmem:[#allocation35_spill] sm:$0xff] }
0x148c   : > { %31069 = vmatpush3.msra.mxu0 %v19080_v11  ;;  %31049 = vmatprep.subr.mxu1 %v19089_v41  ;;  %v19547_v33 = vand.u32 4294901760, %v36871_v1  ;;  %v39361_v11 = vld [vmem:[#allocation24_spill] sm:$0xff] }
0x148d   : > { %31070 = vmatprep.subr.mxu0 %v19087_v19  ;;  %31050 = vmatpush3.msra.mxu1 %v19089_v41  ;;  %v39366_v41 = vld [vmem:[#allocation41_spill] sm:$0xff] }
0x148e   : > { %31071 = vmatpush3.msra.mxu0 %v19087_v19  ;;  %31052 = vmatmul.mubr.f32.vlgmr.msra.gmra.mxu1 %v33000_v32  ;;  %v19548_v23 = vsub.f32 %v36871_v1, %v19547_v33  ;;  %v39363_v19 = vld [vmem:[#allocation32_spill] sm:$0xff] }
0x148f   : > { %31061 = vmatprep.subr.mxu1 %v18991_v37  ;;  %31072 = vmatprep.mubr.f32.mxu0 %v32986_v61 }
0x1490   : > { %31082 = vmatprep.subr.mxu0 %v32578_v12  ;;  %31062 = vmatpush3.msra.mxu1 %v18991_v37  ;;  %v19549_v46 = vand.u32 4294901760, %v19548_v23  ;;  %v39369_v23 = vld [vmem:[#allocation50_spill] sm:$0xff] }
0x1491   : > { %31073 = vmatmul.mubr.f32.vlgmr.msra.gmra.mxu0 %v33000_v32  ;;  %31063 = vmatprep.subr.mxu1 %v18994_v15 }
0x1492   : > { %31083 = vmatpush3.msra.mxu0 %v32578_v12  ;;  %31064 = vmatpush3.msra.mxu1 %v18994_v15 }
0x1493   : > { %31084 = vmatprep.subr.mxu0 %v32572_v8  ;;  %31065 = vmatprep.mubr.f32.mxu1 %v32993_v54 }
0x1494   : > { %31085 = vmatpush3.msra.mxu0 %v32572_v8  ;;  %31066 = vmatmul.mubr.f32.vlgmr.msra.gmra.mxu1 %v33006_v26 }
0x1495   : > { %31075 = vmatprep.subr.mxu1 %v18991_v37  ;;  %31086 = vmatprep.subr.mxu0 %v32574_v9 }
0x1496   : > { %31076 = vmatpush3.msra.mxu1 %v18991_v37  ;;  %31087 = vmatpush3.msra.mxu0 %v32574_v9 }
0x1497   : > { %31077 = vmatprep.subr.mxu1 %v18994_v15  ;;  %31088 = vmatprep.subr.mxu0 %v32576_v10 }
0x1498   : > { %31078 = vmatpush3.msra.mxu1 %v18994_v15  ;;  %31079 = vmatprep.mubr.f32.mxu1 %v32986_v61  ;;  %v24403_v15 = vld [vmem:[%s32556_s28 + $0x38] sm:$0xff] }
0x1499   : > { %31089 = vmatpush3.msra.mxu0 %v32576_v10  ;;  %31080 = vmatmul.mubr.f32.vlgmr.msra.gmra.mxu1 %v33000_v32  ;;  %v36862_v37 = vand.u32 4294901760, %v24403_v15 }
0x149a   : > { %31090 = vmatprep.subr.mxu0 %v32570_v6  ;;  %31117 = vmatprep.subr.mxu1 %v32642_v38 }
0x149b   : > { %31091 = vmatpush3.msra.mxu0 %v32570_v6  ;;  %31118 = vmatpush3.msra.mxu1 %v32642_v38  ;;  %v36876_v60 = vsub.f32 %v24403_v15, %v36862_v37  ;;  %v39368_v15 = vld [vmem:[#allocation47_spill] sm:$0xff] }
0x149c   : > { %31092 = vmatprep.subr.mxu0 %v32580_v13  ;;  %31119 = vmatprep.subr.mxu1 %v38709_v40 }
0x149d   : > { %31093 = vmatpush3.msra.mxu0 %v32580_v13  ;;  %31120 = vmatpush3.msra.mxu1 %v38709_v40  ;;  %v38538_v16 = vand.u32 4294901760, %v36876_v60 }
0x149e   : > { %31094 = vmatprep.subr.mxu0 %v32582_v14  ;;  %31121 = vmatprep.subr.mxu1 %v38710_v57 }
0x149f   : > { %31095 = vmatpush3.msra.mxu0 %v32582_v14  ;;  %31122 = vmatpush3.msra.mxu1 %v38710_v57  ;;  %v19558_v27 = vsub.f32 %v36876_v60, %v38538_v16  ;;  %v39373_v16 = vld [vmem:[#allocation20_spill] sm:$0xff] }
0x14a0   : > { %31096 = vmatprep.subr.mxu0 %v32600_v21  ;;  %31123 = vmatprep.subr.mxu1 %v38711_v24 }
0x14a1   : > { %31097 = vmatpush3.msra.mxu0 %v32600_v21  ;;  %31124 = vmatpush3.msra.mxu1 %v38711_v24  ;;  %v19559_v36 = vand.u32 4294901760, %v19558_v27  ;;  %v39370_v27 = vld [vmem:[#allocation19_spill] sm:$0xff] }
0x14a2   : > { %31098 = vmatprep.subr.mxu0 %v32625_v30  ;;  %31125 = vmatprep.subr.mxu1 %v38712_v58 }
0x14a3   : > { %31099 = vmatpush3.msra.mxu0 %v32625_v30  ;;  %31126 = vmatpush3.msra.mxu1 %v38712_v58 }
0x14a4   : > { %31100 = vmatprep.subr.mxu0 %v32635_v35  ;;  %31127 = vmatprep.subr.mxu1 %v38713_v50 }
0x14a5   : > { %31101 = vmatpush3.msra.mxu0 %v32635_v35  ;;  %31128 = vmatpush3.msra.mxu1 %v38713_v50 }
0x14a6   : > { %31102 = vmatprep.subr.mxu0 %v32655_v44  ;;  %31129 = vmatprep.subr.mxu1 %v38714_v62 }
0x14a7   : > { %31103 = vmatpush3.msra.mxu0 %v32655_v44  ;;  %31130 = vmatpush3.msra.mxu1 %v38714_v62 }
0x14a8   : > { %31104 = vmatprep.subr.mxu0 %v32666_v48  ;;  %31131 = vmatprep.subr.mxu1 %v38715_v42 }
0x14a9   : > { %31105 = vmatpush3.msra.mxu0 %v32666_v48  ;;  %31132 = vmatpush3.msra.mxu1 %v38715_v42 }
0x14aa   : > { %31106 = vmatprep.subr.mxu0 %v32684_v55  ;;  %31133 = vmatprep.subr.mxu1 %v38716_v20 }
0x14ab   : > { %31107 = vmatpush3.msra.mxu0 %v32684_v55  ;;  %31134 = vmatpush3.msra.mxu1 %v38716_v20 }
0x14ac   : > { %31108 = vmatprep.subr.mxu0 %v32718_v4  ;;  %31135 = vmatprep.subr.mxu1 %v38717_v25 }
0x14ad   : > { %31109 = vmatpush3.msra.mxu0 %v32718_v4  ;;  %31136 = vmatpush3.msra.mxu1 %v38717_v25 }
0x14ae   : > { %31110 = vmatprep.subr.mxu0 %v32737_v31  ;;  %31137 = vmatprep.subr.mxu1 %v32792_v63 }
0x14af   : > { %31111 = vmatpush3.msra.mxu0 %v32737_v31  ;;  %31138 = vmatpush3.msra.mxu1 %v32792_v63 }
0x14b0   : > { %31112 = vmatprep.subr.mxu0 %v32753_v43  ;;  %31139 = vmatprep.subr.mxu1 %v32809_v51 }
0x14b1   : > { %31113 = vmatpush3.msra.mxu0 %v32753_v43  ;;  %31140 = vmatpush3.msra.mxu1 %v32809_v51 }
0x14b2   : > { %31114 = vmatprep.mubr.f32.mxu0 %v19549_v46  ;;  %31141 = vmatprep.subr.mxu1 %v32820_v45  ;;  %v39371_v46 = vld [vmem:[#allocation17_spill] sm:$0xff] }
0x14b3   : > { %31152 = vmatprep.subr.mxu0 %v32595_v18  ;;  %31115 = vmatmul.mubr.f32.vlgmr.msra.gmra.mxu0 %v19559_v36  ;;  %v39372_v36 = vld [vmem:[#allocation18_spill] sm:$0xff] }
0x14b4   : > { %31142 = vmatpush3.msra.mxu1 %v32820_v45  ;;  %31153 = vmatpush3.msra.mxu0 %v32595_v18 }
0x14b5   : > { %31143 = vmatprep.subr.mxu1 %v39265_v53  ;;  %31154 = vmatprep.subr.mxu0 %v39266_v0 }
0x14b6   : > { %31144 = vmatpush3.msra.mxu1 %v39265_v53  ;;  %31155 = vmatpush3.msra.mxu0 %v39266_v0 }
0x14b7   : > { %31145 = vmatprep.subr.mxu1 %v39354_v49  ;;  %31156 = vmatprep.subr.mxu0 %v39355_v47 }
0x14b8   : > { %31146 = vmatpush3.msra.mxu1 %v39354_v49  ;;  %31157 = vmatpush3.msra.mxu0 %v39355_v47 }
0x14b9   : > { %31147 = vmatprep.subr.mxu1 %v39356_v52  ;;  %31158 = vmatprep.subr.mxu0 %v39357_v28 }
0x14ba   : > { %31148 = vmatpush3.msra.mxu1 %v39356_v52  ;;  %31149 = vmatprep.mubr.f32.mxu1 %v36858_v22 }
0x14bb   : > { %31159 = vmatpush3.msra.mxu0 %v39357_v28  ;;  %31150 = vmatmul.mubr.f32.vlgmr.msra.gmra.mxu1 %v36862_v37 }
0x14bc   : > { %31160 = vmatprep.subr.mxu0 %v39358_v56  ;;  %31187 = vmatprep.subr.mxu1 %v32578_v12 }
0x14bd   : > { %31161 = vmatpush3.msra.mxu0 %v39358_v56  ;;  %31188 = vmatpush3.msra.mxu1 %v32578_v12 }
0x14be   : > { %31162 = vmatprep.subr.mxu0 %v39359_v34  ;;  %31189 = vmatprep.subr.mxu1 %v32572_v8 }
0x14bf   : > { %31163 = vmatpush3.msra.mxu0 %v39359_v34  ;;  %31190 = vmatpush3.msra.mxu1 %v32572_v8 }
0x14c0   : > { %31164 = vmatprep.subr.mxu0 %v39360_v29  ;;  %31191 = vmatprep.subr.mxu1 %v32574_v9 }
0x14c1   : > { %31165 = vmatpush3.msra.mxu0 %v39360_v29  ;;  %31192 = vmatpush3.msra.mxu1 %v32574_v9 }
0x14c2   : > { %31166 = vmatprep.subr.mxu0 %v39361_v11  ;;  %31193 = vmatprep.subr.mxu1 %v32576_v10 }
0x14c3   : > { %31167 = vmatpush3.msra.mxu0 %v39361_v11  ;;  %31194 = vmatpush3.msra.mxu1 %v32576_v10 }
0x14c4   : > { %31168 = vmatprep.subr.mxu0 %v39362_v3  ;;  %31195 = vmatprep.subr.mxu1 %v32570_v6 }
0x14c5   : > { %31169 = vmatpush3.msra.mxu0 %v39362_v3  ;;  %31196 = vmatpush3.msra.mxu1 %v32570_v6 }
0x14c6   : > { %31170 = vmatprep.subr.mxu0 %v39363_v19  ;;  %31197 = vmatprep.subr.mxu1 %v32580_v13 }
0x14c7   : > { %31171 = vmatpush3.msra.mxu0 %v39363_v19  ;;  %31198 = vmatpush3.msra.mxu1 %v32580_v13 }
0x14c8   : > { %31172 = vmatprep.subr.mxu0 %v39364_v2  ;;  %31199 = vmatprep.subr.mxu1 %v32582_v14 }
0x14c9   : > { %31173 = vmatpush3.msra.mxu0 %v39364_v2  ;;  %31200 = vmatpush3.msra.mxu1 %v32582_v14 }
0x14ca   : > { %31174 = vmatprep.subr.mxu0 %v39365_v39  ;;  %31201 = vmatprep.subr.mxu1 %v32600_v21 }
0x14cb   : > { %31175 = vmatpush3.msra.mxu0 %v39365_v39  ;;  %31202 = vmatpush3.msra.mxu1 %v32600_v21 }
0x14cc   : > { %31176 = vmatprep.subr.mxu0 %v39366_v41  ;;  %31203 = vmatprep.subr.mxu1 %v32625_v30 }
0x14cd   : > { %31177 = vmatpush3.msra.mxu0 %v39366_v41  ;;  %31204 = vmatpush3.msra.mxu1 %v32625_v30 }
0x14ce   : > { %31178 = vmatprep.subr.mxu0 %v39367_v17  ;;  %31205 = vmatprep.subr.mxu1 %v32635_v35 }
0x14cf   : > { %31179 = vmatpush3.msra.mxu0 %v39367_v17  ;;  %31206 = vmatpush3.msra.mxu1 %v32635_v35 }
0x14d0   : > { %31180 = vmatprep.subr.mxu0 %v39368_v15  ;;  %31207 = vmatprep.subr.mxu1 %v32655_v44 }
0x14d1   : > { %31181 = vmatpush3.msra.mxu0 %v39368_v15  ;;  %31208 = vmatpush3.msra.mxu1 %v32655_v44 }
0x14d2   : > { %31182 = vmatprep.subr.mxu0 %v39369_v23  ;;  %31209 = vmatprep.subr.mxu1 %v32666_v48 }
0x14d3   : > { %31183 = vmatpush3.msra.mxu0 %v39369_v23  ;;  %31184 = vmatprep.mubr.f32.mxu0 %v36871_v1  ;;  %v39377_v1 = vld [vmem:[#allocation27_spill] sm:$0xff] }
0x14d4   : > { %31210 = vmatpush3.msra.mxu1 %v32666_v48  ;;  %31185 = vmatmul.mubr.f32.vlgmr.msra.gmra.mxu0 %v36876_v60 }
0x14d5   : > { %31211 = vmatprep.subr.mxu1 %v32684_v55  ;;  %31222 = vmatprep.subr.mxu0 %v39370_v27 }
0x14d6   : > { %31212 = vmatpush3.msra.mxu1 %v32684_v55  ;;  %31223 = vmatpush3.msra.mxu0 %v39370_v27  ;;  %v39375_v27 = vld [vmem:[#allocation23_spill] sm:$0xff] }
0x14d7   : > { %31213 = vmatprep.subr.mxu1 %v32718_v4  ;;  %31224 = vmatprep.subr.mxu0 %v39371_v46 }
0x14d8   : > { %31214 = vmatpush3.msra.mxu1 %v32718_v4  ;;  %31225 = vmatpush3.msra.mxu0 %v39371_v46  ;;  %v39374_v46 = vand.u32 4294901760, %v36876_v60  ;;  %v39378_v60 = vld [vmem:[#allocation31_spill] sm:$0xff] }
0x14d9   : > { %31215 = vmatprep.subr.mxu1 %v32737_v31  ;;  %31226 = vmatprep.subr.mxu0 %v39372_v36 }
0x14da   : > { %31216 = vmatpush3.msra.mxu1 %v32737_v31  ;;  %31227 = vmatpush3.msra.mxu0 %v39372_v36  ;;  %v39376_v36 = vld [vmem:[#allocation26_spill] sm:$0xff] }
0x14db   : > { %31217 = vmatprep.subr.mxu1 %v32753_v43  ;;  %31228 = vmatprep.subr.mxu0 %v39373_v16 }
0x14dc   : > { %31218 = vmatpush3.msra.mxu1 %v32753_v43  ;;  %31219 = vmatprep.mubr.f32.mxu1 %v19547_v33  ;;  %v39379_v33 = vld [vmem:[#allocation34_spill] sm:$0xff] }
0x14dd   : > { %31229 = vmatpush3.msra.mxu0 %v39373_v16  ;;  %31220 = vmatmul.mubr.f32.vlgmr.msra.gmra.mxu1 %v39374_v46  ;;  %v39380_v46 = vld [vmem:[#allocation37_spill] sm:$0xff] }
0x14de   : > { %31230 = vmatprep.subr.mxu0 %v39375_v27  ;;  %31257 = vmatprep.subr.mxu1 %v32578_v12 }
0x14df   : > { %31231 = vmatpush3.msra.mxu0 %v39375_v27  ;;  %31258 = vmatpush3.msra.mxu1 %v32578_v12 }
0x14e0   : > { %31232 = vmatprep.subr.mxu0 %v39376_v36  ;;  %31259 = vmatprep.subr.mxu1 %v32572_v8 }
0x14e1   : > { %31233 = vmatpush3.msra.mxu0 %v39376_v36  ;;  %31260 = vmatpush3.msra.mxu1 %v32572_v8 }
0x14e2   : > { %31234 = vmatprep.subr.mxu0 %v39377_v1  ;;  %31261 = vmatprep.subr.mxu1 %v32574_v9 }
0x14e3   : > { %31235 = vmatpush3.msra.mxu0 %v39377_v1  ;;  %31262 = vmatpush3.msra.mxu1 %v32574_v9  ;;  %v39381_v1 = vld [vmem:[#allocation40_spill] sm:$0xff] }
0x14e4   : > { %31236 = vmatprep.subr.mxu0 %v39378_v60  ;;  %31263 = vmatprep.subr.mxu1 %v32576_v10 }
0x14e5   : > { %31237 = vmatpush3.msra.mxu0 %v39378_v60  ;;  %31264 = vmatpush3.msra.mxu1 %v32576_v10  ;;  %v39382_v60 = vld [vmem:[#allocation43_spill] sm:$0xff] }
0x14e6   : > { %31238 = vmatprep.subr.mxu0 %v39379_v33  ;;  %31265 = vmatprep.subr.mxu1 %v32570_v6 }
0x14e7   : > { %31239 = vmatpush3.msra.mxu0 %v39379_v33  ;;  %31266 = vmatpush3.msra.mxu1 %v32570_v6  ;;  %v39383_v33 = vld [vmem:[#allocation46_spill] sm:$0xff] }
0x14e8   : > { %31240 = vmatprep.subr.mxu0 %v39380_v46  ;;  %31267 = vmatprep.subr.mxu1 %v32580_v13 }
0x14e9   : > { %31241 = vmatpush3.msra.mxu0 %v39380_v46  ;;  %31268 = vmatpush3.msra.mxu1 %v32580_v13  ;;  %v39384_v46 = vld [vmem:[#allocation49_spill] sm:$0xff] }
0x14ea   : > { %31242 = vmatprep.subr.mxu0 %v39381_v1  ;;  %31269 = vmatprep.subr.mxu1 %v32582_v14 }
0x14eb   : > { %31243 = vmatpush3.msra.mxu0 %v39381_v1  ;;  %31270 = vmatpush3.msra.mxu1 %v32582_v14  ;;  %v39385_v1 = vld [vmem:[#allocation51_spill] sm:$0xff] }
0x14ec   : > { %31244 = vmatprep.subr.mxu0 %v39382_v60  ;;  %31271 = vmatprep.subr.mxu1 %v32600_v21 }
0x14ed   : > { %31245 = vmatpush3.msra.mxu0 %v39382_v60  ;;  %31272 = vmatpush3.msra.mxu1 %v32600_v21  ;;  %v39386_v60 = vld [vmem:[#allocation52_spill] sm:$0xff] }
0x14ee   : > { %31246 = vmatprep.subr.mxu0 %v39383_v33  ;;  %31273 = vmatprep.subr.mxu1 %v32625_v30 }
0x14ef   : > { %31247 = vmatpush3.msra.mxu0 %v39383_v33  ;;  %31274 = vmatpush3.msra.mxu1 %v32625_v30 }
0x14f0   : > { %31248 = vmatprep.subr.mxu0 %v39384_v46  ;;  %31275 = vmatprep.subr.mxu1 %v32635_v35 }
0x14f1   : > { %31249 = vmatpush3.msra.mxu0 %v39384_v46  ;;  %31276 = vmatpush3.msra.mxu1 %v32635_v35 }
0x14f2   : > { %31250 = vmatprep.subr.mxu0 %v39385_v1  ;;  %31277 = vmatprep.subr.mxu1 %v32655_v44 }
0x14f3   : > { %31251 = vmatpush3.msra.mxu0 %v39385_v1  ;;  %31278 = vmatpush3.msra.mxu1 %v32655_v44  ;;  %v39387_v1 = vld [vmem:[#allocation56_spill] sm:$0xff] }
0x14f4   : > { %31252 = vmatprep.subr.mxu0 %v39386_v60  ;;  %31279 = vmatprep.subr.mxu1 %v32666_v48 }
0x14f5   : > { %31253 = vmatpush3.msra.mxu0 %v39386_v60  ;;  %31254 = vmatprep.mubr.f32.mxu0 %v36858_v22 }
0x14f6   : > { %31280 = vmatpush3.msra.mxu1 %v32666_v48  ;;  %31255 = vmatmul.mubr.f32.vlgmr.msra.gmra.mxu0 %v36862_v37 }
0x14f7   : > { %31281 = vmatprep.subr.mxu1 %v32684_v55  ;;  %31289 = vmatprep.mubr.f32.mxu1 %v36858_v22 }
0x14f8   : > { %31282 = vmatpush3.msra.mxu1 %v32684_v55  ;;  %31296 = vmatprep.mubr.f32.mxu0 %v39387_v1 }
0x14f9   : > { %31283 = vmatprep.subr.mxu1 %v32718_v4 }
0x14fa   : > { %31284 = vmatpush3.msra.mxu1 %v32718_v4 }
0x14fb   : > { %31285 = vmatprep.subr.mxu1 %v32737_v31 }
0x14fc   : > { %31286 = vmatpush3.msra.mxu1 %v32737_v31 }
0x14fd   : > { %31287 = vmatprep.subr.mxu1 %v32753_v43 }
0x14fe   : > { %31288 = vmatpush3.msra.mxu1 %v32753_v43 }
0x14ff   : > { %31290 = vmatmul.mubr.f32.vlgmr.msra.gmra.mxu1 %v36862_v37 }
0x1500   : > { %31303 = vmatprep.mubr.f32.mxu1 %v32986_v61 }
0x1546   : > { %v31046_v22 = vpop.f32.mrf.mxu0 }
0x1548   : > { %v19035_v60 = vpop.f32.mrf.mxu0 }
0x154b   : > { %v31060_v46 = vpop.f32.mrf.mxu0 }
0x154d   : > { %v19208_v33 = vpop.f32.mrf.mxu0 }
0x154e   : > { %v31053_v1 = vpop.f32.mrf.mxu1 }
0x154f   : > { %v19133_v36 = vadd.f32 %v31053_v1, %v31046_v22 }
0x1550   : > { %v19126_v27 = vpop.f32.mrf.mxu1 }
0x1551   : > { %v19216_v16 = vadd.f32 %v31060_v46, %v19133_v36  ;;  %v19127_v23 = vadd.f32 %v19126_v27, %v19035_v60  ;;  %v31074_v15 = vpop.f32.mrf.mxu0 }
0x1553   : > { %v19209_v17 = vadd.f32 %v19208_v33, %v19127_v23  ;;  %v19375_v19 = vpop.f32.mrf.mxu0 }
0x1554   : > { %v31067_v41 = vpop.f32.mrf.mxu1 }
0x1555   : > { %v19299_v39 = vadd.f32 %v31067_v41, %v19216_v16 }
0x1556   : > { %v19290_v2 = vpop.f32.mrf.mxu1 }
0x1557   : > { %v19382_v3 = vadd.f32 %v31074_v15, %v19299_v39  ;;  %v19291_v11 = vadd.f32 %v19290_v2, %v19209_v17 }
0x1559   : > { %v19376_v37 = vadd.f32 %v19375_v19, %v19291_v11  ;;  %v31081_v29 = vpop.f32.mrf.mxu1 }
0x155a   : > { %v37064_v34 = vadd.f32 %v31081_v29, %v19382_v3 }
0x155b   : > { %v19454_v56 = vpop.f32.mrf.mxu1 }
0x155c   : > { %39388 = vst [vmem:[#allocation113_spill] sm:$0xff] %v37064_v34  ;;  %v37066_v28 = vadd.f32 %v19454_v56, %v19376_v37 }
0x155e   : > { %39389 = vst [vmem:[#allocation118_spill] sm:$0xff] %v37066_v28 }
0x1573   : > { %v31116_v52 = vpop.f32.mrf.mxu0 }
0x1575   : > { %v19551_v1 = vpop.f32.mrf.mxu0 }
0x157b   : > { %v31151_v22 = vpop.f32.mrf.mxu1 }
0x157c   : > { %v19719_v33 = vadd.f32 %v31151_v22, %v31116_v52 }
0x157d   : > { %v19712_v27 = vpop.f32.mrf.mxu1 }
0x157e   : > { %v19713_v41 = vadd.f32 %v19712_v27, %v19551_v1 }
0x1594   : > { %v31186_v36 = vpop.f32.mrf.mxu0 }
0x1595   : > { %v19830_v46 = vadd.f32 %v31186_v36, %v19719_v33 }
0x1596   : > { %v19822_v60 = vpop.f32.mrf.mxu0 }
0x1597   : > { %v19823_v2 = vadd.f32 %v19822_v60, %v19713_v41 }
0x159d   : > { %v31221_v23 = vpop.f32.mrf.mxu1 }
0x159e   : > { %v19927_v11 = vadd.f32 %v31221_v23, %v19830_v46 }
0x159f   : > { %v19918_v39 = vpop.f32.mrf.mxu1 }
0x15a0   : > { %v19919_v29 = vadd.f32 %v19918_v39, %v19823_v2 }
0x15b6   : > { %v31256_v16 = vpop.f32.mrf.mxu0 }
0x15b7   : > { %v20052_v3 = vadd.f32 %v31256_v16, %v19927_v11 }
0x15b8   : > { %v20045_v19 = vpop.f32.mrf.mxu0 }
0x15b9   : > { %v20046_v56 = vadd.f32 %v20045_v19, %v19919_v29 }
0x15bf   : > { %v31291_v17 = vpop.f32.mrf.mxu1 }
0x15c0   : > { %v20145_v15 = vadd.f32 %v31291_v17, %v20052_v3  ;;  %v39390_v17 = vld [vmem:[#allocation54_spill] sm:$0xff] }
0x15c1   : > { %v20138_v37 = vpop.f32.mrf.mxu1 }
0x15c2   : > { %v20177_v28 = vand.u32 4294901760, %v20145_v15  ;;  %v20139_v34 = vadd.f32 %v20138_v37, %v20046_v56  ;;  %v39391_v56 = vld [vmem:[#allocation14_spill] sm:$0xff]  ;;  %v39393_v37 = vld [vmem:[#allocation15_spill] sm:$0xff] }
0x15c4   : > { %v20265_v47 = vsub.f32 %v20145_v15, %v20177_v28  ;;  %v20180_v49 = vand.u32 4294901760, %v20139_v34  ;;  %31292 = vmatprep.subr.mxu0 %v20177_v28  ;;  %v39392_v15 = vld [vmem:[#allocation55_spill] sm:$0xff] }
0x15c5   : > { %31293 = vmatpush3.msra.mxu0 %v20177_v28 }
0x15c6   : > { %v20272_v52 = vsub.f32 %v20139_v34, %v20180_v49  ;;  %31294 = vmatprep.subr.mxu0 %v20180_v49  ;;  %v20266_v1 = vand.u32 4294901760, %v20265_v47 }
0x15c7   : > { %31295 = vmatpush3.msra.mxu0 %v20180_v49 }
0x15c8   : > { %31306 = vmatprep.subr.mxu0 %v20265_v47  ;;  %31297 = vmatmul.mubr.f32.vlgmr.msra.gmra.mxu0 %v33010_v5  ;;  %v20267_v22 = vsub.f32 %v20265_v47, %v20266_v1  ;;  %v20273_v36 = vand.u32 4294901760, %v20272_v52 }
0x15c9   : > { %31307 = vmatpush3.msra.mxu0 %v20265_v47  ;;  %31310 = vmatprep.mubr.f32.mxu0 %v32989_v7  ;;  %v32193_v47 = vld [vmem:[%s32549_s23 + $0x30] sm:$0xff] }
0x15ca   : > { %31308 = vmatprep.subr.mxu0 %v20272_v52  ;;  %v20268_v27 = vand.u32 4294901760, %v20267_v22  ;;  %v20274_v60 = vsub.f32 %v20272_v52, %v20273_v36  ;;  %v20650_v34 = vmul.f32 %v32193_v47, %v32193_v47  ;;  %v39396_v22 = vld [vmem:[#allocation22_spill] sm:$0xff] }
0x15cb   : > { %31309 = vmatpush3.msra.mxu0 %v20272_v52  ;;  %v39394_v52 = vld [vmem:[#allocation16_spill] sm:$0xff]  ;;  %v39401_v47 = vld [vmem:[#allocation38_spill] sm:$0xff] }
0x15cc   : > { %31299 = vmatprep.subr.mxu1 %v20268_v27  ;;  %31320 = vmatprep.subr.mxu0 %v20266_v1  ;;  %v20275_v23 = vand.u32 4294901760, %v20274_v60  ;;  %v39399_v60 = vld [vmem:[#allocation32_spill] sm:$0xff] }
0x15cd   : > { %31300 = vmatpush3.msra.mxu1 %v20268_v27  ;;  %31311 = vmatmul.mubr.f32.vlgmr.msra.gmra.mxu0 %v33003_v59  ;;  %v39398_v27 = vld [vmem:[#allocation29_spill] sm:$0xff] }
0x15ce   : > { %31321 = vmatpush3.msra.mxu0 %v20266_v1  ;;  %31301 = vmatprep.subr.mxu1 %v20275_v23  ;;  %v39395_v1 = vld [vmem:[#allocation21_spill] sm:$0xff] }
0x15cf   : > { %31322 = vmatprep.subr.mxu0 %v20273_v36  ;;  %31302 = vmatpush3.msra.mxu1 %v20275_v23  ;;  %v39400_v23 = vld [vmem:[#allocation35_spill] sm:$0xff] }
0x15d0   : > { %31323 = vmatpush3.msra.mxu0 %v20273_v36  ;;  %31304 = vmatmul.mubr.f32.vlgmr.msra.gmra.mxu1 %v33000_v32  ;;  %v39397_v36 = vld [vmem:[#allocation24_spill] sm:$0xff] }
0x15d1   : > { %31313 = vmatprep.subr.mxu1 %v20177_v28  ;;  %31324 = vmatprep.mubr.f32.mxu0 %v32986_v61 }
0x15d2   : > { %31334 = vmatprep.subr.mxu0 %v32578_v12  ;;  %31314 = vmatpush3.msra.mxu1 %v20177_v28 }
0x15d3   : > { %31325 = vmatmul.mubr.f32.vlgmr.msra.gmra.mxu0 %v33000_v32  ;;  %31315 = vmatprep.subr.mxu1 %v20180_v49 }
0x15d4   : > { %31335 = vmatpush3.msra.mxu0 %v32578_v12  ;;  %31316 = vmatpush3.msra.mxu1 %v20180_v49 }
0x15d5   : > { %31336 = vmatprep.subr.mxu0 %v32572_v8  ;;  %31317 = vmatprep.mubr.f32.mxu1 %v32993_v54 }
0x15d6   : > { %31337 = vmatpush3.msra.mxu0 %v32572_v8  ;;  %31318 = vmatmul.mubr.f32.vlgmr.msra.gmra.mxu1 %v33006_v26 }
0x15d7   : > { %31327 = vmatprep.subr.mxu1 %v20177_v28  ;;  %31338 = vmatprep.subr.mxu0 %v32574_v9 }
0x15d8   : > { %31328 = vmatpush3.msra.mxu1 %v20177_v28  ;;  %31339 = vmatpush3.msra.mxu0 %v32574_v9  ;;  %v32194_v28 = vld [vmem:[%s32549_s23 + $0x38] sm:$0xff] }
0x15d9   : > { %31329 = vmatprep.subr.mxu1 %v20180_v49  ;;  %31340 = vmatprep.subr.mxu0 %v32576_v10  ;;  %v20651_v33 = vmul.f32 %v32194_v28, %v32194_v28  ;;  %v39403_v28 = vld [vmem:[#allocation44_spill] sm:$0xff] }
0x15da   : > { %31330 = vmatpush3.msra.mxu1 %v20180_v49  ;;  %31331 = vmatprep.mubr.f32.mxu1 %v32986_v61  ;;  %v37098_v49 = vand.u32 4294901760, %v20650_v34 }
0x15db   : > { %31341 = vmatpush3.msra.mxu0 %v32576_v10  ;;  %31332 = vmatmul.mubr.f32.vlgmr.msra.gmra.mxu1 %v33000_v32  ;;  %v37102_v16 = vand.u32 4294901760, %v20651_v33 }
0x15dc   : > { %31342 = vmatprep.subr.mxu0 %v32570_v6  ;;  %31369 = vmatprep.subr.mxu1 %v32642_v38  ;;  %v37111_v41 = vsub.f32 %v20650_v34, %v37098_v49  ;;  %v39402_v34 = vld [vmem:[#allocation41_spill] sm:$0xff] }
0x15dd   : > { %31343 = vmatpush3.msra.mxu0 %v32570_v6  ;;  %31370 = vmatpush3.msra.mxu1 %v32642_v38  ;;  %v37116_v46 = vsub.f32 %v20651_v33, %v37102_v16  ;;  %v39404_v33 = vld [vmem:[#allocation47_spill] sm:$0xff] }
0x15de   : > { %31344 = vmatprep.subr.mxu0 %v32580_v13  ;;  %31371 = vmatprep.subr.mxu1 %v38709_v40  ;;  %v20735_v39 = vand.u32 4294901760, %v37111_v41 }
0x15df   : > { %31345 = vmatpush3.msra.mxu0 %v32580_v13  ;;  %31372 = vmatpush3.msra.mxu1 %v38709_v40  ;;  %v38573_v2 = vand.u32 4294901760, %v37116_v46 }
0x15e0   : > { %31346 = vmatprep.subr.mxu0 %v32582_v14  ;;  %31373 = vmatprep.subr.mxu1 %v38710_v57  ;;  %v20736_v11 = vsub.f32 %v37111_v41, %v20735_v39 }
0x15e1   : > { %31347 = vmatpush3.msra.mxu0 %v32582_v14  ;;  %31374 = vmatpush3.msra.mxu1 %v38710_v57  ;;  %v20746_v19 = vsub.f32 %v37116_v46, %v38573_v2  ;;  %v39409_v2 = vld [vmem:[#allocation20_spill] sm:$0xff] }
0x15e2   : > { %31348 = vmatprep.subr.mxu0 %v32600_v21  ;;  %31375 = vmatprep.subr.mxu1 %v38711_v24  ;;  %v20737_v29 = vand.u32 4294901760, %v20736_v11  ;;  %v39405_v11 = vld [vmem:[#allocation50_spill] sm:$0xff] }
0x15e3   : > { %31349 = vmatpush3.msra.mxu0 %v32600_v21  ;;  %31376 = vmatpush3.msra.mxu1 %v38711_v24  ;;  %v20747_v3 = vand.u32 4294901760, %v20746_v19  ;;  %v39406_v19 = vld [vmem:[#allocation19_spill] sm:$0xff] }
0x15e4   : > { %31350 = vmatprep.subr.mxu0 %v32625_v30  ;;  %31377 = vmatprep.subr.mxu1 %v38712_v58 }
0x15e5   : > { %31351 = vmatpush3.msra.mxu0 %v32625_v30  ;;  %31378 = vmatpush3.msra.mxu1 %v38712_v58 }
0x15e6   : > { %31352 = vmatprep.subr.mxu0 %v32635_v35  ;;  %31379 = vmatprep.subr.mxu1 %v38713_v50 }
0x15e7   : > { %31353 = vmatpush3.msra.mxu0 %v32635_v35  ;;  %31380 = vmatpush3.msra.mxu1 %v38713_v50 }
0x15e8   : > { %31354 = vmatprep.subr.mxu0 %v32655_v44  ;;  %31381 = vmatprep.subr.mxu1 %v38714_v62 }
0x15e9   : > { %31355 = vmatpush3.msra.mxu0 %v32655_v44  ;;  %31382 = vmatpush3.msra.mxu1 %v38714_v62 }
0x15ea   : > { %31356 = vmatprep.subr.mxu0 %v32666_v48  ;;  %31383 = vmatprep.subr.mxu1 %v38715_v42 }
0x15eb   : > { %31357 = vmatpush3.msra.mxu0 %v32666_v48  ;;  %31384 = vmatpush3.msra.mxu1 %v38715_v42 }
0x15ec   : > { %31358 = vmatprep.subr.mxu0 %v32684_v55  ;;  %31385 = vmatprep.subr.mxu1 %v38716_v20 }
0x15ed   : > { %31359 = vmatpush3.msra.mxu0 %v32684_v55  ;;  %31386 = vmatpush3.msra.mxu1 %v38716_v20 }
0x15ee   : > { %31360 = vmatprep.subr.mxu0 %v32718_v4  ;;  %31387 = vmatprep.subr.mxu1 %v38717_v25 }
0x15ef   : > { %31361 = vmatpush3.msra.mxu0 %v32718_v4  ;;  %31388 = vmatpush3.msra.mxu1 %v38717_v25 }
0x15f0   : > { %31362 = vmatprep.subr.mxu0 %v32737_v31  ;;  %31389 = vmatprep.subr.mxu1 %v32792_v63 }
0x15f1   : > { %31363 = vmatpush3.msra.mxu0 %v32737_v31  ;;  %31390 = vmatpush3.msra.mxu1 %v32792_v63 }
0x15f2   : > { %31364 = vmatprep.subr.mxu0 %v32753_v43  ;;  %31391 = vmatprep.subr.mxu1 %v32809_v51 }
0x15f3   : > { %31365 = vmatpush3.msra.mxu0 %v32753_v43  ;;  %31392 = vmatpush3.msra.mxu1 %v32809_v51 }
0x15f4   : > { %31366 = vmatprep.mubr.f32.mxu0 %v20737_v29  ;;  %31393 = vmatprep.subr.mxu1 %v32820_v45  ;;  %v39407_v29 = vld [vmem:[#allocation17_spill] sm:$0xff] }
0x15f5   : > { %31404 = vmatprep.subr.mxu0 %v32595_v18  ;;  %31367 = vmatmul.mubr.f32.vlgmr.msra.gmra.mxu0 %v20747_v3  ;;  %v39408_v3 = vld [vmem:[#allocation18_spill] sm:$0xff] }
0x15f6   : > { %31394 = vmatpush3.msra.mxu1 %v32820_v45  ;;  %31405 = vmatpush3.msra.mxu0 %v32595_v18 }
0x15f7   : > { %31395 = vmatprep.subr.mxu1 %v39265_v53  ;;  %31406 = vmatprep.subr.mxu0 %v39266_v0 }
0x15f8   : > { %31396 = vmatpush3.msra.mxu1 %v39265_v53  ;;  %31407 = vmatpush3.msra.mxu0 %v39266_v0 }
0x15f9   : > { %31397 = vmatprep.subr.mxu1 %v39390_v17  ;;  %31408 = vmatprep.subr.mxu0 %v39391_v56 }
0x15fa   : > { %31398 = vmatpush3.msra.mxu1 %v39390_v17  ;;  %31409 = vmatpush3.msra.mxu0 %v39391_v56 }
0x15fb   : > { %31399 = vmatprep.subr.mxu1 %v39392_v15  ;;  %31410 = vmatprep.subr.mxu0 %v39393_v37 }
0x15fc   : > { %31400 = vmatpush3.msra.mxu1 %v39392_v15  ;;  %31401 = vmatprep.mubr.f32.mxu1 %v37098_v49 }
0x15fd   : > { %31411 = vmatpush3.msra.mxu0 %v39393_v37  ;;  %31402 = vmatmul.mubr.f32.vlgmr.msra.gmra.mxu1 %v37102_v16  ;;  %v39424_v37 = vld [vmem:[#allocation113_spill] sm:$0xff] }
0x15fe   : > { %31412 = vmatprep.subr.mxu0 %v39394_v52  ;;  %31439 = vmatprep.subr.mxu1 %v32578_v12  ;;  %v37306_v15 = vmul.f32 %v39424_v37, %v39424_v37 }
0x15ff   : > { %31413 = vmatpush3.msra.mxu0 %v39394_v52  ;;  %31440 = vmatpush3.msra.mxu1 %v32578_v12 }
0x1600   : > { %31414 = vmatprep.subr.mxu0 %v39395_v1  ;;  %31441 = vmatprep.subr.mxu1 %v32572_v8  ;;  %39425 = vst [vmem:[#allocation110_spill] sm:$0xff] %v37306_v15 }
0x1601   : > { %31415 = vmatpush3.msra.mxu0 %v39395_v1  ;;  %31442 = vmatpush3.msra.mxu1 %v32572_v8 }
0x1602   : > { %31416 = vmatprep.subr.mxu0 %v39396_v22  ;;  %31443 = vmatprep.subr.mxu1 %v32574_v9 }
0x1603   : > { %31417 = vmatpush3.msra.mxu0 %v39396_v22  ;;  %31444 = vmatpush3.msra.mxu1 %v32574_v9 }
0x1604   : > { %31418 = vmatprep.subr.mxu0 %v39397_v36  ;;  %31445 = vmatprep.subr.mxu1 %v32576_v10 }
0x1605   : > { %31419 = vmatpush3.msra.mxu0 %v39397_v36  ;;  %31446 = vmatpush3.msra.mxu1 %v32576_v10 }
0x1606   : > { %31420 = vmatprep.subr.mxu0 %v39398_v27  ;;  %31447 = vmatprep.subr.mxu1 %v32570_v6 }
0x1607   : > { %31421 = vmatpush3.msra.mxu0 %v39398_v27  ;;  %31448 = vmatpush3.msra.mxu1 %v32570_v6 }
0x1608   : > { %31422 = vmatprep.subr.mxu0 %v39399_v60  ;;  %31449 = vmatprep.subr.mxu1 %v32580_v13 }
0x1609   : > { %31423 = vmatpush3.msra.mxu0 %v39399_v60  ;;  %31450 = vmatpush3.msra.mxu1 %v32580_v13 }
0x160a   : > { %31424 = vmatprep.subr.mxu0 %v39400_v23  ;;  %31451 = vmatprep.subr.mxu1 %v32582_v14 }
0x160b   : > { %31425 = vmatpush3.msra.mxu0 %v39400_v23  ;;  %31452 = vmatpush3.msra.mxu1 %v32582_v14 }
0x160c   : > { %31426 = vmatprep.subr.mxu0 %v39401_v47  ;;  %31453 = vmatprep.subr.mxu1 %v32600_v21 }
0x160d   : > { %31427 = vmatpush3.msra.mxu0 %v39401_v47  ;;  %31454 = vmatpush3.msra.mxu1 %v32600_v21 }
0x160e   : > { %31428 = vmatprep.subr.mxu0 %v39402_v34  ;;  %31455 = vmatprep.subr.mxu1 %v32625_v30 }
0x160f   : > { %31429 = vmatpush3.msra.mxu0 %v39402_v34  ;;  %31456 = vmatpush3.msra.mxu1 %v32625_v30 }
0x1610   : > { %31430 = vmatprep.subr.mxu0 %v39403_v28  ;;  %31457 = vmatprep.subr.mxu1 %v32635_v35 }
0x1611   : > { %31431 = vmatpush3.msra.mxu0 %v39403_v28  ;;  %31458 = vmatpush3.msra.mxu1 %v32635_v35 }
0x1612   : > { %31432 = vmatprep.subr.mxu0 %v39404_v33  ;;  %31459 = vmatprep.subr.mxu1 %v32655_v44 }
0x1613   : > { %31433 = vmatpush3.msra.mxu0 %v39404_v33  ;;  %31460 = vmatpush3.msra.mxu1 %v32655_v44 }
0x1614   : > { %31434 = vmatprep.subr.mxu0 %v39405_v11  ;;  %31461 = vmatprep.subr.mxu1 %v32666_v48 }
0x1615   : > { %31435 = vmatpush3.msra.mxu0 %v39405_v11  ;;  %31436 = vmatprep.mubr.f32.mxu0 %v37111_v41  ;;  %v39413_v41 = vld [vmem:[#allocation27_spill] sm:$0xff] }
0x1616   : > { %31462 = vmatpush3.msra.mxu1 %v32666_v48  ;;  %31437 = vmatmul.mubr.f32.vlgmr.msra.gmra.mxu0 %v37116_v46 }
0x1617   : > { %31463 = vmatprep.subr.mxu1 %v32684_v55  ;;  %31474 = vmatprep.subr.mxu0 %v39406_v19 }
0x1618   : > { %31464 = vmatpush3.msra.mxu1 %v32684_v55  ;;  %31475 = vmatpush3.msra.mxu0 %v39406_v19  ;;  %v39411_v19 = vld [vmem:[#allocation23_spill] sm:$0xff] }
0x1619   : > { %31465 = vmatprep.subr.mxu1 %v32718_v4  ;;  %31476 = vmatprep.subr.mxu0 %v39407_v29 }
0x161a   : > { %31466 = vmatpush3.msra.mxu1 %v32718_v4  ;;  %31477 = vmatpush3.msra.mxu0 %v39407_v29  ;;  %v39410_v29 = vand.u32 4294901760, %v37116_v46  ;;  %v39414_v46 = vld [vmem:[#allocation31_spill] sm:$0xff] }
0x161b   : > { %31467 = vmatprep.subr.mxu1 %v32737_v31  ;;  %31478 = vmatprep.subr.mxu0 %v39408_v3 }
0x161c   : > { %31468 = vmatpush3.msra.mxu1 %v32737_v31  ;;  %31479 = vmatpush3.msra.mxu0 %v39408_v3  ;;  %v39412_v3 = vld [vmem:[#allocation26_spill] sm:$0xff] }
0x161d   : > { %31469 = vmatprep.subr.mxu1 %v32753_v43  ;;  %31480 = vmatprep.subr.mxu0 %v39409_v2 }
0x161e   : > { %31470 = vmatpush3.msra.mxu1 %v32753_v43  ;;  %31471 = vmatprep.mubr.f32.mxu1 %v20735_v39  ;;  %v39415_v39 = vld [vmem:[#allocation34_spill] sm:$0xff] }
0x161f   : > { %31481 = vmatpush3.msra.mxu0 %v39409_v2  ;;  %31472 = vmatmul.mubr.f32.vlgmr.msra.gmra.mxu1 %v39410_v29  ;;  %v39416_v29 = vld [vmem:[#allocation37_spill] sm:$0xff] }
0x1620   : > { %31482 = vmatprep.subr.mxu0 %v39411_v19  ;;  %31509 = vmatprep.subr.mxu1 %v32578_v12 }
0x1621   : > { %31483 = vmatpush3.msra.mxu0 %v39411_v19  ;;  %31510 = vmatpush3.msra.mxu1 %v32578_v12 }
0x1622   : > { %31484 = vmatprep.subr.mxu0 %v39412_v3  ;;  %31511 = vmatprep.subr.mxu1 %v32572_v8 }
0x1623   : > { %31485 = vmatpush3.msra.mxu0 %v39412_v3  ;;  %31512 = vmatpush3.msra.mxu1 %v32572_v8 }
0x1624   : > { %31486 = vmatprep.subr.mxu0 %v39413_v41  ;;  %31513 = vmatprep.subr.mxu1 %v32574_v9 }
0x1625   : > { %31487 = vmatpush3.msra.mxu0 %v39413_v41  ;;  %31514 = vmatpush3.msra.mxu1 %v32574_v9  ;;  %v39417_v41 = vld [vmem:[#allocation40_spill] sm:$0xff] }
0x1626   : > { %31488 = vmatprep.subr.mxu0 %v39414_v46  ;;  %31515 = vmatprep.subr.mxu1 %v32576_v10 }
0x1627   : > { %31489 = vmatpush3.msra.mxu0 %v39414_v46  ;;  %31516 = vmatpush3.msra.mxu1 %v32576_v10  ;;  %v39418_v46 = vld [vmem:[#allocation43_spill] sm:$0xff] }
0x1628   : > { %31490 = vmatprep.subr.mxu0 %v39415_v39  ;;  %31517 = vmatprep.subr.mxu1 %v32570_v6 }
0x1629   : > { %31491 = vmatpush3.msra.mxu0 %v39415_v39  ;;  %31518 = vmatpush3.msra.mxu1 %v32570_v6  ;;  %v39419_v39 = vld [vmem:[#allocation46_spill] sm:$0xff] }
0x162a   : > { %31492 = vmatprep.subr.mxu0 %v39416_v29  ;;  %31519 = vmatprep.subr.mxu1 %v32580_v13 }
0x162b   : > { %31493 = vmatpush3.msra.mxu0 %v39416_v29  ;;  %31520 = vmatpush3.msra.mxu1 %v32580_v13  ;;  %v39420_v29 = vld [vmem:[#allocation49_spill] sm:$0xff] }
0x162c   : > { %31494 = vmatprep.subr.mxu0 %v39417_v41  ;;  %31521 = vmatprep.subr.mxu1 %v32582_v14 }
0x162d   : > { %31495 = vmatpush3.msra.mxu0 %v39417_v41  ;;  %31522 = vmatpush3.msra.mxu1 %v32582_v14  ;;  %v39421_v41 = vld [vmem:[#allocation51_spill] sm:$0xff] }
0x162e   : > { %31496 = vmatprep.subr.mxu0 %v39418_v46  ;;  %31523 = vmatprep.subr.mxu1 %v32600_v21 }
0x162f   : > { %31497 = vmatpush3.msra.mxu0 %v39418_v46  ;;  %31524 = vmatpush3.msra.mxu1 %v32600_v21  ;;  %v39422_v46 = vld [vmem:[#allocation52_spill] sm:$0xff] }
0x1630   : > { %31498 = vmatprep.subr.mxu0 %v39419_v39  ;;  %31525 = vmatprep.subr.mxu1 %v32625_v30 }
0x1631   : > { %31499 = vmatpush3.msra.mxu0 %v39419_v39  ;;  %31526 = vmatpush3.msra.mxu1 %v32625_v30 }
0x1632   : > { %31500 = vmatprep.subr.mxu0 %v39420_v29  ;;  %31527 = vmatprep.subr.mxu1 %v32635_v35 }
0x1633   : > { %31501 = vmatpush3.msra.mxu0 %v39420_v29  ;;  %31528 = vmatpush3.msra.mxu1 %v32635_v35 }
0x1634   : > { %31502 = vmatprep.subr.mxu0 %v39421_v41  ;;  %31529 = vmatprep.subr.mxu1 %v32655_v44 }
0x1635   : > { %31503 = vmatpush3.msra.mxu0 %v39421_v41  ;;  %31530 = vmatpush3.msra.mxu1 %v32655_v44  ;;  %v39423_v41 = vld [vmem:[#allocation56_spill] sm:$0xff] }
0x1636   : > { %31504 = vmatprep.subr.mxu0 %v39422_v46  ;;  %31531 = vmatprep.subr.mxu1 %v32666_v48 }
0x1637   : > { %31505 = vmatpush3.msra.mxu0 %v39422_v46  ;;  %31506 = vmatprep.mubr.f32.mxu0 %v37098_v49 }
0x1638   : > { %31532 = vmatpush3.msra.mxu1 %v32666_v48  ;;  %31507 = vmatmul.mubr.f32.vlgmr.msra.gmra.mxu0 %v37102_v16 }
0x1639   : > { %31533 = vmatprep.subr.mxu1 %v32684_v55  ;;  %31541 = vmatprep.mubr.f32.mxu1 %v37098_v49 }
0x163a   : > { %31534 = vmatpush3.msra.mxu1 %v32684_v55  ;;  %31548 = vmatprep.mubr.f32.mxu0 %v39423_v41 }
0x163b   : > { %31535 = vmatprep.subr.mxu1 %v32718_v4 }
0x163c   : > { %31536 = vmatpush3.msra.mxu1 %v32718_v4 }
0x163d   : > { %31537 = vmatprep.subr.mxu1 %v32737_v31 }
0x163e   : > { %31538 = vmatpush3.msra.mxu1 %v32737_v31 }
0x163f   : > { %31539 = vmatprep.subr.mxu1 %v32753_v43 }
0x1640   : > { %31540 = vmatpush3.msra.mxu1 %v32753_v43 }
0x1641   : > { %31542 = vmatmul.mubr.f32.vlgmr.msra.gmra.mxu1 %v37102_v16 }
0x1642   : > { %31555 = vmatprep.mubr.f32.mxu1 %v32986_v61 }
0x1688   : > { %v31298_v49 = vpop.f32.mrf.mxu0 }
0x168a   : > { %v20221_v46 = vpop.f32.mrf.mxu0 }
0x168d   : > { %v31312_v29 = vpop.f32.mrf.mxu0 }
0x168f   : > { %v20394_v39 = vpop.f32.mrf.mxu0 }
0x1690   : > { %v31305_v41 = vpop.f32.mrf.mxu1 }
0x1691   : > { %v20319_v3 = vadd.f32 %v31305_v41, %v31298_v49 }
0x1692   : > { %v20312_v19 = vpop.f32.mrf.mxu1 }
0x1693   : > { %v20402_v2 = vadd.f32 %v31312_v29, %v20319_v3  ;;  %v20313_v11 = vadd.f32 %v20312_v19, %v20221_v46  ;;  %v31326_v33 = vpop.f32.mrf.mxu0  ;;  %v39428_v3 = vld [vmem:[#allocation118_spill] sm:$0xff] }
0x1695   : > { %v20395_v28 = vadd.f32 %v20394_v39, %v20313_v11  ;;  %v20561_v60 = vpop.f32.mrf.mxu0 }
0x1696   : > { %v31319_v34 = vpop.f32.mrf.mxu1 }
0x1697   : > { %v20485_v47 = vadd.f32 %v31319_v34, %v20402_v2  ;;  %v37315_v2 = vmul.f32 %v39428_v3, %v39428_v3 }
0x1698   : > { %v20476_v23 = vpop.f32.mrf.mxu1 }
0x1699   : > { %v20568_v27 = vadd.f32 %v31326_v33, %v20485_v47  ;;  %v20477_v36 = vadd.f32 %v20476_v23, %v20395_v28  ;;  %39429 = vst [vmem:[#allocation117_spill] sm:$0xff] %v37315_v2 }
0x169b   : > { %v20562_v16 = vadd.f32 %v20561_v60, %v20477_v36  ;;  %v31333_v22 = vpop.f32.mrf.mxu1 }
0x169c   : > { %v20647_v1 = vadd.f32 %v31333_v22, %v20568_v27 }
0x169d   : > { %v20640_v52 = vpop.f32.mrf.mxu1 }
0x169e   : > { %v37308_v41 = vmul.f32 %v20647_v1, %v20647_v1  ;;  %v37311_v19 = vmul.f32 %v20647_v1, %v39424_v37  ;;  %v20641_v11 = vadd.f32 %v20640_v52, %v20562_v16 }
0x16a0   : > { %39426 = vst [vmem:[#allocation116_spill] sm:$0xff] %v37308_v41  ;;  %39427 = vst [vmem:[#allocation111_spill] sm:$0xff] %v37311_v19  ;;  %v37319_v36 = vadd.f32 %v37308_v41, %v37306_v15  ;;  %v37321_v22 = vmul.f32 %v20641_v11, %v20641_v11  ;;  %v37324_v27 = vmul.f32 %v20641_v11, %v39428_v3 }
0x16a2   : > { %39430 = vst [vmem:[#allocation112_spill] sm:$0xff] %v37319_v36  ;;  %39431 = vst [vmem:[#allocation115_spill] sm:$0xff] %v37321_v22  ;;  %v37328_v60 = vadd.f32 %v37321_v22, %v37315_v2 }
0x16a3   : > { %39432 = vst [vmem:[#allocation91_spill] sm:$0xff] %v37324_v27 }
0x16a4   : > { %39433 = vst [vmem:[#allocation113_spill] sm:$0xff] %v37328_v60 }
0x16b5   : > { %v31368_v37 = vpop.f32.mrf.mxu0 }
0x16b7   : > { %v20739_v1 = vpop.f32.mrf.mxu0 }
0x16bd   : > { %v31403_v52 = vpop.f32.mrf.mxu1 }
0x16be   : > { %v20907_v33 = vadd.f32 %v31403_v52, %v31368_v37 }
0x16bf   : > { %v20900_v47 = vpop.f32.mrf.mxu1 }
0x16c0   : > { %v20901_v39 = vadd.f32 %v20900_v47, %v20739_v1 }
0x16d6   : > { %v31438_v23 = vpop.f32.mrf.mxu0 }
0x16d7   : > { %v21018_v29 = vadd.f32 %v31438_v23, %v20907_v33 }
0x16d8   : > { %v21010_v34 = vpop.f32.mrf.mxu0 }
0x16d9   : > { %v21011_v16 = vadd.f32 %v21010_v34, %v20901_v39 }
0x16df   : > { %v31473_v28 = vpop.f32.mrf.mxu1 }
0x16e0   : > { %v21115_v19 = vadd.f32 %v31473_v28, %v21018_v29 }
0x16e1   : > { %v21106_v49 = vpop.f32.mrf.mxu1 }
0x16e2   : > { %v21107_v3 = vadd.f32 %v21106_v49, %v21011_v16  ;;  %v39434_v49 = vld [vmem:[#allocation54_spill] sm:$0xff] }
0x16e3   : > { %v39435_v16 = vld [vmem:[#allocation14_spill] sm:$0xff] }
0x16f8   : > { %v31508_v46 = vpop.f32.mrf.mxu0 }
0x16f9   : > { %v21240_v27 = vadd.f32 %v31508_v46, %v21115_v19 }
0x16fa   : > { %v21233_v11 = vpop.f32.mrf.mxu0 }
0x16fb   : > { %v21234_v22 = vadd.f32 %v21233_v11, %v21107_v3  ;;  %v39436_v11 = vld [vmem:[#allocation55_spill] sm:$0xff] }
0x16fc   : > { %v39437_v3 = vld [vmem:[#allocation15_spill] sm:$0xff] }
0x1701   : > { %v31543_v36 = vpop.f32.mrf.mxu1 }
0x1702   : > { %v21333_v60 = vadd.f32 %v31543_v36, %v21240_v27 }
0x1703   : > { %v21326_v41 = vpop.f32.mrf.mxu1 }
0x1704   : > { %v21365_v2 = vand.u32 4294901760, %v21333_v60  ;;  %v21327_v15 = vadd.f32 %v21326_v41, %v21234_v22 }
0x1706   : > { %v21453_v56 = vsub.f32 %v21333_v60, %v21365_v2  ;;  %v21368_v17 = vand.u32 4294901760, %v21327_v15  ;;  %31544 = vmatprep.subr.mxu0 %v21365_v2 }
0x1707   : > { %31545 = vmatpush3.msra.mxu0 %v21365_v2 }
0x1708   : > { %v21460_v37 = vsub.f32 %v21327_v15, %v21368_v17  ;;  %31546 = vmatprep.subr.mxu0 %v21368_v17  ;;  %v21454_v1 = vand.u32 4294901760, %v21453_v56 }
0x1709   : > { %31547 = vmatpush3.msra.mxu0 %v21368_v17 }
0x170a   : > { %31558 = vmatprep.subr.mxu0 %v21453_v56  ;;  %31549 = vmatmul.mubr.f32.vlgmr.msra.gmra.mxu0 %v33010_v5  ;;  %v21455_v52 = vsub.f32 %v21453_v56, %v21454_v1  ;;  %v21461_v23 = vand.u32 4294901760, %v21460_v37 }
0x170b   : > { %31559 = vmatpush3.msra.mxu0 %v21453_v56  ;;  %31562 = vmatprep.mubr.f32.mxu0 %v32989_v7  ;;  %v37351_v56 = vld [vmem:[%s32556_s28 + $0x30] sm:$0xff] }
0x170c   : > { %31560 = vmatprep.subr.mxu0 %v21460_v37  ;;  %v21456_v19 = vand.u32 4294901760, %v21455_v52  ;;  %v21462_v36 = vsub.f32 %v21460_v37, %v21461_v23  ;;  %v21838_v15 = vmul.f32 %v37351_v56, %v37351_v56  ;;  %v39440_v52 = vld [vmem:[#allocation22_spill] sm:$0xff] }
0x170d   : > { %31561 = vmatpush3.msra.mxu0 %v21460_v37  ;;  %v39438_v37 = vld [vmem:[#allocation16_spill] sm:$0xff] }
0x170e   : > { %31551 = vmatprep.subr.mxu1 %v21456_v19  ;;  %31572 = vmatprep.subr.mxu0 %v21454_v1  ;;  %v21463_v41 = vand.u32 4294901760, %v21462_v36  ;;  %v37368_v22 = vand.u32 4294901760, %v21838_v15  ;;  %v39443_v36 = vld [vmem:[#allocation32_spill] sm:$0xff] }
0x170f   : > { %31552 = vmatpush3.msra.mxu1 %v21456_v19  ;;  %31563 = vmatmul.mubr.f32.vlgmr.msra.gmra.mxu0 %v33003_v59  ;;  %v39442_v19 = vld [vmem:[#allocation29_spill] sm:$0xff] }
0x1710   : > { %31573 = vmatpush3.msra.mxu0 %v21454_v1  ;;  %31553 = vmatprep.subr.mxu1 %v21463_v41  ;;  %v37381_v60 = vsub.f32 %v21838_v15, %v37368_v22  ;;  %v39439_v1 = vld [vmem:[#allocation21_spill] sm:$0xff]  ;;  %v39445_v15 = vld [vmem:[#allocation38_spill] sm:$0xff] }
0x1711   : > { %31574 = vmatprep.subr.mxu0 %v21461_v23  ;;  %31554 = vmatpush3.msra.mxu1 %v21463_v41  ;;  %v39444_v41 = vld [vmem:[#allocation35_spill] sm:$0xff] }
0x1712   : > { %31575 = vmatpush3.msra.mxu0 %v21461_v23  ;;  %31556 = vmatmul.mubr.f32.vlgmr.msra.gmra.mxu1 %v33000_v32  ;;  %v38615_v34 = vand.u32 4294901760, %v37381_v60  ;;  %v39441_v23 = vld [vmem:[#allocation24_spill] sm:$0xff] }
0x1713   : > { %31565 = vmatprep.subr.mxu1 %v21365_v2  ;;  %31576 = vmatprep.mubr.f32.mxu0 %v32986_v61 }
0x1714   : > { %31586 = vmatprep.subr.mxu0 %v32578_v12  ;;  %31566 = vmatpush3.msra.mxu1 %v21365_v2  ;;  %v21924_v33 = vsub.f32 %v37381_v60, %v38615_v34  ;;  %v39452_v34 = vld [vmem:[#allocation18_spill] sm:$0xff] }
0x1715   : > { %31577 = vmatmul.mubr.f32.vlgmr.msra.gmra.mxu0 %v33000_v32  ;;  %31567 = vmatprep.subr.mxu1 %v21368_v17 }
0x1716   : > { %31587 = vmatpush3.msra.mxu0 %v32578_v12  ;;  %31568 = vmatpush3.msra.mxu1 %v21368_v17  ;;  %v21925_v39 = vand.u32 4294901760, %v21924_v33  ;;  %v39447_v33 = vld [vmem:[#allocation44_spill] sm:$0xff] }
0x1717   : > { %31588 = vmatprep.subr.mxu0 %v32572_v8  ;;  %31569 = vmatprep.mubr.f32.mxu1 %v32993_v54 }
0x1718   : > { %31589 = vmatpush3.msra.mxu0 %v32572_v8  ;;  %31570 = vmatmul.mubr.f32.vlgmr.msra.gmra.mxu1 %v33006_v26 }
0x1719   : > { %31579 = vmatprep.subr.mxu1 %v21365_v2  ;;  %31590 = vmatprep.subr.mxu0 %v32574_v9 }
0x171a   : > { %31580 = vmatpush3.msra.mxu1 %v21365_v2  ;;  %31591 = vmatpush3.msra.mxu0 %v32574_v9 }
0x171b   : > { %31581 = vmatprep.subr.mxu1 %v21368_v17  ;;  %31592 = vmatprep.subr.mxu0 %v32576_v10 }
0x171c   : > { %31582 = vmatpush3.msra.mxu1 %v21368_v17  ;;  %31583 = vmatprep.mubr.f32.mxu1 %v32986_v61  ;;  %v37358_v17 = vld [vmem:[%s32556_s28 + $0x38] sm:$0xff] }
0x171d   : > { %31593 = vmatpush3.msra.mxu0 %v32576_v10  ;;  %31584 = vmatmul.mubr.f32.vlgmr.msra.gmra.mxu1 %v33000_v32  ;;  %v21839_v2 = vmul.f32 %v37358_v17, %v37358_v17 }
0x171e   : > { %31594 = vmatprep.subr.mxu0 %v32570_v6  ;;  %31621 = vmatprep.subr.mxu1 %v32642_v38 }
0x171f   : > { %31595 = vmatpush3.msra.mxu0 %v32570_v6  ;;  %31622 = vmatpush3.msra.mxu1 %v32642_v38  ;;  %v37372_v27 = vand.u32 4294901760, %v21839_v2 }
0x1720   : > { %31596 = vmatprep.subr.mxu0 %v32580_v13  ;;  %31623 = vmatprep.subr.mxu1 %v38709_v40 }
0x1721   : > { %31597 = vmatpush3.msra.mxu0 %v32580_v13  ;;  %31624 = vmatpush3.msra.mxu1 %v38709_v40  ;;  %v37386_v47 = vsub.f32 %v21839_v2, %v37372_v27  ;;  %v39446_v2 = vld [vmem:[#allocation41_spill] sm:$0xff] }
0x1722   : > { %31598 = vmatprep.subr.mxu0 %v32582_v14  ;;  %31625 = vmatprep.subr.mxu1 %v38710_v57 }
0x1723   : > { %31599 = vmatpush3.msra.mxu0 %v32582_v14  ;;  %31626 = vmatpush3.msra.mxu1 %v38710_v57  ;;  %v38614_v28 = vand.u32 4294901760, %v37386_v47 }
0x1724   : > { %31600 = vmatprep.subr.mxu0 %v32600_v21  ;;  %31627 = vmatprep.subr.mxu1 %v38711_v24 }
0x1725   : > { %31601 = vmatpush3.msra.mxu0 %v32600_v21  ;;  %31628 = vmatpush3.msra.mxu1 %v38711_v24  ;;  %v21934_v46 = vsub.f32 %v37386_v47, %v38614_v28  ;;  %v39451_v28 = vld [vmem:[#allocation17_spill] sm:$0xff] }
0x1726   : > { %31602 = vmatprep.subr.mxu0 %v32625_v30  ;;  %31629 = vmatprep.subr.mxu1 %v38712_v58 }
0x1727   : > { %31603 = vmatpush3.msra.mxu0 %v32625_v30  ;;  %31630 = vmatpush3.msra.mxu1 %v38712_v58  ;;  %v21935_v29 = vand.u32 4294901760, %v21934_v46  ;;  %v39448_v46 = vld [vmem:[#allocation47_spill] sm:$0xff] }
0x1728   : > { %31604 = vmatprep.subr.mxu0 %v32635_v35  ;;  %31631 = vmatprep.subr.mxu1 %v38713_v50 }
0x1729   : > { %31605 = vmatpush3.msra.mxu0 %v32635_v35  ;;  %31632 = vmatpush3.msra.mxu1 %v38713_v50 }
0x172a   : > { %31606 = vmatprep.subr.mxu0 %v32655_v44  ;;  %31633 = vmatprep.subr.mxu1 %v38714_v62 }
0x172b   : > { %31607 = vmatpush3.msra.mxu0 %v32655_v44  ;;  %31634 = vmatpush3.msra.mxu1 %v38714_v62 }
0x172c   : > { %31608 = vmatprep.subr.mxu0 %v32666_v48  ;;  %31635 = vmatprep.subr.mxu1 %v38715_v42 }
0x172d   : > { %31609 = vmatpush3.msra.mxu0 %v32666_v48  ;;  %31636 = vmatpush3.msra.mxu1 %v38715_v42 }
0x172e   : > { %31610 = vmatprep.subr.mxu0 %v32684_v55  ;;  %31637 = vmatprep.subr.mxu1 %v38716_v20 }
0x172f   : > { %31611 = vmatpush3.msra.mxu0 %v32684_v55  ;;  %31638 = vmatpush3.msra.mxu1 %v38716_v20 }
0x1730   : > { %31612 = vmatprep.subr.mxu0 %v32718_v4  ;;  %31639 = vmatprep.subr.mxu1 %v38717_v25 }
0x1731   : > { %31613 = vmatpush3.msra.mxu0 %v32718_v4  ;;  %31640 = vmatpush3.msra.mxu1 %v38717_v25 }
0x1732   : > { %31614 = vmatprep.subr.mxu0 %v32737_v31  ;;  %31641 = vmatprep.subr.mxu1 %v32792_v63 }
0x1733   : > { %31615 = vmatpush3.msra.mxu0 %v32737_v31  ;;  %31642 = vmatpush3.msra.mxu1 %v32792_v63 }
0x1734   : > { %31616 = vmatprep.subr.mxu0 %v32753_v43  ;;  %31643 = vmatprep.subr.mxu1 %v32809_v51 }
0x1735   : > { %31617 = vmatpush3.msra.mxu0 %v32753_v43  ;;  %31644 = vmatpush3.msra.mxu1 %v32809_v51 }
0x1736   : > { %31618 = vmatprep.mubr.f32.mxu0 %v21925_v39  ;;  %31645 = vmatprep.subr.mxu1 %v32820_v45  ;;  %v39449_v39 = vld [vmem:[#allocation50_spill] sm:$0xff] }
0x1737   : > { %31656 = vmatprep.subr.mxu0 %v32595_v18  ;;  %31619 = vmatmul.mubr.f32.vlgmr.msra.gmra.mxu0 %v21935_v29  ;;  %v39450_v29 = vld [vmem:[#allocation19_spill] sm:$0xff] }
0x1738   : > { %31646 = vmatpush3.msra.mxu1 %v32820_v45  ;;  %31657 = vmatpush3.msra.mxu0 %v32595_v18 }
0x1739   : > { %31647 = vmatprep.subr.mxu1 %v39265_v53  ;;  %31658 = vmatprep.subr.mxu0 %v39266_v0 }
0x173a   : > { %31648 = vmatpush3.msra.mxu1 %v39265_v53  ;;  %31659 = vmatpush3.msra.mxu0 %v39266_v0 }
0x173b   : > { %31649 = vmatprep.subr.mxu1 %v39434_v49  ;;  %31660 = vmatprep.subr.mxu0 %v39435_v16 }
0x173c   : > { %31650 = vmatpush3.msra.mxu1 %v39434_v49  ;;  %31661 = vmatpush3.msra.mxu0 %v39435_v16 }
0x173d   : > { %31651 = vmatprep.subr.mxu1 %v39436_v11  ;;  %31662 = vmatprep.subr.mxu0 %v39437_v3 }
0x173e   : > { %31652 = vmatpush3.msra.mxu1 %v39436_v11  ;;  %31653 = vmatprep.mubr.f32.mxu1 %v37368_v22 }
0x173f   : > { %31663 = vmatpush3.msra.mxu0 %v39437_v3  ;;  %31654 = vmatmul.mubr.f32.vlgmr.msra.gmra.mxu1 %v37372_v27 }
0x1740   : > { %31664 = vmatprep.subr.mxu0 %v39438_v37  ;;  %31691 = vmatprep.subr.mxu1 %v32578_v12 }
0x1741   : > { %31665 = vmatpush3.msra.mxu0 %v39438_v37  ;;  %31692 = vmatpush3.msra.mxu1 %v32578_v12 }
0x1742   : > { %31666 = vmatprep.subr.mxu0 %v39439_v1  ;;  %31693 = vmatprep.subr.mxu1 %v32572_v8 }
0x1743   : > { %31667 = vmatpush3.msra.mxu0 %v39439_v1  ;;  %31694 = vmatpush3.msra.mxu1 %v32572_v8 }
0x1744   : > { %31668 = vmatprep.subr.mxu0 %v39440_v52  ;;  %31695 = vmatprep.subr.mxu1 %v32574_v9 }
0x1745   : > { %31669 = vmatpush3.msra.mxu0 %v39440_v52  ;;  %31696 = vmatpush3.msra.mxu1 %v32574_v9 }
0x1746   : > { %31670 = vmatprep.subr.mxu0 %v39441_v23  ;;  %31697 = vmatprep.subr.mxu1 %v32576_v10 }
0x1747   : > { %31671 = vmatpush3.msra.mxu0 %v39441_v23  ;;  %31698 = vmatpush3.msra.mxu1 %v32576_v10 }
0x1748   : > { %31672 = vmatprep.subr.mxu0 %v39442_v19  ;;  %31699 = vmatprep.subr.mxu1 %v32570_v6 }
0x1749   : > { %31673 = vmatpush3.msra.mxu0 %v39442_v19  ;;  %31700 = vmatpush3.msra.mxu1 %v32570_v6 }
0x174a   : > { %31674 = vmatprep.subr.mxu0 %v39443_v36  ;;  %31701 = vmatprep.subr.mxu1 %v32580_v13 }
0x174b   : > { %31675 = vmatpush3.msra.mxu0 %v39443_v36  ;;  %31702 = vmatpush3.msra.mxu1 %v32580_v13 }
0x174c   : > { %31676 = vmatprep.subr.mxu0 %v39444_v41  ;;  %31703 = vmatprep.subr.mxu1 %v32582_v14 }
0x174d   : > { %31677 = vmatpush3.msra.mxu0 %v39444_v41  ;;  %31704 = vmatpush3.msra.mxu1 %v32582_v14 }
0x174e   : > { %31678 = vmatprep.subr.mxu0 %v39445_v15  ;;  %31705 = vmatprep.subr.mxu1 %v32600_v21 }
0x174f   : > { %31679 = vmatpush3.msra.mxu0 %v39445_v15  ;;  %31706 = vmatpush3.msra.mxu1 %v32600_v21 }
0x1750   : > { %31680 = vmatprep.subr.mxu0 %v39446_v2  ;;  %31707 = vmatprep.subr.mxu1 %v32625_v30 }
0x1751   : > { %31681 = vmatpush3.msra.mxu0 %v39446_v2  ;;  %31708 = vmatpush3.msra.mxu1 %v32625_v30 }
0x1752   : > { %31682 = vmatprep.subr.mxu0 %v39447_v33  ;;  %31709 = vmatprep.subr.mxu1 %v32635_v35 }
0x1753   : > { %31683 = vmatpush3.msra.mxu0 %v39447_v33  ;;  %31710 = vmatpush3.msra.mxu1 %v32635_v35 }
0x1754   : > { %31684 = vmatprep.subr.mxu0 %v39448_v46  ;;  %31711 = vmatprep.subr.mxu1 %v32655_v44 }
0x1755   : > { %31685 = vmatpush3.msra.mxu0 %v39448_v46  ;;  %31712 = vmatpush3.msra.mxu1 %v32655_v44  ;;  %v39456_v46 = vld [vmem:[#allocation23_spill] sm:$0xff] }
0x1756   : > { %31686 = vmatprep.subr.mxu0 %v39449_v39  ;;  %31713 = vmatprep.subr.mxu1 %v32666_v48 }
0x1757   : > { %31687 = vmatpush3.msra.mxu0 %v39449_v39  ;;  %31688 = vmatprep.mubr.f32.mxu0 %v37381_v60  ;;  %v39453_v39 = vld [vmem:[#allocation20_spill] sm:$0xff] }
0x1758   : > { %31714 = vmatpush3.msra.mxu1 %v32666_v48  ;;  %31689 = vmatmul.mubr.f32.vlgmr.msra.gmra.mxu0 %v37386_v47 }
0x1759   : > { %31715 = vmatprep.subr.mxu1 %v32684_v55  ;;  %31726 = vmatprep.subr.mxu0 %v39450_v29 }
0x175a   : > { %31716 = vmatpush3.msra.mxu1 %v32684_v55  ;;  %31727 = vmatpush3.msra.mxu0 %v39450_v29  ;;  %v39454_v29 = vand.u32 4294901760, %v37381_v60  ;;  %v39458_v60 = vld [vmem:[#allocation27_spill] sm:$0xff] }
0x175b   : > { %31717 = vmatprep.subr.mxu1 %v32718_v4  ;;  %31728 = vmatprep.subr.mxu0 %v39451_v28 }
0x175c   : > { %31718 = vmatpush3.msra.mxu1 %v32718_v4  ;;  %31729 = vmatpush3.msra.mxu0 %v39451_v28  ;;  %v39455_v28 = vand.u32 4294901760, %v37386_v47  ;;  %v39459_v47 = vld [vmem:[#allocation31_spill] sm:$0xff] }
0x175d   : > { %31719 = vmatprep.subr.mxu1 %v32737_v31  ;;  %31730 = vmatprep.subr.mxu0 %v39452_v34 }
0x175e   : > { %31720 = vmatpush3.msra.mxu1 %v32737_v31  ;;  %31731 = vmatpush3.msra.mxu0 %v39452_v34  ;;  %v39457_v34 = vld [vmem:[#allocation26_spill] sm:$0xff] }
0x175f   : > { %31721 = vmatprep.subr.mxu1 %v32753_v43  ;;  %31732 = vmatprep.subr.mxu0 %v39453_v39 }
0x1760   : > { %31722 = vmatpush3.msra.mxu1 %v32753_v43  ;;  %31723 = vmatprep.mubr.f32.mxu1 %v39454_v29  ;;  %v39461_v29 = vld [vmem:[#allocation37_spill] sm:$0xff] }
0x1761   : > { %31733 = vmatpush3.msra.mxu0 %v39453_v39  ;;  %31724 = vmatmul.mubr.f32.vlgmr.msra.gmra.mxu1 %v39455_v28  ;;  %v39460_v28 = vld [vmem:[#allocation34_spill] sm:$0xff] }
0x1762   : > { %31734 = vmatprep.subr.mxu0 %v39456_v46  ;;  %31761 = vmatprep.subr.mxu1 %v32578_v12 }
0x1763   : > { %31735 = vmatpush3.msra.mxu0 %v39456_v46  ;;  %31762 = vmatpush3.msra.mxu1 %v32578_v12 }
0x1764   : > { %31736 = vmatprep.subr.mxu0 %v39457_v34  ;;  %31763 = vmatprep.subr.mxu1 %v32572_v8 }
0x1765   : > { %31737 = vmatpush3.msra.mxu0 %v39457_v34  ;;  %31764 = vmatpush3.msra.mxu1 %v32572_v8 }
0x1766   : > { %31738 = vmatprep.subr.mxu0 %v39458_v60  ;;  %31765 = vmatprep.subr.mxu1 %v32574_v9 }
0x1767   : > { %31739 = vmatpush3.msra.mxu0 %v39458_v60  ;;  %31766 = vmatpush3.msra.mxu1 %v32574_v9  ;;  %v39462_v60 = vld [vmem:[#allocation40_spill] sm:$0xff] }
0x1768   : > { %31740 = vmatprep.subr.mxu0 %v39459_v47  ;;  %31767 = vmatprep.subr.mxu1 %v32576_v10 }
0x1769   : > { %31741 = vmatpush3.msra.mxu0 %v39459_v47  ;;  %31768 = vmatpush3.msra.mxu1 %v32576_v10  ;;  %v39463_v47 = vld [vmem:[#allocation43_spill] sm:$0xff] }
0x176a   : > { %31742 = vmatprep.subr.mxu0 %v39460_v28  ;;  %31769 = vmatprep.subr.mxu1 %v32570_v6 }
0x176b   : > { %31743 = vmatpush3.msra.mxu0 %v39460_v28  ;;  %31770 = vmatpush3.msra.mxu1 %v32570_v6  ;;  %v39464_v28 = vld [vmem:[#allocation46_spill] sm:$0xff] }
0x176c   : > { %31744 = vmatprep.subr.mxu0 %v39461_v29  ;;  %31771 = vmatprep.subr.mxu1 %v32580_v13 }
0x176d   : > { %31745 = vmatpush3.msra.mxu0 %v39461_v29  ;;  %31772 = vmatpush3.msra.mxu1 %v32580_v13  ;;  %v39465_v29 = vld [vmem:[#allocation49_spill] sm:$0xff] }
0x176e   : > { %31746 = vmatprep.subr.mxu0 %v39462_v60  ;;  %31773 = vmatprep.subr.mxu1 %v32582_v14 }
0x176f   : > { %31747 = vmatpush3.msra.mxu0 %v39462_v60  ;;  %31774 = vmatpush3.msra.mxu1 %v32582_v14  ;;  %v39466_v60 = vld [vmem:[#allocation51_spill] sm:$0xff] }
0x1770   : > { %31748 = vmatprep.subr.mxu0 %v39463_v47  ;;  %31775 = vmatprep.subr.mxu1 %v32600_v21 }
0x1771   : > { %31749 = vmatpush3.msra.mxu0 %v39463_v47  ;;  %31776 = vmatpush3.msra.mxu1 %v32600_v21  ;;  %v39467_v47 = vld [vmem:[#allocation52_spill] sm:$0xff] }
0x1772   : > { %31750 = vmatprep.subr.mxu0 %v39464_v28  ;;  %31777 = vmatprep.subr.mxu1 %v32625_v30 }
0x1773   : > { %31751 = vmatpush3.msra.mxu0 %v39464_v28  ;;  %31778 = vmatpush3.msra.mxu1 %v32625_v30 }
0x1774   : > { %31752 = vmatprep.subr.mxu0 %v39465_v29  ;;  %31779 = vmatprep.subr.mxu1 %v32635_v35 }
0x1775   : > { %31753 = vmatpush3.msra.mxu0 %v39465_v29  ;;  %31780 = vmatpush3.msra.mxu1 %v32635_v35 }
0x1776   : > { %31754 = vmatprep.subr.mxu0 %v39466_v60  ;;  %31781 = vmatprep.subr.mxu1 %v32655_v44 }
0x1777   : > { %31755 = vmatpush3.msra.mxu0 %v39466_v60  ;;  %31782 = vmatpush3.msra.mxu1 %v32655_v44  ;;  %v39468_v60 = vld [vmem:[#allocation56_spill] sm:$0xff] }
0x1778   : > { %31756 = vmatprep.subr.mxu0 %v39467_v47  ;;  %31783 = vmatprep.subr.mxu1 %v32666_v48 }
0x1779   : > { %31757 = vmatpush3.msra.mxu0 %v39467_v47  ;;  %31758 = vmatprep.mubr.f32.mxu0 %v37368_v22 }
0x177a   : > { %31784 = vmatpush3.msra.mxu1 %v32666_v48  ;;  %31759 = vmatmul.mubr.f32.vlgmr.msra.gmra.mxu0 %v37372_v27 }
0x177b   : > { %31785 = vmatprep.subr.mxu1 %v32684_v55  ;;  %31793 = vmatprep.mubr.f32.mxu1 %v37368_v22 }
0x177c   : > { %31786 = vmatpush3.msra.mxu1 %v32684_v55  ;;  %31800 = vmatprep.mubr.f32.mxu0 %v39468_v60 }
0x177d   : > { %31787 = vmatprep.subr.mxu1 %v32718_v4 }
0x177e   : > { %31788 = vmatpush3.msra.mxu1 %v32718_v4 }
0x177f   : > { %31789 = vmatprep.subr.mxu1 %v32737_v31 }
0x1780   : > { %31790 = vmatpush3.msra.mxu1 %v32737_v31 }
0x1781   : > { %31791 = vmatprep.subr.mxu1 %v32753_v43 }
0x1782   : > { %31792 = vmatpush3.msra.mxu1 %v32753_v43 }
0x1783   : > { %31794 = vmatmul.mubr.f32.vlgmr.msra.gmra.mxu1 %v37372_v27 }
0x1784   : > { %31807 = vmatprep.mubr.f32.mxu1 %v32986_v61 }
0x17ca   : > { %v31550_v22 = vpop.f32.mrf.mxu0 }
0x17cc   : > { %v21409_v47 = vpop.f32.mrf.mxu0 }
0x17cf   : > { %v31564_v29 = vpop.f32.mrf.mxu0 }
0x17d1   : > { %v21582_v28 = vpop.f32.mrf.mxu0 }
0x17d2   : > { %v31557_v60 = vpop.f32.mrf.mxu1 }
0x17d3   : > { %v21507_v34 = vadd.f32 %v31557_v60, %v31550_v22 }
0x17d4   : > { %v21500_v46 = vpop.f32.mrf.mxu1 }
0x17d5   : > { %v21590_v39 = vadd.f32 %v31564_v29, %v21507_v34  ;;  %v21501_v33 = vadd.f32 %v21500_v46, %v21409_v47  ;;  %v31578_v2 = vpop.f32.mrf.mxu0 }
0x17d7   : > { %v21583_v15 = vadd.f32 %v21582_v28, %v21501_v33  ;;  %v21749_v23 = vpop.f32.mrf.mxu0 }
0x17d8   : > { %v31571_v41 = vpop.f32.mrf.mxu1 }
0x17d9   : > { %v21673_v36 = vadd.f32 %v31571_v41, %v21590_v39 }
0x17da   : > { %v21664_v19 = vpop.f32.mrf.mxu1 }
0x17db   : > { %v21756_v52 = vadd.f32 %v31578_v2, %v21673_v36  ;;  %v21665_v1 = vadd.f32 %v21664_v19, %v21583_v15 }
0x17dd   : > { %v21750_v27 = vadd.f32 %v21749_v23, %v21665_v1  ;;  %v31585_v37 = vpop.f32.mrf.mxu1 }
0x17de   : > { %v37574_v3 = vadd.f32 %v31585_v37, %v21756_v52 }
0x17df   : > { %v21828_v11 = vpop.f32.mrf.mxu1 }
0x17e0   : > { %39469 = vst [vmem:[#allocation118_spill] sm:$0xff] %v37574_v3  ;;  %v37578_v60 = vadd.f32 %v21828_v11, %v21750_v27 }
0x17e2   : > { %39471 = vst [vmem:[#allocation119_spill] sm:$0xff] %v37578_v60 }
0x17f7   : > { %v31620_v33 = vpop.f32.mrf.mxu0 }
0x17f9   : > { %v21927_v47 = vpop.f32.mrf.mxu0 }
0x17ff   : > { %v31655_v41 = vpop.f32.mrf.mxu1 }
0x1800   : > { %v22095_v1 = vadd.f32 %v31655_v41, %v31620_v33 }
0x1801   : > { %v22088_v28 = vpop.f32.mrf.mxu1 }
0x1802   : > { %v22089_v37 = vadd.f32 %v22088_v28, %v21927_v47 }
0x1818   : > { %v31690_v39 = vpop.f32.mrf.mxu0 }
0x1819   : > { %v22206_v52 = vadd.f32 %v31690_v39, %v22095_v1  ;;  %v39483_v1 = vld [vmem:[#allocation29_spill] sm:$0xff] }
0x181a   : > { %v22198_v36 = vpop.f32.mrf.mxu0 }
0x181b   : > { %v22199_v2 = vadd.f32 %v22198_v36, %v22089_v37  ;;  %v39481_v36 = vld [vmem:[#allocation22_spill] sm:$0xff]  ;;  %v39485_v37 = vld [vmem:[#allocation35_spill] sm:$0xff] }
0x1821   : > { %v31725_v19 = vpop.f32.mrf.mxu1 }
0x1822   : > { %v22303_v29 = vadd.f32 %v31725_v19, %v22206_v52  ;;  %v39482_v19 = vld [vmem:[#allocation24_spill] sm:$0xff]  ;;  %v39486_v52 = vld [vmem:[#allocation38_spill] sm:$0xff] }
0x1823   : > { %v22294_v15 = vpop.f32.mrf.mxu1 }
0x1824   : > { %v22295_v11 = vadd.f32 %v22294_v15, %v22199_v2  ;;  %v39487_v15 = vld [vmem:[#allocation41_spill] sm:$0xff]  ;;  %v39488_v2 = vld [vmem:[#allocation44_spill] sm:$0xff] }
0x183a   : > { %v31760_v23 = vpop.f32.mrf.mxu0 }
0x183b   : > { %v22428_v27 = vadd.f32 %v31760_v23, %v22303_v29  ;;  %v39484_v23 = vld [vmem:[#allocation32_spill] sm:$0xff]  ;;  %v39489_v29 = vld [vmem:[#allocation47_spill] sm:$0xff] }
0x183c   : > { %v22421_v22 = vpop.f32.mrf.mxu0 }
0x183d   : > { %v22422_v16 = vadd.f32 %v22421_v22, %v22295_v11  ;;  %v39490_v22 = vld [vmem:[#allocation50_spill] sm:$0xff]  ;;  %v39491_v11 = vld [vmem:[#allocation19_spill] sm:$0xff] }
0x1843   : > { %v31795_v49 = vpop.f32.mrf.mxu1 }
0x1844   : > { %v22521_v46 = vadd.f32 %v31795_v49, %v22428_v27  ;;  %v39492_v27 = vld [vmem:[#allocation17_spill] sm:$0xff] }
0x1845   : > { %v22514_v34 = vpop.f32.mrf.mxu1 }
0x1846   : > { %v22553_v60 = vand.u32 4294901760, %v22521_v46  ;;  %v22515_v3 = vadd.f32 %v22514_v34, %v22422_v16  ;;  %v39477_v34 = vld [vmem:[#allocation55_spill] sm:$0xff] }
0x1848   : > { %v22641_v0 = vsub.f32 %v22521_v46, %v22553_v60  ;;  %v22556_v53 = vand.u32 4294901760, %v22515_v3  ;;  %31796 = vmatprep.subr.mxu0 %v22553_v60  ;;  %v39480_v46 = vld [vmem:[#allocation21_spill] sm:$0xff] }
0x1849   : > { %31797 = vmatpush3.msra.mxu0 %v22553_v60 }
0x184a   : > { %v22648_v33 = vsub.f32 %v22515_v3, %v22556_v53  ;;  %31798 = vmatprep.subr.mxu0 %v22556_v53  ;;  %v22642_v47 = vand.u32 4294901760, %v22641_v0 }
0x184b   : > { %31799 = vmatpush3.msra.mxu0 %v22556_v53 }
0x184c   : > { %31810 = vmatprep.subr.mxu0 %v22641_v0  ;;  %31801 = vmatmul.mubr.f32.vlgmr.msra.gmra.mxu0 %v33010_v5  ;;  %v22643_v41 = vsub.f32 %v22641_v0, %v22642_v47  ;;  %v22649_v39 = vand.u32 4294901760, %v22648_v33 }
0x184d   : > { %31811 = vmatpush3.msra.mxu0 %v22641_v0  ;;  %31814 = vmatprep.mubr.f32.mxu0 %v32989_v7  ;;  %v32197_v0 = vld [vmem:[%s32549_s23 + $0x30] sm:$0xff] }
0x184e   : > { %31812 = vmatprep.subr.mxu0 %v22648_v33  ;;  %v22644_v49 = vand.u32 4294901760, %v22643_v41  ;;  %v22650_v28 = vsub.f32 %v22648_v33, %v22649_v39  ;;  %v23026_v3 = vmul.f32 %v32197_v0, %v37351_v56  ;;  %v39495_v41 = vld [vmem:[#allocation23_spill] sm:$0xff] }
0x184f   : > { %31813 = vmatpush3.msra.mxu0 %v22648_v33  ;;  %v39493_v33 = vld [vmem:[#allocation18_spill] sm:$0xff] }
0x1850   : > { %31803 = vmatprep.subr.mxu1 %v22644_v49  ;;  %31824 = vmatprep.subr.mxu0 %v22642_v47  ;;  %v22651_v16 = vand.u32 4294901760, %v22650_v28  ;;  %v37614_v56 = vand.u32 4294901760, %v23026_v3  ;;  %v39498_v28 = vld [vmem:[#allocation31_spill] sm:$0xff] }
0x1851   : > { %31804 = vmatpush3.msra.mxu1 %v22644_v49  ;;  %31815 = vmatmul.mubr.f32.vlgmr.msra.gmra.mxu0 %v33003_v59  ;;  %v39497_v49 = vld [vmem:[#allocation27_spill] sm:$0xff] }
0x1852   : > { %31825 = vmatpush3.msra.mxu0 %v22642_v47  ;;  %31805 = vmatprep.subr.mxu1 %v22651_v16  ;;  %v39494_v47 = vld [vmem:[#allocation20_spill] sm:$0xff] }
0x1853   : > { %31826 = vmatprep.subr.mxu0 %v22649_v39  ;;  %31806 = vmatpush3.msra.mxu1 %v22651_v16 }
0x1854   : > { %31827 = vmatpush3.msra.mxu0 %v22649_v39  ;;  %31808 = vmatmul.mubr.f32.vlgmr.msra.gmra.mxu1 %v33000_v32  ;;  %v39496_v39 = vld [vmem:[#allocation26_spill] sm:$0xff] }
0x1855   : > { %31817 = vmatprep.subr.mxu1 %v22553_v60  ;;  %31828 = vmatprep.mubr.f32.mxu0 %v32986_v61 }
0x1856   : > { %31838 = vmatprep.subr.mxu0 %v32578_v12  ;;  %31818 = vmatpush3.msra.mxu1 %v22553_v60 }
0x1857   : > { %31829 = vmatmul.mubr.f32.vlgmr.msra.gmra.mxu0 %v33000_v32  ;;  %31819 = vmatprep.subr.mxu1 %v22556_v53 }
0x1858   : > { %31839 = vmatpush3.msra.mxu0 %v32578_v12  ;;  %31820 = vmatpush3.msra.mxu1 %v22556_v53 }
0x1859   : > { %31840 = vmatprep.subr.mxu0 %v32572_v8  ;;  %31821 = vmatprep.mubr.f32.mxu1 %v32993_v54 }
0x185a   : > { %31841 = vmatpush3.msra.mxu0 %v32572_v8  ;;  %31822 = vmatmul.mubr.f32.vlgmr.msra.gmra.mxu1 %v33006_v26 }
0x185b   : > { %31831 = vmatprep.subr.mxu1 %v22553_v60  ;;  %31842 = vmatprep.subr.mxu0 %v32574_v9 }
0x185c   : > { %31832 = vmatpush3.msra.mxu1 %v22553_v60  ;;  %31843 = vmatpush3.msra.mxu0 %v32574_v9  ;;  %v32198_v60 = vld [vmem:[%s32549_s23 + $0x38] sm:$0xff] }
0x185d   : > { %31833 = vmatprep.subr.mxu1 %v22556_v53  ;;  %31844 = vmatprep.subr.mxu0 %v32576_v10 }
0x185e   : > { %31834 = vmatpush3.msra.mxu1 %v22556_v53  ;;  %31835 = vmatprep.mubr.f32.mxu1 %v32986_v61  ;;  %v23027_v53 = vmul.f32 %v32198_v60, %v37358_v17  ;;  %v39475_v17 = vld [vmem:[#allocation54_spill] sm:$0xff] }
0x185f   : > { %31845 = vmatpush3.msra.mxu0 %v32576_v10  ;;  %31836 = vmatmul.mubr.f32.vlgmr.msra.gmra.mxu1 %v33000_v32 }
0x1860   : > { %31846 = vmatprep.subr.mxu0 %v32570_v6  ;;  %31873 = vmatprep.subr.mxu1 %v32642_v38 }
0x1861   : > { %31847 = vmatpush3.msra.mxu0 %v32570_v6  ;;  %31874 = vmatpush3.msra.mxu1 %v32642_v38  ;;  %v37618_v38 = vand.u32 4294901760, %v23027_v53 }
0x1862   : > { %31848 = vmatprep.subr.mxu0 %v32580_v13  ;;  %31875 = vmatprep.subr.mxu1 %v38709_v40 }
0x1863   : > { %31849 = vmatpush3.msra.mxu0 %v32580_v13  ;;  %31876 = vmatpush3.msra.mxu1 %v38709_v40  ;;  %v37627_v40 = vsub.f32 %v23026_v3, %v37614_v56 }
0x1864   : > { %31850 = vmatprep.subr.mxu0 %v32582_v14  ;;  %31877 = vmatprep.subr.mxu1 %v38710_v57 }
0x1865   : > { %31851 = vmatpush3.msra.mxu0 %v32582_v14  ;;  %31878 = vmatpush3.msra.mxu1 %v38710_v57  ;;  %v37632_v57 = vsub.f32 %v23027_v53, %v37618_v38 }
0x1866   : > { %31852 = vmatprep.subr.mxu0 %v32600_v21  ;;  %31879 = vmatprep.subr.mxu1 %v38711_v24 }
0x1867   : > { %31853 = vmatpush3.msra.mxu0 %v32600_v21  ;;  %31880 = vmatpush3.msra.mxu1 %v38711_v24  ;;  %v23111_v24 = vand.u32 4294901760, %v37627_v40 }
0x1868   : > { %31854 = vmatprep.subr.mxu0 %v32625_v30  ;;  %31881 = vmatprep.subr.mxu1 %v38712_v58 }
0x1869   : > { %31855 = vmatpush3.msra.mxu0 %v32625_v30  ;;  %31882 = vmatpush3.msra.mxu1 %v38712_v58  ;;  %v23121_v58 = vand.u32 4294901760, %v37632_v57 }
0x186a   : > { %31856 = vmatprep.subr.mxu0 %v32635_v35  ;;  %31883 = vmatprep.subr.mxu1 %v38713_v50 }
0x186b   : > { %31857 = vmatpush3.msra.mxu0 %v32635_v35  ;;  %31884 = vmatpush3.msra.mxu1 %v38713_v50  ;;  %v23112_v50 = vsub.f32 %v37627_v40, %v23111_v24 }
0x186c   : > { %31858 = vmatprep.subr.mxu0 %v32655_v44  ;;  %31885 = vmatprep.subr.mxu1 %v38714_v62 }
0x186d   : > { %31859 = vmatpush3.msra.mxu0 %v32655_v44  ;;  %31886 = vmatpush3.msra.mxu1 %v38714_v62  ;;  %v23122_v62 = vsub.f32 %v37632_v57, %v23121_v58 }
0x186e   : > { %31860 = vmatprep.subr.mxu0 %v32666_v48  ;;  %31887 = vmatprep.subr.mxu1 %v38715_v42 }
0x186f   : > { %31861 = vmatpush3.msra.mxu0 %v32666_v48  ;;  %31888 = vmatpush3.msra.mxu1 %v38715_v42  ;;  %v23113_v42 = vand.u32 4294901760, %v23112_v50 }
0x1870   : > { %31862 = vmatprep.subr.mxu0 %v32684_v55  ;;  %31889 = vmatprep.subr.mxu1 %v38716_v20 }
0x1871   : > { %31863 = vmatpush3.msra.mxu0 %v32684_v55  ;;  %31890 = vmatpush3.msra.mxu1 %v38716_v20  ;;  %v23123_v20 = vand.u32 4294901760, %v23122_v62 }
0x1872   : > { %31864 = vmatprep.subr.mxu0 %v32718_v4  ;;  %31891 = vmatprep.subr.mxu1 %v38717_v25 }
0x1873   : > { %31865 = vmatpush3.msra.mxu0 %v32718_v4  ;;  %31892 = vmatpush3.msra.mxu1 %v38717_v25  ;;  %v39474_v25 = vld [vmem:[#allocation13_spill] sm:$0xff] }
0x1874   : > { %31866 = vmatprep.subr.mxu0 %v32737_v31  ;;  %31893 = vmatprep.subr.mxu1 %v32792_v63 }
0x1875   : > { %31867 = vmatpush3.msra.mxu0 %v32737_v31  ;;  %31894 = vmatpush3.msra.mxu1 %v32792_v63  ;;  %v39473_v63 = vld [vmem:[#allocation53_spill] sm:$0xff] }
0x1876   : > { %31868 = vmatprep.subr.mxu0 %v32753_v43  ;;  %31895 = vmatprep.subr.mxu1 %v32809_v51 }
0x1877   : > { %31869 = vmatpush3.msra.mxu0 %v32753_v43  ;;  %31896 = vmatpush3.msra.mxu1 %v32809_v51  ;;  %v39476_v51 = vld [vmem:[#allocation14_spill] sm:$0xff] }
0x1878   : > { %31870 = vmatprep.mubr.f32.mxu0 %v23113_v42  ;;  %31897 = vmatprep.subr.mxu1 %v32820_v45 }
0x1879   : > { %31908 = vmatprep.subr.mxu0 %v32595_v18  ;;  %31871 = vmatmul.mubr.f32.vlgmr.msra.gmra.mxu0 %v23123_v20  ;;  %v39508_v20 = vld [vmem:[#allocation116_spill] sm:$0xff] }
0x187a   : > { %31898 = vmatpush3.msra.mxu1 %v32820_v45  ;;  %31909 = vmatpush3.msra.mxu0 %v32595_v18  ;;  %v39478_v45 = vld [vmem:[#allocation15_spill] sm:$0xff]  ;;  %v39479_v18 = vld [vmem:[#allocation16_spill] sm:$0xff] }
0x187b   : > { %31899 = vmatprep.subr.mxu1 %v39473_v63  ;;  %31910 = vmatprep.subr.mxu0 %v39474_v25 }
0x187c   : > { %31900 = vmatpush3.msra.mxu1 %v39473_v63  ;;  %31911 = vmatpush3.msra.mxu0 %v39474_v25 }
0x187d   : > { %31901 = vmatprep.subr.mxu1 %v39475_v17  ;;  %31912 = vmatprep.subr.mxu0 %v39476_v51 }
0x187e   : > { %31902 = vmatpush3.msra.mxu1 %v39475_v17  ;;  %31913 = vmatpush3.msra.mxu0 %v39476_v51  ;;  %v39509_v17 = vld [vmem:[#allocation118_spill] sm:$0xff] }
0x187f   : > { %31903 = vmatprep.subr.mxu1 %v39477_v34  ;;  %31914 = vmatprep.subr.mxu0 %v39478_v45  ;;  %v39510_v51 = vld [vmem:[#allocation110_spill] sm:$0xff] }
0x1880   : > { %31904 = vmatpush3.msra.mxu1 %v39477_v34  ;;  %31905 = vmatprep.mubr.f32.mxu1 %v37614_v56  ;;  %v39511_v34 = vsub.f32 %v39509_v17, %v39510_v51  ;;  %v39526_v17 = vld [vmem:[#allocation25_spill] sm:$0xff]  ;;  %v39527_v51 = vld [vmem:[#allocation28_spill] sm:$0xff] }
0x1881   : > { %31915 = vmatpush3.msra.mxu0 %v39478_v45  ;;  %31906 = vmatmul.mubr.f32.vlgmr.msra.gmra.mxu1 %v37618_v38 }
0x1882   : > { %31916 = vmatprep.subr.mxu0 %v39479_v18  ;;  %31943 = vmatprep.subr.mxu1 %v32578_v12 }
0x1883   : > { %31917 = vmatpush3.msra.mxu0 %v39479_v18  ;;  %31944 = vmatpush3.msra.mxu1 %v32578_v12  ;;  %v39512_v18 = vld [vmem:[#allocation115_spill] sm:$0xff] }
0x1884   : > { %31918 = vmatprep.subr.mxu0 %v39480_v46  ;;  %31945 = vmatprep.subr.mxu1 %v32572_v8 }
0x1885   : > { %31919 = vmatpush3.msra.mxu0 %v39480_v46  ;;  %31946 = vmatpush3.msra.mxu1 %v32572_v8 }
0x1886   : > { %31920 = vmatprep.subr.mxu0 %v39481_v36  ;;  %31947 = vmatprep.subr.mxu1 %v32574_v9 }
0x1887   : > { %31921 = vmatpush3.msra.mxu0 %v39481_v36  ;;  %31948 = vmatpush3.msra.mxu1 %v32574_v9  ;;  %v39513_v36 = vld [vmem:[#allocation112_spill] sm:$0xff] }
0x1888   : > { %31922 = vmatprep.subr.mxu0 %v39482_v19  ;;  %31949 = vmatprep.subr.mxu1 %v32576_v10 }
0x1889   : > { %31923 = vmatpush3.msra.mxu0 %v39482_v19  ;;  %31950 = vmatpush3.msra.mxu1 %v32576_v10  ;;  %v24239_v19 = vadd.f32 0.0001, %v39513_v36  ;;  %v39531_v36 = vld [vmem:[#allocation95_spill] sm:$0xff] }
0x188a   : > { %31924 = vmatprep.subr.mxu0 %v39483_v1  ;;  %31951 = vmatprep.subr.mxu1 %v32570_v6 }
0x188b   : > { %31925 = vmatpush3.msra.mxu0 %v39483_v1  ;;  %31952 = vmatpush3.msra.mxu1 %v32570_v6 }
0x188c   : > { %31926 = vmatprep.subr.mxu0 %v39484_v23  ;;  %31953 = vmatprep.subr.mxu1 %v32580_v13 }
0x188d   : > { %31927 = vmatpush3.msra.mxu0 %v39484_v23  ;;  %31954 = vmatpush3.msra.mxu1 %v32580_v13  ;;  %v39514_v23 = vld [vmem:[#allocation119_spill] sm:$0xff] }
0x188e   : > { %31928 = vmatprep.subr.mxu0 %v39485_v37  ;;  %31955 = vmatprep.subr.mxu1 %v32582_v14 }
0x188f   : > { %31929 = vmatpush3.msra.mxu0 %v39485_v37  ;;  %31956 = vmatpush3.msra.mxu1 %v32582_v14  ;;  %v39515_v37 = vld [vmem:[#allocation117_spill] sm:$0xff] }
0x1890   : > { %31930 = vmatprep.subr.mxu0 %v39486_v52  ;;  %31957 = vmatprep.subr.mxu1 %v32600_v21 }
0x1891   : > { %31931 = vmatpush3.msra.mxu0 %v39486_v52  ;;  %31958 = vmatpush3.msra.mxu1 %v32600_v21  ;;  %v39516_v52 = vsub.f32 %v39514_v23, %v39515_v37  ;;  %v39533_v23 = vld [vmem:[#allocation57_spill] sm:$0xff] }
0x1892   : > { %31932 = vmatprep.subr.mxu0 %v39487_v15  ;;  %31959 = vmatprep.subr.mxu1 %v32625_v30 }
0x1893   : > { %31933 = vmatpush3.msra.mxu0 %v39487_v15  ;;  %31960 = vmatpush3.msra.mxu1 %v32625_v30 }
0x1894   : > { %31934 = vmatprep.subr.mxu0 %v39488_v2  ;;  %31961 = vmatprep.subr.mxu1 %v32635_v35 }
0x1895   : > { %31935 = vmatpush3.msra.mxu0 %v39488_v2  ;;  %31962 = vmatpush3.msra.mxu1 %v32635_v35  ;;  %v39517_v2 = vld [vmem:[#allocation113_spill] sm:$0xff] }
0x1896   : > { %31936 = vmatprep.subr.mxu0 %v39489_v29  ;;  %31963 = vmatprep.subr.mxu1 %v32655_v44 }
0x1897   : > { %31937 = vmatpush3.msra.mxu0 %v39489_v29  ;;  %31964 = vmatpush3.msra.mxu1 %v32655_v44  ;;  %v24238_v29 = vadd.f32 0.0001, %v39517_v2 }
0x1898   : > { %31938 = vmatprep.subr.mxu0 %v39490_v22  ;;  %31965 = vmatprep.subr.mxu1 %v32666_v48 }
0x1899   : > { %31939 = vmatpush3.msra.mxu0 %v39490_v22  ;;  %31940 = vmatprep.mubr.f32.mxu0 %v37627_v40 }
0x189a   : > { %31966 = vmatpush3.msra.mxu1 %v32666_v48  ;;  %31941 = vmatmul.mubr.f32.vlgmr.msra.gmra.mxu0 %v37632_v57 }
0x189b   : > { %31967 = vmatprep.subr.mxu1 %v32684_v55  ;;  %31978 = vmatprep.subr.mxu0 %v39491_v11 }
0x189c   : > { %31968 = vmatpush3.msra.mxu1 %v32684_v55  ;;  %31979 = vmatpush3.msra.mxu0 %v39491_v11 }
0x189d   : > { %31969 = vmatprep.subr.mxu1 %v32718_v4  ;;  %31980 = vmatprep.subr.mxu0 %v39492_v27 }
0x189e   : > { %31970 = vmatpush3.msra.mxu1 %v32718_v4  ;;  %31981 = vmatpush3.msra.mxu0 %v39492_v27 }
0x189f   : > { %31971 = vmatprep.subr.mxu1 %v32737_v31  ;;  %31982 = vmatprep.subr.mxu0 %v39493_v33 }
0x18a0   : > { %31972 = vmatpush3.msra.mxu1 %v32737_v31  ;;  %31983 = vmatpush3.msra.mxu0 %v39493_v33 }
0x18a1   : > { %31973 = vmatprep.subr.mxu1 %v32753_v43  ;;  %31984 = vmatprep.subr.mxu0 %v39494_v47 }
0x18a2   : > { %31974 = vmatpush3.msra.mxu1 %v32753_v43  ;;  %31975 = vmatprep.mubr.f32.mxu1 %v23111_v24 }
0x18a3   : > { %31985 = vmatpush3.msra.mxu0 %v39494_v47  ;;  %31976 = vmatmul.mubr.f32.vlgmr.msra.gmra.mxu1 %v23121_v58 }
0x18a4   : > { %31986 = vmatprep.subr.mxu0 %v39495_v41  ;;  %32013 = vmatprep.subr.mxu1 %v32578_v12 }
0x18a5   : > { %31987 = vmatpush3.msra.mxu0 %v39495_v41  ;;  %32014 = vmatpush3.msra.mxu1 %v32578_v12  ;;  %v39499_v12 = vld [vmem:[#allocation34_spill] sm:$0xff] }
0x18a6   : > { %31988 = vmatprep.subr.mxu0 %v39496_v39  ;;  %32015 = vmatprep.subr.mxu1 %v32572_v8 }
0x18a7   : > { %31989 = vmatpush3.msra.mxu0 %v39496_v39  ;;  %32016 = vmatpush3.msra.mxu1 %v32572_v8  ;;  %v39500_v8 = vld [vmem:[#allocation37_spill] sm:$0xff] }
0x18a8   : > { %31990 = vmatprep.subr.mxu0 %v39497_v49  ;;  %32017 = vmatprep.subr.mxu1 %v32574_v9 }
0x18a9   : > { %31991 = vmatpush3.msra.mxu0 %v39497_v49  ;;  %32018 = vmatpush3.msra.mxu1 %v32574_v9  ;;  %v39501_v9 = vld [vmem:[#allocation40_spill] sm:$0xff] }
0x18aa   : > { %31992 = vmatprep.subr.mxu0 %v39498_v28  ;;  %32019 = vmatprep.subr.mxu1 %v32576_v10 }
0x18ab   : > { %31993 = vmatpush3.msra.mxu0 %v39498_v28  ;;  %32020 = vmatpush3.msra.mxu1 %v32576_v10  ;;  %v39502_v10 = vld [vmem:[#allocation43_spill] sm:$0xff] }
0x18ac   : > { %31994 = vmatprep.subr.mxu0 %v39499_v12  ;;  %32021 = vmatprep.subr.mxu1 %v32570_v6 }
0x18ad   : > { %31995 = vmatpush3.msra.mxu0 %v39499_v12  ;;  %32022 = vmatpush3.msra.mxu1 %v32570_v6  ;;  %v39503_v6 = vld [vmem:[#allocation46_spill] sm:$0xff] }
0x18ae   : > { %31996 = vmatprep.subr.mxu0 %v39500_v8  ;;  %32023 = vmatprep.subr.mxu1 %v32580_v13 }
0x18af   : > { %31997 = vmatpush3.msra.mxu0 %v39500_v8  ;;  %32024 = vmatpush3.msra.mxu1 %v32580_v13  ;;  %v39504_v13 = vld [vmem:[#allocation49_spill] sm:$0xff] }
0x18b0   : > { %31998 = vmatprep.subr.mxu0 %v39501_v9  ;;  %32025 = vmatprep.subr.mxu1 %v32582_v14 }
0x18b1   : > { %31999 = vmatpush3.msra.mxu0 %v39501_v9  ;;  %32026 = vmatpush3.msra.mxu1 %v32582_v14  ;;  %v39505_v14 = vld [vmem:[#allocation51_spill] sm:$0xff] }
0x18b2   : > { %32000 = vmatprep.subr.mxu0 %v39502_v10  ;;  %32027 = vmatprep.subr.mxu1 %v32600_v21 }
0x18b3   : > { %32001 = vmatpush3.msra.mxu0 %v39502_v10  ;;  %32028 = vmatpush3.msra.mxu1 %v32600_v21  ;;  %v39506_v21 = vld [vmem:[#allocation52_spill] sm:$0xff] }
0x18b4   : > { %32002 = vmatprep.subr.mxu0 %v39503_v6  ;;  %32029 = vmatprep.subr.mxu1 %v32625_v30 }
0x18b5   : > { %32003 = vmatpush3.msra.mxu0 %v39503_v6  ;;  %32030 = vmatpush3.msra.mxu1 %v32625_v30  ;;  %v39507_v30 = vld [vmem:[#allocation56_spill] sm:$0xff] }
0x18b6   : > { %32004 = vmatprep.subr.mxu0 %v39504_v13  ;;  %32031 = vmatprep.subr.mxu1 %v32635_v35 }
0x18b7   : > { %32005 = vmatpush3.msra.mxu0 %v39504_v13  ;;  %32032 = vmatpush3.msra.mxu1 %v32635_v35 }
0x18b8   : > { %32006 = vmatprep.subr.mxu0 %v39505_v14  ;;  %32033 = vmatprep.subr.mxu1 %v32655_v44 }
0x18b9   : > { %32007 = vmatpush3.msra.mxu0 %v39505_v14  ;;  %32034 = vmatpush3.msra.mxu1 %v32655_v44 }
0x18ba   : > { %32008 = vmatprep.subr.mxu0 %v39506_v21  ;;  %32035 = vmatprep.subr.mxu1 %v32666_v48 }
0x18bb   : > { %32009 = vmatpush3.msra.mxu0 %v39506_v21  ;;  %32010 = vmatprep.mubr.f32.mxu0 %v37614_v56 }
0x18bc   : > { %32036 = vmatpush3.msra.mxu1 %v32666_v48  ;;  %32011 = vmatmul.mubr.f32.vlgmr.msra.gmra.mxu0 %v37618_v38 }
0x18bd   : > { %32037 = vmatprep.subr.mxu1 %v32684_v55  ;;  %32045 = vmatprep.mubr.f32.mxu1 %v37614_v56 }
0x18be   : > { %32038 = vmatpush3.msra.mxu1 %v32684_v55  ;;  %32052 = vmatprep.mubr.f32.mxu0 %v39507_v30 }
0x18bf   : > { %32039 = vmatprep.subr.mxu1 %v32718_v4 }
0x18c0   : > { %32040 = vmatpush3.msra.mxu1 %v32718_v4 }
0x18c1   : > { %32041 = vmatprep.subr.mxu1 %v32737_v31 }
0x18c2   : > { %32042 = vmatpush3.msra.mxu1 %v32737_v31 }
0x18c3   : > { %32043 = vmatprep.subr.mxu1 %v32753_v43 }
0x18c4   : > { %32044 = vmatpush3.msra.mxu1 %v32753_v43 }
0x18c5   : > { %32046 = vmatmul.mubr.f32.vlgmr.msra.gmra.mxu1 %v37618_v38 }
0x18c6   : > { %32059 = vmatprep.mubr.f32.mxu1 %v32986_v61 }
0x190c   : > { %v31802_v35 = vpop.f32.mrf.mxu0 }
0x190e   : > { %v22597_v44 = vpop.f32.mrf.mxu0 }
0x1911   : > { %v31816_v48 = vpop.f32.mrf.mxu0 }
0x1913   : > { %v22770_v16 = vpop.f32.mrf.mxu0 }
0x1914   : > { %v31809_v55 = vpop.f32.mrf.mxu1 }
0x1915   : > { %v22695_v0 = vadd.f32 %v31809_v55, %v31802_v35 }
0x1916   : > { %v22688_v3 = vpop.f32.mrf.mxu1 }
0x1917   : > { %v22778_v4 = vadd.f32 %v31816_v48, %v22695_v0  ;;  %v22689_v60 = vadd.f32 %v22688_v3, %v22597_v44  ;;  %v31830_v53 = vpop.f32.mrf.mxu0 }
0x1919   : > { %v22771_v56 = vadd.f32 %v22770_v16, %v22689_v60  ;;  %v22937_v24 = vpop.f32.mrf.mxu0 }
0x191a   : > { %v31823_v31 = vpop.f32.mrf.mxu1 }
0x191b   : > { %v22861_v40 = vadd.f32 %v31823_v31, %v22778_v4 }
0x191c   : > { %v22852_v57 = vpop.f32.mrf.mxu1 }
0x191d   : > { %v22944_v43 = vadd.f32 %v31830_v53, %v22861_v40  ;;  %v22853_v58 = vadd.f32 %v22852_v57, %v22771_v56 }
0x191f   : > { %v22938_v38 = vadd.f32 %v22937_v24, %v22853_v58  ;;  %v31837_v50 = vpop.f32.mrf.mxu1 }
0x1920   : > { %v23023_v62 = vadd.f32 %v31837_v50, %v22944_v43 }
0x1921   : > { %v23016_v42 = vpop.f32.mrf.mxu1 }
0x1922   : > { %v24223_v63 = vsub.f32 %v23023_v62, %v39508_v20  ;;  %v23017_v25 = vadd.f32 %v23016_v42, %v22938_v38  ;;  %v39521_v38 = vld [vmem:[#allocation48_spill] sm:$0xff]  ;;  %v39522_v62 = vld [vmem:[#allocation79_spill] sm:$0xff] }
0x1923   : > { %v39523_v42 = vld [vmem:[#allocation80_spill] sm:$0xff] }
0x1924   : > { %v24241_v45 = vadd.f32 %v24223_v63, %v39511_v34  ;;  %v24222_v46 = vsub.f32 %v23017_v25, %v39512_v18  ;;  %v7151_v20 = vadd.f32 %v39523_v42, %v39522_v62  ;;  %v39524_v63 = vld [vmem:[#allocation102_spill] sm:$0xff]  ;;  %v39525_v25 = vld [vmem:[#allocation103_spill] sm:$0xff]  ;;  %v1165_v34 = vadd.f32 %v39527_v51, %v39526_v17 }
0x1925   : > { %v39556_v62 = vld [vmem:[#allocation94_spill] sm:$0xff]  ;;  %v39560_v51 = vld [vmem:[#allocation63_spill] sm:$0xff] }
0x1926   : > { %v24243_v1 = vadd.f32 0.0009, %v24241_v45  ;;  %v24240_v15 = vadd.f32 %v24222_v46, %v39516_v52  ;;  %v39529_v45 = vld [vmem:[#allocation72_spill] sm:$0xff] }
0x1927   : > { %v39530_v46 = vld [vmem:[#allocation88_spill] sm:$0xff] }
0x1928   : > { %v37830_v22 = vmul.f32 %v24243_v1, %v24239_v19  ;;  %v24242_v11 = vadd.f32 0.0009, %v24240_v15  ;;  %v39532_v19 = vld [vmem:[#allocation96_spill] sm:$0xff]  ;;  %v39535_v15 = vld [vmem:[#allocation65_spill] sm:$0xff] }
0x1929   : > { %v9525_v1 = vadd.f32 %v39532_v19, %v39531_v36  ;;  %v39534_v52 = vld [vmem:[#allocation64_spill] sm:$0xff]  ;;  %v39564_v36 = vld [vmem:[#allocation85_spill] sm:$0xff] }
0x192a   : > { %v37832_v27 = vmul.f32 %v24242_v11, %v24238_v29  ;;  %v3539_v2 = vadd.f32 %v39535_v15, %v39534_v52  ;;  %v39536_v29 = vld [vmem:[#allocation81_spill] sm:$0xff]  ;;  %v39567_v15 = vld [vmem:[#allocation36_spill] sm:$0xff] }
0x192b   : > { %v7233_v11 = vadd.f32 %v39536_v29, %v7151_v20  ;;  %v39557_v20 = vld [vmem:[#allocation100_spill] sm:$0xff] }
0x1939   : > { %v31872_v33 = vpop.f32.mrf.mxu0 }
0x193b   : > { %v23115_v47 = vpop.f32.mrf.mxu0 }
0x1941   : > { %v31907_v41 = vpop.f32.mrf.mxu1 }
0x1942   : > { %v23283_v8 = vadd.f32 %v31907_v41, %v31872_v33  ;;  %v39537_v33 = vld [vmem:[#allocation104_spill] sm:$0xff]  ;;  %v39538_v41 = vld [vmem:[#allocation30_spill] sm:$0xff] }
0x1943   : > { %v23276_v49 = vpop.f32.mrf.mxu1 }
0x1944   : > { %v23277_v10 = vadd.f32 %v23276_v49, %v23115_v47  ;;  %v39539_v49 = vld [vmem:[#allocation73_spill] sm:$0xff] }
0x195a   : > { %v31942_v39 = vpop.f32.mrf.mxu0 }
0x195b   : > { %v23394_v6 = vadd.f32 %v31942_v39, %v23283_v8  ;;  %v1247_v39 = vadd.f32 %v39538_v41, %v1165_v34 }
0x195c   : > { %v23386_v28 = vpop.f32.mrf.mxu0 }
0x195d   : > { %v23387_v14 = vadd.f32 %v23386_v28, %v23277_v10 }
0x1963   : > { %v31977_v12 = vpop.f32.mrf.mxu1 }
0x1964   : > { %v23491_v21 = vadd.f32 %v31977_v12, %v23394_v6  ;;  %v39540_v12 = vld [vmem:[#allocation89_spill] sm:$0xff]  ;;  %v39542_v6 = vld [vmem:[#allocation58_spill] sm:$0xff] }
0x1965   : > { %v23482_v13 = vpop.f32.mrf.mxu1 }
0x1966   : > { %v23483_v35 = vadd.f32 %v23482_v13, %v23387_v14  ;;  %v39543_v14 = vld [vmem:[#allocation66_spill] sm:$0xff] }
0x197c   : > { %v32012_v9 = vpop.f32.mrf.mxu0 }
0x197d   : > { %v23616_v44 = vadd.f32 %v32012_v9, %v23491_v21  ;;  %v39541_v9 = vld [vmem:[#allocation97_spill] sm:$0xff]  ;;  %v3621_v21 = vadd.f32 %v39543_v14, %v3539_v2 }
0x197e   : > { %v23609_v30 = vpop.f32.mrf.mxu0  ;;  %v9607_v10 = vadd.f32 %v39541_v9, %v9525_v1  ;;  %v39565_v1 = vld [vmem:[#allocation83_spill] sm:$0xff] }
0x197f   : > { %v23610_v55 = vadd.f32 %v23609_v30, %v23483_v35  ;;  %v39544_v30 = vld [vmem:[#allocation82_spill] sm:$0xff] }
0x1980   : > { %v7315_v35 = vadd.f32 %v39544_v30, %v7233_v11  ;;  %v39568_v11 = vld [vmem:[#allocation101_spill] sm:$0xff] }
0x1985   : > { %v32047_v48 = vpop.f32.mrf.mxu1 }
0x1986   : > { %v23709_v16 = vadd.f32 %v32047_v48, %v23616_v44  ;;  %v39545_v44 = vld [vmem:[#allocation105_spill] sm:$0xff] }
0x1987   : > { %v23702_v0 = vpop.f32.mrf.mxu1 }
0x1988   : > { %v23741_v3 = vand.u32 4294901760, %v23709_v16  ;;  %v23703_v4 = vadd.f32 %v23702_v0, %v23610_v55  ;;  %v39546_v55 = vld [vmem:[#allocation33_spill] sm:$0xff]  ;;  %v39547_v0 = vld [vmem:[#allocation74_spill] sm:$0xff] }
0x198a   : > { %v23829_v60 = vsub.f32 %v23709_v16, %v23741_v3  ;;  %v23744_v53 = vand.u32 4294901760, %v23703_v4  ;;  %32048 = vmatprep.subr.mxu0 %v23741_v3  ;;  %v1329_v16 = vadd.f32 %v39546_v55, %v1247_v39 }
0x198b   : > { %32049 = vmatpush3.msra.mxu0 %v23741_v3 }
0x198c   : > { %v23836_v56 = vsub.f32 %v23703_v4, %v23744_v53  ;;  %32050 = vmatprep.subr.mxu0 %v23744_v53  ;;  %v23830_v31 = vand.u32 4294901760, %v23829_v60  ;;  %v39548_v4 = vld [vmem:[#allocation93_spill] sm:$0xff] }
0x198d   : > { %32051 = vmatpush3.msra.mxu0 %v23744_v53 }
0x198e   : > { %32062 = vmatprep.subr.mxu0 %v23829_v60  ;;  %32053 = vmatmul.mubr.f32.vlgmr.msra.gmra.mxu0 %v33010_v5  ;;  %v23831_v40 = vsub.f32 %v23829_v60, %v23830_v31  ;;  %v23837_v57 = vand.u32 4294901760, %v23836_v56  ;;  %v39520_v5 = vld [vmem:[#allocation45_spill] sm:$0xff] }
0x198f   : > { %32063 = vmatpush3.msra.mxu0 %v23829_v60  ;;  %32066 = vmatprep.mubr.f32.mxu0 %v32989_v7  ;;  %v39519_v7 = vld [vmem:[#allocation87_spill] sm:$0xff]  ;;  %v2351_v50 = vadd.f32 %v39521_v38, %v39520_v5  ;;  %v39555_v38 = vld [vmem:[#allocation68_spill] sm:$0xff] }
0x1990   : > { %32064 = vmatprep.subr.mxu0 %v23836_v56  ;;  %v23832_v24 = vand.u32 4294901760, %v23831_v40  ;;  %v23838_v43 = vsub.f32 %v23836_v56, %v23837_v57 }
0x1991   : > { %32065 = vmatpush3.msra.mxu0 %v23836_v56  ;;  %v2433_v37 = vadd.f32 %v39533_v23, %v2351_v50 }
0x1992   : > { %32055 = vmatprep.subr.mxu1 %v23832_v24  ;;  %32076 = vmatprep.subr.mxu0 %v23830_v31  ;;  %v23839_v58 = vand.u32 4294901760, %v23838_v43  ;;  %v39552_v43 = vld [vmem:[#allocation84_spill] sm:$0xff] }
0x1993   : > { %32056 = vmatpush3.msra.mxu1 %v23832_v24  ;;  %32067 = vmatmul.mubr.f32.vlgmr.msra.gmra.mxu0 %v33003_v59  ;;  %v39518_v59 = vld [vmem:[#allocation86_spill] sm:$0xff]  ;;  %v2515_v13 = vadd.f32 %v39542_v6, %v2433_v37 }
0x1994   : > { %32077 = vmatpush3.msra.mxu0 %v23830_v31  ;;  %32057 = vmatprep.subr.mxu1 %v23839_v58  ;;  %v39550_v31 = vld [vmem:[#allocation62_spill] sm:$0xff] }
0x1995   : > { %32078 = vmatprep.subr.mxu0 %v23837_v57  ;;  %32058 = vmatpush3.msra.mxu1 %v23839_v58  ;;  %v2600_v40 = vadd.f32 %v39550_v31, %v2515_v13  ;;  %v7400_v58 = vadd.f32 %v39552_v43, %v7315_v35  ;;  %v39566_v37 = vld [vmem:[#allocation42_spill] sm:$0xff] }
0x1996   : > { %32079 = vmatpush3.msra.mxu0 %v23837_v57  ;;  %32060 = vmatmul.mubr.f32.vlgmr.msra.gmra.mxu1 %v33000_v32  ;;  %v39551_v57 = vld [vmem:[#allocation67_spill] sm:$0xff] }
0x1997   : > { %32069 = vmatprep.subr.mxu1 %v23741_v3  ;;  %32073 = vmatprep.mubr.f32.mxu1 %v32993_v54  ;;  %v8337_v54 = vadd.f32 %v39519_v7, %v39518_v59  ;;  %v3703_v24 = vadd.f32 %v39551_v57, %v3621_v21  ;;  %v39553_v59 = vld [vmem:[#allocation99_spill] sm:$0xff]  ;;  %v2679_v34 = vadd.f32 %v39560_v51, %v2600_v40  ;;  %v39572_v21 = vld [vmem:[#allocation90_spill] sm:$0xff] }
0x1998   : > { %32070 = vmatpush3.msra.mxu1 %v23741_v3  ;;  %32080 = vmatprep.mubr.f32.mxu0 %v32986_v61  ;;  %v7479_v19 = vadd.f32 %v39564_v36, %v7400_v58 }
0x1999   : > { %32071 = vmatprep.subr.mxu1 %v23744_v53  ;;  %32081 = vmatmul.mubr.f32.vlgmr.msra.gmra.mxu0 %v33000_v32  ;;  %v6254_v39 = vmul.f32 %v2679_v34, %v2679_v34 }
0x199a   : > { %32072 = vmatpush3.msra.mxu1 %v23744_v53  ;;  %v12238_v9 = vmul.f32 %v7479_v19, %v7479_v19 }
0x199b   : > { %32074 = vmatmul.mubr.f32.vlgmr.msra.gmra.mxu1 %v33006_v26  ;;  %32083 = vmatprep.subr.mxu1 %v23741_v3  ;;  %v10713_v26 = vadd.f32 %v39525_v25, %v39524_v63  ;;  %v39558_v25 = vld [vmem:[#allocation92_spill] sm:$0xff] }
0x199c   : > { %32084 = vmatpush3.msra.mxu1 %v23741_v3  ;;  %32087 = vmatprep.mubr.f32.mxu1 %v32986_v61  ;;  %v39528_v61 = vld [vmem:[#allocation71_spill] sm:$0xff] }
0x199d   : > { %32085 = vmatprep.subr.mxu1 %v23744_v53  ;;  %v4727_v18 = vadd.f32 %v39529_v45, %v39528_v61  ;;  %v10795_v47 = vadd.f32 %v39537_v33, %v10713_v26  ;;  %v39559_v26 = vld [vmem:[#allocation106_spill] sm:$0xff]  ;;  %v39561_v61 = vld [vmem:[#allocation69_spill] sm:$0xff] }
0x199e   : > { %32086 = vmatpush3.msra.mxu1 %v23744_v53  ;;  %v39549_v53 = vld [vmem:[#allocation98_spill] sm:$0xff]  ;;  %v11901_v17 = vadd.f32 %v39559_v26, %v39558_v25  ;;  %v3788_v45 = vadd.f32 %v39561_v61, %v3703_v24  ;;  %v39576_v24 = vld [vmem:[#allocation108_spill] sm:$0xff] }
0x199f   : > { %32088 = vmatmul.mubr.f32.vlgmr.msra.gmra.mxu1 %v33000_v32  ;;  %v8419_v32 = vadd.f32 %v39530_v46, %v8337_v54  ;;  %v4809_v28 = vadd.f32 %v39539_v49, %v4727_v18  ;;  %v10877_v48 = vadd.f32 %v39545_v44, %v10795_v47  ;;  %v9689_v56 = vadd.f32 %v39549_v53, %v9607_v10  ;;  %v39554_v54 = vld [vmem:[#allocation39_spill] sm:$0xff]  ;;  %v39562_v18 = vld [vmem:[#allocation61_spill] sm:$0xff]  ;;  %v39570_v49 = vld [vmem:[#allocation70_spill] sm:$0xff] }
0x19a0   : > { %v1414_v5 = vadd.f32 %v39554_v54, %v1329_v16  ;;  %v39563_v46 = vld [vmem:[#allocation75_spill] sm:$0xff]  ;;  %v39575_v53 = vld [vmem:[#allocation77_spill] sm:$0xff] }
0x19a1   : > { %v8501_v8 = vadd.f32 %v39540_v12, %v8419_v32  ;;  %v4891_v3 = vadd.f32 %v39547_v0, %v4809_v28  ;;  %v10962_v7 = vadd.f32 %v39553_v59, %v10877_v48  ;;  %v9774_v63 = vadd.f32 %v39557_v20, %v9689_v56  ;;  %v39569_v47 = vld [vmem:[#allocation107_spill] sm:$0xff]  ;;  %v39571_v12 = vld [vmem:[#allocation76_spill] sm:$0xff]  ;;  %v39577_v59 = vld [vmem:[#allocation78_spill] sm:$0xff] }
0x19a2   : > { %v5915_v32 = vadd.f32 %v39563_v46, %v39562_v18  ;;  %v1493_v52 = vadd.f32 %v39566_v37, %v1414_v5  ;;  %v11983_v41 = vadd.f32 %v39569_v47, %v11901_v17  ;;  %v3867_v28 = vadd.f32 %v39570_v49, %v3788_v45  ;;  %v39573_v44 = vld [vmem:[#allocation59_spill] sm:$0xff] }
0x19a3   : > { %v8586_v60 = vadd.f32 %v39548_v4, %v8501_v8  ;;  %v4976_v50 = vadd.f32 %v39555_v38, %v4891_v3  ;;  %v11041_v23 = vadd.f32 %v39565_v1, %v10962_v7  ;;  %v9853_v33 = vadd.f32 %v39568_v11, %v9774_v63  ;;  %v39574_v3 = vld [vmem:[#allocation60_spill] sm:$0xff] }
0x19a4   : > { %v5997_v8 = vadd.f32 %v39571_v12, %v5915_v32  ;;  %v6252_v6 = vmul.f32 %v1493_v52, %v1493_v52  ;;  %v12065_v30 = vadd.f32 %v39572_v21, %v11983_v41  ;;  %v6256_v38 = vmul.f32 %v2679_v34, %v1493_v52 }
0x19a5   : > { %v8665_v42 = vadd.f32 %v39556_v62, %v8586_v60  ;;  %v5055_v2 = vadd.f32 %v39567_v15, %v4976_v50  ;;  %v12244_v14 = vsub.f32 %v9853_v33, %v12238_v9 }
0x19a6   : > { %v6258_v35 = vsub.f32 %v3867_v28, %v6252_v6  ;;  %v6079_v48 = vadd.f32 %v39573_v44, %v5997_v8  ;;  %v12150_v4 = vadd.f32 %v39574_v3, %v12065_v30  ;;  %v6274_v60 = vadd.f32 %v6254_v39, %v6252_v6  ;;  %v39578_v30 = vld [vmem:[#allocation111_spill] sm:$0xff]  ;;  %v39580_v3 = vld [vmem:[#allocation109_spill] sm:$0xff] }
0x19a7   : > { %v12240_v29 = vmul.f32 %v8665_v42, %v8665_v42  ;;  %v6260_v13 = vsub.f32 %v5055_v2, %v6254_v39  ;;  %v12242_v54 = vmul.f32 %v8665_v42, %v7479_v19  ;;  %v6264_v45 = vmul.f32 2.0, %v6256_v38 }
0x19a8   : > { %v6164_v56 = vadd.f32 %v39575_v53, %v6079_v48  ;;  %v12229_v43 = vadd.f32 %v39576_v24, %v12150_v4  ;;  %v6276_v58 = vadd.f32 0.0001, %v6274_v60  ;;  %v18262_v4 = vsub.f32 1.0, %v39580_v3 }
0x19a9   : > { %v12246_v10 = vsub.f32 %v11041_v23, %v12240_v29  ;;  %v6278_v16 = vadd.f32 %v6260_v13, %v6258_v35  ;;  %v12260_v0 = vadd.f32 %v12240_v29, %v12238_v9  ;;  %v12250_v61 = vmul.f32 2.0, %v12242_v54 }
0x19aa   : > { %v6243_v7 = vadd.f32 %v39577_v59, %v6164_v56  ;;  %v12248_v62 = vsub.f32 %v12229_v43, %v12242_v54  ;;  %v6266_v34 = vadd.f32 0.0001, %v6264_v45  ;;  %v24227_v35 = vmul.f32 2.0, %v39578_v30 }
0x19ab   : > { %v12264_v55 = vadd.f32 %v12246_v10, %v12244_v14  ;;  %v6280_v40 = vadd.f32 0.0009, %v6278_v16  ;;  %v12262_v57 = vadd.f32 0.0001, %v12260_v0  ;;  %v12252_v42 = vadd.f32 0.0001, %v12250_v61 }
0x19ac   : > { %v6262_v63 = vsub.f32 %v6243_v7, %v6256_v38  ;;  %v12254_v26 = vmul.f32 2.0, %v12248_v62  ;;  %v24229_v60 = vadd.f32 0.0001, %v24227_v35 }
0x19ad   : > { %v12266_v31 = vadd.f32 0.0009, %v12264_v55  ;;  %v6282_v50 = vmul.f32 %v6280_v40, %v6276_v58  ;;  %v39579_v55 = vld [vmem:[#allocation91_spill] sm:$0xff]  ;;  %v18264_v58 = vmul.f32 0.5, %v18262_v4 }
0x19ae   : > { %v6268_v17 = vmul.f32 2.0, %v6262_v63  ;;  %v12256_v18 = vadd.f32 0.0009, %v12254_v26  ;;  %v24226_v16 = vmul.f32 2.0, %v39579_v55 }
0x19af   : > { %v12268_v5 = vmul.f32 %v12266_v31, %v12262_v57  ;;  %v18266_v62 = vmax.f32 %v18264_v58, 0.0 }
0x19b0   : > { %v6270_v32 = vadd.f32 0.0009, %v6268_v17  ;;  %v12258_v52 = vmul.f32 %v12256_v18, %v12252_v42  ;;  %v24228_v57 = vadd.f32 0.0001, %v24226_v16 }
0x19b1   : > { %32167 = vrcp.f32 %v12268_v5  ;;  %v18268_v61 = vmin.f32 %v18266_v62, 1.0 }
0x19b2   : > { %32169 = vrcp.f32 %v6282_v50  ;;  %v6272_v15 = vmul.f32 %v6270_v32, %v6266_v34 }
0x19b3   : > { %32171 = vrcp.f32 %v37830_v22 }
0x19b4   : > { %32173 = vrcp.f32 %v37832_v27 }
0x19be   : > { %v32168_v47 = vpop.eup %32167 }
0x19bf   : > { %v32170_v39 = vpop.eup %32169  ;;  %v12271_v49 = vmul.f32 %v32168_v47, %v12258_v52 }
0x19c0   : > { %v6285_v8 = vmul.f32 %v32170_v39, %v6272_v15  ;;  %v32172_v59 = vpop.eup %32171 }
0x19c1   : > { %v12274_v21 = vsub.f32 1.0, %v12271_v49  ;;  %v32174_v38 = vpop.eup %32173 }
0x19c2   : > { %v6288_v48 = vsub.f32 1.0, %v6285_v8 }
0x19c3   : > { %v12276_v31 = vmul.f32 0.5, %v12274_v21 }
0x19c4   : > { %v6290_v40 = vmul.f32 0.5, %v6288_v48 }
0x19c5   : > { %v12278_v54 = vmax.f32 %v12276_v31, 0.0 }
0x19c6   : > { %v6292_v50 = vmax.f32 %v6290_v40, 0.0 }
0x1a4e   : > { %v32054_v20 = vpop.f32.mrf.mxu0 }
0x1a50   : > { %v23785_v25 = vpop.f32.mrf.mxu0 }
0x1a53   : > { %v32068_v51 = vpop.f32.mrf.mxu0 }
0x1a55   : > { %v23958_v1 = vpop.f32.mrf.mxu0 }
0x1a56   : > { %v32061_v46 = vpop.f32.mrf.mxu1 }
0x1a57   : > { %v23883_v36 = vadd.f32 %v32061_v46, %v32054_v20 }
0x1a58   : > { %v23876_v19 = vpop.f32.mrf.mxu1 }
0x1a59   : > { %v23966_v23 = vadd.f32 %v32068_v51, %v23883_v36  ;;  %v23877_v37 = vadd.f32 %v23876_v19, %v23785_v25  ;;  %v32082_v11 = vpop.f32.mrf.mxu0  ;;  %v12280_v25 = vmin.f32 %v12278_v54, 1.0  ;;  %v6294_v51 = vmin.f32 %v6292_v50, 1.0  ;;  %v39581_v19 = vld [vmem:[#allocation114_spill] sm:$0xff] }
0x1a5b   : > { %v23959_v2 = vadd.f32 %v23958_v1, %v23877_v37  ;;  %v32075_v29 = vpop.f32.mrf.mxu1  ;;  %v24125_v9 = vpop.f32.mrf.mxu0  ;;  %v12282_v46 = vadd.f32 %v12280_v25, %v6294_v51 }
0x1a5c   : > { %v24049_v33 = vadd.f32 %v32075_v29, %v23966_v23 }
0x1a5d   : > { %v24040_v41 = vpop.f32.mrf.mxu1  ;;  %v18270_v1 = vadd.f32 %v18268_v61, %v12282_v46 }
0x1a5e   : > { %v24132_v28 = vadd.f32 %v32082_v11, %v24049_v33  ;;  %v24041_v12 = vadd.f32 %v24040_v41, %v23959_v2 }
0x1a5f   : > { %v32089_v10 = vpop.f32.mrf.mxu1 }
0x1a60   : > { %v24126_v6 = vadd.f32 %v24125_v9, %v24041_v12  ;;  %v24211_v13 = vadd.f32 %v32089_v10, %v24132_v28 }
0x1a61   : > { %v24204_v14 = vpop.f32.mrf.mxu1 }
0x1a62   : > { %v24225_v22 = vsub.f32 %v24211_v13, %v39578_v30  ;;  %v24205_v44 = vadd.f32 %v24204_v14, %v24126_v6 }
0x1a64   : > { %v24231_v0 = vmul.f32 2.0, %v24225_v22  ;;  %v24224_v27 = vsub.f32 %v24205_v44, %v39579_v55 }
0x1a66   : > { %v24233_v53 = vadd.f32 0.0009, %v24231_v0  ;;  %v24230_v56 = vmul.f32 2.0, %v24224_v27 }
0x1a68   : > { %v24235_v24 = vmul.f32 %v24233_v53, %v24229_v60  ;;  %v24232_v43 = vadd.f32 0.0009, %v24230_v56 }
0x1a6a   : > { %v24234_v7 = vmul.f32 %v24232_v43, %v24228_v57  ;;  %v24249_v5 = vmul.f32 %v32172_v59, %v24235_v24 }
0x1a6c   : > { %v24247_v20 = vmul.f32 %v32174_v38, %v24234_v7  ;;  %v24251_v63 = vsub.f32 1.0, %v24249_v5 }
0x1a6e   : > { %v24250_v26 = vsub.f32 1.0, %v24247_v20  ;;  %v24253_v17 = vmul.f32 0.5, %v24251_v63 }
0x1a70   : > { %v24252_v45 = vmul.f32 0.5, %v24250_v26  ;;  %v24255_v18 = vmax.f32 %v24253_v17, 0.0 }
0x1a72   : > { %v24254_v32 = vmax.f32 %v24252_v45, 0.0  ;;  %v24257_v36 = vmin.f32 %v24255_v18, 1.0 }
0x1a74   : > { %v24256_v42 = vmin.f32 %v24254_v32, 1.0  ;;  %v24259_v34 = vadd.f32 %v24257_v36, %v39581_v19 }
0x1a76   : > { %v24258_v23 = vadd.f32 %v24256_v42, %v18270_v1 }
0x1a78   : > { %v24260_v37 = vadd.f32 %v24259_v34, %v24258_v23 }
0x1a7a   : > { %24261 = vadd.xlane.f32.xlu0 %v24260_v37 }
0x1b03   : > { %v24262_v52 = vpop.xlane.xlu0 %24261 }
0x1b04   : > { %v24263_v15 = vrot.slane %v24262_v52, 4 }
0x1b06   : > { %v24264_v2 = vadd.f32 %v24263_v15, %v24262_v52 }
0x1b08   : > { %v24265_v29 = vrot.slane %v24264_v2, 2 }
0x1b0a   : > { %v24266_v11 = vadd.f32 %v24265_v29, %v24264_v2 }
0x1b0c   : > { %v24267_v33 = vrot.slane %v24266_v11, 1 }
0x1b0e   : > { %v24268_v47 = vadd.f32 %v24267_v33, %v24266_v11 }
0x1b10   : > { %32090 = vpush %v24268_v47 }
0x1b41   : > { %s32091_s6 = spop %32090 }
0x1b42   : > { %v24270_v41 = vstv %s32091_s6 }
0x1b43   : > { %24272 = vst.msk [vmem:[%s286_s29] sm:$0x1] %vm24271_vm1, %v24270_v41 }
0x1b44 PF: > { %p18_p3 = scmp.ge.s32.totalorder %s32454_s9, 4   ;;  %s39582_s15 = smov %s32345_s16 }
0x1b45   : > { %s39583_s16 = smov %s32349_s17  ;;  %s39584_s17 = smov %s32465_s13 }
0x1b46   : > { %s39585_s18 = smov %s32454_s9  ;;  %20 = sbr.rel (!%p18_p3) target bundleno = 6 (0x6), region = 103 }
0x1b4b   :  { %24290 = vsyncpa [#allocation3], 1 }
0x1b4c   :  { %24292 = vsyncpa [#allocation3 + $0x1], 1 }
0x1b4d   :  { %24293 = vsyncpa [#allocation5], 1 }
0x1b4e   :  { %24295 = vsyncpa [#allocation5 + $0x1], 1 }
0x1b4f   :  { %24296 = vsyncpa [#allocation8], 1 }

</bundles_post_ra>
